<compile_context>
chip_gen: v5e
topology: v5e:2x2
jax: 0.10.0
libtpu: 0.0.40
codegen_flags: <defaults>
</compile_context>

<pallas_src>
import jax
import jax.numpy as jnp
from jax import lax
from jax.experimental import pallas as pl
from jax.experimental.pallas import tpu as pltpu

EPS = 1e-5  # nn.InstanceNorm2d default eps


# ---------------------------------------------------------------------------
# Fused Pallas kernel: conv3x3 -> IN -> ReLU -> conv3x3 -> IN -> +res -> ReLU
# ---------------------------------------------------------------------------
def _make_block_kernel(p, w_cols, cpad, d1, d2, pad1, pad2):
    """p = H*W, w_cols = W, cpad = lane-padded channel count."""
    inv_p = 1.0 / p

    def kernel(mask_ref, x_ref, w1_ref, w2_ref, o_ref, mid_ref):
        # mask_ref: (P, 4)  column-validity masks (left/right per conv), x dtype
        # x_ref:    (1, P + 2*pad1, cpad)   flat-padded, channel-padded image
        # w1_ref/w2_ref: (9, cpad, cpad)    per-tap folded conv weights
        # o_ref:    (1, P, cpad)
        # mid_ref:  VMEM scratch (P + 2*pad2, cpad)  intermediate activation
        masks = mask_ref[...]
        ml1, mr1 = masks[:, 0:1], masks[:, 1:2]
        ml2, mr2 = masks[:, 2:3], masks[:, 3:4]

        def conv3x3(load_tap, w_ref, ml, mr, dil):
            # 9 shifted-tap matmuls accumulated in f32 on the MXU.
            acc = jnp.zeros((p, cpad), jnp.float32)
            for i in range(3):            # ky
                for j in range(3):        # kx
                    off = (i - 1) * dil * w_cols + (j - 1) * dil
                    tap = load_tap(off)
                    if j == 0:            # reads column x-dil -> mask col < dil
                        tap = tap * ml
                    elif j == 2:          # reads column x+dil -> mask col >= W-dil
                        tap = tap * mr
                    acc = acc + jnp.dot(tap, w_ref[i * 3 + j],
                                        preferred_element_type=jnp.float32)
            return acc

        def inorm(y):
            # One-pass InstanceNorm stats over the spatial axis (per channel).
            mean = jnp.sum(y, axis=0, keepdims=True) * inv_p
            var = jnp.sum(y * y, axis=0, keepdims=True) * inv_p - mean * mean
            return (y - mean) * lax.rsqrt(jnp.maximum(var, 0.0) + EPS)

        # ---- conv1 -> bn1 -> relu ----
        acc1 = conv3x3(lambda off: x_ref[0, pl.ds(pad1 + off, p), :],
                       w1_ref, ml1, mr1, d1)
        y1 = jnp.maximum(inorm(acc1), 0.0)

        # Stash intermediate (flat-padded for conv2) entirely in VMEM.
        mid_ref[pl.ds(0, pad2), :] = jnp.zeros((pad2, cpad), mid_ref.dtype)
        mid_ref[pl.ds(pad2 + p, pad2), :] = jnp.zeros((pad2, cpad), mid_ref.dtype)
        mid_ref[pl.ds(pad2, p), :] = y1.astype(mid_ref.dtype)

        # ---- conv2 -> bn2 -> (+ residual) -> relu ----
        acc2 = conv3x3(lambda off: mid_ref[pl.ds(pad2 + off, p), :],
                       w2_ref, ml2, mr2, d2)
        y2 = inorm(acc2)
        res = x_ref[0, pl.ds(pad1, p), :].astype(jnp.float32)
        o_ref[0] = jnp.maximum(y2 + res, 0.0).astype(o_ref.dtype)

    return kernel


# ---------------------------------------------------------------------------
# Wrapper: layout plumbing only (no im2col, no intermediate HBM traffic)
# ---------------------------------------------------------------------------
def basic_block_forward(x_nchw, w1_oihw, w2_oihw, dilation=(1, 1)):
    n, c_in, h, w = x_nchw.shape
    planes = w1_oihw.shape[0]
    assert planes == c_in, "stride=1 / downsample=None requires inplanes == planes"
    d1, d2 = dilation
    p = h * w
    pad1 = d1 * (w + 1)                 # flat zero-pad covering row/col shifts
    pad2 = d2 * (w + 1)
    cpad = ((c_in + 127) // 128) * 128  # lane-dense channels
    dtype = x_nchw.dtype
    itemsize = jnp.dtype(dtype).itemsize

    # NCHW -> flattened NHWC, channel-padded, flat-spatially-padded.
    x_flat = jnp.transpose(x_nchw, (0, 2, 3, 1)).reshape(n, p, c_in)
    x_flat = jnp.pad(x_flat, ((0, 0), (pad1, pad1), (0, cpad - c_in)))

    def fold(wgt):
        # (Cout, Cin, 3, 3) -> (9, cpad, cpad), tap-major, lane = Cout.
        co, ci, kh, kw = wgt.shape
        wt = jnp.transpose(wgt, (2, 3, 1, 0)).reshape(kh * kw, ci, co)
        return jnp.pad(wt, ((0, 0), (0, cpad - ci), (0, cpad - co))).astype(dtype)

    w1m, w2m = fold(w1_oihw), fold(w2_oihw)

    # Column-validity masks (computed once in the wrapper; tiny).
    col = (jnp.arange(p, dtype=jnp.int32) % w)[:, None]
    masks = jnp.concatenate(
        [col >= d1, col < w - d1, col >= d2, col < w - d2], axis=1
    ).astype(dtype)                                              # (P, 4)

    kernel = _make_block_kernel(p, w, cpad, d1, d2, pad1, pad2)

    flops = 2 * 2 * 9 * n * p * cpad * cpad                      # 2 convs
    bytes_accessed = (x_flat.size + n * p * cpad + w1m.size + w2m.size
                      + masks.size) * itemsize

    out = pl.pallas_call(
        kernel,
        out_shape=jax.ShapeDtypeStruct((n, p, cpad), dtype),
        grid=(n,),
        in_specs=[
            pl.BlockSpec((p, 4), lambda i: (0, 0)),
            pl.BlockSpec((1, p + 2 * pad1, cpad), lambda i: (i, 0, 0)),
            pl.BlockSpec((9, cpad, cpad), lambda i: (0, 0, 0)),
            pl.BlockSpec((9, cpad, cpad), lambda i: (0, 0, 0)),
        ],
        out_specs=pl.BlockSpec((1, p, cpad), lambda i: (i, 0, 0)),
        scratch_shapes=[pltpu.VMEM((p + 2 * pad2, cpad), dtype)],
        compiler_params=pltpu.CompilerParams(
            dimension_semantics=("parallel",),
            vmem_limit_bytes=32 * 1024 * 1024),
        cost_estimate=pl.CostEstimate(
            flops=flops, transcendentals=2 * n * cpad,
            bytes_accessed=bytes_accessed),
    )(masks, x_flat, w1m, w2m)

    out = out[:, :, :planes].reshape(n, h, w, planes)            # drop lane pad
    return jnp.transpose(out, (0, 3, 1, 2))                      # back to NCHW


# ---------------------------------------------------------------------------
# Pure-JAX reference (for a sanity check)
# ---------------------------------------------------------------------------
def _reference_forward(x, w1, w2):
    def conv(inp, wgt, d):
        return lax.conv_general_dilated(
            inp, wgt, window_strides=(1, 1), padding=((d, d), (d, d)),
            rhs_dilation=(d, d), dimension_numbers=("NCHW", "OIHW", "NCHW"))

    def inorm(y):
        m = jnp.mean(y, axis=(2, 3), keepdims=True)
        v = jnp.mean((y - m) ** 2, axis=(2, 3), keepdims=True)
        return (y - m) * lax.rsqrt(v + EPS)

    out = jax.nn.relu(inorm(conv(x, w1, 1)))
    out = inorm(conv(out, w2, 1))
    return jax.nn.relu(out + x)


if __name__ == "__main__":
    # Small deterministic config: batch=2, inplanes=planes=4, 16x16 spatial.
    key = jax.random.PRNGKey(0)
    k_x, k_w1, k_w2 = jax.random.split(key, 3)

    batch, inplanes, planes, spatial = 2, 4, 4, 16
    x = jax.random.normal(k_x, (batch, inplanes, spatial, spatial), jnp.float32)
    w1 = 0.1 * jax.random.normal(k_w1, (planes, inplanes, 3, 3), jnp.float32)
    w2 = 0.1 * jax.random.normal(k_w2, (planes, planes, 3, 3), jnp.float32)

    out = basic_block_forward(x, w1, w2)
    jax.block_until_ready(out)

    ref = _reference_forward(x, w1, w2)
    assert out.shape == ref.shape == (batch, planes, spatial, spatial)
    assert jnp.allclose(out, ref, atol=1e-4, rtol=1e-4), "mismatch vs reference"

    print("KERNEL_OK")
</pallas_src>

<mosaic_0001>
module attributes {stable_mosaic.version = 11 : i64} {
  func.func @kernel(%arg0: i32, %arg1: memref<256x4xf32, #tpu.memory_space<vmem>>, %arg2: memref<1x290x128xf32, #tpu.memory_space<vmem>>, %arg3: memref<9x128x128xf32, #tpu.memory_space<vmem>>, %arg4: memref<9x128x128xf32, #tpu.memory_space<vmem>>, %arg5: memref<1x256x128xf32, #tpu.memory_space<vmem>>, %arg6: memref<290x128xf32, #tpu.memory_space<vmem>>) attributes {dimension_semantics = [#tpu.dimension_semantics<parallel>], iteration_bounds = array<i64: 2>, scalar_prefetch = 0 : i64, scratch_operands = 1 : i64, tpu.core_type = #tpu.core_type<tc>, window_params = [{pipeline_mode = #tpu.pipeline_mode<synchronous>, transform_indices = @transform_0, window_bounds = array<i64: 256, 4>}, {transform_indices = @transform_1, window_bounds = array<i64: 1, 290, 128>}, {pipeline_mode = #tpu.pipeline_mode<synchronous>, transform_indices = @transform_2, window_bounds = array<i64: 9, 128, 128>}, {pipeline_mode = #tpu.pipeline_mode<synchronous>, transform_indices = @transform_3, window_bounds = array<i64: 9, 128, 128>}, {transform_indices = @transform_4, window_bounds = array<i64: 1, 256, 128>}]} {
    %c0 = arith.constant 0 : index
    %c0_0 = arith.constant 0 : index
    %0 = vector.load %arg1[%c0, %c0_0] : memref<256x4xf32, #tpu.memory_space<vmem>>, vector<256x4xf32>
    %1 = vector.extract_strided_slice %0 {offsets = [0, 0], sizes = [256, 1], strides = [1, 1]} : vector<256x4xf32> to vector<256x1xf32>
    %2 = vector.extract_strided_slice %0 {offsets = [0, 1], sizes = [256, 1], strides = [1, 1]} : vector<256x4xf32> to vector<256x1xf32>
    %3 = vector.extract_strided_slice %0 {offsets = [0, 2], sizes = [256, 1], strides = [1, 1]} : vector<256x4xf32> to vector<256x1xf32>
    %4 = vector.extract_strided_slice %0 {offsets = [0, 3], sizes = [256, 1], strides = [1, 1]} : vector<256x4xf32> to vector<256x1xf32>
    %cst = arith.constant 0.000000e+00 : f32
    %5 = vector.broadcast %cst : f32 to vector<256x128xf32>
    %c0_1 = arith.constant 0 : index
    %c0_2 = arith.constant 0 : index
    %c0_3 = arith.constant 0 : index
    %6 = vector.load %arg2[%c0_1, %c0_2, %c0_3] : memref<1x290x128xf32, #tpu.memory_space<vmem>>, vector<1x256x128xf32>
    %7 = vector.shape_cast %6 : vector<1x256x128xf32> to vector<256x128xf32>
    %8 = vector.broadcast %1 : vector<256x1xf32> to vector<256x128xf32>
    %9 = arith.mulf %7, %8 : vector<256x128xf32>
    %c0_4 = arith.constant 0 : index
    %c0_5 = arith.constant 0 : index
    %c0_6 = arith.constant 0 : index
    %10 = vector.load %arg3[%c0_4, %c0_5, %c0_6] : memref<9x128x128xf32, #tpu.memory_space<vmem>>, vector<1x128x128xf32>
    %11 = vector.shape_cast %10 : vector<1x128x128xf32> to vector<128x128xf32>
    %cst_7 = arith.constant dense<0.000000e+00> : vector<256x128xf32>
    %12 = tpu.matmul %9, %11, %cst_7 {dimension_numbers = #tpu.dot_dimension_numbers<[1], [0], [0], [1], [0, 0, 1, 1], [], []>} : vector<256x128xf32>, vector<128x128xf32>, vector<256x128xf32> -> vector<256x128xf32>
    %13 = arith.addf %5, %12 : vector<256x128xf32>
    %c0_8 = arith.constant 0 : index
    %c1 = arith.constant 1 : index
    %c0_9 = arith.constant 0 : index
    %14 = vector.load %arg2[%c0_8, %c1, %c0_9] : memref<1x290x128xf32, #tpu.memory_space<vmem>>, vector<1x256x128xf32>
    %15 = vector.shape_cast %14 : vector<1x256x128xf32> to vector<256x128xf32>
    %c1_10 = arith.constant 1 : index
    %c0_11 = arith.constant 0 : index
    %c0_12 = arith.constant 0 : index
    %16 = vector.load %arg3[%c1_10, %c0_11, %c0_12] : memref<9x128x128xf32, #tpu.memory_space<vmem>>, vector<1x128x128xf32>
    %17 = vector.shape_cast %16 : vector<1x128x128xf32> to vector<128x128xf32>
    %cst_13 = arith.constant dense<0.000000e+00> : vector<256x128xf32>
    %18 = tpu.matmul %15, %17, %cst_13 {dimension_numbers = #tpu.dot_dimension_numbers<[1], [0], [0], [1], [0, 0, 1, 1], [], []>} : vector<256x128xf32>, vector<128x128xf32>, vector<256x128xf32> -> vector<256x128xf32>
    %19 = arith.addf %13, %18 : vector<256x128xf32>
    %c0_14 = arith.constant 0 : index
    %c2 = arith.constant 2 : index
    %c0_15 = arith.constant 0 : index
    %20 = vector.load %arg2[%c0_14, %c2, %c0_15] : memref<1x290x128xf32, #tpu.memory_space<vmem>>, vector<1x256x128xf32>
    %21 = vector.shape_cast %20 : vector<1x256x128xf32> to vector<256x128xf32>
    %22 = vector.broadcast %2 : vector<256x1xf32> to vector<256x128xf32>
    %23 = arith.mulf %21, %22 : vector<256x128xf32>
    %c2_16 = arith.constant 2 : index
    %c0_17 = arith.constant 0 : index
    %c0_18 = arith.constant 0 : index
    %24 = vector.load %arg3[%c2_16, %c0_17, %c0_18] : memref<9x128x128xf32, #tpu.memory_space<vmem>>, vector<1x128x128xf32>
    %25 = vector.shape_cast %24 : vector<1x128x128xf32> to vector<128x128xf32>
    %cst_19 = arith.constant dense<0.000000e+00> : vector<256x128xf32>
    %26 = tpu.matmul %23, %25, %cst_19 {dimension_numbers = #tpu.dot_dimension_numbers<[1], [0], [0], [1], [0, 0, 1, 1], [], []>} : vector<256x128xf32>, vector<128x128xf32>, vector<256x128xf32> -> vector<256x128xf32>
    %27 = arith.addf %19, %26 : vector<256x128xf32>
    %c0_20 = arith.constant 0 : index
    %c16 = arith.constant 16 : index
    %c0_21 = arith.constant 0 : index
    %28 = vector.load %arg2[%c0_20, %c16, %c0_21] : memref<1x290x128xf32, #tpu.memory_space<vmem>>, vector<1x256x128xf32>
    %29 = vector.shape_cast %28 : vector<1x256x128xf32> to vector<256x128xf32>
    %30 = vector.broadcast %1 : vector<256x1xf32> to vector<256x128xf32>
    %31 = arith.mulf %29, %30 : vector<256x128xf32>
    %c3 = arith.constant 3 : index
    %c0_22 = arith.constant 0 : index
    %c0_23 = arith.constant 0 : index
    %32 = vector.load %arg3[%c3, %c0_22, %c0_23] : memref<9x128x128xf32, #tpu.memory_space<vmem>>, vector<1x128x128xf32>
    %33 = vector.shape_cast %32 : vector<1x128x128xf32> to vector<128x128xf32>
    %cst_24 = arith.constant dense<0.000000e+00> : vector<256x128xf32>
    %34 = tpu.matmul %31, %33, %cst_24 {dimension_numbers = #tpu.dot_dimension_numbers<[1], [0], [0], [1], [0, 0, 1, 1], [], []>} : vector<256x128xf32>, vector<128x128xf32>, vector<256x128xf32> -> vector<256x128xf32>
    %35 = arith.addf %27, %34 : vector<256x128xf32>
    %c0_25 = arith.constant 0 : index
    %c17 = arith.constant 17 : index
    %c0_26 = arith.constant 0 : index
    %36 = vector.load %arg2[%c0_25, %c17, %c0_26] : memref<1x290x128xf32, #tpu.memory_space<vmem>>, vector<1x256x128xf32>
    %37 = vector.shape_cast %36 : vector<1x256x128xf32> to vector<256x128xf32>
    %c4 = arith.constant 4 : index
    %c0_27 = arith.constant 0 : index
    %c0_28 = arith.constant 0 : index
    %38 = vector.load %arg3[%c4, %c0_27, %c0_28] : memref<9x128x128xf32, #tpu.memory_space<vmem>>, vector<1x128x128xf32>
    %39 = vector.shape_cast %38 : vector<1x128x128xf32> to vector<128x128xf32>
    %cst_29 = arith.constant dense<0.000000e+00> : vector<256x128xf32>
    %40 = tpu.matmul %37, %39, %cst_29 {dimension_numbers = #tpu.dot_dimension_numbers<[1], [0], [0], [1], [0, 0, 1, 1], [], []>} : vector<256x128xf32>, vector<128x128xf32>, vector<256x128xf32> -> vector<256x128xf32>
    %41 = arith.addf %35, %40 : vector<256x128xf32>
    %c0_30 = arith.constant 0 : index
    %c18 = arith.constant 18 : index
    %c0_31 = arith.constant 0 : index
    %42 = vector.load %arg2[%c0_30, %c18, %c0_31] : memref<1x290x128xf32, #tpu.memory_space<vmem>>, vector<1x256x128xf32>
    %43 = vector.shape_cast %42 : vector<1x256x128xf32> to vector<256x128xf32>
    %44 = vector.broadcast %2 : vector<256x1xf32> to vector<256x128xf32>
    %45 = arith.mulf %43, %44 : vector<256x128xf32>
    %c5 = arith.constant 5 : index
    %c0_32 = arith.constant 0 : index
    %c0_33 = arith.constant 0 : index
    %46 = vector.load %arg3[%c5, %c0_32, %c0_33] : memref<9x128x128xf32, #tpu.memory_space<vmem>>, vector<1x128x128xf32>
    %47 = vector.shape_cast %46 : vector<1x128x128xf32> to vector<128x128xf32>
    %cst_34 = arith.constant dense<0.000000e+00> : vector<256x128xf32>
    %48 = tpu.matmul %45, %47, %cst_34 {dimension_numbers = #tpu.dot_dimension_numbers<[1], [0], [0], [1], [0, 0, 1, 1], [], []>} : vector<256x128xf32>, vector<128x128xf32>, vector<256x128xf32> -> vector<256x128xf32>
    %49 = arith.addf %41, %48 : vector<256x128xf32>
    %c0_35 = arith.constant 0 : index
    %c32 = arith.constant 32 : index
    %c0_36 = arith.constant 0 : index
    %50 = vector.load %arg2[%c0_35, %c32, %c0_36] : memref<1x290x128xf32, #tpu.memory_space<vmem>>, vector<1x256x128xf32>
    %51 = vector.shape_cast %50 : vector<1x256x128xf32> to vector<256x128xf32>
    %52 = vector.broadcast %1 : vector<256x1xf32> to vector<256x128xf32>
    %53 = arith.mulf %51, %52 : vector<256x128xf32>
    %c6 = arith.constant 6 : index
    %c0_37 = arith.constant 0 : index
    %c0_38 = arith.constant 0 : index
    %54 = vector.load %arg3[%c6, %c0_37, %c0_38] : memref<9x128x128xf32, #tpu.memory_space<vmem>>, vector<1x128x128xf32>
    %55 = vector.shape_cast %54 : vector<1x128x128xf32> to vector<128x128xf32>
    %cst_39 = arith.constant dense<0.000000e+00> : vector<256x128xf32>
    %56 = tpu.matmul %53, %55, %cst_39 {dimension_numbers = #tpu.dot_dimension_numbers<[1], [0], [0], [1], [0, 0, 1, 1], [], []>} : vector<256x128xf32>, vector<128x128xf32>, vector<256x128xf32> -> vector<256x128xf32>
    %57 = arith.addf %49, %56 : vector<256x128xf32>
    %c0_40 = arith.constant 0 : index
    %c33 = arith.constant 33 : index
    %c0_41 = arith.constant 0 : index
    %58 = vector.load %arg2[%c0_40, %c33, %c0_41] : memref<1x290x128xf32, #tpu.memory_space<vmem>>, vector<1x256x128xf32>
    %59 = vector.shape_cast %58 : vector<1x256x128xf32> to vector<256x128xf32>
    %c7 = arith.constant 7 : index
    %c0_42 = arith.constant 0 : index
    %c0_43 = arith.constant 0 : index
    %60 = vector.load %arg3[%c7, %c0_42, %c0_43] : memref<9x128x128xf32, #tpu.memory_space<vmem>>, vector<1x128x128xf32>
    %61 = vector.shape_cast %60 : vector<1x128x128xf32> to vector<128x128xf32>
    %cst_44 = arith.constant dense<0.000000e+00> : vector<256x128xf32>
    %62 = tpu.matmul %59, %61, %cst_44 {dimension_numbers = #tpu.dot_dimension_numbers<[1], [0], [0], [1], [0, 0, 1, 1], [], []>} : vector<256x128xf32>, vector<128x128xf32>, vector<256x128xf32> -> vector<256x128xf32>
    %63 = arith.addf %57, %62 : vector<256x128xf32>
    %c0_45 = arith.constant 0 : index
    %c34 = arith.constant 34 : index
    %c0_46 = arith.constant 0 : index
    %64 = vector.load %arg2[%c0_45, %c34, %c0_46] : memref<1x290x128xf32, #tpu.memory_space<vmem>>, vector<1x256x128xf32>
    %65 = vector.shape_cast %64 : vector<1x256x128xf32> to vector<256x128xf32>
    %66 = vector.broadcast %2 : vector<256x1xf32> to vector<256x128xf32>
    %67 = arith.mulf %65, %66 : vector<256x128xf32>
    %c8 = arith.constant 8 : index
    %c0_47 = arith.constant 0 : index
    %c0_48 = arith.constant 0 : index
    %68 = vector.load %arg3[%c8, %c0_47, %c0_48] : memref<9x128x128xf32, #tpu.memory_space<vmem>>, vector<1x128x128xf32>
    %69 = vector.shape_cast %68 : vector<1x128x128xf32> to vector<128x128xf32>
    %cst_49 = arith.constant dense<0.000000e+00> : vector<256x128xf32>
    %70 = tpu.matmul %67, %69, %cst_49 {dimension_numbers = #tpu.dot_dimension_numbers<[1], [0], [0], [1], [0, 0, 1, 1], [], []>} : vector<256x128xf32>, vector<128x128xf32>, vector<256x128xf32> -> vector<256x128xf32>
    %71 = arith.addf %63, %70 : vector<256x128xf32>
    %cst_50 = arith.constant dense<0.000000e+00> : vector<128xf32>
    %72 = vector.multi_reduction <add>, %71, %cst_50 [0] : vector<256x128xf32> to vector<128xf32>
    %73 = vector.shape_cast %72 : vector<128xf32> to vector<1x128xf32>
    %cst_51 = arith.constant 3.906250e-03 : f32
    %74 = vector.broadcast %cst_51 : f32 to vector<1x128xf32>
    %75 = arith.mulf %73, %74 : vector<1x128xf32>
    %76 = arith.mulf %71, %71 : vector<256x128xf32>
    %cst_52 = arith.constant dense<0.000000e+00> : vector<128xf32>
    %77 = vector.multi_reduction <add>, %76, %cst_52 [0] : vector<256x128xf32> to vector<128xf32>
    %78 = vector.shape_cast %77 : vector<128xf32> to vector<1x128xf32>
    %cst_53 = arith.constant 3.906250e-03 : f32
    %79 = vector.broadcast %cst_53 : f32 to vector<1x128xf32>
    %80 = arith.mulf %78, %79 : vector<1x128xf32>
    %81 = arith.mulf %75, %75 : vector<1x128xf32>
    %82 = arith.subf %80, %81 : vector<1x128xf32>
    %83 = vector.broadcast %75 : vector<1x128xf32> to vector<256x128xf32>
    %84 = arith.subf %71, %83 : vector<256x128xf32>
    %cst_54 = arith.constant 0.000000e+00 : f32
    %85 = vector.broadcast %cst_54 : f32 to vector<1x128xf32>
    %86 = arith.maximumf %82, %85 : vector<1x128xf32>
    %cst_55 = arith.constant 9.99999974E-6 : f32
    %87 = vector.broadcast %cst_55 : f32 to vector<1x128xf32>
    %88 = arith.addf %86, %87 : vector<1x128xf32>
    %89 = math.rsqrt %88 : vector<1x128xf32>
    %90 = vector.broadcast %89 : vector<1x128xf32> to vector<256x128xf32>
    %91 = arith.mulf %84, %90 : vector<256x128xf32>
    %cst_56 = arith.constant 0.000000e+00 : f32
    %92 = vector.broadcast %cst_56 : f32 to vector<256x128xf32>
    %93 = arith.maximumf %91, %92 : vector<256x128xf32>
    %cst_57 = arith.constant 0.000000e+00 : f32
    %94 = vector.broadcast %cst_57 : f32 to vector<17x128xf32>
    %c0_58 = arith.constant 0 : index
    %c0_59 = arith.constant 0 : index
    %95 = vector.load %arg6[%c0_58, %c0_59] : memref<290x128xf32, #tpu.memory_space<vmem>>, vector<17x128xf32>
    tpu.vector_store %arg6[%c0_58, %c0_59], %94 {strides = array<i32>} : memref<290x128xf32, #tpu.memory_space<vmem>>, vector<17x128xf32>,
    %cst_60 = arith.constant 0.000000e+00 : f32
    %96 = vector.broadcast %cst_60 : f32 to vector<17x128xf32>
    %c273 = arith.constant 273 : index
    %c0_61 = arith.constant 0 : index
    %97 = vector.load %arg6[%c273, %c0_61] : memref<290x128xf32, #tpu.memory_space<vmem>>, vector<17x128xf32>
    tpu.vector_store %arg6[%c273, %c0_61], %96 {strides = array<i32>} : memref<290x128xf32, #tpu.memory_space<vmem>>, vector<17x128xf32>,
    %c17_62 = arith.constant 17 : index
    %c0_63 = arith.constant 0 : index
    %98 = vector.load %arg6[%c17_62, %c0_63] : memref<290x128xf32, #tpu.memory_space<vmem>>, vector<256x128xf32>
    tpu.vector_store %arg6[%c17_62, %c0_63], %93 {strides = array<i32>} : memref<290x128xf32, #tpu.memory_space<vmem>>, vector<256x128xf32>,
    %cst_64 = arith.constant 0.000000e+00 : f32
    %99 = vector.broadcast %cst_64 : f32 to vector<256x128xf32>
    %c0_65 = arith.constant 0 : index
    %c0_66 = arith.constant 0 : index
    %100 = vector.load %arg6[%c0_65, %c0_66] : memref<290x128xf32, #tpu.memory_space<vmem>>, vector<256x128xf32>
    %101 = vector.broadcast %3 : vector<256x1xf32> to vector<256x128xf32>
    %102 = arith.mulf %100, %101 : vector<256x128xf32>
    %c0_67 = arith.constant 0 : index
    %c0_68 = arith.constant 0 : index
    %c0_69 = arith.constant 0 : index
    %103 = vector.load %arg4[%c0_67, %c0_68, %c0_69] : memref<9x128x128xf32, #tpu.memory_space<vmem>>, vector<1x128x128xf32>
    %104 = vector.shape_cast %103 : vector<1x128x128xf32> to vector<128x128xf32>
    %cst_70 = arith.constant dense<0.000000e+00> : vector<256x128xf32>
    %105 = tpu.matmul %102, %104, %cst_70 {dimension_numbers = #tpu.dot_dimension_numbers<[1], [0], [0], [1], [0, 0, 1, 1], [], []>} : vector<256x128xf32>, vector<128x128xf32>, vector<256x128xf32> -> vector<256x128xf32>
    %106 = arith.addf %99, %105 : vector<256x128xf32>
    %c1_71 = arith.constant 1 : index
    %c0_72 = arith.constant 0 : index
    %107 = vector.load %arg6[%c1_71, %c0_72] : memref<290x128xf32, #tpu.memory_space<vmem>>, vector<256x128xf32>
    %c1_73 = arith.constant 1 : index
    %c0_74 = arith.constant 0 : index
    %c0_75 = arith.constant 0 : index
    %108 = vector.load %arg4[%c1_73, %c0_74, %c0_75] : memref<9x128x128xf32, #tpu.memory_space<vmem>>, vector<1x128x128xf32>
    %109 = vector.shape_cast %108 : vector<1x128x128xf32> to vector<128x128xf32>
    %cst_76 = arith.constant dense<0.000000e+00> : vector<256x128xf32>
    %110 = tpu.matmul %107, %109, %cst_76 {dimension_numbers = #tpu.dot_dimension_numbers<[1], [0], [0], [1], [0, 0, 1, 1], [], []>} : vector<256x128xf32>, vector<128x128xf32>, vector<256x128xf32> -> vector<256x128xf32>
    %111 = arith.addf %106, %110 : vector<256x128xf32>
    %c2_77 = arith.constant 2 : index
    %c0_78 = arith.constant 0 : index
    %112 = vector.load %arg6[%c2_77, %c0_78] : memref<290x128xf32, #tpu.memory_space<vmem>>, vector<256x128xf32>
    %113 = vector.broadcast %4 : vector<256x1xf32> to vector<256x128xf32>
    %114 = arith.mulf %112, %113 : vector<256x128xf32>
    %c2_79 = arith.constant 2 : index
    %c0_80 = arith.constant 0 : index
    %c0_81 = arith.constant 0 : index
    %115 = vector.load %arg4[%c2_79, %c0_80, %c0_81] : memref<9x128x128xf32, #tpu.memory_space<vmem>>, vector<1x128x128xf32>
    %116 = vector.shape_cast %115 : vector<1x128x128xf32> to vector<128x128xf32>
    %cst_82 = arith.constant dense<0.000000e+00> : vector<256x128xf32>
    %117 = tpu.matmul %114, %116, %cst_82 {dimension_numbers = #tpu.dot_dimension_numbers<[1], [0], [0], [1], [0, 0, 1, 1], [], []>} : vector<256x128xf32>, vector<128x128xf32>, vector<256x128xf32> -> vector<256x128xf32>
    %118 = arith.addf %111, %117 : vector<256x128xf32>
    %c16_83 = arith.constant 16 : index
    %c0_84 = arith.constant 0 : index
    %119 = vector.load %arg6[%c16_83, %c0_84] : memref<290x128xf32, #tpu.memory_space<vmem>>, vector<256x128xf32>
    %120 = vector.broadcast %3 : vector<256x1xf32> to vector<256x128xf32>
    %121 = arith.mulf %119, %120 : vector<256x128xf32>
    %c3_85 = arith.constant 3 : index
    %c0_86 = arith.constant 0 : index
    %c0_87 = arith.constant 0 : index
    %122 = vector.load %arg4[%c3_85, %c0_86, %c0_87] : memref<9x128x128xf32, #tpu.memory_space<vmem>>, vector<1x128x128xf32>
    %123 = vector.shape_cast %122 : vector<1x128x128xf32> to vector<128x128xf32>
    %cst_88 = arith.constant dense<0.000000e+00> : vector<256x128xf32>
    %124 = tpu.matmul %121, %123, %cst_88 {dimension_numbers = #tpu.dot_dimension_numbers<[1], [0], [0], [1], [0, 0, 1, 1], [], []>} : vector<256x128xf32>, vector<128x128xf32>, vector<256x128xf32> -> vector<256x128xf32>
    %125 = arith.addf %118, %124 : vector<256x128xf32>
    %c17_89 = arith.constant 17 : index
    %c0_90 = arith.constant 0 : index
    %126 = vector.load %arg6[%c17_89, %c0_90] : memref<290x128xf32, #tpu.memory_space<vmem>>, vector<256x128xf32>
    %c4_91 = arith.constant 4 : index
    %c0_92 = arith.constant 0 : index
    %c0_93 = arith.constant 0 : index
    %127 = vector.load %arg4[%c4_91, %c0_92, %c0_93] : memref<9x128x128xf32, #tpu.memory_space<vmem>>, vector<1x128x128xf32>
    %128 = vector.shape_cast %127 : vector<1x128x128xf32> to vector<128x128xf32>
    %cst_94 = arith.constant dense<0.000000e+00> : vector<256x128xf32>
    %129 = tpu.matmul %126, %128, %cst_94 {dimension_numbers = #tpu.dot_dimension_numbers<[1], [0], [0], [1], [0, 0, 1, 1], [], []>} : vector<256x128xf32>, vector<128x128xf32>, vector<256x128xf32> -> vector<256x128xf32>
    %130 = arith.addf %125, %129 : vector<256x128xf32>
    %c18_95 = arith.constant 18 : index
    %c0_96 = arith.constant 0 : index
    %131 = vector.load %arg6[%c18_95, %c0_96] : memref<290x128xf32, #tpu.memory_space<vmem>>, vector<256x128xf32>
    %132 = vector.broadcast %4 : vector<256x1xf32> to vector<256x128xf32>
    %133 = arith.mulf %131, %132 : vector<256x128xf32>
    %c5_97 = arith.constant 5 : index
    %c0_98 = arith.constant 0 : index
    %c0_99 = arith.constant 0 : index
    %134 = vector.load %arg4[%c5_97, %c0_98, %c0_99] : memref<9x128x128xf32, #tpu.memory_space<vmem>>, vector<1x128x128xf32>
    %135 = vector.shape_cast %134 : vector<1x128x128xf32> to vector<128x128xf32>
    %cst_100 = arith.constant dense<0.000000e+00> : vector<256x128xf32>
    %136 = tpu.matmul %133, %135, %cst_100 {dimension_numbers = #tpu.dot_dimension_numbers<[1], [0], [0], [1], [0, 0, 1, 1], [], []>} : vector<256x128xf32>, vector<128x128xf32>, vector<256x128xf32> -> vector<256x128xf32>
    %137 = arith.addf %130, %136 : vector<256x128xf32>
    %c32_101 = arith.constant 32 : index
    %c0_102 = arith.constant 0 : index
    %138 = vector.load %arg6[%c32_101, %c0_102] : memref<290x128xf32, #tpu.memory_space<vmem>>, vector<256x128xf32>
    %139 = vector.broadcast %3 : vector<256x1xf32> to vector<256x128xf32>
    %140 = arith.mulf %138, %139 : vector<256x128xf32>
    %c6_103 = arith.constant 6 : index
    %c0_104 = arith.constant 0 : index
    %c0_105 = arith.constant 0 : index
    %141 = vector.load %arg4[%c6_103, %c0_104, %c0_105] : memref<9x128x128xf32, #tpu.memory_space<vmem>>, vector<1x128x128xf32>
    %142 = vector.shape_cast %141 : vector<1x128x128xf32> to vector<128x128xf32>
    %cst_106 = arith.constant dense<0.000000e+00> : vector<256x128xf32>
    %143 = tpu.matmul %140, %142, %cst_106 {dimension_numbers = #tpu.dot_dimension_numbers<[1], [0], [0], [1], [0, 0, 1, 1], [], []>} : vector<256x128xf32>, vector<128x128xf32>, vector<256x128xf32> -> vector<256x128xf32>
    %144 = arith.addf %137, %143 : vector<256x128xf32>
    %c33_107 = arith.constant 33 : index
    %c0_108 = arith.constant 0 : index
    %145 = vector.load %arg6[%c33_107, %c0_108] : memref<290x128xf32, #tpu.memory_space<vmem>>, vector<256x128xf32>
    %c7_109 = arith.constant 7 : index
    %c0_110 = arith.constant 0 : index
    %c0_111 = arith.constant 0 : index
    %146 = vector.load %arg4[%c7_109, %c0_110, %c0_111] : memref<9x128x128xf32, #tpu.memory_space<vmem>>, vector<1x128x128xf32>
    %147 = vector.shape_cast %146 : vector<1x128x128xf32> to vector<128x128xf32>
    %cst_112 = arith.constant dense<0.000000e+00> : vector<256x128xf32>
    %148 = tpu.matmul %145, %147, %cst_112 {dimension_numbers = #tpu.dot_dimension_numbers<[1], [0], [0], [1], [0, 0, 1, 1], [], []>} : vector<256x128xf32>, vector<128x128xf32>, vector<256x128xf32> -> vector<256x128xf32>
    %149 = arith.addf %144, %148 : vector<256x128xf32>
    %c34_113 = arith.constant 34 : index
    %c0_114 = arith.constant 0 : index
    %150 = vector.load %arg6[%c34_113, %c0_114] : memref<290x128xf32, #tpu.memory_space<vmem>>, vector<256x128xf32>
    %151 = vector.broadcast %4 : vector<256x1xf32> to vector<256x128xf32>
    %152 = arith.mulf %150, %151 : vector<256x128xf32>
    %c8_115 = arith.constant 8 : index
    %c0_116 = arith.constant 0 : index
    %c0_117 = arith.constant 0 : index
    %153 = vector.load %arg4[%c8_115, %c0_116, %c0_117] : memref<9x128x128xf32, #tpu.memory_space<vmem>>, vector<1x128x128xf32>
    %154 = vector.shape_cast %153 : vector<1x128x128xf32> to vector<128x128xf32>
    %cst_118 = arith.constant dense<0.000000e+00> : vector<256x128xf32>
    %155 = tpu.matmul %152, %154, %cst_118 {dimension_numbers = #tpu.dot_dimension_numbers<[1], [0], [0], [1], [0, 0, 1, 1], [], []>} : vector<256x128xf32>, vector<128x128xf32>, vector<256x128xf32> -> vector<256x128xf32>
    %156 = arith.addf %149, %155 : vector<256x128xf32>
    %cst_119 = arith.constant dense<0.000000e+00> : vector<128xf32>
    %157 = vector.multi_reduction <add>, %156, %cst_119 [0] : vector<256x128xf32> to vector<128xf32>
    %158 = vector.shape_cast %157 : vector<128xf32> to vector<1x128xf32>
    %cst_120 = arith.constant 3.906250e-03 : f32
    %159 = vector.broadcast %cst_120 : f32 to vector<1x128xf32>
    %160 = arith.mulf %158, %159 : vector<1x128xf32>
    %161 = arith.mulf %156, %156 : vector<256x128xf32>
    %cst_121 = arith.constant dense<0.000000e+00> : vector<128xf32>
    %162 = vector.multi_reduction <add>, %161, %cst_121 [0] : vector<256x128xf32> to vector<128xf32>
    %163 = vector.shape_cast %162 : vector<128xf32> to vector<1x128xf32>
    %cst_122 = arith.constant 3.906250e-03 : f32
    %164 = vector.broadcast %cst_122 : f32 to vector<1x128xf32>
    %165 = arith.mulf %163, %164 : vector<1x128xf32>
    %166 = arith.mulf %160, %160 : vector<1x128xf32>
    %167 = arith.subf %165, %166 : vector<1x128xf32>
    %168 = vector.broadcast %160 : vector<1x128xf32> to vector<256x128xf32>
    %169 = arith.subf %156, %168 : vector<256x128xf32>
    %cst_123 = arith.constant 0.000000e+00 : f32
    %170 = vector.broadcast %cst_123 : f32 to vector<1x128xf32>
    %171 = arith.maximumf %167, %170 : vector<1x128xf32>
    %cst_124 = arith.constant 9.99999974E-6 : f32
    %172 = vector.broadcast %cst_124 : f32 to vector<1x128xf32>
    %173 = arith.addf %171, %172 : vector<1x128xf32>
    %174 = math.rsqrt %173 : vector<1x128xf32>
    %175 = vector.broadcast %174 : vector<1x128xf32> to vector<256x128xf32>
    %176 = arith.mulf %169, %175 : vector<256x128xf32>
    %c0_125 = arith.constant 0 : index
    %c17_126 = arith.constant 17 : index
    %c0_127 = arith.constant 0 : index
    %177 = vector.load %arg2[%c0_125, %c17_126, %c0_127] : memref<1x290x128xf32, #tpu.memory_space<vmem>>, vector<1x256x128xf32>
    %178 = vector.shape_cast %177 : vector<1x256x128xf32> to vector<256x128xf32>
    %179 = arith.addf %176, %178 : vector<256x128xf32>
    %cst_128 = arith.constant 0.000000e+00 : f32
    %180 = vector.broadcast %cst_128 : f32 to vector<256x128xf32>
    %181 = arith.maximumf %179, %180 : vector<256x128xf32>
    %c0_129 = arith.constant 0 : index
    %c0_130 = arith.constant 0 : index
    %c0_131 = arith.constant 0 : index
    %182 = vector.load %arg5[%c0_129, %c0_130, %c0_131] : memref<1x256x128xf32, #tpu.memory_space<vmem>>, vector<1x256x128xf32>
    %183 = vector.shape_cast %182 : vector<1x256x128xf32> to vector<256x128xf32>
    %184 = vector.shape_cast %181 : vector<256x128xf32> to vector<1x256x128xf32>
    tpu.vector_store %arg5[%c0_129, %c0_130, %c0_131], %184 {strides = array<i32>} : memref<1x256x128xf32, #tpu.memory_space<vmem>>, vector<1x256x128xf32>,
    return
  }
  func.func @transform_0(%arg0: i32) -> (i32, i32) {
    %c0_i32 = arith.constant 0 : i32
    %c0_i32_0 = arith.constant 0 : i32
    %c0_i32_1 = arith.constant 0 : i32
    return %c0_i32, %c0_i32_0 : i32, i32
  }
  func.func @transform_1(%arg0: i32) -> (i32, i32, i32) {
    %c0_i32 = arith.constant 0 : i32
    %c0_i32_0 = arith.constant 0 : i32
    %c0_i32_1 = arith.constant 0 : i32
    return %arg0, %c0_i32, %c0_i32_0 : i32, i32, i32
  }
  func.func @transform_2(%arg0: i32) -> (i32, i32, i32) {
    %c0_i32 = arith.constant 0 : i32
    %c0_i32_0 = arith.constant 0 : i32
    %c0_i32_1 = arith.constant 0 : i32
    %c0_i32_2 = arith.constant 0 : i32
    return %c0_i32, %c0_i32_0, %c0_i32_1 : i32, i32, i32
  }
  func.func @transform_3(%arg0: i32) -> (i32, i32, i32) {
    %c0_i32 = arith.constant 0 : i32
    %c0_i32_0 = arith.constant 0 : i32
    %c0_i32_1 = arith.constant 0 : i32
    %c0_i32_2 = arith.constant 0 : i32
    return %c0_i32, %c0_i32_0, %c0_i32_1 : i32, i32, i32
  }
  func.func @transform_4(%arg0: i32) -> (i32, i32, i32) {
    %c0_i32 = arith.constant 0 : i32
    %c0_i32_0 = arith.constant 0 : i32
    %c0_i32_1 = arith.constant 0 : i32
    return %arg0, %c0_i32, %c0_i32_0 : i32, i32, i32
  }
}

</mosaic_0001>

<bundles_post_ra>
// kernel: tpu_custom_call.1
= control target key start
LH: loop header
LB: loop body
LE: loop exit
PB: predicated region body
PF: predicated region fallthrough
CT: control target
= control target key end

     0   :  { %9 = vsyncpa [#allocation4], 0  ;;  %s10169_s0 = inlined_call_operand.vmem [shape: f32[256,4], index: 0, kind: input, shape index: {}]   ;;  %s10170_s1 = inlined_call_operand.vmem [shape: f32[2,290,128], index: 1, kind: input, shape index: {}]   ;;  %s10171_s2 = inlined_call_operand.vmem [shape: f32[9,128,128], index: 2, kind: input, shape index: {}]   ;;  %s10172_s3 = inlined_call_operand.hbm [shape: f32[9,128,128], index: 3, kind: input, shape index: {}]   ;;  %s10173_s4 = inlined_call_operand.hbm [shape: f32[2,256,128], index: 4, kind: output, shape index: {}]  }
   0x1   :  { %10 = vsyncpa [#allocation5], 0 }
   0x2   :  { %12 = vsyncpa [#allocation5 + $0x1], 0  ;;  %s5734_s15 = smov 0   ;;  %s5736_s16 = smov 0  }
   0x3   :  { %s5738_s17 = smov 0   ;;  %s5740_s18 = smov 0  }
   0x4 LB: > { %s5755_s19 = sadd.s32 4294967295, %s5697_s18   ;;  %s5195_s20 = sadd.s32 4294967294, %s5697_s18   ;;  %s5697_s18 = sphi %s5740_s18, %s11024_s18   ;;  %s5693_s17 = sphi %s5738_s17, %s11023_s17   ;;  %s5689_s16 = sphi %s5736_s16, %s11022_s16   ;;  %s5685_s15 = sphi %s5734_s15, %s11021_s15  }
   0x5   : > { %s5759_s21 = sadd.s32 1, %s5697_s18   ;;  %s114_s22 = sadd.s32 1, %s5693_s17 }
   0x6   : > { %s111_s23 = ssub.s32 %s5697_s18, %s5759_s21  ;;  %p124_p0 = scmp.ne.s32.totalorder %s5693_s17, %s5689_s16 }
   0x7   : > { %p112_p1 = scmp.eq.s32.totalorder %s111_s23, 0  ;;  %p125_p2 = scmp.eq.s32.totalorder %s5755_s19, 1 }
   0x8   : > { %p130_p3 = scmp.ne.s32.totalorder %s5689_s16, %s5685_s15  ;;  %p131_p4 = scmp.eq.s32.totalorder %s5195_s20, 1 }
   0x9   : > { %s5770_s24 = scalar_select %p112_p1, %s5693_s17, %s114_s22  }
   0xa   : > { %p5772_p5 = por %p125_p2, %p124_p0  ;;  %p5776_p6 = por %p131_p4, %p130_p3 }
   0xb   : > { %p5196_p7 = scmp.ge.s32.totalorder %s5697_s18, 1  ;;  %p138_p8 = scmp.lt.s32.totalorder %s5697_s18, 3 }
   0xc   : > { %p5384_p9 = scmp.eq.s32.totalorder %s5755_s19, 0  ;;  %s155_s29 = sshll.u32 %s10172_s3, 4  ;;  %s156_s29 = int_to_ptr.hbm [resolvable:$true] %s155_s29 }
   0xd   : > { %p139_p10 = pnand %p5196_p7, %p138_p8  ;;  %s5699_s30 = smov [#allocation3]  }
   0xe   : > { %s157_s5 = sshll.u32 %s5699_s30, 4  ;;  %s5700_s6 = smov 128   ;;  %s158_s5 = int_to_ptr.vmem [resolvable:$true] %s157_s5 }
   0xf   : > { %p5376_p11 = pneg %p139_p10  ;;  %s5701_s7 = smov 8  }
  0x10   : > { %181 = sbr.rel (%p139_p10) target bundleno = 1965 (0x7ad), region = 36 }
  0x11   : > { %p5377_p12 = pnand %p5384_p9, %p5376_p11 }
  0x13   : > { %5379 = dma.hbm_to_vmem [thread:$0]  (!%p5377_p12), %s156_s29, 18432, %s158_s5, [#allocation4], %s5700_s6, %s5700_s6, %s5701_s7  }
  0x15   : > { %5676 = dma.done.wait (%p5384_p9), [#allocation4], 18432  }
  0x16   : > { %5678 = vsyncadd (%p5384_p9), [#allocation4], 4294948864  ;;  %v10174_v0 = vmov 0   ;;  %v5218_v1 = vld [vmem:[%s10171_s2 + $0xf8] sm:$0xff]  ;;  %v5801_v2 = vld [vmem:[%s10169_s0 + $0xa0] sm:$0xff]  ;;  %p208_p13 = scmp.lt.s32.totalorder %s5755_s19, 1 }
  0x17   : > { %5431 = vset.pattern.permute.xlu2 %v10174_v0  ;;  %5430 = vset.pattern.permute.xlu1 %v10174_v0  ;;  %v5806_v3 = vld [vmem:[%s10169_s0 + $0x90] sm:$0xff]  ;;  %v5811_v4 = vld [vmem:[%s10169_s0 + $0x80] sm:$0xff]  ;;  %v5216_v6 = vld [vmem:[%s10171_s2 + $0xe8] sm:$0xff]  ;;  %v10176_v38 = vmov 1   ;;  %s205_s9 = sand.u32 1, %s5689_s16   ;;  %s5336_s12 = sshll.u32 %s5755_s19, 8 }
  0x18   : > { %5429 = vset.pattern.permute.xlu0 %v10174_v0  ;;  %534 = vmatpush.msra.mxu0 %v5218_v1  ;;  %v5217_v5 = vld [vmem:[%s10171_s2 + $0xf0] sm:$0xff]  ;;  %v5215_v7 = vld [vmem:[%s10171_s2 + $0xe0] sm:$0xff]  ;;  %v5214_v8 = vld [vmem:[%s10171_s2 + $0xd8] sm:$0xff]  ;;  %s209_s14 = scalar_select %p208_p13, %s5755_s19, 1 }
  0x19   : > { %5337 = vmatpush.msra.mxu2 %v5218_v1  ;;  %379 = vperm.xlu2 %5431, %v5801_v2   ;;  %v5831_v9 = vld [vmem:[%s10169_s0 + $0xa8] sm:$0xff]  ;;  %v5836_v10 = vld [vmem:[%s10169_s0 + $0x98] sm:$0xff]  ;;  %v5213_v12 = vld [vmem:[%s10171_s2 + $0xd0] sm:$0xff]  ;;  %s5201_s10 = sshll.u32 %s205_s9, 8  ;;  %s5106_s23 = scalar_lea.sflag [#allocation5], %s205_s9 }
  0x1a   : > { %369 = vperm.xlu1 %5430, %v5806_v3   ;;  %359 = vperm.xlu0 %5429, %v5811_v4   ;;  %v5841_v11 = vld [vmem:[%s10169_s0 + $0x88] sm:$0xff]  ;;  %v5211_v14 = vld [vmem:[%s10171_s2 + $0xc0] sm:$0xff]  ;;  %v5210_v15 = vld [vmem:[%s10171_s2 + $0xb8] sm:$0xff]  ;;  %s5369_s30 = smul.u32 296, %s209_s14  ;;  %s10017_s11 = scalar_lea.vmem [#allocation6], %s5201_s10 }
  0x1b   : > { %535 = vmatpush.msra.mxu0 %v5217_v5  ;;  %5338 = vmatpush.msra.mxu2 %v5217_v5  ;;  %v5212_v13 = vld [vmem:[%s10171_s2 + $0xc8] sm:$0xff]  ;;  %v5861_v16 = vld [vmem:[%s10169_s0 + $0xc0] sm:$0xff]  ;;  %v5866_v17 = vld [vmem:[%s10169_s0 + $0xb8] sm:$0xff]  ;;  %s5118_s14 = sshll.u32 %s10017_s11, 4  ;;  %s5651_s5 = scalar_lea.hbm %s10173_s4, 512  ;;  %s5119_s14 = int_to_ptr.vmem [resolvable:$true] %s5118_s14 }
  0x1c   : > { %v5872_v18 = vld [vmem:[%s10169_s0 + $0xb0] sm:$0xff]  ;;  %v5208_v20 = vld [vmem:[%s10171_s2 + $0xa8] sm:$0xff]  ;;  %v5207_v21 = vld [vmem:[%s10171_s2 + $0xa0] sm:$0xff]  ;;  %s5917_s20 = scalar_lea.vmem %s10170_s1, %s5369_s30 }
  0x1d   : > { %536 = vmatpush.msra.mxu0 %v5216_v6  ;;  %5339 = vmatpush.msra.mxu2 %v5216_v6  ;;  %v5209_v19 = vld [vmem:[%s10171_s2 + $0xb0] sm:$0xff]  ;;  %v5206_v22 = vld [vmem:[%s10171_s2 + $0x98] sm:$0xff]  ;;  %v5903_v25 = vld [vmem:[%s10169_s0 + $0xc8] sm:$0xff] }
  0x1e   : > { %v5893_v23 = vld [vmem:[%s10169_s0 + $0xd8] sm:$0xff]  ;;  %v5898_v24 = vld [vmem:[%s10169_s0 + $0xd0] sm:$0xff]  ;;  %v5204_v27 = vld [vmem:[%s10171_s2 + $0x88] sm:$0xff] }
  0x1f   : > { %537 = vmatpush.msra.mxu0 %v5215_v7  ;;  %5340 = vmatpush.msra.mxu2 %v5215_v7  ;;  %v5205_v26 = vld [vmem:[%s10171_s2 + $0x90] sm:$0xff]  ;;  %v5203_v28 = vld [vmem:[%s10171_s2 + $0x80] sm:$0xff]  ;;  %v5932_v32 = vld [vmem:[%s10169_s0 + $0xe8] sm:$0xff] }
  0x20   : > { %v485_v29 = vld [vmem:[%s5917_s20 + $0x1] sm:$0xff]  ;;  %v5927_v31 = vld [vmem:[%s10169_s0 + $0xf0] sm:$0xff]  ;;  %v5950_v37 = vld [vmem:[%s10169_s0 + $0xf8] sm:$0xff] }
  0x21   : > { %538 = vmatpush.msra.mxu0 %v5214_v8  ;;  %5341 = vmatpush.msra.mxu2 %v5214_v8  ;;  %v501_v30 = vld [vmem:[%s5917_s20 + $0x81] sm:$0xff]  ;;  %v486_v34 = vld [vmem:[%s5917_s20 + $0x9] sm:$0xff]  ;;  %v5955_v39 = vld [vmem:[%s5917_s20 + $0x11] sm:$0xff] }
  0x22   : > { %384 = vperm.xlu2 %5431, %v5831_v9   ;;  %374 = vperm.xlu1 %5430, %v5836_v10   ;;  %v5937_v33 = vld [vmem:[%s10169_s0 + $0xe0] sm:$0xff]  ;;  %v502_v35 = vld [vmem:[%s5917_s20 + $0x89] sm:$0xff]  ;;  %v503_v40 = vld [vmem:[%s5917_s20 + $0x91] sm:$0xff] }
  0x23   : > { %364 = vperm.xlu0 %5429, %v5841_v11   ;;  %539 = vmatpush.msra.mxu0 %v5213_v12  ;;  %v213_v36 = vld [vmem:[%s10169_s0] sm:$0xff]  ;;  %v214_v41 = vld [vmem:[%s10169_s0 + $0x8] sm:$0xff]  ;;  %v484_v42 = vld [vmem:[%s10171_s2 + $0x78] sm:$0xff] }
  0x24   : > { %5342 = vmatpush.msra.mxu2 %v5213_v12  ;;  %v215_v43 = vld [vmem:[%s10169_s0 + $0x10] sm:$0xff]  ;;  %5353 = vmatpush.msra.mxu3 %v484_v42  ;;  %v5972_v44 = vld [vmem:[%s5917_s20 + $0x19] sm:$0xff]  ;;  %v482_v47 = vld [vmem:[%s10171_s2 + $0x68] sm:$0xff] }
  0x25   : > { %540 = vmatpush.msra.mxu0 %v5212_v13  ;;  %647 = vmatpush.msra.mxu1 %v484_v42  ;;  %v504_v45 = vld [vmem:[%s5917_s20 + $0x99] sm:$0xff]  ;;  %v483_v46 = vld [vmem:[%s10171_s2 + $0x70] sm:$0xff]  ;;  %v5993_v51 = vld [vmem:[%s5917_s20 + $0x21] sm:$0xff] }
  0x26   : > { %5343 = vmatpush.msra.mxu2 %v5212_v13  ;;  %v216_v48 = vld [vmem:[%s10169_s0 + $0x18] sm:$0xff]  ;;  %5354 = vmatpush.msra.mxu3 %v483_v46  ;;  %v481_v49 = vld [vmem:[%s10171_s2 + $0x60] sm:$0xff]  ;;  %v479_v53 = vld [vmem:[%s10171_s2 + $0x50] sm:$0xff] }
  0x27   : > { %541 = vmatpush.msra.mxu0 %v5211_v14  ;;  %648 = vmatpush.msra.mxu1 %v483_v46  ;;  %v480_v50 = vld [vmem:[%s10171_s2 + $0x58] sm:$0xff]  ;;  %v505_v52 = vld [vmem:[%s5917_s20 + $0xa1] sm:$0xff]  ;;  %v219_v56 = vld [vmem:[%s10169_s0 + $0x30] sm:$0xff] }
  0x28   : > { %5344 = vmatpush.msra.mxu2 %v5211_v14  ;;  %5355 = vmatpush.msra.mxu3 %v482_v47  ;;  %v478_v54 = vld [vmem:[%s10171_s2 + $0x48] sm:$0xff]  ;;  %v217_v55 = vld [vmem:[%s10169_s0 + $0x20] sm:$0xff]  ;;  %v476_v60 = vld [vmem:[%s10171_s2 + $0x38] sm:$0xff] }
  0x29   : > { %542 = vmatpush.msra.mxu0 %v5210_v15  ;;  %649 = vmatpush.msra.mxu1 %v482_v47  ;;  %v477_v57 = vld [vmem:[%s10171_s2 + $0x40] sm:$0xff]  ;;  %v6016_v58 = vld [vmem:[%s5917_s20 + $0x29] sm:$0xff]  ;;  %v6036_v5 = vld [vmem:[%s5917_s20 + $0x31] sm:$0xff] }
  0x2a   : > { %5345 = vmatpush.msra.mxu2 %v5210_v15  ;;  %399 = vperm.xlu2 %5431, %v5861_v16   ;;  %v506_v59 = vld [vmem:[%s5917_s20 + $0xa9] sm:$0xff]  ;;  %v221_v1 = vld [vmem:[%s10169_s0 + $0x40] sm:$0xff]  ;;  %v507_v6 = vld [vmem:[%s5917_s20 + $0xb1] sm:$0xff] }
  0x2b   : > { %394 = vperm.xlu1 %5430, %v5866_v17   ;;  %389 = vperm.xlu0 %5429, %v5872_v18   ;;  %v475_v61 = vld [vmem:[%s10171_s2 + $0x30] sm:$0xff]  ;;  %v218_v62 = vld [vmem:[%s10169_s0 + $0x28] sm:$0xff]  ;;  %v473_v7 = vld [vmem:[%s10171_s2 + $0x20] sm:$0xff] }
  0x2c   : > { %543 = vmatpush.msra.mxu0 %v5209_v19  ;;  %5346 = vmatpush.msra.mxu2 %v5209_v19  ;;  %v474_v63 = vld [vmem:[%s10171_s2 + $0x28] sm:$0xff]  ;;  %v472_v8 = vld [vmem:[%s10171_s2 + $0x18] sm:$0xff]  ;;  %v471_v12 = vld [vmem:[%s10171_s2 + $0x10] sm:$0xff] }
  0x2d   : > { %5356 = vmatpush.msra.mxu3 %v481_v49  ;;  %650 = vmatpush.msra.mxu1 %v481_v49  ;;  %v220_v13 = vld [vmem:[%s10169_s0 + $0x38] sm:$0xff]  ;;  %v470_v14 = vld [vmem:[%s10171_s2 + $0x8] sm:$0xff]  ;;  %v5265_v42 = vld [vmem:[%s10171_s2 + $0x270] sm:$0xff] }
  0x2e   : > { %544 = vmatpush.msra.mxu0 %v5208_v20  ;;  %5347 = vmatpush.msra.mxu2 %v5208_v20  ;;  %v5234_v15 = vld [vmem:[%s10171_s2 + $0x178] sm:$0xff] }
  0x2f   : > { %5357 = vmatpush.msra.mxu3 %v480_v50  ;;  %651 = vmatpush.msra.mxu1 %v480_v50  ;;  %v6061_v19 = vld [vmem:[%s5917_s20 + $0x39] sm:$0xff]  ;;  %v222_v50 = vld [vmem:[%s10169_s0 + $0x48] sm:$0xff] }
  0x30   : > { %545 = vmatpush.msra.mxu0 %v5207_v21  ;;  %5348 = vmatpush.msra.mxu2 %v5207_v21  ;;  %v508_v20 = vld [vmem:[%s5917_s20 + $0xb9] sm:$0xff] }
  0x31   : > { %5358 = vmatpush.msra.mxu3 %v479_v53  ;;  %652 = vmatpush.msra.mxu1 %v479_v53  ;;  %v469_v21 = vld [vmem:[%s10171_s2] sm:$0xff]  ;;  %v6125_v49 = vld [vmem:[%s10169_s0 + $0x58] sm:$0xff]  ;;  %v510_v53 = vld [vmem:[%s5917_s20 + $0xc9] sm:$0xff] }
  0x32   : > { %546 = vmatpush.msra.mxu0 %v5206_v22  ;;  %5349 = vmatpush.msra.mxu2 %v5206_v22  ;;  %v5250_v22 = vld [vmem:[%s10171_s2 + $0x1f8] sm:$0xff] }
  0x33   : > { %414 = vperm.xlu2 %5431, %v5893_v23   ;;  %409 = vperm.xlu1 %5430, %v5898_v24  }
  0x34   : > { %404 = vperm.xlu0 %5429, %v5903_v25   ;;  %547 = vmatpush.msra.mxu0 %v5205_v26 }
  0x35   : > { %5350 = vmatpush.msra.mxu2 %v5205_v26  ;;  %5359 = vmatpush.msra.mxu3 %v478_v54  ;;  %v6073_v26 = vld [vmem:[%s5917_s20 + $0xb0] sm:$0xff] }
  0x36   : > { %548 = vmatpush.msra.mxu0 %v5204_v27  ;;  %653 = vmatpush.msra.mxu1 %v478_v54  ;;  %v5232_v54 = vld [vmem:[%s10171_s2 + $0x168] sm:$0xff] }
  0x37   : > { %5351 = vmatpush.msra.mxu2 %v5204_v27  ;;  %5360 = vmatpush.msra.mxu3 %v477_v57  ;;  %v6076_v27 = vld [vmem:[%s5917_s20 + $0xc0] sm:$0xff] }
  0x38   : > { %549 = vmatpush.msra.mxu0 %v5203_v28  ;;  %654 = vmatpush.msra.mxu1 %v477_v57  ;;  %v5231_v57 = vld [vmem:[%s10171_s2 + $0x160] sm:$0xff] }
  0x39   : > { %5352 = vmatpush.msra.mxu2 %v5203_v28  ;;  %550 = vmatmul.f32.vlgmr.msra.gmra.mxu0 %v485_v29 }
  0x3a   : > { %598 = vmatmul.f32.vlgmr.msra.gmra.mxu2 %v501_v30  ;;  %5361 = vmatpush.msra.mxu3 %v476_v60 }
  0x3b   : > { %429 = vperm.xlu2 %5431, %v5927_v31   ;;  %424 = vperm.xlu1 %5430, %v5932_v32  }
  0x3c   : > { %419 = vperm.xlu0 %5429, %v5937_v33   ;;  %5362 = vmatpush.msra.mxu3 %v475_v61 }
  0x3d   : > { %655 = vmatpush.msra.mxu1 %v476_v60  ;;  %969 = vmatpush.msrb.mxu2 %v5234_v15  ;;  %v5230_v60 = vld [vmem:[%s10171_s2 + $0x158] sm:$0xff] }
  0x3e   : > { %5363 = vmatpush.msra.mxu3 %v474_v63  ;;  %v511_v15 = vld [vmem:[%s5917_s20 + $0xd1] sm:$0xff] }
  0x3f   : > { %656 = vmatpush.msra.mxu1 %v475_v61  ;;  %v5262_v61 = vld [vmem:[%s10171_s2 + $0x258] sm:$0xff] }
  0x40   : > { %5364 = vmatpush.msra.mxu3 %v473_v7 }
  0x41   : > { %553 = vmatmul.f32.gmra.mxu0 %v486_v34  ;;  %657 = vmatpush.msra.mxu1 %v474_v63  ;;  %v6090_v34 = vld [vmem:[%s5917_s20 + $0x41] sm:$0xff]  ;;  %v6163_v63 = vld [vmem:[%s5917_s20 + $0xd0] sm:$0xff] }
  0x42   : > { %601 = vmatmul.f32.gmra.mxu2 %v502_v35  ;;  %5365 = vmatpush.msra.mxu3 %v472_v8  ;;  %v509_v35 = vld [vmem:[%s5917_s20 + $0xc1] sm:$0xff] }
  0x43   : > { %279 = vperm.xlu2 %5431, %v213_v36   ;;  %5432 = vset.pattern.permute.xlu1 %v10176_v38 }
  0x44   : > { %434 = vperm.xlu0 %5429, %v5950_v37   ;;  %793 = vperm.xlu1 %5432, %v213_v36   ;;  %v5233_v36 = vld [vmem:[%s10171_s2 + $0x170] sm:$0xff] }
  0x45   : > { %5366 = vmatpush.msra.mxu3 %v471_v12  ;;  %658 = vmatpush.msra.mxu1 %v473_v7  ;;  %v5261_v7 = vld [vmem:[%s10171_s2 + $0x250] sm:$0xff] }
  0x46   : > { %970 = vmatpush.msrb.mxu2 %v5233_v36  ;;  %v6203_v36 = vld [vmem:[%s5917_s20 + $0xf8] sm:$0xff] }
  0x47   : > { %5367 = vmatpush.msra.mxu3 %v470_v14  ;;  %659 = vmatpush.msra.mxu1 %v472_v8 }
  0x48   : > { %971 = vmatpush.msrb.mxu2 %v5232_v54  ;;  %v261_v54 = vld [vmem:[%s5917_s20 + $0x80] sm:$0xff] }
  0x49   : > { %556 = vmatmul.f32.gmra.mxu0 %v5955_v39  ;;  %5368 = vmatpush.msra.mxu3 %v469_v21 }
  0x4a   : > { %604 = vmatmul.f32.gmra.mxu2 %v503_v40  ;;  %660 = vmatpush.msra.mxu1 %v471_v12  ;;  %v5249_v40 = vld [vmem:[%s10171_s2 + $0x1f0] sm:$0xff] }
  0x4b   : > { %5435 = vset.pattern.permute.xlu2 %v10176_v38  ;;  %1195 = vmatpush.msrb.mxu3 %v5250_v22  ;;  %v5247_v22 = vld [vmem:[%s10171_s2 + $0x1e0] sm:$0xff] }
  0x4c   : > { %5433 = vset.pattern.permute.xlu0 %v10176_v38  ;;  %801 = vperm.xlu2 %5435, %v215_v43  }
  0x4d   : > { %5434 = vset.pattern.permute.xlu1 %v10174_v0  ;;  %797 = vperm.xlu0 %5433, %v214_v41  }
  0x4e   : > { %284 = vperm.xlu1 %5434, %v214_v41   ;;  %661 = vmatpush.msra.mxu1 %v470_v14  ;;  %v5266_v41 = vld [vmem:[%s10171_s2 + $0x278] sm:$0xff] }
  0x4f   : > { %1196 = vmatpush.msrb.mxu3 %v5249_v40  ;;  %1389 = vmatpush.msrb.mxu0 %v5266_v41  ;;  %v6186_v14 = vld [vmem:[%s5917_s20 + $0x51] sm:$0xff]  ;;  %v5259_v40 = vld [vmem:[%s10171_s2 + $0x240] sm:$0xff] }
  0x50   : > { %662 = vmatpush.msra.mxu1 %v469_v21  ;;  %972 = vmatpush.msrb.mxu2 %v5231_v57  ;;  %v5260_v21 = vld [vmem:[%s10171_s2 + $0x248] sm:$0xff]  ;;  %v6209_v41 = vld [vmem:[%s5917_s20 + $0xa0] sm:$0xff] }
  0x51   : > { %559 = vmatmul.f32.gmra.mxu0 %v5972_v44 }
  0x52   : > { %607 = vmatmul.f32.gmra.mxu2 %v504_v45  ;;  %v6110_v45 = vld [vmem:[%s5917_s20 + $0xc8] sm:$0xff]  ;;  %1390 = vmatpush.msrb.mxu0 %v5265_v42  ;;  %v6212_v42 = vld [vmem:[%s5917_s20 + $0x90] sm:$0xff] }
  0x53   : > { %973 = vmatpush.msrb.mxu2 %v5230_v60 }
  0x54   : > { %805 = vperm.xlu2 %5435, %v216_v48  }
  0x55   : > { %5436 = vset.pattern.permute.xlu0 %v10174_v0 }
  0x56   : > { %289 = vperm.xlu1 %5434, %v215_v43   ;;  %294 = vperm.xlu0 %5436, %v216_v48   ;;  %v6107_v43 = vld [vmem:[%s5917_s20 + $0xb8] sm:$0xff] }
  0x59   : > { %562 = vmatmul.f32.gmra.mxu0 %v5993_v51 }
  0x5a   : > { %610 = vmatmul.f32.gmra.mxu2 %v505_v52  ;;  %v6133_v52 = vld [vmem:[%s5917_s20 + $0x49] sm:$0xff] }
  0x5c   : > { %5438 = vset.pattern.permute.xlu2 %v10174_v0 }
  0x5d   : > { %299 = vperm.xlu2 %5438, %v217_v55  }
  0x5e   : > { %5437 = vset.pattern.permute.xlu1 %v10176_v38  ;;  %5439 = vset.pattern.permute.xlu0 %v10176_v38 }
  0x5f   : > { %809 = vperm.xlu1 %5437, %v217_v55   ;;  %817 = vperm.xlu0 %5439, %v219_v56   ;;  %v5264_v55 = vld [vmem:[%s10171_s2 + $0x268] sm:$0xff] }
  0x60   : > { %1391 = vmatpush.msrb.mxu0 %v5264_v55  ;;  %v5258_v55 = vld [vmem:[%s10171_s2 + $0x238] sm:$0xff] }
  0x61   : > { %565 = vmatmul.f32.gmra.mxu0 %v6016_v58 }
  0x62   : > { %613 = vmatmul.f32.gmra.mxu2 %v506_v59  ;;  %v5263_v59 = vld [vmem:[%s10171_s2 + $0x260] sm:$0xff] }
  0x63   : > { %1392 = vmatpush.msrb.mxu0 %v5263_v59 }
  0x65   : > { %304 = vperm.xlu2 %5438, %v218_v62   ;;  %1393 = vmatpush.msrb.mxu0 %v5262_v61 }
  0x67   : > { %813 = vperm.xlu1 %5437, %v218_v62   ;;  %5442 = vset.pattern.permute.xlu0 %v10174_v0  ;;  %v5229_v62 = vld [vmem:[%s10171_s2 + $0x150] sm:$0xff] }
  0x68   : > { %319 = vperm.xlu0 %5442, %v221_v1   ;;  %974 = vmatpush.msrb.mxu2 %v5229_v62  ;;  %v5225_v62 = vld [vmem:[%s10171_s2 + $0x130] sm:$0xff] }
  0x69   : > { %568 = vmatmul.f32.gmra.mxu0 %v6036_v5 }
  0x6a   : > { %616 = vmatmul.f32.gmra.mxu2 %v507_v6  ;;  %1394 = vmatpush.msrb.mxu0 %v5261_v7  ;;  %v6242_v7 = vld [vmem:[%s10169_s0 + $0x68] sm:$0xff] }
  0x6c   : > { %1395 = vmatpush.msrb.mxu0 %v5260_v21 }
  0x6d   : > { %5441 = vset.pattern.permute.xlu2 %v10176_v38 }
  0x6e   : > { %821 = vperm.xlu2 %5441, %v220_v13   ;;  %1396 = vmatpush.msrb.mxu0 %v5259_v40  ;;  %v512_v40 = vld [vmem:[%s5917_s20 + $0xd9] sm:$0xff] }
  0x6f   : > { %5440 = vset.pattern.permute.xlu1 %v10174_v0 }
  0x70   : > { %309 = vperm.xlu1 %5440, %v219_v56   ;;  %5445 = vset.pattern.permute.xlu0 %v10176_v38  ;;  %v5248_v56 = vld [vmem:[%s10171_s2 + $0x1e8] sm:$0xff] }
  0x71   : > { %571 = vmatmul.f32.gmra.mxu0 %v6061_v19  ;;  %837 = vperm.xlu0 %5445, %v6125_v49  }
  0x72   : > { %619 = vmatmul.f32.gmra.mxu2 %v508_v20  ;;  %1197 = vmatpush.msrb.mxu3 %v5248_v56  ;;  %v5228_v20 = vld [vmem:[%s10171_s2 + $0x148] sm:$0xff] }
  0x73   : > { %v6078_v28 = vpop.permute.xlu2 %379  ;;  %975 = vmatpush.msrb.mxu2 %v5228_v20  ;;  %v6224_v56 = vld [vmem:[%s5917_s20 + $0xe8] sm:$0xff]  ;;  %1397 = vmatpush.msrb.mxu0 %v5258_v55 }
  0x74   : > { %v6083_v29 = vmul.f32 %v6073_v26, %v6078_v28  ;;  %v6087_v30 = vmul.f32 %v6076_v27, %v6078_v28  ;;  %1198 = vmatpush.msrb.mxu3 %v5247_v22  ;;  %v5256_v55 = vld [vmem:[%s10171_s2 + $0x228] sm:$0xff] }
  0x76   : > { %10297 = vst [vmem:[#allocation9_spill] sm:$0xff] %v6083_v29  ;;  %825 = vperm.xlu2 %5441, %v221_v1   ;;  %v6166_v1 = vld [vmem:[%s5917_s20 + $0xe0] sm:$0xff] }
  0x77   : > { %10298 = vst [vmem:[#allocation10_spill] sm:$0xff] %v6087_v30 }
  0x78   : > { %314 = vperm.xlu1 %5440, %v220_v13   ;;  %v223_v13 = vld [vmem:[%s10169_s0 + $0x50] sm:$0xff] }
  0x79   : > { %574 = vmatmul.f32.gmra.mxu0 %v6090_v34  ;;  %5448 = vset.pattern.permute.xlu0 %v10174_v0 }
  0x7a   : > { %622 = vmatmul.f32.gmra.mxu2 %v509_v35  ;;  %v5227_v35 = vld [vmem:[%s10171_s2 + $0x140] sm:$0xff]  ;;  %344 = vperm.xlu0 %5448, %v6242_v7  }
  0x7b   : > { %976 = vmatpush.msrb.mxu2 %v5227_v35  ;;  %v6259_v35 = vld [vmem:[%s5917_s20 + $0x59] sm:$0xff] }
  0x7c   : > { %v6112_v46 = vpop.permute.xlu2 %384 }
  0x7d   : > { %v6116_v47 = vmul.f32 %v6107_v43, %v6112_v46  ;;  %v6120_v48 = vmul.f32 %v6110_v45, %v6112_v46 }
  0x7e   : > { %5444 = vset.pattern.permute.xlu2 %v10174_v0  ;;  %v5257_v0 = vld [vmem:[%s10171_s2 + $0x230] sm:$0xff] }
  0x7f   : > { %10299 = vst [vmem:[#allocation11_spill] sm:$0xff] %v6116_v47  ;;  %324 = vperm.xlu2 %5444, %v222_v50   ;;  %1398 = vmatpush.msrb.mxu0 %v5257_v0  ;;  %v513_v47 = vld [vmem:[%s5917_s20 + $0xe1] sm:$0xff] }
  0x80   : > { %10300 = vst [vmem:[#allocation12_spill] sm:$0xff] %v6120_v48  ;;  %5443 = vset.pattern.permute.xlu1 %v10176_v38 }
  0x81   : > { %829 = vperm.xlu1 %5443, %v222_v50   ;;  %577 = vmatmul.f32.gmra.mxu0 %v6133_v52  ;;  %v5226_v50 = vld [vmem:[%s10171_s2 + $0x138] sm:$0xff] }
  0x82   : > { %625 = vmatmul.f32.gmra.mxu2 %v510_v53  ;;  %1399 = vmatpush.msrb.mxu0 %v5256_v55 }
  0x83   : > { %977 = vmatpush.msrb.mxu2 %v5226_v50  ;;  %v5224_v50 = vld [vmem:[%s10171_s2 + $0x128] sm:$0xff] }
  0x84   : > { %v6168_v6 = vpop.permute.xlu2 %399 }
  0x85   : > { %v6175_v8 = vmul.f32 %v6163_v63, %v6168_v6  ;;  %v6179_v12 = vmul.f32 %v6166_v1, %v6168_v6  ;;  %978 = vmatpush.msrb.mxu2 %v5225_v62  ;;  %v6282_v62 = vld [vmem:[%s5917_s20 + $0x98] sm:$0xff] }
  0x87   : > { %10301 = vst [vmem:[#allocation13_spill] sm:$0xff] %v6175_v8  ;;  %329 = vperm.xlu2 %5444, %v223_v13   ;;  %979 = vmatpush.msrb.mxu2 %v5224_v50  ;;  %v6320_v8 = vld [vmem:[%s5917_s20 + $0x61] sm:$0xff] }
  0x88   : > { %10302 = vst [vmem:[#allocation14_spill] sm:$0xff] %v6179_v12  ;;  %v5255_v12 = vld [vmem:[%s10171_s2 + $0x220] sm:$0xff] }
  0x89   : > { %833 = vperm.xlu1 %5443, %v223_v13   ;;  %580 = vmatmul.f32.gmra.mxu0 %v6186_v14 }
  0x8a   : > { %628 = vmatmul.f32.gmra.mxu2 %v511_v15  ;;  %1400 = vmatpush.msrb.mxu0 %v5255_v12  ;;  %v6338_v12 = vld [vmem:[%s5917_s20 + $0xd8] sm:$0xff] }
  0x8c   : > { %v6217_v53 = vpop.permute.xlu1 %369  ;;  %v360_v61 = vpop.permute.xlu0 %359 }
  0x8d   : > { %v6226_v57 = vpop.permute.xlu2 %414  ;;  %v6230_v59 = vmul.f32 %v6209_v41, %v6217_v53  ;;  %v6234_v60 = vmul.f32 %v6073_v26, %v6217_v53  ;;  %v6253_v20 = vmul.f32 %v6212_v42, %v360_v61  ;;  %v6256_v21 = vmul.f32 %v6209_v41, %v360_v61 }
  0x8e   : > { %v6246_v13 = vmul.f32 %v6224_v56, %v6226_v57  ;;  %v6250_v15 = vmul.f32 %v6203_v36, %v6226_v57  ;;  %v453_v22 = vmul.f32 %v360_v61, %v261_v54  ;;  %v5246_v54 = vld [vmem:[%s10171_s2 + $0x1d8] sm:$0xff]  ;;  %v6279_v61 = vld [vmem:[%s5917_s20 + $0xa8] sm:$0xff] }
  0x8f   : > { %10303 = vst [vmem:[#allocation15_spill] sm:$0xff] %v6230_v59  ;;  %5447 = vset.pattern.permute.xlu2 %v10176_v38  ;;  %v262_v38 = vld [vmem:[%s5917_s20 + $0x88] sm:$0xff]  ;;  %1199 = vmatpush.msrb.mxu3 %v5246_v54 }
  0x90   : > { %10304 = vst [vmem:[#allocation16_spill] sm:$0xff] %v6234_v60  ;;  %711 = vmatmul.f32.vlgmr.msra.gmra.mxu3 %v453_v22  ;;  %v5223_v22 = vld [vmem:[%s10171_s2 + $0x120] sm:$0xff]  ;;  %v5254_v60 = vld [vmem:[%s10171_s2 + $0x218] sm:$0xff] }
  0x91   : > { %10305 = vst [vmem:[#allocation17_spill] sm:$0xff] %v6246_v13  ;;  %583 = vmatmul.f32.gmra.mxu0 %v6259_v35  ;;  %980 = vmatpush.msrb.mxu2 %v5223_v22  ;;  %v5221_v22 = vld [vmem:[%s10171_s2 + $0x110] sm:$0xff] }
  0x92   : > { %10306 = vst [vmem:[#allocation18_spill] sm:$0xff] %v6250_v15  ;;  %v10309_v15 = vmov 0   ;;  %631 = vmatmul.f32.gmra.mxu2 %v512_v40  ;;  %v225_v40 = vld [vmem:[%s10169_s0 + $0x60] sm:$0xff]  ;;  %1401 = vmatpush.msrb.mxu0 %v5254_v60  ;;  %v5252_v60 = vld [vmem:[%s10171_s2 + $0x208] sm:$0xff] }
  0x93   : > { %10307 = vst [vmem:[#allocation19_spill] sm:$0xff] %v6253_v20  ;;  %5446 = vset.pattern.permute.xlu1 %v10309_v15  ;;  %841 = vperm.xlu2 %5447, %v225_v40  }
  0x94   : > { %10308 = vst [vmem:[#allocation20_spill] sm:$0xff] %v6256_v21  ;;  %334 = vperm.xlu1 %5446, %v6125_v49   ;;  %v6297_v0 = vpop.permute.xlu1 %374  ;;  %v5222_v49 = vld [vmem:[%s10171_s2 + $0x118] sm:$0xff] }
  0x95   : > { %v6295_v48 = vpop.permute.xlu2 %429  ;;  %v6304_v50 = vmul.f32 %v6279_v61, %v6297_v0  ;;  %v6308_v54 = vmul.f32 %v6107_v43, %v6297_v0  ;;  %v365_v30 = vpop.permute.xlu0 %364  ;;  %981 = vmatpush.msrb.mxu2 %v5222_v49  ;;  %v6341_v49 = vld [vmem:[%s5917_s20 + $0x10] sm:$0xff] }
  0x96   : > { %10310 = vst [vmem:[#allocation21_spill] sm:$0xff] %v6295_v48  ;;  %v6314_v55 = vmul.f32 %v6282_v62, %v365_v30  ;;  %v6317_v21 = vmul.f32 %v6279_v61, %v365_v30  ;;  %v454_v13 = vmul.f32 %v365_v30, %v262_v38  ;;  %v5245_v38 = vld [vmem:[%s10171_s2 + $0x1d0] sm:$0xff]  ;;  %v5220_v30 = vld [vmem:[%s10171_s2 + $0x108] sm:$0xff] }
  0x97   : > { %10311 = vst [vmem:[#allocation22_spill] sm:$0xff] %v6304_v50  ;;  %982 = vmatpush.msrb.mxu2 %v5221_v22  ;;  %1200 = vmatpush.msrb.mxu3 %v5245_v38  ;;  %v5251_v22 = vld [vmem:[%s10171_s2 + $0x200] sm:$0xff] }
  0x98   : > { %10312 = vst [vmem:[#allocation23_spill] sm:$0xff] %v6308_v54  ;;  %v10315_v54 = vmov 1   ;;  %714 = vmatmul.f32.gmra.mxu3 %v454_v13  ;;  %v245_v13 = vld [vmem:[%s5917_s20] sm:$0xff] }
  0x99   : > { %10313 = vst [vmem:[#allocation24_spill] sm:$0xff] %v6314_v55  ;;  %5451 = vset.pattern.permute.xlu0 %v10315_v54  ;;  %586 = vmatmul.f32.gmra.mxu0 %v6320_v8 }
  0x9a   : > { %10314 = vst [vmem:[#allocation25_spill] sm:$0xff] %v6317_v21  ;;  %v5253_v21 = vld [vmem:[%s10171_s2 + $0x210] sm:$0xff]  ;;  %634 = vmatmul.f32.gmra.mxu2 %v513_v47  ;;  %v5219_v47 = vld [vmem:[%s10171_s2 + $0x100] sm:$0xff]  ;;  %857 = vperm.xlu0 %5451, %v5811_v4  }
  0x9b   : > { %1402 = vmatpush.msrb.mxu0 %v5253_v21  ;;  %983 = vmatpush.msrb.mxu2 %v5220_v30 }
  0x9c   : > { %339 = vperm.xlu1 %5446, %v225_v40   ;;  %v455_v40 = vmul.f32 %v6212_v42, %v6217_v53  ;;  %845 = vperm.xlu2 %5447, %v6242_v7  }
  0x9d   : > { %v6350_v29 = vpop.permute.xlu1 %394  ;;  %v6352_v50 = vpop.permute.xlu2 %279  ;;  %1403 = vmatpush.msrb.mxu0 %v5252_v60  ;;  %984 = vmatpush.msrb.mxu2 %v5219_v47  ;;  %v227_v60 = vld [vmem:[%s10169_s0 + $0x70] sm:$0xff] }
  0x9e   : > { %10316 = vst [vmem:[#allocation26_spill] sm:$0xff] %v6352_v50  ;;  %v6362_v21 = vmul.f32 %v6110_v45, %v6350_v29  ;;  %v6366_v38 = vmul.f32 %v6338_v12, %v6350_v29  ;;  %v6368_v59 = vpop.permute.xlu0 %389  ;;  %v6372_v42 = vmul.f32 %v6341_v49, %v6352_v50  ;;  %v437_v30 = vmul.f32 %v6352_v50, %v245_v13  ;;  %v6397_v13 = vld [vmem:[%s5917_s20 + $0xf0] sm:$0xff] }
  0x9f   : > { %v6376_v53 = vmul.f32 %v6076_v27, %v6368_v59  ;;  %v6380_v7 = vmul.f32 %v6163_v63, %v6368_v59  ;;  %1404 = vmatpush.msrb.mxu0 %v5251_v22 }
  0xa0   : > { %10317 = vst [vmem:[#allocation27_spill] sm:$0xff] %v6362_v21  ;;  %v6384_v21 = vld [vmem:[%s5917_s20 + $0x69] sm:$0xff]  ;;  %663 = vmatmul.f32.vlgmr.msra.gmra.mxu1 %v437_v30  ;;  %717 = vmatmul.f32.gmra.mxu3 %v455_v40  ;;  %v456_v40 = vmul.f32 %v6282_v62, %v6297_v0  ;;  %v6423_v62 = vld [vmem:[%s5917_s20 + $0x71] sm:$0xff] }
  0xa1   : > { %10318 = vst [vmem:[#allocation28_spill] sm:$0xff] %v6366_v38  ;;  %v514_v38 = vld [vmem:[%s5917_s20 + $0xe9] sm:$0xff]  ;;  %589 = vmatmul.f32.gmra.mxu0 %v6384_v21  ;;  %v515_v0 = vld [vmem:[%s5917_s20 + $0xf1] sm:$0xff] }
  0xa2   : > { %10319 = vst [vmem:[#allocation29_spill] sm:$0xff] %v6376_v53  ;;  %v5244_v53 = vld [vmem:[%s10171_s2 + $0x1c8] sm:$0xff]  ;;  %637 = vmatmul.f32.gmra.mxu2 %v514_v38  ;;  %877 = vperm.xlu0 %5451, %v5831_v9   ;;  %v228_v30 = vld [vmem:[%s10169_s0 + $0x78] sm:$0xff]  ;;  %v457_v9 = vmul.f32 %v6209_v41, %v6078_v28 }
  0xa3   : > { %10320 = vst [vmem:[#allocation30_spill] sm:$0xff] %v6380_v7  ;;  %1201 = vmatpush.msrb.mxu3 %v5244_v53  ;;  %v1789_v7 = vld [vmem:[%s5917_s20 + $0x108] sm:$0xff]  ;;  %v6459_v41 = vld [vmem:[%s5917_s20 + $0x79] sm:$0xff] }
  0xa4   : > { %5449 = vset.pattern.permute.xlu1 %v10315_v54  ;;  %5450 = vset.pattern.permute.xlu2 %v10309_v15 }
  0xa5   : > { %849 = vperm.xlu1 %5449, %v227_v60   ;;  %v6400_v4 = vpop.permute.xlu1 %409  ;;  %349 = vperm.xlu2 %5450, %v227_v60  }
  0xa6   : > { %v6402_v47 = vpop.permute.xlu0 %404  ;;  %v6408_v22 = vmul.f32 %v6166_v1, %v6400_v4  ;;  %v6412_v38 = vmul.f32 %v6397_v13, %v6400_v4  ;;  %v6430_v60 = vpop.permute.xlu2 %801 }
  0xa7   : > { %v6416_v15 = vmul.f32 %v6338_v12, %v6402_v47  ;;  %v6420_v53 = vmul.f32 %v6224_v56, %v6402_v47 }
  0xa8   : > { %10321 = vst [vmem:[#allocation31_spill] sm:$0xff] %v6408_v22  ;;  %720 = vmatmul.f32.gmra.mxu3 %v456_v40 }
  0xa9   : > { %10322 = vst [vmem:[#allocation32_spill] sm:$0xff] %v6412_v38  ;;  %v5243_v38 = vld [vmem:[%s10171_s2 + $0x1c0] sm:$0xff]  ;;  %592 = vmatmul.f32.gmra.mxu0 %v6423_v62 }
  0xaa   : > { %10323 = vst [vmem:[#allocation33_spill] sm:$0xff] %v6416_v15  ;;  %640 = vmatmul.f32.gmra.mxu2 %v515_v0  ;;  %1202 = vmatpush.msrb.mxu3 %v5243_v38  ;;  %v516_v0 = vld [vmem:[%s5917_s20 + $0xf9] sm:$0xff] }
  0xab   : > { %10324 = vst [vmem:[#allocation34_spill] sm:$0xff] %v6420_v53  ;;  %v1144_v53 = vld [vmem:[%s5917_s20 + $0x100] sm:$0xff]  ;;  %889 = vperm.xlu0 %5451, %v5861_v16  }
  0xad   : > { %853 = vperm.xlu1 %5449, %v228_v30   ;;  %v6440_v40 = vpop.permute.xlu1 %424  ;;  %354 = vperm.xlu2 %5450, %v228_v30   ;;  %v5242_v30 = vld [vmem:[%s10171_s2 + $0x1b8] sm:$0xff] }
  0xae   : > { %v6442_v22 = vpop.permute.xlu0 %419  ;;  %v6446_v15 = vmul.f32 %v6203_v36, %v6440_v40  ;;  %v6449_v50 = vmul.f32 %v1789_v7, %v6440_v40  ;;  %v6467_v7 = vpop.permute.xlu2 %805  ;;  %1203 = vmatpush.msrb.mxu3 %v5242_v30 }
  0xaf   : > { %v6453_v38 = vmul.f32 %v6397_v13, %v6442_v22  ;;  %v6456_v28 = vmul.f32 %v1144_v53, %v6442_v22  ;;  %v760_v53 = vld [vmem:[%s5917_s20 + $0x2] sm:$0xff] }
  0xb0   : > { %10325 = vst [vmem:[#allocation35_spill] sm:$0xff] %v6446_v15  ;;  %723 = vmatmul.f32.gmra.mxu3 %v457_v9  ;;  %v1534_v9 = vld [vmem:[%s5917_s20 + $0x12] sm:$0xff] }
  0xb1   : > { %10326 = vst [vmem:[#allocation36_spill] sm:$0xff] %v6449_v50  ;;  %595 = vmatmul.f32.gmra.mxu0 %v6459_v41 }
  0xb2   : > { %10327 = vst [vmem:[#allocation37_spill] sm:$0xff] %v6453_v38  ;;  %643 = vmatmul.f32.gmra.mxu2 %v516_v0  ;;  %v458_v0 = vmul.f32 %v6279_v61, %v6112_v46 }
  0xb3   : > { %10328 = vst [vmem:[#allocation38_spill] sm:$0xff] %v6456_v28  ;;  %901 = vperm.xlu0 %5451, %v5893_v23   ;;  %v6501_v23 = vld [vmem:[%s5917_s20 + $0x2a] sm:$0xff] }
  0xb5   : > { %861 = vperm.xlu1 %5449, %v5841_v11   ;;  %5452 = vset.pattern.permute.xlu2 %v10315_v54  ;;  %v5241_v54 = vld [vmem:[%s10171_s2 + $0x1b0] sm:$0xff] }
  0xb6   : > { %v6471_v50 = vpop.permute.xlu0 %434  ;;  %v6474_v16 = vpop.f32.mrf.mxu0  ;;  %865 = vperm.xlu2 %5452, %v5806_v3   ;;  %1204 = vmatpush.msrb.mxu3 %v5241_v54  ;;  %v761_v3 = vld [vmem:[%s5917_s20 + $0xa] sm:$0xff] }
  0xb7   : > { %10329 = vst [vmem:[#allocation39_spill] sm:$0xff] %v6471_v50  ;;  %v6477_v28 = vpop.permute.xlu1 %793  ;;  %v6495_v61 = vpop.permute.xlu2 %299 }
  0xb8   : > { %10330 = vst [vmem:[#allocation40_spill] sm:$0xff] %v6474_v16  ;;  %v920_v11 = vmul.f32 %v6477_v28, %v760_v53  ;;  %v6484_v30 = vmul.f32 %v1534_v9, %v6477_v28  ;;  %726 = vmatmul.f32.gmra.mxu3 %v458_v0  ;;  %v246_v53 = vld [vmem:[%s5917_s20 + $0x8] sm:$0xff]  ;;  %v6735_v16 = vld [vmem:[%s5917_s20 + $0x7a] sm:$0xff] }
  0xb9   : > { %10331 = vst [vmem:[#allocation41_spill] sm:$0xff] %v6477_v28  ;;  %1405 = vmatmul.f32.vlgmr.msrb.gmra.mxu0 %v5955_v39  ;;  %v463_v28 = vmul.f32 %v6163_v63, %v6400_v4  ;;  %v5236_v63 = vld [vmem:[%s10171_s2 + $0x188] sm:$0xff] }
  0xba   : > { %985 = vmatmul.f32.vlgmr.msrb.gmra.mxu2 %v920_v11  ;;  %v459_v11 = vmul.f32 %v6073_v26, %v6368_v59  ;;  %v460_v59 = vmul.f32 %v6107_v43, %v6350_v29  ;;  %v6543_v29 = vld [vmem:[%s5917_s20 + $0x1a] sm:$0xff] }
  0xbb   : > { %913 = vperm.xlu0 %5451, %v5927_v31   ;;  %v922_v31 = vmul.f32 %v1534_v9, %v6430_v60 }
  0xbd   : > { %869 = vperm.xlu1 %5449, %v5836_v10   ;;  %v6492_v46 = vpop.f32.mrf.mxu2 }
  0xbe   : > { %10332 = vst [vmem:[#allocation42_spill] sm:$0xff] %v6492_v46  ;;  %v6498_v15 = vpop.f32.mrf.mxu0  ;;  %873 = vperm.xlu2 %5452, %v5801_v2   ;;  %v5240_v46 = vld [vmem:[%s10171_s2 + $0x1a8] sm:$0xff] }
  0xbf   : > { %10333 = vst [vmem:[#allocation43_spill] sm:$0xff] %v6498_v15  ;;  %v6503_v0 = vpop.permute.xlu0 %797  ;;  %1205 = vmatpush.msrb.mxu3 %v5240_v46  ;;  %v6690_v15 = vld [vmem:[%s5917_s20 + $0x70] sm:$0xff] }
  0xc0   : > { %v6510_v10 = vmul.f32 %v6501_v23, %v6503_v0  ;;  %v6512_v39 = vpop.permute.xlu1 %284  ;;  %v921_v54 = vmul.f32 %v6503_v0, %v761_v3  ;;  %729 = vmatmul.f32.gmra.mxu3 %v459_v11  ;;  %v6529_v3 = vpop.permute.xlu2 %304 }
  0xc1   : > { %10335 = vst [vmem:[#allocation45_spill] sm:$0xff] %v6512_v39  ;;  %v438_v38 = vmul.f32 %v6512_v39, %v246_v53  ;;  %1408 = vmatmul.f32.gmra.mxu0 %v5972_v44 }
  0xc2   : > { %10334 = vst [vmem:[#allocation44_spill] sm:$0xff] %v6510_v10  ;;  %988 = vmatmul.f32.gmra.mxu2 %v921_v54  ;;  %v5238_v54 = vld [vmem:[%s10171_s2 + $0x198] sm:$0xff] }
  0xc3   : > { %666 = vmatmul.f32.gmra.mxu1 %v438_v38  ;;  %v5239_v38 = vld [vmem:[%s10171_s2 + $0x1a0] sm:$0xff] }
  0xc4   : > { %1206 = vmatpush.msrb.mxu3 %v5239_v38 }
  0xc5   : > { %881 = vperm.xlu1 %5449, %v5872_v18   ;;  %v6522_v2 = vpop.f32.mrf.mxu2 }
  0xc6   : > { %10336 = vst [vmem:[#allocation46_spill] sm:$0xff] %v6522_v2  ;;  %v6525_v26 = vpop.f32.mrf.mxu0  ;;  %885 = vperm.xlu2 %5452, %v5866_v17   ;;  %v6546_v17 = vld [vmem:[%s5917_s20 + $0x18] sm:$0xff]  ;;  %1207 = vmatpush.msrb.mxu3 %v5238_v54 }
  0xc7   : > { %10337 = vst [vmem:[#allocation47_spill] sm:$0xff] %v6525_v26 }
  0xc8   : > { %v6532_v44 = vpop.permute.xlu1 %289  ;;  %732 = vmatmul.f32.gmra.mxu3 %v460_v59  ;;  %v6540_v9 = vpop.permute.xlu0 %294 }
  0xc9   : > { %v439_v18 = vmul.f32 %v6341_v49, %v6532_v44  ;;  %1411 = vmatmul.f32.gmra.mxu0 %v5993_v51  ;;  %v923_v49 = vmul.f32 %v6467_v7, %v6543_v29  ;;  %v461_v51 = vmul.f32 %v6076_v27, %v6168_v6  ;;  %v440_v53 = vmul.f32 %v6540_v9, %v6546_v17  ;;  %v6559_v11 = vpop.permute.xlu2 %821  ;;  %v6571_v6 = vld [vmem:[%s5917_s20 + $0x22] sm:$0xff] }
  0xca   : > { %991 = vmatmul.f32.gmra.mxu2 %v922_v31  ;;  %10340 = vst [vmem:[#allocation50_spill] sm:$0xff] %v6559_v11  ;;  %v6577_v31 = vld [vmem:[%s5917_s20 + $0x20] sm:$0xff] }
  0xcb   : > { %669 = vmatmul.f32.gmra.mxu1 %v439_v18  ;;  %v441_v38 = vmul.f32 %v6577_v31, %v6495_v61 }
  0xcd   : > { %893 = vperm.xlu1 %5449, %v5903_v25   ;;  %v6549_v43 = vpop.f32.mrf.mxu2 }
  0xce   : > { %10338 = vst [vmem:[#allocation48_spill] sm:$0xff] %v6549_v43  ;;  %v6553_v46 = vpop.f32.mrf.mxu0  ;;  %897 = vperm.xlu2 %5452, %v5898_v24   ;;  %v6618_v43 = vld [vmem:[%s5917_s20 + $0x50] sm:$0xff] }
  0xcf   : > { %10339 = vst [vmem:[#allocation49_spill] sm:$0xff] %v6553_v46  ;;  %v6670_v46 = vld [vmem:[%s5917_s20 + $0x32] sm:$0xff] }
  0xd0   : > { %735 = vmatmul.f32.gmra.mxu3 %v461_v51 }
  0xd1   : > { %v6562_v25 = vpop.permute.xlu1 %809  ;;  %1414 = vmatmul.f32.gmra.mxu0 %v6016_v58  ;;  %v6568_v27 = vpop.permute.xlu0 %817  ;;  %v462_v58 = vmul.f32 %v6110_v45, %v6402_v47  ;;  %v6605_v47 = vld [vmem:[%s5917_s20 + $0x4a] sm:$0xff] }
  0xd2   : > { %994 = vmatmul.f32.gmra.mxu2 %v923_v49  ;;  %10341 = vst [vmem:[#allocation51_spill] sm:$0xff] %v6568_v27  ;;  %v924_v59 = vmul.f32 %v6571_v6, %v6562_v25  ;;  %v6588_v49 = vld [vmem:[%s5917_s20 + $0x52] sm:$0xff]  ;;  %v6593_v51 = vpop.permute.xlu2 %825 }
  0xd3   : > { %672 = vmatmul.f32.gmra.mxu1 %v440_v53  ;;  %v6598_v53 = vmul.f32 %v6588_v49, %v6593_v51 }
  0xd5   : > { %905 = vperm.xlu1 %5449, %v5937_v33   ;;  %v6574_v24 = vpop.f32.mrf.mxu2  ;;  %v6591_v33 = vld [vmem:[%s5917_s20 + $0x62] sm:$0xff]  ;;  %10344 = vst [vmem:[#allocation54_spill] sm:$0xff] %v6598_v53 }
  0xd6   : > { %10342 = vst [vmem:[#allocation52_spill] sm:$0xff] %v6574_v24  ;;  %v6581_v18 = vpop.f32.mrf.mxu0  ;;  %909 = vperm.xlu2 %5452, %v5932_v32   ;;  %v6602_v45 = vmul.f32 %v6591_v33, %v6593_v51  ;;  %v5237_v24 = vld [vmem:[%s10171_s2 + $0x190] sm:$0xff] }
  0xd7   : > { %10343 = vst [vmem:[#allocation53_spill] sm:$0xff] %v6581_v18  ;;  %1208 = vmatpush.msrb.mxu3 %v5237_v24  ;;  %v6648_v24 = vld [vmem:[%s5917_s20 + $0x58] sm:$0xff]  ;;  %v6651_v18 = vld [vmem:[%s5917_s20 + $0x68] sm:$0xff] }
  0xd8   : > { %10345 = vst [vmem:[#allocation55_spill] sm:$0xff] %v6602_v45  ;;  %738 = vmatmul.f32.gmra.mxu3 %v462_v58  ;;  %v6621_v58 = vld [vmem:[%s5917_s20 + $0x60] sm:$0xff] }
  0xd9   : > { %v6607_v54 = vpop.permute.xlu1 %813  ;;  %1417 = vmatmul.f32.gmra.mxu0 %v6036_v5  ;;  %1209 = vmatpush.msrb.mxu3 %v5236_v63 }
  0xda   : > { %10346 = vst [vmem:[#allocation56_spill] sm:$0xff] %v6607_v54  ;;  %997 = vmatmul.f32.gmra.mxu2 %v924_v59  ;;  %v6615_v32 = vmul.f32 %v6605_v47, %v6607_v54  ;;  %v6623_v45 = vpop.permute.xlu0 %319  ;;  %v6634_v59 = vld [vmem:[%s5917_s20 + $0x28] sm:$0xff]  ;;  %v925_v10 = vmul.f32 %v6501_v23, %v6607_v54  ;;  %v6777_v54 = vld [vmem:[%s5917_s20 + $0x72] sm:$0xff] }
  0xdb   : > { %675 = vmatmul.f32.gmra.mxu1 %v441_v38  ;;  %v6627_v2 = vmul.f32 %v6618_v43, %v6623_v45  ;;  %v6631_v5 = vmul.f32 %v6621_v58, %v6623_v45 }
  0xdc   : > { %10347 = vst [vmem:[#allocation57_spill] sm:$0xff] %v6615_v32 }
  0xdd   : > { %10348 = vst [vmem:[#allocation58_spill] sm:$0xff] %v6631_v5  ;;  %917 = vperm.xlu1 %5449, %v5950_v37   ;;  %v6637_v32 = vpop.f32.mrf.mxu2  ;;  %v442_v5 = vmul.f32 %v6634_v59, %v6529_v3  ;;  %v6653_v37 = vpop.permute.xlu2 %324 }
  0xde   : > { %10349 = vst [vmem:[#allocation59_spill] sm:$0xff] %v6637_v32  ;;  %v6641_v38 = vpop.f32.mrf.mxu0  ;;  %v6657_v32 = vmul.f32 %v6648_v24, %v6653_v37 }
  0xdf   : > { %10350 = vst [vmem:[#allocation60_spill] sm:$0xff] %v6641_v38  ;;  %v6661_v38 = vmul.f32 %v6651_v18, %v6653_v37 }
  0xe0   : > { %741 = vmatmul.f32.gmra.mxu3 %v463_v28 }
  0xe1   : > { %10351 = vst [vmem:[#allocation61_spill] sm:$0xff] %v6661_v38  ;;  %1420 = vmatmul.f32.gmra.mxu0 %v6061_v19  ;;  %v6677_v38 = vld [vmem:[%s5917_s20 + $0x30] sm:$0xff]  ;;  %v464_v19 = vmul.f32 %v6338_v12, %v6226_v57  ;;  %v5235_v57 = vld [vmem:[%s10171_s2 + $0x180] sm:$0xff] }
  0xe2   : > { %1000 = vmatmul.f32.gmra.mxu2 %v925_v10  ;;  %v6667_v4 = vpop.permute.xlu1 %309  ;;  %v926_v10 = vmul.f32 %v6670_v46, %v6568_v27  ;;  %1210 = vmatpush.msrb.mxu3 %v5235_v57 }
  0xe3   : > { %678 = vmatmul.f32.gmra.mxu1 %v442_v5  ;;  %v6674_v26 = vmul.f32 %v6618_v43, %v6667_v4  ;;  %v443_v5 = vmul.f32 %v6677_v38, %v6667_v4  ;;  %v6737_v53 = vpop.permute.xlu0 %837 }
  0xe5   : > { %10352 = vst [vmem:[#allocation62_spill] sm:$0xff] %v6674_v26  ;;  %v6679_v28 = vpop.f32.mrf.mxu2  ;;  %v6692_v63 = vpop.permute.xlu2 %329 }
  0xe6   : > { %10353 = vst [vmem:[#allocation63_spill] sm:$0xff] %v6679_v28  ;;  %v6683_v55 = vpop.f32.mrf.mxu0  ;;  %v6696_v26 = vmul.f32 %v6621_v58, %v6692_v63  ;;  %v6700_v28 = vmul.f32 %v6690_v15, %v6692_v63 }
  0xe7   : > { %10354 = vst [vmem:[#allocation64_spill] sm:$0xff] %v6683_v55  ;;  %v6709_v55 = vld [vmem:[%s5917_s20 + $0x3a] sm:$0xff] }
  0xe8   : > { %10355 = vst [vmem:[#allocation65_spill] sm:$0xff] %v6696_v26  ;;  %744 = vmatmul.f32.gmra.mxu3 %v464_v19  ;;  %v6716_v19 = vld [vmem:[%s5917_s20 + $0x38] sm:$0xff] }
  0xe9   : > { %10356 = vst [vmem:[#allocation66_spill] sm:$0xff] %v6700_v28  ;;  %1423 = vmatmul.f32.gmra.mxu0 %v6090_v34  ;;  %v927_v34 = vmul.f32 %v6709_v55, %v6559_v11 }
  0xea   : > { %1003 = vmatmul.f32.gmra.mxu2 %v926_v10  ;;  %v6706_v12 = vpop.permute.xlu1 %314  ;;  %10357 = vst [vmem:[#allocation67_spill] sm:$0xff] %v6709_v55  ;;  %v5298_v10 = vld [vmem:[%s10171_s2 + $0x378] sm:$0xff] }
  0xeb   : > { %681 = vmatmul.f32.gmra.mxu1 %v443_v5  ;;  %v6713_v20 = vmul.f32 %v6648_v24, %v6706_v12  ;;  %1841 = vmatpush.msra.mxu2 %v5298_v10  ;;  %v444_v57 = vmul.f32 %v6716_v19, %v6706_v12  ;;  %v6745_v10 = vmul.f32 %v6735_v16, %v6737_v53 }
  0xed   : > { %10358 = vst [vmem:[#allocation68_spill] sm:$0xff] %v6713_v20  ;;  %v6718_v28 = vpop.f32.mrf.mxu2  ;;  %v465_v20 = vmul.f32 %v6166_v1, %v6442_v22  ;;  %v5314_v1 = vld [vmem:[%s10171_s2 + $0x3f8] sm:$0xff]  ;;  %v6752_v22 = vld [vmem:[%s5917_s20 + $0x42] sm:$0xff]  ;;  %v6782_v26 = vpop.permute.xlu2 %841 }
  0xee   : > { %10359 = vst [vmem:[#allocation69_spill] sm:$0xff] %v6718_v28  ;;  %v6725_v5 = vpop.f32.mrf.mxu0  ;;  %v6732_v28 = vld [vmem:[%s5917_s20 + $0x6a] sm:$0xff]  ;;  %2035 = vmatpush.msra.mxu3 %v5314_v1 }
  0xef   : > { %10360 = vst [vmem:[#allocation70_spill] sm:$0xff] %v6725_v5  ;;  %v6741_v11 = vmul.f32 %v6732_v28, %v6737_v53 }
  0xf0   : > { %747 = vmatmul.f32.gmra.mxu3 %v465_v20  ;;  %10362 = vst [vmem:[#allocation72_spill] sm:$0xff] %v6745_v10  ;;  %v6755_v20 = vld [vmem:[%s5917_s20 + $0x5a] sm:$0xff] }
  0xf1   : > { %10361 = vst [vmem:[#allocation71_spill] sm:$0xff] %v6741_v11  ;;  %1426 = vmatmul.f32.gmra.mxu0 %v6133_v52  ;;  %v6758_v11 = vld [vmem:[%s5917_s20 + $0x40] sm:$0xff]  ;;  %v928_v52 = vmul.f32 %v6752_v22, %v6593_v51  ;;  %v6790_v51 = vmul.f32 %v6777_v54, %v6782_v26 }
  0xf2   : > { %1006 = vmatmul.f32.gmra.mxu2 %v927_v34  ;;  %v445_v1 = vmul.f32 %v6758_v11, %v6623_v45 }
  0xf3   : > { %684 = vmatmul.f32.gmra.mxu1 %v444_v57  ;;  %v830_v5 = vpop.permute.xlu1 %829  ;;  %v466_v57 = vmul.f32 %v6224_v56, %v6440_v40  ;;  %v5330_v40 = vld [vmem:[%s10171_s2 + $0x478] sm:$0xff] }
  0xf4   : > { %v6761_v10 = vmul.f32 %v6755_v20, %v830_v5  ;;  %v6764_v27 = vmul.f32 %v6732_v28, %v830_v5  ;;  %2261 = vmatpush.msra.mxu0 %v5330_v40  ;;  %v467_v40 = vmul.f32 %v6397_v13, %v6295_v48  ;;  %v6846_v48 = vpop.permute.xlu0 %344 }
  0xf5   : > { %v6766_v55 = vpop.f32.mrf.mxu2  ;;  %10373 = vst [vmem:[#allocation83_spill] sm:$0xff] %v6846_v48 }
  0xf6   : > { %10363 = vst [vmem:[#allocation73_spill] sm:$0xff] %v6761_v10  ;;  %v6770_v34 = vpop.f32.mrf.mxu0  ;;  %v6780_v10 = vld [vmem:[%s5917_s20 + $0x82] sm:$0xff] }
  0xf7   : > { %10364 = vst [vmem:[#allocation74_spill] sm:$0xff] %v6764_v27  ;;  %v6786_v27 = vmul.f32 %v6512_v39, %v6546_v17  ;;  %v6794_v56 = vmul.f32 %v6780_v10, %v6782_v26  ;;  %v6801_v17 = vld [vmem:[%s5917_s20 + $0x48] sm:$0xff] }
  0xf8   : > { %10365 = vst [vmem:[#allocation75_spill] sm:$0xff] %v6766_v55  ;;  %750 = vmatmul.f32.gmra.mxu3 %v466_v57  ;;  %v5282_v57 = vld [vmem:[%s10171_s2 + $0x2f8] sm:$0xff] }
  0xf9   : > { %10366 = vst [vmem:[#allocation76_spill] sm:$0xff] %v6770_v34  ;;  %1429 = vmatmul.f32.gmra.mxu0 %v6186_v14  ;;  %1615 = vmatpush.msrb.mxu1 %v5282_v57  ;;  %v929_v14 = vmul.f32 %v6605_v47, %v830_v5  ;;  %v5280_v47 = vld [vmem:[%s10171_s2 + $0x2e8] sm:$0xff]  ;;  %v6833_v57 = vpop.permute.xlu2 %845 }
  0xfa   : > { %10367 = vst [vmem:[#allocation77_spill] sm:$0xff] %v6794_v56  ;;  %1009 = vmatmul.f32.gmra.mxu2 %v928_v52  ;;  %v5281_v52 = vld [vmem:[%s10171_s2 + $0x2f0] sm:$0xff]  ;;  %v6837_v13 = vmul.f32 %v6735_v16, %v6833_v57 }
  0xfb   : > { %687 = vmatmul.f32.gmra.mxu1 %v445_v1  ;;  %v834_v45 = vpop.permute.xlu1 %833  ;;  %v6831_v5 = vld [vmem:[%s5917_s20 + $0x8a] sm:$0xff] }
  0xfc   : > { %v6804_v55 = vmul.f32 %v6591_v33, %v834_v45  ;;  %v6807_v34 = vmul.f32 %v6777_v54, %v834_v45  ;;  %1616 = vmatpush.msrb.mxu1 %v5281_v52  ;;  %10371 = vst [vmem:[#allocation81_spill] sm:$0xff] %v6837_v13  ;;  %v6844_v52 = vld [vmem:[%s5917_s20 + $0x78] sm:$0xff] }
  0xfd   : > { %v6812_v56 = vpop.f32.mrf.mxu2 }
  0xfe   : > { %10368 = vst [vmem:[#allocation78_spill] sm:$0xff] %v6807_v34  ;;  %v6818_v1 = vpop.f32.mrf.mxu0  ;;  %v446_v34 = vmul.f32 %v6801_v17, %v6653_v37  ;;  %v6841_v37 = vmul.f32 %v6831_v5, %v6833_v57  ;;  %1617 = vmatpush.msrb.mxu1 %v5280_v47 }
  0xff   : > { %10369 = vst [vmem:[#allocation79_spill] sm:$0xff] %v6812_v56  ;;  %v5297_v56 = vld [vmem:[%s10171_s2 + $0x370] sm:$0xff] }
 0x100   : > { %10370 = vst [vmem:[#allocation80_spill] sm:$0xff] %v6818_v1  ;;  %1842 = vmatpush.msra.mxu2 %v5297_v56  ;;  %753 = vmatmul.f32.gmra.mxu3 %v467_v40  ;;  %v5313_v1 = vld [vmem:[%s10171_s2 + $0x3f0] sm:$0xff]  ;;  %v5279_v56 = vld [vmem:[%s10171_s2 + $0x2e0] sm:$0xff]  ;;  %v5278_v40 = vld [vmem:[%s10171_s2 + $0x2d8] sm:$0xff] }
 0x101   : > { %10372 = vst [vmem:[#allocation82_spill] sm:$0xff] %v6841_v37  ;;  %1432 = vmatmul.f32.gmra.mxu0 %v6259_v35  ;;  %v6857_v37 = vmul.f32 %v6844_v52, %v6846_v48  ;;  %2036 = vmatpush.msra.mxu3 %v5313_v1  ;;  %v930_v35 = vmul.f32 %v6588_v49, %v834_v45  ;;  %v5276_v49 = vld [vmem:[%s10171_s2 + $0x2c8] sm:$0xff]  ;;  %v5329_v45 = vld [vmem:[%s10171_s2 + $0x470] sm:$0xff] }
 0x102   : > { %1012 = vmatmul.f32.gmra.mxu2 %v929_v14  ;;  %1618 = vmatpush.msrb.mxu1 %v5279_v56  ;;  %v5277_v14 = vld [vmem:[%s10171_s2 + $0x2d0] sm:$0xff]  ;;  %v468_v56 = vmul.f32 %v6203_v36, %v6471_v50  ;;  %v5275_v36 = vld [vmem:[%s10171_s2 + $0x2c0] sm:$0xff]  ;;  %v1150_v50 = vmul.f32 %v6677_v38, %v6495_v61 }
 0x103   : > { %690 = vmatmul.f32.gmra.mxu1 %v446_v34  ;;  %2262 = vmatpush.msra.mxu0 %v5329_v45  ;;  %v5271_v45 = vld [vmem:[%s10171_s2 + $0x2a0] sm:$0xff] }
 0x104   : > { %1619 = vmatpush.msrb.mxu1 %v5278_v40  ;;  %v5274_v40 = vld [vmem:[%s10171_s2 + $0x2b8] sm:$0xff] }
 0x105   : > { %v6862_v47 = vpop.f32.mrf.mxu2 }
 0x106   : > { %10374 = vst [vmem:[#allocation84_spill] sm:$0xff] %v6862_v47  ;;  %v335_v39 = vpop.permute.xlu1 %334  ;;  %v6874_v1 = vpop.f32.mrf.mxu0  ;;  %v447_v47 = vmul.f32 %v6618_v43, %v6692_v63  ;;  %1620 = vmatpush.msrb.mxu1 %v5277_v14  ;;  %v5296_v14 = vld [vmem:[%s10171_s2 + $0x368] sm:$0xff] }
 0x107   : > { %v6869_v13 = vmul.f32 %v6651_v18, %v335_v39  ;;  %v6872_v34 = vmul.f32 %v6844_v52, %v335_v39  ;;  %1843 = vmatpush.msra.mxu2 %v5296_v14 }
 0x108   : > { %756 = vmatmul.f32.gmra.mxu3 %v468_v56  ;;  %1621 = vmatpush.msrb.mxu1 %v5276_v49  ;;  %v448_v56 = vmul.f32 %v6648_v24, %v335_v39  ;;  %v5273_v49 = vld [vmem:[%s10171_s2 + $0x2b0] sm:$0xff]  ;;  %v5272_v39 = vld [vmem:[%s10171_s2 + $0x2a8] sm:$0xff] }
 0x109   : > { %10375 = vst [vmem:[#allocation85_spill] sm:$0xff] %v6872_v34  ;;  %1435 = vmatmul.f32.gmra.mxu0 %v6320_v8  ;;  %v931_v8 = vmul.f32 %v6755_v20, %v6737_v53  ;;  %v5312_v53 = vld [vmem:[%s10171_s2 + $0x3e8] sm:$0xff]  ;;  %v6924_v20 = vpop.permute.xlu2 %349 }
 0x10a   : > { %1015 = vmatmul.f32.gmra.mxu2 %v930_v35  ;;  %1622 = vmatpush.msrb.mxu1 %v5275_v36  ;;  %10380 = vst [vmem:[#allocation90_spill] sm:$0xff] %v6924_v20  ;;  %v6932_v36 = vld [vmem:[%s5917_s20 + $0x92] sm:$0xff] }
 0x10b   : > { %693 = vmatmul.f32.gmra.mxu1 %v447_v47  ;;  %2037 = vmatpush.msra.mxu3 %v5312_v53  ;;  %v6945_v53 = vld [vmem:[%s5917_s20 + $0xa2] sm:$0xff] }
 0x10c   : > { %1623 = vmatpush.msrb.mxu1 %v5274_v40 }
 0x10d   : > { %v6890_v43 = vpop.f32.mrf.mxu2 }
 0x10e   : > { %10376 = vst [vmem:[#allocation86_spill] sm:$0xff] %v6890_v43  ;;  %v6892_v63 = vpop.permute.xlu1 %339  ;;  %v6906_v35 = vpop.f32.mrf.mxu0  ;;  %1624 = vmatpush.msrb.mxu1 %v5273_v49 }
 0x10f   : > { %10377 = vst [vmem:[#allocation87_spill] sm:$0xff] %v6892_v63  ;;  %v6904_v47 = vmul.f32 %v6690_v15, %v6892_v63 }
 0x110   : > { %10378 = vst [vmem:[#allocation88_spill] sm:$0xff] %v6906_v35  ;;  %1211 = vmatmul.f32.vlgmr.msrb.gmra.mxu3 %v6372_v42  ;;  %1625 = vmatpush.msrb.mxu1 %v5272_v39  ;;  %v5328_v39 = vld [vmem:[%s10171_s2 + $0x468] sm:$0xff] }
 0x111   : > { %1438 = vmatmul.f32.gmra.mxu0 %v6384_v21  ;;  %v932_v21 = vmul.f32 %v6591_v33, %v6782_v26  ;;  %v6989_v34 = vpop.permute.xlu2 %354 }
 0x112   : > { %1018 = vmatmul.f32.gmra.mxu2 %v931_v8  ;;  %v449_v8 = vmul.f32 %v6621_v58, %v6892_v63  ;;  %1626 = vmatpush.msrb.mxu1 %v5271_v45  ;;  %v5270_v58 = vld [vmem:[%s10171_s2 + $0x298] sm:$0xff]  ;;  %v5269_v45 = vld [vmem:[%s10171_s2 + $0x290] sm:$0xff] }
 0x113   : > { %696 = vmatmul.f32.gmra.mxu1 %v448_v56  ;;  %v6920_v24 = vpop.f32.mrf.mxu3  ;;  %2263 = vmatpush.msra.mxu0 %v5328_v39  ;;  %v6978_v63 = vld [vmem:[%s5917_s20 + $0x9a] sm:$0xff] }
 0x114   : > { %1627 = vmatpush.msrb.mxu1 %v5270_v58  ;;  %v1148_v58 = vmul.f32 %v6577_v31, %v6532_v44  ;;  %v5267_v31 = vld [vmem:[%s10171_s2 + $0x280] sm:$0xff] }
 0x115   : > { %v6922_v42 = vpop.f32.mrf.mxu2 }
 0x116   : > { %10379 = vst [vmem:[#allocation89_spill] sm:$0xff] %v6922_v42  ;;  %v6934_v14 = vpop.f32.mrf.mxu0  ;;  %v6947_v42 = vpop.permute.xlu0 %857  ;;  %1628 = vmatpush.msrb.mxu1 %v5269_v45 }
 0x117   : > { %v850_v40 = vpop.permute.xlu1 %849  ;;  %10381 = vst [vmem:[#allocation91_spill] sm:$0xff] %v6934_v14  ;;  %v6951_v26 = vmul.f32 %v6932_v36, %v6947_v42  ;;  %v6955_v33 = vmul.f32 %v6945_v53, %v6947_v42 }
 0x118   : > { %v6939_v56 = vmul.f32 %v6780_v10, %v850_v40  ;;  %v6942_v49 = vmul.f32 %v6932_v36, %v850_v40  ;;  %1214 = vmatmul.f32.gmra.mxu3 %v6786_v27 }
 0x119   : > { %10383 = vst [vmem:[#allocation93_spill] sm:$0xff] %v6955_v33  ;;  %1441 = vmatmul.f32.gmra.mxu0 %v6423_v62 }
 0x11a   : > { %10382 = vst [vmem:[#allocation92_spill] sm:$0xff] %v6942_v49  ;;  %1021 = vmatmul.f32.gmra.mxu2 %v932_v21  ;;  %v5268_v49 = vld [vmem:[%s10171_s2 + $0x288] sm:$0xff]  ;;  %v933_v21 = vmul.f32 %v6732_v28, %v6833_v57 }
 0x11b   : > { %699 = vmatmul.f32.gmra.mxu1 %v449_v8  ;;  %v6968_v33 = vpop.f32.mrf.mxu3  ;;  %v5295_v8 = vld [vmem:[%s10171_s2 + $0x360] sm:$0xff] }
 0x11c   : > { %1844 = vmatpush.msra.mxu2 %v5295_v8  ;;  %1629 = vmatpush.msrb.mxu1 %v5268_v49  ;;  %v1149_v8 = vmul.f32 %v6634_v59, %v6540_v9  ;;  %v7028_v59 = vpop.permute.xlu2 %865 }
 0x11d   : > { %v6970_v27 = vpop.f32.mrf.mxu2 }
 0x11e   : > { %10384 = vst [vmem:[#allocation94_spill] sm:$0xff] %v6970_v27  ;;  %v6983_v39 = vpop.f32.mrf.mxu0  ;;  %v450_v27 = vmul.f32 %v6651_v18, %v6846_v48  ;;  %v5311_v18 = vld [vmem:[%s10171_s2 + $0x3e0] sm:$0xff]  ;;  %1630 = vmatpush.msrb.mxu1 %v5267_v31 }
 0x11f   : > { %v854_v62 = vpop.permute.xlu1 %853  ;;  %10385 = vst [vmem:[#allocation95_spill] sm:$0xff] %v6983_v39  ;;  %2038 = vmatpush.msra.mxu3 %v5311_v18  ;;  %v7026_v18 = vld [vmem:[%s5917_s20 + $0xb2] sm:$0xff] }
 0x120   : > { %v6992_v28 = vmul.f32 %v6831_v5, %v854_v62  ;;  %v6995_v57 = vmul.f32 %v6978_v63, %v854_v62  ;;  %1217 = vmatmul.f32.gmra.mxu3 %v1148_v58  ;;  %v934_v58 = vmul.f32 %v6777_v54, %v850_v40  ;;  %v7032_v54 = vmul.f32 %v6945_v53, %v7028_v59 }
 0x121   : > { %1444 = vmatmul.f32.gmra.mxu0 %v6459_v41  ;;  %v451_v41 = vmul.f32 %v6690_v15, %v6924_v20  ;;  %v7036_v40 = vmul.f32 %v7026_v18, %v7028_v59  ;;  %v5327_v15 = vld [vmem:[%s10171_s2 + $0x460] sm:$0xff] }
 0x122   : > { %10386 = vst [vmem:[#allocation96_spill] sm:$0xff] %v6995_v57  ;;  %1024 = vmatmul.f32.gmra.mxu2 %v933_v21  ;;  %v7012_v57 = vld [vmem:[%s5917_s20 + $0xaa] sm:$0xff]  ;;  %2264 = vmatpush.msra.mxu0 %v5327_v15 }
 0x123   : > { %702 = vmatmul.f32.gmra.mxu1 %v450_v27  ;;  %v7004_v45 = vpop.f32.mrf.mxu3  ;;  %v1354_v27 = vld [vmem:[%s5917_s20 + $0x81] sm:$0xff]  ;;  %10390 = vst [vmem:[#allocation100_spill] sm:$0xff] %v7036_v40 }
 0x124   : > { %v7086_v39 = vpop.permute.xlu2 %873 }
 0x125   : > { %v7006_v49 = vpop.f32.mrf.mxu2  ;;  %v940_v14 = vmul.f32 %v6945_v53, %v7086_v39 }
 0x126   : > { %10387 = vst [vmem:[#allocation97_spill] sm:$0xff] %v7006_v49  ;;  %v7014_v43 = vpop.f32.mrf.mxu0 }
 0x127   : > { %v862_v48 = vpop.permute.xlu1 %861  ;;  %10388 = vst [vmem:[#allocation98_spill] sm:$0xff] %v7014_v43  ;;  %v935_v43 = vmul.f32 %v6735_v16, %v854_v62  ;;  %v5310_v16 = vld [vmem:[%s10171_s2 + $0x3d8] sm:$0xff] }
 0x128   : > { %v7020_v21 = vmul.f32 %v6978_v63, %v862_v48  ;;  %v7023_v31 = vmul.f32 %v7012_v57, %v862_v48  ;;  %1220 = vmatmul.f32.gmra.mxu3 %v1149_v8  ;;  %v5294_v8 = vld [vmem:[%s10171_s2 + $0x358] sm:$0xff] }
 0x129   : > { %1447 = vmatmul.f32.gmra.mxu0 %v1354_v27  ;;  %1845 = vmatpush.msra.mxu2 %v5294_v8  ;;  %v7057_v27 = vld [vmem:[%s5917_s20 + $0xba] sm:$0xff]  ;;  %v936_v8 = vmul.f32 %v6780_v10, %v6947_v42 }
 0x12a   : > { %10389 = vst [vmem:[#allocation99_spill] sm:$0xff] %v7023_v31  ;;  %1027 = vmatmul.f32.gmra.mxu2 %v934_v58  ;;  %v452_v58 = vmul.f32 %v6844_v52, %v6989_v34  ;;  %2039 = vmatpush.msra.mxu3 %v5310_v16 }
 0x12b   : > { %705 = vmatmul.f32.gmra.mxu1 %v451_v41  ;;  %v7041_v31 = vpop.f32.mrf.mxu3  ;;  %v1355_v41 = vld [vmem:[%s5917_s20 + $0x89] sm:$0xff] }
 0x12d   : > { %v7043_v49 = vpop.f32.mrf.mxu2 }
 0x12e   : > { %10391 = vst [vmem:[#allocation101_spill] sm:$0xff] %v7043_v49  ;;  %v7051_v40 = vpop.f32.mrf.mxu0 }
 0x12f   : > { %10392 = vst [vmem:[#allocation102_spill] sm:$0xff] %v7051_v40  ;;  %v7059_v15 = vpop.permute.xlu1 %869  ;;  %v7084_v40 = vld [vmem:[%s5917_s20 + $0xc2] sm:$0xff] }
 0x130   : > { %1223 = vmatmul.f32.gmra.mxu3 %v1150_v50  ;;  %v7066_v38 = vmul.f32 %v7012_v57, %v7059_v15  ;;  %v7070_v52 = vmul.f32 %v7057_v27, %v7059_v15  ;;  %v7094_v16 = vmul.f32 %v7084_v40, %v7086_v39 }
 0x131   : > { %1450 = vmatmul.f32.gmra.mxu0 %v1355_v41  ;;  %v1356_v41 = vld [vmem:[%s5917_s20 + $0x91] sm:$0xff] }
 0x132   : > { %1030 = vmatmul.f32.gmra.mxu2 %v935_v43  ;;  %10393 = vst [vmem:[#allocation103_spill] sm:$0xff] %v7070_v52  ;;  %v1151_v43 = vmul.f32 %v6716_v19, %v6529_v3  ;;  %v5326_v19 = vld [vmem:[%s10171_s2 + $0x458] sm:$0xff]  ;;  %v1152_v52 = vmul.f32 %v6758_v11, %v6667_v4  ;;  %v1567_v11 = vmul.f32 %v6503_v0, %v6543_v29  ;;  %v5309_v4 = vld [vmem:[%s10171_s2 + $0x3d0] sm:$0xff] }
 0x133   : > { %708 = vmatmul.f32.gmra.mxu1 %v452_v58  ;;  %v7072_v50 = vpop.f32.mrf.mxu3  ;;  %v7090_v58 = vmul.f32 %v7026_v18, %v7086_v39  ;;  %10396 = vst [vmem:[#allocation106_spill] sm:$0xff] %v7094_v16  ;;  %2265 = vmatpush.msra.mxu0 %v5326_v19  ;;  %v938_v0 = vmul.f32 %v6932_v36, %v7028_v59  ;;  %v5325_v36 = vld [vmem:[%s10171_s2 + $0x450] sm:$0xff] }
 0x134   : > { %2040 = vmatpush.msra.mxu3 %v5309_v4  ;;  %v1568_v4 = vmul.f32 %v6571_v6, %v6430_v60  ;;  %v7172_v6 = vpop.f32.mrf.mxu1  ;;  %v1570_v39 = vmul.f32 %v6670_v46, %v6562_v25  ;;  %v5291_v46 = vld [vmem:[%s10171_s2 + $0x340] sm:$0xff] }
 0x135   : > { %v7074_v62 = vpop.f32.mrf.mxu2  ;;  %2266 = vmatpush.msra.mxu0 %v5325_v36 }
 0x136   : > { %10394 = vst [vmem:[#allocation104_spill] sm:$0xff] %v7074_v62  ;;  %v7078_v49 = vpop.f32.mrf.mxu0  ;;  %v1359_v62 = vld [vmem:[%s5917_s20 + $0xa9] sm:$0xff] }
 0x137   : > { %10395 = vst [vmem:[#allocation105_spill] sm:$0xff] %v7078_v49  ;;  %v937_v49 = vmul.f32 %v6831_v5, %v862_v48 }
 0x138   : > { %1226 = vmatmul.f32.gmra.mxu3 %v1151_v43  ;;  %v5293_v43 = vld [vmem:[%s10171_s2 + $0x350] sm:$0xff] }
 0x139   : > { %1453 = vmatmul.f32.gmra.mxu0 %v1356_v41  ;;  %1846 = vmatpush.msra.mxu2 %v5293_v43  ;;  %v7116_v41 = vpop.permute.xlu0 %877 }
 0x13a   : > { %1033 = vmatmul.f32.gmra.mxu2 %v936_v8  ;;  %v1357_v8 = vld [vmem:[%s5917_s20 + $0x99] sm:$0xff]  ;;  %v7120_v19 = vmul.f32 %v7057_v27, %v7116_v41 }
 0x13b   : > { %1631 = vmatmul.f32.vlgmr.msrb.gmra.mxu1 %v6484_v30  ;;  %v7100_v10 = vpop.f32.mrf.mxu3  ;;  %v7114_v30 = vld [vmem:[%s5917_s20 + $0xca] sm:$0xff] }
 0x13c   : > { %v7124_v48 = vmul.f32 %v7114_v30, %v7116_v41 }
 0x13d   : > { %v7102_v42 = vpop.f32.mrf.mxu2 }
 0x13e   : > { %v7110_v16 = vpop.f32.mrf.mxu0  ;;  %10398 = vst [vmem:[#allocation108_spill] sm:$0xff] %v7124_v48  ;;  %v7138_v48 = vpop.permute.xlu1 %881 }
 0x13f   : > { %10397 = vst [vmem:[#allocation107_spill] sm:$0xff] %v7110_v16  ;;  %v7136_v16 = vld [vmem:[%s5917_s20 + $0xd2] sm:$0xff]  ;;  %v7144_v29 = vmul.f32 %v7084_v40, %v7138_v48 }
 0x140   : > { %1229 = vmatmul.f32.gmra.mxu3 %v1152_v52 }
 0x141   : > { %1456 = vmatmul.f32.gmra.mxu0 %v1357_v8  ;;  %10400 = vst [vmem:[#allocation110_spill] sm:$0xff] %v7144_v29  ;;  %v1153_v8 = vmul.f32 %v6801_v17, %v6706_v12  ;;  %v7168_v12 = vld [vmem:[%s5917_s20 + $0xea] sm:$0xff] }
 0x142   : > { %1036 = vmatmul.f32.gmra.mxu2 %v937_v49  ;;  %v7148_v49 = vmul.f32 %v7136_v16, %v7138_v48 }
 0x143   : > { %1634 = vmatmul.f32.gmra.mxu1 %v1567_v11  ;;  %v7131_v5 = vpop.f32.mrf.mxu3  ;;  %v1358_v11 = vld [vmem:[%s5917_s20 + $0xa1] sm:$0xff] }
 0x144   : > { %10399 = vst [vmem:[#allocation109_spill] sm:$0xff] %v7131_v5  ;;  %v7236_v5 = vpop.permute.xlu0 %889 }
 0x145   : > { %v7133_v43 = vpop.f32.mrf.mxu2  ;;  %10401 = vst [vmem:[#allocation111_spill] sm:$0xff] %v7148_v49  ;;  %v7240_v29 = vmul.f32 %v7136_v16, %v7236_v5 }
 0x146   : > { %v7150_v52 = vpop.f32.mrf.mxu0  ;;  %v7170_v17 = vpop.permute.xlu1 %893 }
 0x147   : > { %10402 = vst [vmem:[#allocation112_spill] sm:$0xff] %v7150_v52  ;;  %v7165_v52 = vld [vmem:[%s5917_s20 + $0xda] sm:$0xff] }
 0x148   : > { %1232 = vmatmul.f32.gmra.mxu3 %v1153_v8  ;;  %v939_v8 = vmul.f32 %v6978_v63, %v7059_v15  ;;  %10414 = vst [vmem:[#allocation124_spill] sm:$0xff] %v7240_v29 }
 0x149   : > { %1459 = vmatmul.f32.gmra.mxu0 %v1358_v11  ;;  %v7182_v11 = vmul.f32 %v7168_v12, %v7170_v17 }
 0x14a   : > { %1039 = vmatmul.f32.gmra.mxu2 %v938_v0  ;;  %v7178_v0 = vmul.f32 %v7165_v52, %v7170_v17 }
 0x14b   : > { %1637 = vmatmul.f32.gmra.mxu1 %v1568_v4  ;;  %v7160_v59 = vpop.f32.mrf.mxu3  ;;  %10405 = vst [vmem:[#allocation115_spill] sm:$0xff] %v7182_v11  ;;  %v5292_v4 = vld [vmem:[%s10171_s2 + $0x348] sm:$0xff]  ;;  %v1569_v11 = vmul.f32 %v6501_v23, %v6467_v7  ;;  %v7218_v23 = vpop.f32.mrf.mxu1 }
 0x14c   : > { %10403 = vst [vmem:[#allocation113_spill] sm:$0xff] %v7160_v59  ;;  %1847 = vmatpush.msra.mxu2 %v5292_v4  ;;  %v7190_v59 = vpop.permute.xlu2 %885  ;;  %v5308_v4 = vld [vmem:[%s10171_s2 + $0x3c8] sm:$0xff]  ;;  %v7279_v29 = vpop.permute.xlu0 %901 }
 0x14d   : > { %v7162_v49 = vpop.f32.mrf.mxu2  ;;  %10404 = vst [vmem:[#allocation114_spill] sm:$0xff] %v7178_v0  ;;  %v7194_v63 = vmul.f32 %v7114_v30, %v7190_v59  ;;  %v7198_v15 = vmul.f32 %v7165_v52, %v7190_v59  ;;  %2041 = vmatpush.msra.mxu3 %v5308_v4  ;;  %v1360_v4 = vld [vmem:[%s5917_s20 + $0xb1] sm:$0xff] }
 0x14e   : > { %v7187_v36 = vpop.f32.mrf.mxu0  ;;  %1848 = vmatpush.msra.mxu2 %v5291_v46  ;;  %v7277_v46 = vld [vmem:[%s5917_s20 + $0xfa] sm:$0xff] }
 0x14f   : > { %10406 = vst [vmem:[#allocation116_spill] sm:$0xff] %v7187_v36 }
 0x150   : > { %10407 = vst [vmem:[#allocation117_spill] sm:$0xff] %v7194_v63  ;;  %1235 = vmatmul.f32.gmra.mxu3 %v6627_v2  ;;  %v7214_v2 = vld [vmem:[%s5917_s20 + $0x102] sm:$0xff]  ;;  %v7216_v63 = vpop.permute.xlu1 %905 }
 0x151   : > { %10408 = vst [vmem:[#allocation118_spill] sm:$0xff] %v7198_v15  ;;  %1462 = vmatmul.f32.gmra.mxu0 %v1359_v62  ;;  %v7211_v15 = vld [vmem:[%s5917_s20 + $0xf2] sm:$0xff] }
 0x152   : > { %1042 = vmatmul.f32.gmra.mxu2 %v939_v8  ;;  %10410 = vst [vmem:[#allocation120_spill] sm:$0xff] %v7214_v2  ;;  %v7224_v62 = vmul.f32 %v7211_v15, %v7216_v63  ;;  %v7228_v8 = vmul.f32 %v7214_v2, %v7216_v63 }
 0x153   : > { %1640 = vmatmul.f32.gmra.mxu1 %v1569_v11  ;;  %v7206_v36 = vpop.f32.mrf.mxu3 }
 0x154   : > { %10409 = vst [vmem:[#allocation119_spill] sm:$0xff] %v7206_v36  ;;  %v7234_v36 = vld [vmem:[%s5917_s20 + $0xe2] sm:$0xff] }
 0x155   : > { %v7208_v0 = vpop.f32.mrf.mxu2  ;;  %10411 = vst [vmem:[#allocation121_spill] sm:$0xff] %v7224_v62  ;;  %v7244_v53 = vmul.f32 %v7236_v5, %v7234_v36  ;;  %v1361_v62 = vld [vmem:[%s5917_s20 + $0xb9] sm:$0xff] }
 0x156   : > { %10412 = vst [vmem:[#allocation122_spill] sm:$0xff] %v7228_v8  ;;  %v7230_v11 = vpop.f32.mrf.mxu0  ;;  %v5324_v8 = vld [vmem:[%s10171_s2 + $0x448] sm:$0xff] }
 0x157   : > { %10413 = vst [vmem:[#allocation123_spill] sm:$0xff] %v7230_v11  ;;  %2267 = vmatpush.msra.mxu0 %v5324_v8  ;;  %v10419_v8 = vld [vmem:[#allocation56_spill] sm:$0xff] }
 0x158   : > { %10415 = vst [vmem:[#allocation125_spill] sm:$0xff] %v7244_v53  ;;  %1238 = vmatmul.f32.gmra.mxu3 %v6657_v32  ;;  %v941_v53 = vmul.f32 %v7012_v57, %v7116_v41  ;;  %v5307_v57 = vld [vmem:[%s10171_s2 + $0x3c0] sm:$0xff] }
 0x159   : > { %1465 = vmatmul.f32.gmra.mxu0 %v1360_v4  ;;  %v10418_v4 = vld [vmem:[#allocation65_spill] sm:$0xff]  ;;  %2042 = vmatpush.msra.mxu3 %v5307_v57 }
 0x15a   : > { %1045 = vmatmul.f32.gmra.mxu2 %v940_v14  ;;  %v7264_v14 = vpop.f32.mrf.mxu1 }
 0x15b   : > { %1643 = vmatmul.f32.gmra.mxu1 %v1570_v39  ;;  %v7252_v11 = vpop.f32.mrf.mxu3  ;;  %v10420_v39 = vld [vmem:[#allocation67_spill] sm:$0xff] }
 0x15c   : > { %10416 = vst [vmem:[#allocation126_spill] sm:$0xff] %v7252_v11  ;;  %v1571_v11 = vmul.f32 %v10420_v39, %v10419_v8  ;;  %v7285_v8 = vmul.f32 %v7168_v12, %v7279_v29  ;;  %v898_v39 = vpop.permute.xlu2 %897 }
 0x15d   : > { %v7254_v2 = vpop.f32.mrf.mxu2  ;;  %v7295_v57 = vmul.f32 %v898_v39, %v7234_v36 }
 0x15e   : > { %v7261_v32 = vpop.f32.mrf.mxu0  ;;  %10422 = vst [vmem:[#allocation56_spill] sm:$0xff] %v7285_v8 }
 0x15f   : > { %10417 = vst [vmem:[#allocation127_spill] sm:$0xff] %v7261_v32 }
 0x160   : > { %1241 = vmatmul.f32.gmra.mxu3 %v10418_v4  ;;  %v942_v4 = vmul.f32 %v7026_v18, %v7138_v48  ;;  %10425 = vst [vmem:[#allocation129_spill] sm:$0xff] %v7295_v57  ;;  %v10427_v18 = vld [vmem:[#allocation51_spill] sm:$0xff] }
 0x161   : > { %1468 = vmatmul.f32.gmra.mxu0 %v1361_v62  ;;  %v7289_v62 = vmul.f32 %v7279_v29, %v7277_v46  ;;  %v1572_v48 = vmul.f32 %v6752_v22, %v10427_v18  ;;  %v5290_v22 = vld [vmem:[%s10171_s2 + $0x338] sm:$0xff]  ;;  %v1363_v18 = vld [vmem:[%s5917_s20 + $0xc9] sm:$0xff] }
 0x162   : > { %1048 = vmatmul.f32.gmra.mxu2 %v941_v53  ;;  %v1362_v53 = vld [vmem:[%s5917_s20 + $0xc1] sm:$0xff] }
 0x163   : > { %1646 = vmatmul.f32.gmra.mxu1 %v1571_v11  ;;  %v7272_v41 = vpop.f32.mrf.mxu3  ;;  %10423 = vst [vmem:[#allocation67_spill] sm:$0xff] %v7289_v62  ;;  %v5323_v62 = vld [vmem:[%s10171_s2 + $0x440] sm:$0xff]  ;;  %1849 = vmatpush.msra.mxu2 %v5290_v22  ;;  %v944_v22 = vmul.f32 %v7084_v40, %v7236_v5 }
 0x164   : > { %10421 = vst [vmem:[#allocation65_spill] sm:$0xff] %v7272_v41  ;;  %v7298_v41 = vmul.f32 %v7211_v15, %v898_v39  ;;  %2268 = vmatpush.msra.mxu0 %v5323_v62 }
 0x165   : > { %v7274_v32 = vpop.f32.mrf.mxu2 }
 0x166   : > { %v7291_v11 = vpop.f32.mrf.mxu0  ;;  %10426 = vst [vmem:[#allocation130_spill] sm:$0xff] %v7298_v41  ;;  %v1541_v41 = vld [vmem:[%s5917_s20 + $0x4a] sm:$0xff] }
 0x167   : > { %10424 = vst [vmem:[#allocation128_spill] sm:$0xff] %v7291_v11  ;;  %v7306_v11 = vpop.f32.mrf.mxu1 }
 0x168   : > { %1244 = vmatmul.f32.gmra.mxu3 %v6869_v13  ;;  %v943_v13 = vmul.f32 %v7057_v27, %v7190_v59 }
 0x169   : > { %1471 = vmatmul.f32.gmra.mxu0 %v1362_v53  ;;  %v5306_v53 = vld [vmem:[%s10171_s2 + $0x3b8] sm:$0xff] }
 0x16a   : > { %1051 = vmatmul.f32.gmra.mxu2 %v942_v4  ;;  %v10429_v4 = vld [vmem:[#allocation50_spill] sm:$0xff]  ;;  %2043 = vmatpush.msra.mxu3 %v5306_v53 }
 0x16b   : > { %1649 = vmatmul.f32.gmra.mxu1 %v1572_v48  ;;  %v7308_v8 = vpop.f32.mrf.mxu3  ;;  %v1573_v62 = vmul.f32 %v1541_v41, %v10429_v4  ;;  %v1364_v41 = vld [vmem:[%s5917_s20 + $0xd1] sm:$0xff] }
 0x16d   : > { %v7310_v57 = vpop.f32.mrf.mxu2 }
 0x16e   : > { %v7318_v35 = vpop.f32.mrf.mxu0 }
 0x16f   : > { %10428 = vst [vmem:[#allocation131_spill] sm:$0xff] %v7318_v35  ;;  %v7326_v27 = vpop.f32.mrf.mxu1 }
 0x170   : > { %1247 = vmatmul.f32.gmra.mxu3 %v6904_v47 }
 0x171   : > { %1474 = vmatmul.f32.gmra.mxu0 %v1363_v18  ;;  %v5322_v18 = vld [vmem:[%s10171_s2 + $0x438] sm:$0xff] }
 0x172   : > { %1054 = vmatmul.f32.gmra.mxu2 %v943_v13  ;;  %v1128_v13 = vld [vmem:[%s5917_s20 + $0x80] sm:$0xff]  ;;  %2269 = vmatpush.msra.mxu0 %v5322_v18  ;;  %v5305_v18 = vld [vmem:[%s10171_s2 + $0x3b0] sm:$0xff] }
 0x173   : > { %1652 = vmatmul.f32.gmra.mxu1 %v1573_v62  ;;  %v7328_v59 = vpop.f32.mrf.mxu3  ;;  %v10431_v62 = vld [vmem:[#allocation54_spill] sm:$0xff]  ;;  %v1160_v40 = vmul.f32 %v1128_v13, %v6924_v20  ;;  %v10434_v13 = vld [vmem:[#allocation73_spill] sm:$0xff]  ;;  %2044 = vmatpush.msra.mxu3 %v5305_v18 }
 0x175   : > { %v7330_v48 = vpop.f32.mrf.mxu2 }
 0x176   : > { %v7334_v47 = vpop.f32.mrf.mxu0 }
 0x177   : > { %10430 = vst [vmem:[#allocation50_spill] sm:$0xff] %v7334_v47  ;;  %v7348_v47 = vpop.f32.mrf.mxu1 }
 0x178   : > { %1250 = vmatmul.f32.gmra.mxu3 %v6857_v37  ;;  %v5289_v37 = vld [vmem:[%s10171_s2 + $0x330] sm:$0xff] }
 0x179   : > { %1477 = vmatmul.f32.gmra.mxu0 %v1364_v41  ;;  %1850 = vmatpush.msra.mxu2 %v5289_v37  ;;  %v945_v41 = vmul.f32 %v7114_v30, %v7170_v17  ;;  %v946_v37 = vmul.f32 %v7136_v16, %v898_v39  ;;  %v5288_v39 = vld [vmem:[%s10171_s2 + $0x328] sm:$0xff] }
 0x17a   : > { %1057 = vmatmul.f32.gmra.mxu2 %v944_v22  ;;  %v1365_v22 = vld [vmem:[%s5917_s20 + $0xd9] sm:$0xff] }
 0x17b   : > { %1655 = vmatmul.f32.gmra.mxu1 %v10431_v62  ;;  %v7343_v53 = vpop.f32.mrf.mxu3  ;;  %v1129_v62 = vld [vmem:[%s5917_s20 + $0x88] sm:$0xff]  ;;  %1851 = vmatpush.msra.mxu2 %v5288_v39  ;;  %v5287_v39 = vld [vmem:[%s10171_s2 + $0x320] sm:$0xff] }
 0x17c   : > { %10432 = vst [vmem:[#allocation54_spill] sm:$0xff] %v7343_v53  ;;  %v1161_v30 = vmul.f32 %v1129_v62, %v6989_v34  ;;  %v947_v62 = vmul.f32 %v7165_v52, %v7279_v29  ;;  %v5319_v29 = vld [vmem:[%s10171_s2 + $0x420] sm:$0xff] }
 0x17d   : > { %v7346_v5 = vpop.f32.mrf.mxu2  ;;  %1852 = vmatpush.msra.mxu2 %v5287_v39  ;;  %v948_v39 = vmul.f32 %v7216_v63, %v7234_v36  ;;  %v5283_v36 = vld [vmem:[%s10171_s2 + $0x300] sm:$0xff] }
 0x17e   : > { %v7353_v35 = vpop.f32.mrf.mxu0 }
 0x17f   : > { %10433 = vst [vmem:[#allocation132_spill] sm:$0xff] %v7353_v35  ;;  %v7372_v53 = vpop.f32.mrf.mxu1 }
 0x180   : > { %1253 = vmatmul.f32.gmra.mxu3 %v1160_v40  ;;  %v1366_v40 = vld [vmem:[%s5917_s20 + $0xe1] sm:$0xff] }
 0x181   : > { %1480 = vmatmul.f32.gmra.mxu0 %v1365_v22  ;;  %v5321_v22 = vld [vmem:[%s10171_s2 + $0x430] sm:$0xff] }
 0x182   : > { %1060 = vmatmul.f32.gmra.mxu2 %v945_v41  ;;  %2270 = vmatpush.msra.mxu0 %v5321_v22  ;;  %v5304_v22 = vld [vmem:[%s10171_s2 + $0x3a8] sm:$0xff] }
 0x183   : > { %1658 = vmatmul.f32.gmra.mxu1 %v10434_v13  ;;  %v7363_v20 = vpop.f32.mrf.mxu3  ;;  %v1367_v13 = vld [vmem:[%s5917_s20 + $0xe9] sm:$0xff]  ;;  %2045 = vmatpush.msra.mxu3 %v5304_v22  ;;  %v1368_v22 = vld [vmem:[%s5917_s20 + $0xf1] sm:$0xff] }
 0x185   : > { %v7365_v35 = vpop.f32.mrf.mxu2 }
 0x186   : > { %v7369_v17 = vpop.f32.mrf.mxu0 }
 0x187   : > { %10435 = vst [vmem:[#allocation73_spill] sm:$0xff] %v7369_v17  ;;  %v7405_v52 = vpop.f32.mrf.mxu1 }
 0x188   : > { %1256 = vmatmul.f32.gmra.mxu3 %v1161_v30 }
 0x189   : > { %1483 = vmatmul.f32.gmra.mxu0 %v1366_v40  ;;  %v10438_v40 = vld [vmem:[#allocation19_spill] sm:$0xff] }
 0x18a   : > { %1063 = vmatmul.f32.gmra.mxu2 %v946_v37  ;;  %v10437_v37 = vld [vmem:[#allocation40_spill] sm:$0xff] }
 0x18b   : > { %1661 = vmatmul.f32.gmra.mxu1 %v6804_v55  ;;  %v7378_v41 = vpop.f32.mrf.mxu3  ;;  %v5320_v55 = vld [vmem:[%s10171_s2 + $0x428] sm:$0xff]  ;;  %v665_v30 = vadd.f32 %v7172_v6, %v10437_v37 }
 0x18c   : > { %2271 = vmatpush.msra.mxu0 %v5320_v55  ;;  %v10439_v55 = vld [vmem:[#allocation71_spill] sm:$0xff] }
 0x18d   : > { %v7380_v16 = vpop.f32.mrf.mxu2  ;;  %v1082_v6 = vadd.f32 %v7102_v42, %v665_v30  ;;  %v5285_v42 = vld [vmem:[%s10171_s2 + $0x310] sm:$0xff] }
 0x18e   : > { %v7385_v18 = vpop.f32.mrf.mxu0  ;;  %2272 = vmatpush.msra.mxu0 %v5319_v29  ;;  %v10441_v29 = vld [vmem:[#allocation43_spill] sm:$0xff] }
 0x18f   : > { %10436 = vst [vmem:[#allocation133_spill] sm:$0xff] %v7385_v18  ;;  %v5318_v18 = vld [vmem:[%s10171_s2 + $0x418] sm:$0xff] }
 0x190   : > { %1259 = vmatmul.f32.gmra.mxu3 %v10438_v40  ;;  %v5286_v40 = vld [vmem:[%s10171_s2 + $0x318] sm:$0xff]  ;;  %2273 = vmatpush.msra.mxu0 %v5318_v18  ;;  %v5284_v18 = vld [vmem:[%s10171_s2 + $0x308] sm:$0xff] }
 0x191   : > { %1486 = vmatmul.f32.gmra.mxu0 %v1367_v13  ;;  %1853 = vmatpush.msra.mxu2 %v5286_v40  ;;  %v7447_v40 = vpop.f32.mrf.mxu1 }
 0x192   : > { %1066 = vmatmul.f32.gmra.mxu2 %v947_v62  ;;  %v5317_v62 = vld [vmem:[%s10171_s2 + $0x410] sm:$0xff] }
 0x193   : > { %1664 = vmatmul.f32.gmra.mxu1 %v10439_v55  ;;  %v1212_v37 = vpop.f32.mrf.mxu3  ;;  %1854 = vmatpush.msra.mxu2 %v5285_v42  ;;  %v10442_v55 = vld [vmem:[#allocation24_spill] sm:$0xff] }
 0x194   : > { %v7415_v17 = vadd.f32 %v1212_v37, %v1082_v6  ;;  %2274 = vmatpush.msra.mxu0 %v5317_v62  ;;  %v668_v6 = vadd.f32 %v7218_v23, %v10441_v29  ;;  %v5316_v37 = vld [vmem:[%s10171_s2 + $0x408] sm:$0xff]  ;;  %v5315_v23 = vld [vmem:[%s10171_s2 + $0x400] sm:$0xff]  ;;  %v7449_v62 = vpop.permute.xlu2 %909  ;;  %v10445_v29 = vld [vmem:[#allocation47_spill] sm:$0xff] }
 0x195   : > { %v7417_v13 = vpop.f32.mrf.mxu2  ;;  %1855 = vmatpush.msra.mxu2 %v5284_v18  ;;  %v949_v18 = vmul.f32 %v7168_v12, %v7449_v62 }
 0x196   : > { %v7425_v30 = vpop.f32.mrf.mxu0  ;;  %v1083_v63 = vadd.f32 %v7133_v43, %v668_v6  ;;  %2275 = vmatpush.msra.mxu0 %v5316_v37  ;;  %v671_v6 = vadd.f32 %v7264_v14, %v10445_v29  ;;  %v5303_v37 = vld [vmem:[%s10171_s2 + $0x3a0] sm:$0xff] }
 0x197   : > { %10440 = vst [vmem:[#allocation40_spill] sm:$0xff] %v7425_v30  ;;  %1856 = vmatpush.msra.mxu2 %v5283_v36  ;;  %2046 = vmatpush.msra.mxu3 %v5303_v37  ;;  %v1371_v30 = vld [vmem:[%s5917_s20 + $0x109] sm:$0xff] }
 0x198   : > { %1262 = vmatmul.f32.gmra.mxu3 %v10442_v55  ;;  %2276 = vmatpush.msra.mxu0 %v5315_v23  ;;  %v10446_v55 = vld [vmem:[#allocation15_spill] sm:$0xff]  ;;  %v1084_v36 = vadd.f32 %v7162_v49, %v671_v6  ;;  %v10450_v49 = vld [vmem:[#allocation49_spill] sm:$0xff]  ;;  %v10451_v6 = vld [vmem:[#allocation22_spill] sm:$0xff] }
 0x199   : > { %1489 = vmatmul.f32.gmra.mxu0 %v1368_v22  ;;  %v7474_v14 = vpop.f32.mrf.mxu1 }
 0x19a   : > { %1069 = vmatmul.f32.gmra.mxu2 %v948_v39 }
 0x19b   : > { %1667 = vmatmul.f32.gmra.mxu1 %v6790_v51  ;;  %v1215_v42 = vpop.f32.mrf.mxu3  ;;  %v1369_v51 = vld [vmem:[%s5917_s20 + $0xf9] sm:$0xff] }
 0x19c   : > { %v7451_v22 = vadd.f32 %v1215_v42, %v1083_v63  ;;  %v10447_v63 = vld [vmem:[#allocation81_spill] sm:$0xff]  ;;  %v7468_v42 = vpop.permute.xlu0 %913 }
 0x19d   : > { %v7453_v39 = vpop.f32.mrf.mxu2 }
 0x19e   : > { %10443 = vst [vmem:[#allocation19_spill] sm:$0xff] %v7451_v22  ;;  %v7455_v43 = vpop.f32.mrf.mxu0 }
 0x19f   : > { %10444 = vst [vmem:[#allocation71_spill] sm:$0xff] %v7455_v43 }
 0x1a0   : > { %1265 = vmatmul.f32.gmra.mxu3 %v10446_v55  ;;  %v1370_v55 = vld [vmem:[%s5917_s20 + $0x101] sm:$0xff] }
 0x1a1   : > { %1492 = vmatmul.f32.gmra.mxu0 %v1369_v51  ;;  %v950_v51 = vmul.f32 %v7211_v15, %v7468_v42 }
 0x1a2   : > { %1072 = vmatmul.f32.gmra.mxu2 %v949_v18  ;;  %v674_v18 = vadd.f32 %v7306_v11, %v10450_v49  ;;  %v5302_v49 = vld [vmem:[%s10171_s2 + $0x398] sm:$0xff] }
 0x1a3   : > { %1670 = vmatmul.f32.gmra.mxu1 %v10447_v63  ;;  %v1218_v23 = vpop.f32.mrf.mxu3  ;;  %v7486_v63 = vpop.permute.xlu1 %917  ;;  %2047 = vmatpush.msra.mxu3 %v5302_v49  ;;  %v10460_v49 = vld [vmem:[#allocation42_spill] sm:$0xff] }
 0x1a4   : > { %v7470_v12 = vadd.f32 %v1218_v23, %v1084_v36  ;;  %v1085_v37 = vadd.f32 %v7208_v0, %v674_v18  ;;  %v951_v11 = vmul.f32 %v7486_v63, %v7277_v46 }
 0x1a5   : > { %v7472_v43 = vpop.f32.mrf.mxu2 }
 0x1a6   : > { %10448 = vst [vmem:[#allocation43_spill] sm:$0xff] %v7470_v12  ;;  %v7476_v29 = vpop.f32.mrf.mxu0 }
 0x1a7   : > { %10449 = vst [vmem:[#allocation24_spill] sm:$0xff] %v7476_v29 }
 0x1a8   : > { %1268 = vmatmul.f32.gmra.mxu3 %v10451_v6 }
 0x1a9   : > { %1495 = vmatmul.f32.gmra.mxu0 %v1370_v55  ;;  %v10454_v55 = vld [vmem:[#allocation53_spill] sm:$0xff] }
 0x1aa   : > { %1075 = vmatmul.f32.gmra.mxu2 %v950_v51  ;;  %v677_v0 = vadd.f32 %v7326_v27, %v10454_v55  ;;  %v7499_v51 = vpop.f32.mrf.mxu1  ;;  %v5497_v27 = vld [vmem:[%s5917_s20 + $0x20] sm:$0xff]  ;;  %v10456_v55 = vld [vmem:[#allocation26_spill] sm:$0xff] }
 0x1ab   : > { %1673 = vmatmul.f32.gmra.mxu1 %v6939_v56  ;;  %v1221_v36 = vpop.f32.mrf.mxu3  ;;  %v10455_v56 = vld [vmem:[#allocation9_spill] sm:$0xff] }
 0x1ac   : > { %v7488_v23 = vadd.f32 %v1221_v36, %v1085_v37  ;;  %v1086_v18 = vadd.f32 %v7254_v2, %v677_v0 }
 0x1ad   : > { %v7490_v29 = vpop.f32.mrf.mxu2 }
 0x1ae   : > { %10452 = vst [vmem:[#allocation47_spill] sm:$0xff] %v7488_v23  ;;  %v7492_v15 = vpop.f32.mrf.mxu0  ;;  %v10457_v23 = vld [vmem:[#allocation41_spill] sm:$0xff] }
 0x1af   : > { %10453 = vst [vmem:[#allocation15_spill] sm:$0xff] %v7492_v15  ;;  %v1792_v15 = vmul.f32 %v5497_v27, %v10456_v55 }
 0x1b0   : > { %1271 = vmatmul.f32.gmra.mxu3 %v10455_v56  ;;  %v5498_v56 = vld [vmem:[%s5917_s20 + $0x22] sm:$0xff] }
 0x1b1   : > { %1498 = vmatmul.f32.gmra.mxu0 %v1371_v30  ;;  %v2212_v12 = vmul.f32 %v5498_v56, %v10457_v23  ;;  %v10458_v30 = vld [vmem:[#allocation60_spill] sm:$0xff]  ;;  %v10461_v56 = vld [vmem:[#allocation45_spill] sm:$0xff] }
 0x1b2   : > { %1078 = vmatmul.f32.gmra.mxu2 %v951_v11  ;;  %v680_v2 = vadd.f32 %v7348_v47, %v10458_v30  ;;  %v10459_v11 = vld [vmem:[#allocation11_spill] sm:$0xff]  ;;  %v7521_v0 = vpop.f32.mrf.mxu1  ;;  %v5499_v47 = vld [vmem:[%s5917_s20 + $0x28] sm:$0xff] }
 0x1b3   : > { %1676 = vmatmul.f32.gmra.mxu1 %v6992_v28  ;;  %v1224_v6 = vpop.f32.mrf.mxu3  ;;  %v1793_v30 = vmul.f32 %v5499_v47, %v10461_v56  ;;  %v5500_v56 = vld [vmem:[%s5917_s20 + $0x32] sm:$0xff] }
 0x1b4   : > { %v7507_v37 = vadd.f32 %v1224_v6, %v1086_v18  ;;  %v1087_v28 = vadd.f32 %v7274_v32, %v680_v2  ;;  %v713_v18 = vadd.f32 %v6920_v24, %v10460_v49  ;;  %v5301_v24 = vld [vmem:[%s10171_s2 + $0x390] sm:$0xff]  ;;  %v10465_v2 = vld [vmem:[#allocation44_spill] sm:$0xff] }
 0x1b5   : > { %v7509_v36 = vpop.f32.mrf.mxu2  ;;  %2048 = vmatpush.msra.mxu3 %v5301_v24  ;;  %v10469_v24 = vld [vmem:[#allocation48_spill] sm:$0xff] }
 0x1b6   : > { %v7515_v22 = vpop.f32.mrf.mxu0 }
 0x1b8   : > { %1274 = vmatmul.f32.gmra.mxu3 %v10459_v11 }
 0x1b9   : > { %2277 = vmatmul.f32.vlgmr.msra.gmra.mxu0 %v2212_v12  ;;  %v10463_v12 = vld [vmem:[#allocation29_spill] sm:$0xff] }
 0x1ba   : > { %1857 = vmatmul.f32.vlgmr.msra.gmra.mxu2 %v1792_v15  ;;  %v10462_v15 = vld [vmem:[#allocation64_spill] sm:$0xff] }
 0x1bb   : > { %1679 = vmatmul.f32.gmra.mxu1 %v6951_v26  ;;  %v1227_v6 = vpop.f32.mrf.mxu3  ;;  %v683_v32 = vadd.f32 %v7372_v53, %v10462_v15  ;;  %v5501_v15 = vld [vmem:[%s5917_s20 + $0x30] sm:$0xff] }
 0x1bc   : > { %v7526_v23 = vadd.f32 %v1227_v6, %v1087_v28  ;;  %v10466_v28 = vld [vmem:[#allocation46_spill] sm:$0xff] }
 0x1bd   : > { %v1034_v27 = vpop.f32.mrf.mxu2  ;;  %v1088_v11 = vadd.f32 %v7310_v57, %v683_v32  ;;  %v716_v53 = vadd.f32 %v6968_v33, %v10466_v28  ;;  %v1794_v57 = vmul.f32 %v5501_v15, %v6532_v44  ;;  %v10468_v33 = vld [vmem:[#allocation27_spill] sm:$0xff]  ;;  %v5300_v15 = vld [vmem:[%s10171_s2 + $0x388] sm:$0xff] }
 0x1be   : > { %v7528_v55 = vadd.f32 %v1034_v27, %v713_v18  ;;  %v7538_v26 = vpop.f32.mrf.mxu0  ;;  %v7545_v18 = vpop.f32.mrf.mxu1  ;;  %2049 = vmatpush.msra.mxu3 %v5300_v15 }
 0x1bf   : > { %10464 = vst [vmem:[#allocation81_spill] sm:$0xff] %v7538_v26 }
 0x1c0   : > { %1277 = vmatmul.f32.gmra.mxu3 %v10463_v12 }
 0x1c1   : > { %2280 = vmatmul.f32.gmra.mxu0 %v10465_v2  ;;  %v719_v2 = vadd.f32 %v7004_v45, %v10469_v24  ;;  %v5504_v24 = vld [vmem:[%s5917_s20 + $0x40] sm:$0xff] }
 0x1c2   : > { %1860 = vmatmul.f32.gmra.mxu2 %v1793_v30  ;;  %v2214_v30 = vmul.f32 %v5500_v56, %v6430_v60  ;;  %v5503_v56 = vld [vmem:[%s5917_s20 + $0x3a] sm:$0xff] }
 0x1c3   : > { %1682 = vmatmul.f32.gmra.mxu1 %v7020_v21  ;;  %v1230_v49 = vpop.f32.mrf.mxu3  ;;  %v10467_v21 = vld [vmem:[#allocation70_spill] sm:$0xff] }
 0x1c4   : > { %v7547_v6 = vadd.f32 %v1230_v49, %v1088_v11  ;;  %v686_v32 = vadd.f32 %v7405_v52, %v10467_v21  ;;  %v5502_v49 = vld [vmem:[%s5917_s20 + $0x38] sm:$0xff] }
 0x1c5   : > { %v1037_v27 = vpop.f32.mrf.mxu2 }
 0x1c6   : > { %v7549_v47 = vadd.f32 %v1037_v27, %v716_v53  ;;  %v1089_v12 = vadd.f32 %v7330_v48, %v686_v32  ;;  %v7562_v60 = vpop.f32.mrf.mxu0  ;;  %v7568_v52 = vpop.f32.mrf.mxu1  ;;  %v1795_v27 = vmul.f32 %v5502_v49, %v6540_v9  ;;  %v10471_v48 = vld [vmem:[#allocation76_spill] sm:$0xff] }
 0x1c7   : > { %10470 = vst [vmem:[#allocation49_spill] sm:$0xff] %v7562_v60  ;;  %v689_v45 = vadd.f32 %v7447_v40, %v10471_v48  ;;  %v10473_v9 = vld [vmem:[#allocation52_spill] sm:$0xff] }
 0x1c8   : > { %1280 = vmatmul.f32.gmra.mxu3 %v10468_v33 }
 0x1c9   : > { %2283 = vmatmul.f32.gmra.mxu0 %v2214_v30  ;;  %v10472_v30 = vld [vmem:[#allocation13_spill] sm:$0xff] }
 0x1ca   : > { %1863 = vmatmul.f32.gmra.mxu2 %v1794_v57  ;;  %v1090_v57 = vadd.f32 %v7346_v5, %v689_v45 }
 0x1cb   : > { %1685 = vmatmul.f32.gmra.mxu1 %v7032_v54  ;;  %v1233_v11 = vpop.f32.mrf.mxu3  ;;  %v2215_v54 = vmul.f32 %v5503_v56, %v6467_v7  ;;  %v722_v7 = vadd.f32 %v7041_v31, %v10473_v9  ;;  %v10476_v31 = vld [vmem:[#allocation33_spill] sm:$0xff]  ;;  %v10477_v56 = vld [vmem:[#allocation59_spill] sm:$0xff] }
 0x1cc   : > { %v7564_v28 = vadd.f32 %v1233_v11, %v1089_v12  ;;  %v5505_v11 = vld [vmem:[%s5917_s20 + $0x42] sm:$0xff] }
 0x1cd   : > { %v1040_v44 = vpop.f32.mrf.mxu2  ;;  %v2216_v5 = vmul.f32 %v5505_v11, %v6562_v25  ;;  %v10482_v11 = vld [vmem:[#allocation51_spill] sm:$0xff] }
 0x1ce   : > { %v7566_v53 = vadd.f32 %v1040_v44, %v719_v2  ;;  %v7586_v33 = vpop.f32.mrf.mxu0  ;;  %v1796_v2 = vmul.f32 %v5504_v24, %v6495_v61  ;;  %v7596_v49 = vpop.f32.mrf.mxu1 }
 0x1cf   : > { %10474 = vst [vmem:[#allocation22_spill] sm:$0xff] %v7586_v33 }
 0x1d0   : > { %1283 = vmatmul.f32.gmra.mxu3 %v10472_v30 }
 0x1d1   : > { %2286 = vmatmul.f32.gmra.mxu0 %v2215_v54  ;;  %v725_v54 = vadd.f32 %v7072_v50, %v10477_v56  ;;  %v5299_v50 = vld [vmem:[%s10171_s2 + $0x380] sm:$0xff]  ;;  %v10488_v56 = vld [vmem:[#allocation69_spill] sm:$0xff] }
 0x1d2   : > { %1866 = vmatmul.f32.gmra.mxu2 %v1795_v27  ;;  %2050 = vmatpush.msra.mxu3 %v5299_v50 }
 0x1d3   : > { %1688 = vmatmul.f32.gmra.mxu1 %v7066_v38  ;;  %v1236_v21 = vpop.f32.mrf.mxu3  ;;  %v10475_v38 = vld [vmem:[#allocation80_spill] sm:$0xff] }
 0x1d4   : > { %v7584_v32 = vadd.f32 %v1236_v21, %v1090_v57  ;;  %v692_v44 = vadd.f32 %v7474_v14, %v10475_v38  ;;  %v5506_v14 = vld [vmem:[%s5917_s20 + $0x48] sm:$0xff]  ;;  %v10479_v57 = vld [vmem:[#allocation31_spill] sm:$0xff]  ;;  %v10483_v38 = vld [vmem:[#allocation88_spill] sm:$0xff] }
 0x1d5   : > { %v1043_v40 = vpop.f32.mrf.mxu2  ;;  %v1797_v30 = vmul.f32 %v5506_v14, %v6529_v3  ;;  %v10481_v3 = vld [vmem:[#allocation63_spill] sm:$0xff] }
 0x1d6   : > { %v7588_v12 = vadd.f32 %v1043_v40, %v722_v7  ;;  %v1091_v27 = vadd.f32 %v7365_v35, %v692_v44  ;;  %v7609_v15 = vpop.f32.mrf.mxu0  ;;  %v695_v35 = vadd.f32 %v7499_v51, %v6874_v1  ;;  %v7619_v7 = vpop.f32.mrf.mxu1  ;;  %v728_v21 = vadd.f32 %v7100_v10, %v10481_v3  ;;  %v10484_v44 = vld [vmem:[#allocation17_spill] sm:$0xff]  ;;  %v10492_v3 = vld [vmem:[#allocation68_spill] sm:$0xff] }
 0x1d7   : > { %10478 = vst [vmem:[#allocation53_spill] sm:$0xff] %v7609_v15  ;;  %v2914_v15 = vld [vmem:[#allocation3 + $0xd8] sm:$0xff] }
 0x1d8   : > { %1286 = vmatmul.f32.gmra.mxu3 %v10476_v31  ;;  %v1092_v9 = vadd.f32 %v7380_v16, %v695_v35  ;;  %v698_v16 = vadd.f32 %v7521_v0, %v10483_v38  ;;  %v10486_v31 = vld [vmem:[#allocation62_spill] sm:$0xff] }
 0x1d9   : > { %2289 = vmatmul.f32.gmra.mxu0 %v2216_v5 }
 0x1da   : > { %1869 = vmatmul.f32.gmra.mxu2 %v1796_v2  ;;  %v5507_v2 = vld [vmem:[%s5917_s20 + $0x52] sm:$0xff]  ;;  %v1093_v10 = vadd.f32 %v7417_v13, %v698_v16  ;;  %v10491_v13 = vld [vmem:[#allocation37_spill] sm:$0xff] }
 0x1db   : > { %1691 = vmatmul.f32.gmra.mxu1 %v7090_v58  ;;  %v1239_v61 = vpop.f32.mrf.mxu3  ;;  %v10480_v58 = vld [vmem:[#allocation57_spill] sm:$0xff]  ;;  %v2218_v5 = vmul.f32 %v5507_v2, %v10482_v11 }
 0x1dc   : > { %v7603_v48 = vadd.f32 %v1239_v61, %v1091_v27  ;;  %v10487_v27 = vld [vmem:[#allocation110_spill] sm:$0xff]  ;;  %v10495_v2 = vld [vmem:[#allocation113_spill] sm:$0xff] }
 0x1dd   : > { %v1046_v25 = vpop.f32.mrf.mxu2 }
 0x1de   : > { %v7605_v45 = vadd.f32 %v1046_v25, %v725_v54  ;;  %v10489_v54 = vld [vmem:[#allocation109_spill] sm:$0xff]  ;;  %v7640_v14 = vpop.f32.mrf.mxu1 }
 0x1df   : > { %v731_v61 = vadd.f32 %v10489_v54, %v10488_v56  ;;  %v10500_v56 = vld [vmem:[#allocation55_spill] sm:$0xff] }
 0x1e0   : > { %1289 = vmatmul.f32.gmra.mxu3 %v10479_v57  ;;  %v5508_v57 = vld [vmem:[%s5917_s20 + $0x5a] sm:$0xff] }
 0x1e1   : > { %2292 = vmatmul.f32.gmra.mxu0 %v10480_v58  ;;  %v2219_v50 = vmul.f32 %v5508_v57, %v10429_v4  ;;  %v10490_v58 = vld [vmem:[#allocation91_spill] sm:$0xff] }
 0x1e2   : > { %1872 = vmatmul.f32.gmra.mxu2 %v1797_v30 }
 0x1e3   : > { %1694 = vmatmul.f32.gmra.mxu1 %v7120_v19  ;;  %v1242_v1 = vpop.f32.mrf.mxu3  ;;  %v7633_v19 = vpop.f32.mrf.mxu0 }
 0x1e4   : > { %v7624_v51 = vadd.f32 %v1242_v1, %v1092_v9  ;;  %10485 = vst [vmem:[#allocation9_spill] sm:$0xff] %v7633_v19  ;;  %v701_v9 = vadd.f32 %v7545_v18, %v10490_v58  ;;  %v10493_v1 = vld [vmem:[#allocation117_spill] sm:$0xff] }
 0x1e5   : > { %v1049_v40 = vpop.f32.mrf.mxu2  ;;  %v5533_v19 = vld [vmem:[%s10169_s0 + $0x88] sm:$0xff] }
 0x1e6   : > { %v7626_v24 = vadd.f32 %v1049_v40, %v728_v21  ;;  %v1094_v21 = vadd.f32 %v7453_v39, %v701_v9  ;;  %v10494_v40 = vld [vmem:[#allocation75_spill] sm:$0xff] }
 0x1e7   : > { %v734_v11 = vadd.f32 %v10495_v2, %v10494_v40  ;;  %v10498_v39 = vld [vmem:[#allocation35_spill] sm:$0xff]  ;;  %v10506_v40 = vld [vmem:[#allocation98_spill] sm:$0xff] }
 0x1e8   : > { %1292 = vmatmul.f32.gmra.mxu3 %v10484_v44  ;;  %v7662_v44 = vpop.f32.mrf.mxu1 }
 0x1e9   : > { %2295 = vmatmul.f32.gmra.mxu0 %v2218_v5 }
 0x1ea   : > { %1875 = vmatmul.f32.gmra.mxu2 %v10486_v31  ;;  %v10497_v31 = vld [vmem:[#allocation95_spill] sm:$0xff] }
 0x1eb   : > { %1697 = vmatmul.f32.gmra.mxu1 %v10487_v27  ;;  %v1245_v25 = vpop.f32.mrf.mxu3  ;;  %v7656_v5 = vpop.f32.mrf.mxu0  ;;  %v10499_v27 = vld [vmem:[#allocation58_spill] sm:$0xff] }
 0x1ec   : > { %v7642_v30 = vadd.f32 %v1245_v25, %v1093_v10  ;;  %10496 = vst [vmem:[#allocation26_spill] sm:$0xff] %v7656_v5  ;;  %v704_v10 = vadd.f32 %v7568_v52, %v10497_v31  ;;  %v10502_v25 = vld [vmem:[#allocation79_spill] sm:$0xff]  ;;  %v10509_v31 = vld [vmem:[#allocation114_spill] sm:$0xff] }
 0x1ed   : > { %v1052_v0 = vpop.f32.mrf.mxu2  ;;  %v8081_v5 = vld [vmem:[%s10169_s0 + $0xb8] sm:$0xff] }
 0x1ee   : > { %v7644_v35 = vadd.f32 %v1052_v0, %v731_v61  ;;  %v1095_v54 = vadd.f32 %v7472_v43, %v704_v10  ;;  %v10501_v61 = vld [vmem:[#allocation124_spill] sm:$0xff]  ;;  %v10503_v0 = vld [vmem:[#allocation119_spill] sm:$0xff]  ;;  %v707_v43 = vadd.f32 %v7596_v49, %v10506_v40  ;;  %v5510_v49 = vld [vmem:[%s5917_s20 + $0x108] sm:$0xff] }
 0x1ef   : > { %v737_v57 = vadd.f32 %v10503_v0, %v10502_v25  ;;  %v10510_v10 = vld [vmem:[#allocation84_spill] sm:$0xff]  ;;  %v10512_v0 = vld [vmem:[#allocation39_spill] sm:$0xff] }
 0x1f0   : > { %1295 = vmatmul.f32.gmra.mxu3 %v10491_v13  ;;  %v7683_v2 = vpop.f32.mrf.mxu1 }
 0x1f1   : > { %2298 = vmatmul.f32.gmra.mxu0 %v2219_v50 }
 0x1f2   : > { %1878 = vmatmul.f32.gmra.mxu2 %v10492_v3  ;;  %v5509_v3 = vld [vmem:[%s5917_s20 + $0x100] sm:$0xff] }
 0x1f3   : > { %1700 = vmatmul.f32.gmra.mxu1 %v10493_v1  ;;  %v1248_v38 = vpop.f32.mrf.mxu3  ;;  %v7675_v13 = vpop.f32.mrf.mxu0 }
 0x1f4   : > { %v7658_v16 = vadd.f32 %v1248_v38, %v1094_v21  ;;  %10504 = vst [vmem:[#allocation41_spill] sm:$0xff] %v7675_v13  ;;  %v10505_v21 = vld [vmem:[#allocation21_spill] sm:$0xff]  ;;  %v10508_v38 = vld [vmem:[#allocation74_spill] sm:$0xff] }
 0x1f5   : > { %v1055_v4 = vpop.f32.mrf.mxu2  ;;  %v1176_v1 = vmul.f32 %v5509_v3, %v10505_v21  ;;  %v10515_v3 = vld [vmem:[#allocation66_spill] sm:$0xff] }
 0x1f6   : > { %v7660_v18 = vadd.f32 %v1055_v4, %v734_v11  ;;  %v10507_v11 = vld [vmem:[#allocation61_spill] sm:$0xff]  ;;  %v1096_v4 = vadd.f32 %v7490_v29, %v707_v43 }
 0x1f8   : > { %1298 = vmatmul.f32.gmra.mxu3 %v10498_v39  ;;  %v10511_v39 = vld [vmem:[#allocation126_spill] sm:$0xff]  ;;  %v7704_v43 = vpop.f32.mrf.mxu1 }
 0x1f9   : > { %2301 = vmatmul.f32.gmra.mxu0 %v10500_v56 }
 0x1fa   : > { %1881 = vmatmul.f32.gmra.mxu2 %v10499_v27  ;;  %v740_v27 = vadd.f32 %v10511_v39, %v10510_v10 }
 0x1fb   : > { %1703 = vmatmul.f32.gmra.mxu1 %v10501_v61  ;;  %v1251_v50 = vpop.f32.mrf.mxu3 }
 0x1fc   : > { %v7673_v58 = vadd.f32 %v1251_v50, %v1095_v54  ;;  %v7697_v50 = vpop.f32.mrf.mxu0 }
 0x1fd   : > { %v1058_v9 = vpop.f32.mrf.mxu2  ;;  %10513 = vst [vmem:[#allocation60_spill] sm:$0xff] %v7697_v50 }
 0x1fe   : > { %v7677_v52 = vadd.f32 %v1058_v9, %v737_v57  ;;  %v1177_v57 = vmul.f32 %v5510_v49, %v10512_v0  ;;  %v10514_v9 = vld [vmem:[#allocation102_spill] sm:$0xff]  ;;  %v10522_v49 = vld [vmem:[#allocation72_spill] sm:$0xff] }
 0x1ff   : > { %v710_v29 = vadd.f32 %v7619_v7, %v10514_v9  ;;  %v10524_v9 = vld [vmem:[#allocation89_spill] sm:$0xff] }
 0x200   : > { %1301 = vmatmul.f32.gmra.mxu3 %v1176_v1  ;;  %v10516_v1 = vld [vmem:[#allocation78_spill] sm:$0xff] }
 0x201   : > { %2304 = vmatmul.f32.gmra.mxu0 %v10508_v38  ;;  %v1097_v40 = vadd.f32 %v7509_v36, %v710_v29  ;;  %v10518_v38 = vld [vmem:[#allocation86_spill] sm:$0xff]  ;;  %v10521_v36 = vld [vmem:[#allocation85_spill] sm:$0xff]  ;;  %v746_v29 = vadd.f32 %v7308_v8, %v10524_v9 }
 0x202   : > { %1884 = vmatmul.f32.gmra.mxu2 %v10507_v11  ;;  %v10517_v11 = vld [vmem:[#allocation129_spill] sm:$0xff] }
 0x203   : > { %1706 = vmatmul.f32.gmra.mxu1 %v10509_v31  ;;  %v1254_v56 = vpop.f32.mrf.mxu3  ;;  %v10527_v8 = vld [vmem:[#allocation121_spill] sm:$0xff] }
 0x204   : > { %v7691_v54 = vadd.f32 %v1254_v56, %v1096_v4  ;;  %v10519_v4 = vld [vmem:[#allocation65_spill] sm:$0xff] }
 0x205   : > { %v1061_v61 = vpop.f32.mrf.mxu2  ;;  %v743_v31 = vadd.f32 %v10519_v4, %v10518_v38  ;;  %v1986_v56 = vld [vmem:[%s5917_s20 + $0x21] sm:$0xff]  ;;  %v1987_v4 = vld [vmem:[%s5917_s20 + $0x29] sm:$0xff] }
 0x206   : > { %v7693_v25 = vadd.f32 %v1061_v61, %v740_v27  ;;  %v7714_v61 = vpop.f32.mrf.mxu0 }
 0x207   : > { %10520 = vst [vmem:[#allocation11_spill] sm:$0xff] %v7714_v61 }
 0x208   : > { %1304 = vmatmul.f32.gmra.mxu3 %v1177_v57  ;;  %v10523_v57 = vld [vmem:[#allocation56_spill] sm:$0xff] }
 0x209   : > { %2307 = vmatmul.f32.gmra.mxu0 %v10516_v1  ;;  %v7721_v1 = vpop.f32.mrf.mxu1 }
 0x20a   : > { %1887 = vmatmul.f32.gmra.mxu2 %v10515_v3 }
 0x20b   : > { %1709 = vmatmul.f32.gmra.mxu1 %v10517_v11  ;;  %v1257_v10 = vpop.f32.mrf.mxu3 }
 0x20c   : > { %v7709_v39 = vadd.f32 %v1257_v10, %v1097_v40  ;;  %v10525_v10 = vld [vmem:[#allocation87_spill] sm:$0xff] }
 0x20d   : > { %v1064_v7 = vpop.f32.mrf.mxu2 }
 0x20e   : > { %v7711_v27 = vadd.f32 %v1064_v7, %v743_v31  ;;  %v5511_v31 = vld [vmem:[%s5917_s20 + $0x80] sm:$0xff] }
 0x20f   : > { %v1804_v7 = vmul.f32 %v5511_v31, %v10525_v10  ;;  %v5512_v31 = vld [vmem:[%s5917_s20 + $0x88] sm:$0xff]  ;;  %v10531_v10 = vld [vmem:[#allocation83_spill] sm:$0xff] }
 0x210   : > { %2051 = vmatmul.f32.vlgmr.msra.gmra.mxu3 %v1986_v56  ;;  %v10526_v56 = vld [vmem:[#allocation77_spill] sm:$0xff] }
 0x211   : > { %2310 = vmatmul.f32.gmra.mxu0 %v10522_v49 }
 0x212   : > { %1890 = vmatmul.f32.gmra.mxu2 %v10521_v36  ;;  %v10528_v36 = vld [vmem:[#allocation94_spill] sm:$0xff] }
 0x213   : > { %1712 = vmatmul.f32.gmra.mxu1 %v10523_v57  ;;  %v1260_v3 = vpop.f32.mrf.mxu3  ;;  %v749_v49 = vadd.f32 %v7328_v59, %v10528_v36  ;;  %v1595_v59 = vmul.f32 %v7449_v62, %v7277_v46  ;;  %v1989_v46 = vld [vmem:[%s5917_s20 + $0x39] sm:$0xff] }
 0x214   : > { %v7724_v40 = vadd.f32 %v1260_v3, %v7528_v55  ;;  %v7735_v55 = vpop.f32.mrf.mxu0 }
 0x215   : > { %v1067_v11 = vpop.f32.mrf.mxu2  ;;  %10529 = vst [vmem:[#allocation42_spill] sm:$0xff] %v7735_v55 }
 0x216   : > { %v7726_v38 = vadd.f32 %v1067_v11, %v746_v29  ;;  %v1988_v11 = vld [vmem:[%s5917_s20 + $0x31] sm:$0xff] }
 0x218   : > { %2054 = vmatmul.f32.gmra.mxu3 %v1987_v4  ;;  %v7743_v4 = vpop.f32.mrf.mxu1 }
 0x219   : > { %2313 = vmatmul.f32.gmra.mxu0 %v10526_v56  ;;  %v10532_v56 = vld [vmem:[#allocation82_spill] sm:$0xff] }
 0x21a   : > { %1893 = vmatmul.f32.gmra.mxu2 %v1804_v7  ;;  %v1805_v7 = vmul.f32 %v5512_v31, %v10531_v10 }
 0x21b   : > { %1715 = vmatmul.f32.gmra.mxu1 %v10527_v8  ;;  %v1263_v57 = vpop.f32.mrf.mxu3  ;;  %v10534_v8 = vld [vmem:[#allocation54_spill] sm:$0xff] }
 0x21c   : > { %v7738_v9 = vadd.f32 %v1263_v57, %v7549_v47  ;;  %v10533_v47 = vld [vmem:[#allocation97_spill] sm:$0xff]  ;;  %v1774_v57 = vld [vmem:[%s5917_s20 + $0x90] sm:$0xff]  ;;  %v7756_v31 = vpop.f32.mrf.mxu0 }
 0x21d   : > { %v1070_v29 = vpop.f32.mrf.mxu2  ;;  %v752_v36 = vadd.f32 %v10534_v8, %v10533_v47  ;;  %10536 = vst [vmem:[#allocation29_spill] sm:$0xff] %v7756_v31  ;;  %v10539_v8 = vld [vmem:[#allocation92_spill] sm:$0xff] }
 0x21e   : > { %10530 = vst [vmem:[#allocation45_spill] sm:$0xff] %v7738_v9  ;;  %v7740_v3 = vadd.f32 %v1070_v29, %v749_v49 }
 0x220   : > { %2057 = vmatmul.f32.gmra.mxu3 %v1988_v11  ;;  %v10537_v11 = vld [vmem:[#allocation90_spill] sm:$0xff]  ;;  %v7764_v47 = vpop.f32.mrf.mxu1 }
 0x221   : > { %2316 = vmatmul.f32.gmra.mxu0 %v10532_v56 }
 0x222   : > { %1896 = vmatmul.f32.gmra.mxu2 %v1805_v7  ;;  %v1806_v7 = vmul.f32 %v1774_v57, %v10537_v11  ;;  %v7774_v57 = vld [vmem:[%s5917_s20 + $0x10a] sm:$0xff] }
 0x223   : > { %1718 = vmatmul.f32.gmra.mxu1 %v1595_v59  ;;  %v1266_v49 = vpop.f32.mrf.mxu3  ;;  %v10538_v59 = vld [vmem:[#allocation120_spill] sm:$0xff] }
 0x224   : > { %v7754_v29 = vadd.f32 %v1266_v49, %v7566_v53  ;;  %v1596_v56 = vmul.f32 %v10538_v59, %v7468_v42  ;;  %v10540_v53 = vld [vmem:[#allocation101_spill] sm:$0xff] }
 0x225   : > { %v1073_v55 = vpop.f32.mrf.mxu2  ;;  %v755_v49 = vadd.f32 %v7363_v20, %v10540_v53  ;;  %v1990_v59 = vld [vmem:[%s5917_s20 + $0x41] sm:$0xff] }
 0x226   : > { %10535 = vst [vmem:[#allocation64_spill] sm:$0xff] %v7754_v29  ;;  %v7758_v10 = vadd.f32 %v1073_v55, %v752_v36  ;;  %v1775_v55 = vld [vmem:[%s5917_s20 + $0x98] sm:$0xff]  ;;  %v10543_v20 = vld [vmem:[#allocation96_spill] sm:$0xff]  ;;  %v8141_v29 = vld [vmem:[%s10169_s0 + $0xf0] sm:$0xff] }
 0x228   : > { %2060 = vmatmul.f32.gmra.mxu3 %v1989_v46  ;;  %v1807_v46 = vmul.f32 %v1775_v55, %v6989_v34  ;;  %v1991_v55 = vld [vmem:[%s5917_s20 + $0x49] sm:$0xff] }
 0x229   : > { %2319 = vmatmul.f32.gmra.mxu0 %v10539_v8 }
 0x22a   : > { %1899 = vmatmul.f32.gmra.mxu2 %v1806_v7  ;;  %v7780_v7 = vpop.f32.mrf.mxu0 }
 0x22b   : > { %1721 = vmatmul.f32.gmra.mxu1 %v1596_v56  ;;  %v1269_v31 = vpop.f32.mrf.mxu3  ;;  %10542 = vst [vmem:[#allocation46_spill] sm:$0xff] %v7780_v7  ;;  %v1597_v56 = vmul.f32 %v7774_v57, %v7486_v63  ;;  %v10548_v7 = vld [vmem:[#allocation20_spill] sm:$0xff] }
 0x22c   : > { %v7771_v36 = vadd.f32 %v1269_v31, %v7588_v12  ;;  %v7785_v12 = vpop.f32.mrf.mxu1  ;;  %v10544_v31 = vld [vmem:[#allocation104_spill] sm:$0xff] }
 0x22d   : > { %v1076_v61 = vpop.f32.mrf.mxu2  ;;  %v758_v8 = vadd.f32 %v7378_v41, %v10544_v31 }
 0x22e   : > { %10541 = vst [vmem:[#allocation44_spill] sm:$0xff] %v7771_v36  ;;  %v7776_v11 = vadd.f32 %v1076_v61, %v755_v49  ;;  %v2012_v36 = vld [vmem:[%s5917_s20 + $0xf1] sm:$0xff] }
 0x230   : > { %2063 = vmatmul.f32.gmra.mxu3 %v1990_v59  ;;  %v10546_v59 = vld [vmem:[#allocation105_spill] sm:$0xff] }
 0x231   : > { %2322 = vmatmul.f32.gmra.mxu0 %v10543_v20 }
 0x232   : > { %1902 = vmatmul.f32.gmra.mxu2 %v1807_v46  ;;  %v1502_v46 = vadd.f32 %v10546_v59, %v7415_v17  ;;  %v7797_v20 = vpop.f32.mrf.mxu0  ;;  %v10552_v17 = vld [vmem:[#allocation107_spill] sm:$0xff] }
 0x233   : > { %1724 = vmatmul.f32.gmra.mxu1 %v1597_v56  ;;  %v1272_v61 = vpop.f32.mrf.mxu3  ;;  %10547 = vst [vmem:[#allocation27_spill] sm:$0xff] %v7797_v20  ;;  %v10549_v56 = vld [vmem:[#allocation93_spill] sm:$0xff] }
 0x234   : > { %v7790_v53 = vadd.f32 %v1272_v61, %v7605_v45  ;;  %v1728_v41 = vadd.f32 %v7640_v14, %v1502_v46  ;;  %v10553_v20 = vld [vmem:[#allocation25_spill] sm:$0xff] }
 0x235   : > { %v1079_v34 = vpop.f32.mrf.mxu2 }
 0x236   : > { %10545 = vst [vmem:[#allocation70_spill] sm:$0xff] %v7790_v53  ;;  %v7792_v49 = vadd.f32 %v1079_v34, %v758_v8  ;;  %v1992_v34 = vld [vmem:[%s5917_s20 + $0x51] sm:$0xff] }
 0x238   : > { %2066 = vmatmul.f32.gmra.mxu3 %v1991_v55  ;;  %v10551_v55 = vld [vmem:[#allocation19_spill] sm:$0xff] }
 0x239   : > { %2325 = vmatmul.f32.gmra.mxu0 %v10549_v56  ;;  %v1503_v59 = vadd.f32 %v10552_v17, %v10551_v55  ;;  %v10558_v55 = vld [vmem:[#allocation112_spill] sm:$0xff] }
 0x23a   : > { %1905 = vmatmul.f32.gmra.mxu2 %v10548_v7  ;;  %v10554_v7 = vld [vmem:[#allocation99_spill] sm:$0xff]  ;;  %v7813_v14 = vpop.f32.mrf.mxu0 }
 0x23b   : > { %v1275_v31 = vpop.f32.mrf.mxu3  ;;  %v1729_v56 = vadd.f32 %v7662_v44, %v1503_v59  ;;  %10555 = vst [vmem:[#allocation76_spill] sm:$0xff] %v7813_v14 }
 0x23c   : > { %v7803_v45 = vadd.f32 %v1275_v31, %v7626_v24 }
 0x23d   : > { %v1858_v8 = vpop.f32.mrf.mxu2 }
 0x23e   : > { %10550 = vst [vmem:[#allocation48_spill] sm:$0xff] %v7803_v45  ;;  %v7805_v61 = vadd.f32 %v1858_v8, %v1728_v41  ;;  %v1993_v8 = vld [vmem:[%s5917_s20 + $0x59] sm:$0xff]  ;;  %v8104_v45 = vld [vmem:[%s10169_s0 + $0xc8] sm:$0xff] }
 0x240   : > { %2069 = vmatmul.f32.gmra.mxu3 %v1992_v34  ;;  %v10557_v34 = vld [vmem:[#allocation43_spill] sm:$0xff] }
 0x241   : > { %2328 = vmatmul.f32.gmra.mxu0 %v10554_v7  ;;  %v1504_v17 = vadd.f32 %v10558_v55, %v10557_v34  ;;  %v10560_v7 = vld [vmem:[#allocation100_spill] sm:$0xff] }
 0x242   : > { %1908 = vmatmul.f32.gmra.mxu2 %v10553_v20  ;;  %v10559_v20 = vld [vmem:[#allocation16_spill] sm:$0xff] }
 0x243   : > { %v1278_v46 = vpop.f32.mrf.mxu3  ;;  %v1730_v44 = vadd.f32 %v7683_v2, %v1504_v17  ;;  %v10564_v34 = vld [vmem:[#allocation116_spill] sm:$0xff] }
 0x244   : > { %v7816_v24 = vadd.f32 %v1278_v46, %v7644_v35  ;;  %v7829_v46 = vpop.f32.mrf.mxu0 }
 0x245   : > { %v1861_v41 = vpop.f32.mrf.mxu2  ;;  %10562 = vst [vmem:[#allocation80_spill] sm:$0xff] %v7829_v46 }
 0x246   : > { %10556 = vst [vmem:[#allocation13_spill] sm:$0xff] %v7816_v24  ;;  %v7818_v31 = vadd.f32 %v1861_v41, %v1729_v56  ;;  %v1994_v41 = vld [vmem:[%s5917_s20 + $0x61] sm:$0xff]  ;;  %v2011_v24 = vld [vmem:[%s5917_s20 + $0xe9] sm:$0xff] }
 0x248   : > { %2072 = vmatmul.f32.gmra.mxu3 %v1993_v8  ;;  %v10563_v8 = vld [vmem:[#allocation47_spill] sm:$0xff] }
 0x249   : > { %2331 = vmatmul.f32.gmra.mxu0 %v10560_v7  ;;  %v1505_v55 = vadd.f32 %v10564_v34, %v10563_v8  ;;  %v10566_v7 = vld [vmem:[#allocation103_spill] sm:$0xff]  ;;  %v10569_v34 = vld [vmem:[#allocation10_spill] sm:$0xff] }
 0x24a   : > { %1911 = vmatmul.f32.gmra.mxu2 %v10559_v20  ;;  %v10565_v20 = vld [vmem:[#allocation23_spill] sm:$0xff] }
 0x24b   : > { %v1281_v59 = vpop.f32.mrf.mxu3  ;;  %v1731_v2 = vadd.f32 %v7704_v43, %v1505_v55 }
 0x24c   : > { %v7827_v14 = vadd.f32 %v1281_v59, %v7660_v18 }
 0x24d   : > { %v1864_v35 = vpop.f32.mrf.mxu2 }
 0x24e   : > { %10561 = vst [vmem:[#allocation52_spill] sm:$0xff] %v7827_v14  ;;  %v7831_v56 = vadd.f32 %v1864_v35, %v1730_v44  ;;  %v1995_v44 = vld [vmem:[%s5917_s20 + $0x69] sm:$0xff]  ;;  %v7845_v35 = vpop.f32.mrf.mxu0  ;;  %v2010_v14 = vld [vmem:[%s5917_s20 + $0xe1] sm:$0xff] }
 0x250   : > { %2075 = vmatmul.f32.gmra.mxu3 %v1994_v41  ;;  %v10568_v41 = vld [vmem:[#allocation123_spill] sm:$0xff] }
 0x251   : > { %2334 = vmatmul.f32.gmra.mxu0 %v10566_v7  ;;  %v1506_v8 = vadd.f32 %v10568_v41, %v7507_v37  ;;  %v10573_v41 = vld [vmem:[#allocation12_spill] sm:$0xff] }
 0x252   : > { %1914 = vmatmul.f32.gmra.mxu2 %v10565_v20  ;;  %v10570_v20 = vld [vmem:[#allocation106_spill] sm:$0xff] }
 0x253   : > { %v1284_v17 = vpop.f32.mrf.mxu3  ;;  %v1732_v43 = vadd.f32 %v7721_v1, %v1506_v8 }
 0x254   : > { %v7840_v18 = vadd.f32 %v1284_v17, %v7677_v52  ;;  %v1996_v17 = vld [vmem:[%s5917_s20 + $0x71] sm:$0xff] }
 0x255   : > { %v1867_v59 = vpop.f32.mrf.mxu2 }
 0x256   : > { %10567 = vst [vmem:[#allocation33_spill] sm:$0xff] %v7840_v18  ;;  %v7842_v46 = vadd.f32 %v1867_v59, %v1731_v2  ;;  %v10572_v59 = vld [vmem:[#allocation127_spill] sm:$0xff]  ;;  %v7860_v37 = vpop.f32.mrf.mxu0  ;;  %v8062_v18 = vld [vmem:[%s10169_s0 + $0xa0] sm:$0xff] }
 0x258   : > { %2078 = vmatmul.f32.gmra.mxu3 %v1995_v44  ;;  %v1507_v44 = vadd.f32 %v10572_v59, %v7526_v23  ;;  %v5513_v23 = vld [vmem:[%s10169_s0 + $0x8] sm:$0xff]  ;;  %v10577_v59 = vld [vmem:[#allocation30_spill] sm:$0xff] }
 0x259   : > { %2337 = vmatmul.f32.gmra.mxu0 %v10570_v20 }
 0x25a   : > { %1917 = vmatmul.f32.gmra.mxu2 %v10569_v34  ;;  %v10574_v34 = vld [vmem:[#allocation108_spill] sm:$0xff]  ;;  %v1733_v1 = vadd.f32 %v7743_v4, %v1507_v44  ;;  %v10578_v44 = vld [vmem:[#allocation111_spill] sm:$0xff] }
 0x25b   : > { %v1287_v55 = vpop.f32.mrf.mxu3  ;;  %v10576_v4 = vld [vmem:[#allocation128_spill] sm:$0xff] }
 0x25c   : > { %v7853_v52 = vadd.f32 %v1287_v55, %v7693_v25  ;;  %v1997_v55 = vld [vmem:[%s5917_s20 + $0x79] sm:$0xff] }
 0x25d   : > { %v1870_v7 = vpop.f32.mrf.mxu2 }
 0x25e   : > { %10571 = vst [vmem:[#allocation59_spill] sm:$0xff] %v7853_v52  ;;  %v7855_v2 = vadd.f32 %v1870_v7, %v1732_v43  ;;  %v10195_v7 = vmov 2   ;;  %v5526_v52 = vld [vmem:[%s10169_s0 + $0x78] sm:$0xff] }
 0x25f   : > { %5455 = vset.pattern.permute.xlu1 %v10195_v7  ;;  %5453 = vset.pattern.permute.xlu2 %v10195_v7 }
 0x260   : > { %2081 = vmatmul.f32.gmra.mxu3 %v1996_v17  ;;  %2699 = vperm.xlu1 %5455, %v5513_v23   ;;  %v1508_v17 = vadd.f32 %v10576_v4, %v7547_v6  ;;  %v5515_v6 = vld [vmem:[%s10169_s0 + $0x10] sm:$0xff]  ;;  %v10580_v4 = vld [vmem:[#allocation131_spill] sm:$0xff] }
 0x261   : > { %2340 = vmatmul.f32.gmra.mxu0 %v10574_v34  ;;  %v7884_v34 = vpop.f32.mrf.mxu0 }
 0x262   : > { %1920 = vmatmul.f32.gmra.mxu2 %v10573_v41  ;;  %v1734_v41 = vadd.f32 %v7764_v47, %v1508_v17  ;;  %v1509_v47 = vadd.f32 %v10580_v4, %v7564_v28  ;;  %v10581_v17 = vld [vmem:[#allocation28_spill] sm:$0xff]  ;;  %v10584_v28 = vld [vmem:[#allocation14_spill] sm:$0xff]  ;;  %v10585_v4 = vld [vmem:[#allocation125_spill] sm:$0xff] }
 0x263   : > { %v1290_v8 = vpop.f32.mrf.mxu3 }
 0x264   : > { %v7866_v25 = vadd.f32 %v1290_v8, %v7711_v27  ;;  %v5514_v27 = vld [vmem:[%s10169_s0] sm:$0xff] }
 0x265   : > { %v1873_v20 = vpop.f32.mrf.mxu2  ;;  %2695 = vperm.xlu2 %5453, %v5514_v27  }
 0x266   : > { %10575 = vst [vmem:[#allocation31_spill] sm:$0xff] %v7866_v25  ;;  %v7868_v43 = vadd.f32 %v1873_v20, %v1733_v1  ;;  %v10197_v25 = vmov 3  }
 0x267   : > { %5454 = vset.pattern.permute.xlu0 %v10197_v25 }
 0x268   : > { %2084 = vmatmul.f32.gmra.mxu3 %v1997_v55  ;;  %v1998_v55 = vld [vmem:[%s5917_s20 + $0x81] sm:$0xff]  ;;  %2703 = vperm.xlu1 %5455, %v5515_v6  }
 0x269   : > { %2343 = vmatmul.f32.gmra.mxu0 %v10578_v44  ;;  %3178 = vperm.xlu0 %5454, %v5514_v27   ;;  %v10590_v27 = vmov 2  }
 0x26a   : > { %1923 = vmatmul.f32.gmra.mxu2 %v10577_v59  ;;  %v10582_v59 = vld [vmem:[#allocation118_spill] sm:$0xff] }
 0x26b   : > { %v1293_v1 = vpop.f32.mrf.mxu3 }
 0x26c   : > { %v7887_v8 = vadd.f32 %v1293_v1, %v7726_v38  ;;  %v1735_v38 = vadd.f32 %v7785_v12, %v1509_v47 }
 0x26d   : > { %v1876_v20 = vpop.f32.mrf.mxu2  ;;  %5456 = vset.pattern.permute.xlu2 %v10197_v25 }
 0x26e   : > { %10579 = vst [vmem:[#allocation57_spill] sm:$0xff] %v7887_v8  ;;  %v7889_v7 = vadd.f32 %v1876_v20, %v1734_v41  ;;  %v7903_v20 = vpop.f32.mrf.mxu0  ;;  %3182 = vperm.xlu2 %5456, %v5513_v23  }
 0x270   : > { %2087 = vmatmul.f32.gmra.mxu3 %v1998_v55  ;;  %v1999_v55 = vld [vmem:[%s5917_s20 + $0x89] sm:$0xff]  ;;  %5458 = vset.pattern.permute.xlu1 %v10197_v25 }
 0x271   : > { %2346 = vmatmul.f32.gmra.mxu0 %v10582_v59  ;;  %5457 = vset.pattern.permute.xlu0 %v10590_v27 }
 0x272   : > { %1926 = vmatmul.f32.gmra.mxu2 %v10581_v17  ;;  %v2000_v17 = vld [vmem:[%s5917_s20 + $0x91] sm:$0xff] }
 0x273   : > { %v1296_v44 = vpop.f32.mrf.mxu3 }
 0x274   : > { %v7901_v41 = vadd.f32 %v1296_v44, %v7740_v3  ;;  %v5516_v3 = vld [vmem:[%s10169_s0 + $0x18] sm:$0xff] }
 0x275   : > { %v1879_v1 = vpop.f32.mrf.mxu2  ;;  %3190 = vperm.xlu1 %5458, %v5516_v3   ;;  %v10588_v44 = vld [vmem:[#allocation115_spill] sm:$0xff]  ;;  %2707 = vperm.xlu0 %5457, %v5516_v3   ;;  %v2002_v3 = vld [vmem:[%s5917_s20 + $0xa1] sm:$0xff] }
 0x276   : > { %10583 = vst [vmem:[#allocation63_spill] sm:$0xff] %v7901_v41  ;;  %v7905_v8 = vadd.f32 %v1879_v1, %v1735_v38  ;;  %v7920_v59 = vpop.f32.mrf.mxu0  ;;  %v10587_v38 = vld [vmem:[#allocation34_spill] sm:$0xff]  ;;  %v5517_v1 = vld [vmem:[%s10169_s0 + $0x20] sm:$0xff]  ;;  %3186 = vperm.xlu2 %5456, %v5515_v6  }
 0x277   : > { %v5518_v6 = vld [vmem:[%s10169_s0 + $0x30] sm:$0xff] }
 0x278   : > { %2090 = vmatmul.f32.gmra.mxu3 %v1999_v55  ;;  %v2001_v55 = vld [vmem:[%s5917_s20 + $0x99] sm:$0xff] }
 0x279   : > { %2349 = vmatmul.f32.gmra.mxu0 %v10585_v4  ;;  %v10591_v4 = vld [vmem:[#allocation32_spill] sm:$0xff] }
 0x27a   : > { %1929 = vmatmul.f32.gmra.mxu2 %v10584_v28 }
 0x27b   : > { %v1299_v12 = vpop.f32.mrf.mxu3 }
 0x27c   : > { %v7917_v47 = vadd.f32 %v1299_v12, %v7758_v10  ;;  %v10592_v12 = vld [vmem:[#allocation130_spill] sm:$0xff] }
 0x27d   : > { %3194 = vperm.xlu1 %5458, %v5517_v1   ;;  %5460 = vset.pattern.permute.xlu0 %v10197_v25 }
 0x27e   : > { %10586 = vst [vmem:[#allocation51_spill] sm:$0xff] %v7917_v47  ;;  %v7932_v28 = vpop.f32.mrf.mxu0  ;;  %5459 = vset.pattern.permute.xlu2 %v10590_v27 }
 0x27f   : > { %2711 = vperm.xlu2 %5459, %v5517_v1  }
 0x280   : > { %2093 = vmatmul.f32.gmra.mxu3 %v2000_v17 }
 0x281   : > { %2352 = vmatmul.f32.gmra.mxu0 %v10588_v44  ;;  %v10594_v44 = vld [vmem:[#allocation18_spill] sm:$0xff] }
 0x282   : > { %1932 = vmatmul.f32.gmra.mxu2 %v10587_v38  ;;  %v5519_v38 = vld [vmem:[%s10169_s0 + $0x28] sm:$0xff] }
 0x283   : > { %v1302_v23 = vpop.f32.mrf.mxu3  ;;  %3198 = vperm.xlu0 %5460, %v5519_v38  }
 0x284   : > { %v7928_v10 = vadd.f32 %v1302_v23, %v7776_v11  ;;  %v10595_v23 = vld [vmem:[#allocation67_spill] sm:$0xff] }
 0x285   : > { %5461 = vset.pattern.permute.xlu1 %v10590_v27 }
 0x286   : > { %10589 = vst [vmem:[#allocation88_spill] sm:$0xff] %v7928_v10  ;;  %2719 = vperm.xlu1 %5461, %v5518_v6  }
 0x287   : > { %2715 = vperm.xlu2 %5459, %v5519_v38  }
 0x288   : > { %2096 = vmatmul.f32.gmra.mxu3 %v2001_v55  ;;  %v7951_v55 = vpop.f32.mrf.mxu0 }
 0x289   : > { %2355 = vmatmul.f32.gmra.mxu0 %v10592_v12  ;;  %v2003_v12 = vld [vmem:[%s5917_s20 + $0xa9] sm:$0xff] }
 0x28a   : > { %1935 = vmatmul.f32.gmra.mxu2 %v10591_v4 }
 0x28b   : > { %v1305_v17 = vpop.f32.mrf.mxu3  ;;  %5463 = vset.pattern.permute.xlu0 %v10590_v27 }
 0x28c   : > { %v7942_v11 = vadd.f32 %v1305_v17, %v7792_v49  ;;  %v5520_v49 = vld [vmem:[%s10169_s0 + $0x38] sm:$0xff]  ;;  %v5521_v17 = vld [vmem:[%s10169_s0 + $0x40] sm:$0xff] }
 0x28d   : > { %2727 = vperm.xlu0 %5463, %v5521_v17  }
 0x28e   : > { %10593 = vst [vmem:[#allocation17_spill] sm:$0xff] %v7942_v11  ;;  %2723 = vperm.xlu1 %5461, %v5520_v49   ;;  %v2210_v11 = vld [vmem:[%s5917_s20 + $0x112] sm:$0xff] }
 0x290   : > { %2099 = vmatmul.f32.gmra.mxu3 %v2002_v3  ;;  %v10596_v3 = vld [vmem:[#allocation38_spill] sm:$0xff] }
 0x291   : > { %2358 = vmatmul.f32.gmra.mxu0 %v10595_v23  ;;  %v2918_v23 = vld [vmem:[#allocation3 + $0xf8] sm:$0xff] }
 0x292   : > { %1938 = vmatmul.f32.gmra.mxu2 %v10594_v44  ;;  %v10597_v44 = vld [vmem:[#allocation122_spill] sm:$0xff]  ;;  %2919 = vmatpush.msra.mxu1 %v2918_v23  ;;  %v7979_v23 = vpop.f32.mrf.mxu2 }
 0x293   : > { %v2052_v4 = vpop.f32.mrf.mxu3 }
 0x294   : > { %v7957_v1 = vadd.f32 %v2052_v4, %v7805_v61  ;;  %v10598_v61 = vmov 3   ;;  %v7971_v4 = vpop.f32.mrf.mxu0 }
 0x295   : > { %5462 = vset.pattern.permute.xlu2 %v10598_v61  ;;  %5466 = vset.pattern.permute.xlu0 %v10598_v61 }
 0x296   : > { %5464 = vset.pattern.permute.xlu1 %v10598_v61  ;;  %3202 = vperm.xlu2 %5462, %v5518_v6  }
 0x297   : > { %3210 = vperm.xlu1 %5464, %v5521_v17   ;;  %v1790_v17 = vld [vmem:[%s5917_s20 + $0x110] sm:$0xff] }
 0x298   : > { %2102 = vmatmul.f32.gmra.mxu3 %v2003_v12  ;;  %v2004_v12 = vld [vmem:[%s5917_s20 + $0xb1] sm:$0xff] }
 0x299   : > { %2361 = vmatmul.f32.gmra.mxu0 %v10597_v44  ;;  %v2241_v44 = vmul.f32 %v7774_v57, %v7449_v62  ;;  %v5523_v62 = vld [vmem:[%s10169_s0 + $0x48] sm:$0xff]  ;;  %v2005_v57 = vld [vmem:[%s5917_s20 + $0xb9] sm:$0xff] }
 0x29a   : > { %1941 = vmatmul.f32.gmra.mxu2 %v10596_v3  ;;  %v7974_v3 = vpop.f32.mrf.mxu1 }
 0x29b   : > { %v2055_v25 = vpop.f32.mrf.mxu3 }
 0x29c   : > { %v7968_v38 = vadd.f32 %v2055_v25, %v7818_v31  ;;  %v5522_v31 = vld [vmem:[%s10169_s0 + $0x50] sm:$0xff]  ;;  %v10599_v25 = vld [vmem:[#allocation36_spill] sm:$0xff] }
 0x29d   : > { %3218 = vperm.xlu0 %5466, %v5522_v31  }
 0x29e   : > { %3206 = vperm.xlu2 %5462, %v5520_v49   ;;  %v5524_v49 = vld [vmem:[%s10169_s0 + $0x68] sm:$0xff] }
 0x29f   : > { %3214 = vperm.xlu1 %5464, %v5523_v62  }
 0x2a0   : > { %2105 = vmatmul.f32.gmra.mxu3 %v2004_v12  ;;  %v1822_v12 = vmul.f32 %v1790_v17, %v10505_v21 }
 0x2a1   : > { %2364 = vmatmul.f32.gmra.mxu0 %v2241_v44  ;;  %v7996_v44 = vpop.f32.mrf.mxu0 }
 0x2a2   : > { %1944 = vmatmul.f32.gmra.mxu2 %v10599_v25  ;;  %v2242_v25 = vmul.f32 %v2210_v11, %v7468_v42  ;;  %v7998_v47 = vpop.f32.mrf.mxu1  ;;  %v1791_v42 = vld [vmem:[%s5917_s20 + $0x118] sm:$0xff] }
 0x2a3   : > { %v2058_v6 = vpop.f32.mrf.mxu3  ;;  %v2211_v11 = vld [vmem:[%s5917_s20 + $0x11a] sm:$0xff] }
 0x2a4   : > { %v7988_v10 = vadd.f32 %v2058_v6, %v7831_v56  ;;  %v8001_v56 = vpop.f32.mrf.mxu2  ;;  %v2917_v6 = vld [vmem:[#allocation3 + $0xf0] sm:$0xff] }
 0x2a5   : > { %5469 = vset.pattern.permute.xlu0 %v10590_v27  ;;  %2920 = vmatpush.msra.mxu1 %v2917_v6  ;;  %v2243_v6 = vmul.f32 %v2211_v11, %v7486_v63  ;;  %v2916_v11 = vld [vmem:[#allocation3 + $0xe8] sm:$0xff] }
 0x2a6   : > { %2747 = vperm.xlu0 %5469, %v5524_v49   ;;  %5465 = vset.pattern.permute.xlu2 %v10590_v27 }
 0x2a7   : > { %5467 = vset.pattern.permute.xlu1 %v10590_v27  ;;  %2731 = vperm.xlu2 %5465, %v5523_v62  }
 0x2a8   : > { %2108 = vmatmul.f32.gmra.mxu3 %v2005_v57  ;;  %v2006_v57 = vld [vmem:[%s5917_s20 + $0xc1] sm:$0xff]  ;;  %2921 = vmatpush.msra.mxu1 %v2916_v11 }
 0x2a9   : > { %2367 = vmatmul.f32.gmra.mxu0 %v2242_v25  ;;  %v1823_v25 = vmul.f32 %v1791_v42, %v10512_v0  ;;  %v8019_v41 = vpop.f32.mrf.mxu0  ;;  %v2007_v0 = vld [vmem:[%s5917_s20 + $0xc9] sm:$0xff]  ;;  %v5527_v42 = vld [vmem:[%s10169_s0 + $0x60] sm:$0xff] }
 0x2aa   : > { %1947 = vmatmul.f32.gmra.mxu2 %v1822_v12  ;;  %v5525_v12 = vld [vmem:[%s10169_s0 + $0x58] sm:$0xff] }
 0x2ab   : > { %v2061_v21 = vpop.f32.mrf.mxu3  ;;  %2739 = vperm.xlu1 %5467, %v5525_v12  }
 0x2ac   : > { %v8009_v17 = vadd.f32 %v2061_v21, %v7842_v46  ;;  %v8021_v46 = vpop.f32.mrf.mxu1  ;;  %v8027_v62 = vpop.f32.mrf.mxu2 }
 0x2ae   : > { %5472 = vset.pattern.permute.xlu0 %v10598_v61 }
 0x2af   : > { %3238 = vperm.xlu0 %5472, %v5526_v52   ;;  %2735 = vperm.xlu2 %5465, %v5522_v31   ;;  %v2008_v31 = vld [vmem:[%s5917_s20 + $0xd1] sm:$0xff] }
 0x2b0   : > { %2111 = vmatmul.f32.gmra.mxu3 %v2006_v57 }
 0x2b1   : > { %2370 = vmatmul.f32.gmra.mxu0 %v2243_v6  ;;  %v8036_v57 = vpop.f32.mrf.mxu0 }
 0x2b2   : > { %1950 = vmatmul.f32.gmra.mxu2 %v1823_v25 }
 0x2b3   : > { %v2064_v21 = vpop.f32.mrf.mxu3  ;;  %2743 = vperm.xlu1 %5467, %v5527_v42  }
 0x2b4   : > { %v8030_v63 = vadd.f32 %v2064_v21, %v7855_v2  ;;  %v8039_v6 = vpop.f32.mrf.mxu1  ;;  %v5528_v21 = vld [vmem:[%s10169_s0 + $0x90] sm:$0xff] }
 0x2b7   : > { %5475 = vset.pattern.permute.xlu0 %v10590_v27  ;;  %5468 = vset.pattern.permute.xlu2 %v10598_v61 }
 0x2b8   : > { %2114 = vmatmul.f32.gmra.mxu3 %v2007_v0  ;;  %2767 = vperm.xlu0 %5475, %v5528_v21   ;;  %v8049_v0 = vpop.f32.mrf.mxu2 }
 0x2b9   : > { %3222 = vperm.xlu2 %5468, %v5525_v12  }
 0x2bb   : > { %v2067_v25 = vpop.f32.mrf.mxu3  ;;  %5470 = vset.pattern.permute.xlu1 %v10598_v61 }
 0x2bc   : > { %v8042_v2 = vadd.f32 %v2067_v25, %v7868_v43  ;;  %3230 = vperm.xlu1 %5470, %v5524_v49   ;;  %v8056_v43 = vpop.f32.mrf.mxu0  ;;  %v2009_v25 = vld [vmem:[%s5917_s20 + $0xd9] sm:$0xff]  ;;  %v8065_v49 = vpop.f32.mrf.mxu1 }
 0x2bd   : > { %10600 = vst [vmem:[#allocation62_spill] sm:$0xff] %v8056_v43  ;;  %v2912_v43 = vld [vmem:[#allocation3 + $0xc8] sm:$0xff] }
 0x2c0   : > { %2117 = vmatmul.f32.gmra.mxu3 %v2008_v31  ;;  %5478 = vset.pattern.permute.xlu0 %v10598_v61  ;;  %v8070_v12 = vpop.f32.mrf.mxu2  ;;  %v2915_v31 = vld [vmem:[#allocation3 + $0xe0] sm:$0xff] }
 0x2c1   : > { %3258 = vperm.xlu0 %5478, %v8062_v18   ;;  %3226 = vperm.xlu2 %5468, %v5527_v42  }
 0x2c2   : > { %2922 = vmatpush.msra.mxu1 %v2915_v31 }
 0x2c3   : > { %v2070_v11 = vpop.f32.mrf.mxu3 }
 0x2c4   : > { %v8053_v50 = vadd.f32 %v2070_v11, %v7889_v7  ;;  %v5530_v7 = vld [vmem:[%s10169_s0 + $0x70] sm:$0xff]  ;;  %v8084_v42 = vpop.f32.mrf.mxu0  ;;  %2923 = vmatpush.msra.mxu1 %v2914_v15 }
 0x2c5   : > { %3234 = vperm.xlu1 %5470, %v5530_v7   ;;  %10601 = vst [vmem:[#allocation110_spill] sm:$0xff] %v8084_v42 }
 0x2c8   : > { %2120 = vmatmul.f32.gmra.mxu3 %v2009_v25  ;;  %v5532_v25 = vld [vmem:[%s10169_s0 + $0x80] sm:$0xff]  ;;  %v8092_v31 = vpop.f32.mrf.mxu2 }
 0x2c9   : > { %5481 = vset.pattern.permute.xlu0 %v10590_v27  ;;  %5471 = vset.pattern.permute.xlu2 %v10590_v27 }
 0x2ca   : > { %2787 = vperm.xlu0 %5481, %v8081_v5   ;;  %2751 = vperm.xlu2 %5471, %v5530_v7  }
 0x2cb   : > { %v2073_v11 = vpop.f32.mrf.mxu3 }
 0x2cc   : > { %v8073_v13 = vadd.f32 %v2073_v11, %v7905_v8  ;;  %v8090_v8 = vpop.f32.mrf.mxu1 }
 0x2cd   : > { %5473 = vset.pattern.permute.xlu1 %v10590_v27 }
 0x2ce   : > { %2759 = vperm.xlu1 %5473, %v5532_v25  }
 0x2d0   : > { %2123 = vmatmul.f32.gmra.mxu3 %v2010_v14  ;;  %v8107_v14 = vpop.f32.mrf.mxu0  ;;  %v8113_v33 = vpop.f32.mrf.mxu2 }
 0x2d1   : > { %10602 = vst [vmem:[#allocation69_spill] sm:$0xff] %v8107_v14  ;;  %v5706_v14 = vmov 0.0  }
 0x2d2   : > { %5484 = vset.pattern.permute.xlu0 %v10598_v61  ;;  %2755 = vperm.xlu2 %5471, %v5526_v52   ;;  %10603 = vst [vmem:[#allocation109_spill] sm:$0xff] %v8113_v33 }
 0x2d3   : > { %v8094_v11 = vpop.f32.mrf.mxu3  ;;  %3278 = vperm.xlu0 %5484, %v8104_v45   ;;  %2624 = vst [vmem:[#allocation2] sm:$0xff] %v5706_v14 }
 0x2d4   : > { %v8109_v7 = vpop.f32.mrf.mxu1  ;;  %2626 = vst [vmem:[#allocation2 + $0x10] sm:$0x1] %v5706_v14 }
 0x2d5   : > { %2625 = vst [vmem:[#allocation2 + $0x8] sm:$0xff] %v5706_v14 }
 0x2d6   : > { %2763 = vperm.xlu1 %5473, %v5533_v19   ;;  %2627 = vst [vmem:[#allocation2 + $0x111] sm:$0xff] %v5706_v14 }
 0x2d7   : > { %2628 = vst [vmem:[#allocation2 + $0x119] sm:$0xff] %v5706_v14 }
 0x2d8   : > { %2126 = vmatmul.f32.gmra.mxu3 %v2011_v24  ;;  %v8122_v24 = vld [vmem:[%s10169_s0 + $0xe0] sm:$0xff]  ;;  %v8125_v15 = vpop.f32.mrf.mxu0  ;;  %2629 = vst [vmem:[#allocation2 + $0x121] sm:$0x1] %v5706_v14 }
 0x2d9   : > { %10604 = vst [vmem:[#allocation91_spill] sm:$0xff] %v8125_v15  ;;  %v2913_v15 = vld [vmem:[#allocation3 + $0xd0] sm:$0xff] }
 0x2da   : > { %5474 = vset.pattern.permute.xlu2 %v10598_v61  ;;  %2924 = vmatpush.msra.mxu1 %v2913_v15  ;;  %v2015_v15 = vld [vmem:[%s5917_s20 + $0x109] sm:$0xff] }
 0x2db   : > { %v8111_v53 = vpop.f32.mrf.mxu3  ;;  %5487 = vset.pattern.permute.xlu0 %v10590_v27  ;;  %3242 = vperm.xlu2 %5474, %v5532_v25   ;;  %v5536_v25 = vld [vmem:[%s10169_s0 + $0x98] sm:$0xff] }
 0x2dc   : > { %2807 = vperm.xlu0 %5487, %v8122_v24   ;;  %v8129_v60 = vpop.f32.mrf.mxu1  ;;  %2925 = vmatpush.msra.mxu1 %v2912_v43  ;;  %v2017_v43 = vld [vmem:[%s5917_s20 + $0x119] sm:$0xff] }
 0x2de   : > { %5476 = vset.pattern.permute.xlu1 %v10598_v61 }
 0x2df   : > { %3250 = vperm.xlu1 %5476, %v5528_v21   ;;  %v8132_v21 = vpop.f32.mrf.mxu2 }
 0x2e0   : > { %2129 = vmatmul.f32.gmra.mxu3 %v2012_v36  ;;  %v2013_v36 = vld [vmem:[%s5917_s20 + $0xf9] sm:$0xff]  ;;  %10605 = vst [vmem:[#allocation37_spill] sm:$0xff] %v8132_v21  ;;  %v8146_v14 = vpop.f32.mrf.mxu0 }
 0x2e1   : > { %10606 = vst [vmem:[#allocation68_spill] sm:$0xff] %v8146_v14 }
 0x2e3   : > { %v8127_v52 = vpop.f32.mrf.mxu3  ;;  %3246 = vperm.xlu2 %5474, %v5533_v19   ;;  %v5538_v19 = vld [vmem:[%s10169_s0 + $0xa8] sm:$0xff] }
 0x2e4   : > { %5490 = vset.pattern.permute.xlu0 %v10598_v61  ;;  %v8149_v21 = vpop.f32.mrf.mxu1 }
 0x2e5   : > { %3298 = vperm.xlu0 %5490, %v8141_v29   ;;  %10607 = vst [vmem:[#allocation117_spill] sm:$0xff] %v8149_v21 }
 0x2e7   : > { %3254 = vperm.xlu1 %5476, %v5536_v25   ;;  %v8151_v26 = vpop.f32.mrf.mxu2 }
 0x2e8   : > { %2132 = vmatmul.f32.gmra.mxu3 %v2013_v36  ;;  %v2014_v36 = vld [vmem:[%s5917_s20 + $0x101] sm:$0xff]  ;;  %10608 = vst [vmem:[#allocation75_spill] sm:$0xff] %v8151_v26  ;;  %v8161_v14 = vpop.f32.mrf.mxu0 }
 0x2e9   : > { %10609 = vst [vmem:[#allocation113_spill] sm:$0xff] %v8161_v14 }
 0x2eb   : > { %v8144_v42 = vpop.f32.mrf.mxu3  ;;  %5477 = vset.pattern.permute.xlu2 %v10590_v27 }
 0x2ec   : > { %2771 = vperm.xlu2 %5477, %v5536_v25   ;;  %v8163_v21 = vpop.f32.mrf.mxu1  ;;  %v2016_v25 = vld [vmem:[%s5917_s20 + $0x111] sm:$0xff] }
 0x2ed   : > { %10610 = vst [vmem:[#allocation95_spill] sm:$0xff] %v8163_v21 }
 0x2ef   : > { %5479 = vset.pattern.permute.xlu1 %v10590_v27  ;;  %v8168_v26 = vpop.f32.mrf.mxu2 }
 0x2f0   : > { %2135 = vmatmul.f32.gmra.mxu3 %v2014_v36  ;;  %2779 = vperm.xlu1 %5479, %v5538_v19   ;;  %v5539_v36 = vld [vmem:[%s10169_s0 + $0xb0] sm:$0xff]  ;;  %10611 = vst [vmem:[#allocation35_spill] sm:$0xff] %v8168_v26  ;;  %v8174_v14 = vpop.f32.mrf.mxu0 }
 0x2f1   : > { %10612 = vst [vmem:[#allocation58_spill] sm:$0xff] %v8174_v14 }
 0x2f3   : > { %v8158_v9 = vpop.f32.mrf.mxu3 }
 0x2f4   : > { %2775 = vperm.xlu2 %5477, %v8062_v18   ;;  %v2911_v18 = vld [vmem:[#allocation3 + $0xc0] sm:$0xff] }
 0x2f5   : > { %2926 = vmatpush.msra.mxu1 %v2911_v18 }
 0x2f7   : > { %v8183_v26 = vpop.f32.mrf.mxu2 }
 0x2f8   : > { %2138 = vmatmul.f32.gmra.mxu3 %v2015_v15  ;;  %2783 = vperm.xlu1 %5479, %v5539_v36   ;;  %v8177_v15 = vpop.f32.mrf.mxu1  ;;  %10615 = vst [vmem:[#allocation79_spill] sm:$0xff] %v8183_v26  ;;  %v8189_v14 = vpop.f32.mrf.mxu0 }
 0x2f9   : > { %10613 = vst [vmem:[#allocation55_spill] sm:$0xff] %v8177_v15 }
 0x2fa   : > { %10616 = vst [vmem:[#allocation119_spill] sm:$0xff] %v8189_v14  ;;  %v5541_v14 = vld [vmem:[%s10169_s0 + $0xd0] sm:$0xff] }
 0x2fb   : > { %v8170_v33 = vpop.f32.mrf.mxu3 }
 0x2fc   : > { %5480 = vset.pattern.permute.xlu2 %v10598_v61 }
 0x2fd   : > { %3262 = vperm.xlu2 %5480, %v5538_v19   ;;  %v8199_v19 = vpop.permute.xlu1 %2699 }
 0x2fe   : > { %10621 = vst [vmem:[#allocation114_spill] sm:$0xff] %v8199_v19 }
 0x2ff   : > { %v8197_v26 = vpop.f32.mrf.mxu2 }
 0x300   : > { %2141 = vmatmul.f32.gmra.mxu3 %v2016_v25  ;;  %5482 = vset.pattern.permute.xlu1 %v10598_v61  ;;  %v5540_v25 = vld [vmem:[%s10169_s0 + $0xc0] sm:$0xff]  ;;  %10620 = vst [vmem:[#allocation74_spill] sm:$0xff] %v8197_v26  ;;  %v8208_v18 = vpop.f32.mrf.mxu0 }
 0x301   : > { %3270 = vperm.xlu1 %5482, %v8081_v5   ;;  %v8193_v5 = vpop.f32.mrf.mxu1  ;;  %10623 = vst [vmem:[#allocation126_spill] sm:$0xff] %v8208_v18 }
 0x302   : > { %10618 = vst [vmem:[#allocation98_spill] sm:$0xff] %v8193_v5  ;;  %v2910_v5 = vld [vmem:[#allocation3 + $0xb8] sm:$0xff] }
 0x303   : > { %v8180_v21 = vpop.f32.mrf.mxu3  ;;  %2927 = vmatpush.msra.mxu1 %v2910_v5 }
 0x304   : > { %10614 = vst [vmem:[#allocation124_spill] sm:$0xff] %v8180_v21  ;;  %v8195_v21 = vpop.permute.xlu2 %2695 }
 0x305   : > { %3266 = vperm.xlu2 %5480, %v5539_v36   ;;  %10619 = vst [vmem:[#allocation61_spill] sm:$0xff] %v8195_v21  ;;  %v8216_v19 = vpop.permute.xlu1 %2703 }
 0x306   : > { %10627 = vst [vmem:[#allocation78_spill] sm:$0xff] %v8216_v19 }
 0x307   : > { %v8214_v26 = vpop.f32.mrf.mxu2 }
 0x308   : > { %2144 = vmatmul.f32.gmra.mxu3 %v2017_v43  ;;  %10626 = vst [vmem:[#allocation66_spill] sm:$0xff] %v8214_v26 }
 0x309   : > { %3274 = vperm.xlu1 %5482, %v5540_v25   ;;  %v8210_v36 = vpop.f32.mrf.mxu1 }
 0x30a   : > { %10624 = vst [vmem:[#allocation39_spill] sm:$0xff] %v8210_v36 }
 0x30b   : > { %v8191_v15 = vpop.f32.mrf.mxu3 }
 0x30c   : > { %10617 = vst [vmem:[#allocation21_spill] sm:$0xff] %v8191_v15  ;;  %v8212_v21 = vpop.permute.xlu2 %3182  ;;  %v5542_v15 = vld [vmem:[%s10169_s0 + $0xd8] sm:$0xff] }
 0x30d   : > { %5483 = vset.pattern.permute.xlu2 %v10590_v27  ;;  %10625 = vst [vmem:[#allocation102_spill] sm:$0xff] %v8212_v21  ;;  %v8232_v19 = vpop.permute.xlu1 %3190 }
 0x30e   : > { %2791 = vperm.xlu2 %5483, %v5540_v25   ;;  %v8224_v25 = vpop.f32.mrf.mxu0  ;;  %10632 = vst [vmem:[#allocation72_spill] sm:$0xff] %v8232_v19 }
 0x30f   : > { %10628 = vst [vmem:[#allocation129_spill] sm:$0xff] %v8224_v25  ;;  %v8230_v26 = vpop.f32.mrf.mxu2  ;;  %v2909_v25 = vld [vmem:[#allocation3 + $0xb0] sm:$0xff] }
 0x310   : > { %10631 = vst [vmem:[#allocation85_spill] sm:$0xff] %v8230_v26  ;;  %2928 = vmatpush.msra.mxu1 %v2909_v25  ;;  %v5543_v26 = vld [vmem:[%s10169_s0 + $0xe8] sm:$0xff]  ;;  %v8264_v25 = vadd.f32 %v7884_v34, %v7988_v10  ;;  %v8290_v10 = vadd.f32 %v7920_v59, %v8030_v63 }
 0x311   : > { %5485 = vset.pattern.permute.xlu1 %v10590_v27  ;;  %v8226_v18 = vpop.f32.mrf.mxu1 }
 0x312   : > { %2799 = vperm.xlu1 %5485, %v5541_v14   ;;  %10629 = vst [vmem:[#allocation86_spill] sm:$0xff] %v8226_v18 }
 0x313   : > { %v8202_v43 = vpop.f32.mrf.mxu3 }
 0x314   : > { %10622 = vst [vmem:[#allocation84_spill] sm:$0xff] %v8202_v43  ;;  %v8228_v21 = vpop.permute.xlu2 %3186 }
 0x315   : > { %10630 = vst [vmem:[#allocation65_spill] sm:$0xff] %v8228_v21 }
 0x316   : > { %2795 = vperm.xlu2 %5483, %v8104_v45   ;;  %v8239_v45 = vpop.f32.mrf.mxu0 }
 0x317   : > { %10633 = vst [vmem:[#allocation56_spill] sm:$0xff] %v8239_v45  ;;  %v8247_v19 = vpop.f32.mrf.mxu2  ;;  %v10638_v45 = vld [vmem:[#allocation50_spill] sm:$0xff] }
 0x318   : > { %10636 = vst [vmem:[#allocation77_spill] sm:$0xff] %v8247_v19  ;;  %v1510_v19 = vadd.f32 %v10638_v45, %v7584_v32 }
 0x319   : > { %v8241_v5 = vpop.f32.mrf.mxu1 }
 0x31a   : > { %2803 = vperm.xlu1 %5485, %v5542_v15   ;;  %10634 = vst [vmem:[#allocation89_spill] sm:$0xff] %v8241_v5  ;;  %v1736_v32 = vadd.f32 %v7974_v3, %v1510_v19  ;;  %v10643_v19 = vld [vmem:[#allocation73_spill] sm:$0xff] }
 0x31b   : > { %v8218_v43 = vpop.f32.mrf.mxu3  ;;  %v1512_v45 = vadd.f32 %v10643_v19, %v7624_v51 }
 0x31c   : > { %v8243_v18 = vpop.permute.xlu2 %2711  ;;  %v1962_v59 = vadd.f32 %v7979_v23, %v1736_v32  ;;  %v2448_v32 = vmul.f32 %v8290_v10, %v8290_v10 }
 0x31d   : > { %10635 = vst [vmem:[#allocation87_spill] sm:$0xff] %v8243_v18  ;;  %v8260_v18 = vadd.f32 %v7845_v35, %v7957_v1  ;;  %v10640_v35 = vld [vmem:[#allocation132_spill] sm:$0xff]  ;;  %v1738_v51 = vadd.f32 %v8021_v46, %v1512_v45 }
 0x31e   : > { %5486 = vset.pattern.permute.xlu2 %v10598_v61  ;;  %v1511_v1 = vadd.f32 %v10640_v35, %v7603_v48  ;;  %v8297_v48 = vld [vmem:[%s10169_s0 + $0xf8] sm:$0xff]  ;;  %v10645_v46 = vld [vmem:[#allocation40_spill] sm:$0xff] }
 0x31f   : > { %3282 = vperm.xlu2 %5486, %v5541_v14   ;;  %v8256_v14 = vadd.f32 %v7860_v37, %v7968_v38  ;;  %v8274_v37 = vpop.f32.mrf.mxu0  ;;  %v2444_v34 = vmul.f32 %v8260_v18, %v8260_v18 }
 0x320   : > { %10639 = vst [vmem:[#allocation94_spill] sm:$0xff] %v8274_v37  ;;  %v1737_v3 = vadd.f32 %v7998_v47, %v1511_v1  ;;  %v8305_v37 = vpop.f32.mrf.mxu2  ;;  %v10644_v1 = vld [vmem:[#allocation133_spill] sm:$0xff] }
 0x321   : > { %v2445_v5 = vmul.f32 %v8256_v14, %v8256_v14  ;;  %v2406_v35 = vadd.f32 %v8256_v14, %v8260_v18  ;;  %v1513_v19 = vadd.f32 %v10644_v1, %v7642_v30  ;;  %v1964_v30 = vadd.f32 %v8027_v62, %v1738_v51  ;;  %v10646_v62 = vld [vmem:[#allocation71_spill] sm:$0xff]  ;;  %v10647_v51 = vld [vmem:[#allocation24_spill] sm:$0xff] }
 0x322   : > { %5488 = vset.pattern.permute.xlu1 %v10598_v61 }
 0x323   : > { %v8234_v36 = vpop.f32.mrf.mxu3  ;;  %3290 = vperm.xlu1 %5488, %v8122_v24   ;;  %v8252_v24 = vpop.permute.xlu1 %3194  ;;  %v2476_v63 = vadd.f32 %v2445_v5, %v2444_v34  ;;  %v2407_v23 = vadd.f32 %v2406_v35, %v8264_v25  ;;  %v1514_v34 = vadd.f32 %v10645_v46, %v7658_v16 }
 0x324   : > { %10637 = vst [vmem:[#allocation121_spill] sm:$0xff] %v8252_v24  ;;  %v8280_v24 = vpop.f32.mrf.mxu1 }
 0x325   : > { %10641 = vst [vmem:[#allocation83_spill] sm:$0xff] %v8280_v24  ;;  %v8313_v24 = vadd.f32 %v7932_v28, %v8042_v2  ;;  %v8326_v28 = vadd.f32 %v7951_v55, %v8053_v50  ;;  %v2156_v2 = vadd.f32 %v8094_v11, %v1962_v59  ;;  %v8338_v50 = vadd.f32 %v7971_v4, %v8073_v13 }
 0x326   : > { %v1740_v16 = vadd.f32 %v8065_v49, %v1514_v34 }
 0x327   : > { %3286 = vperm.xlu2 %5486, %v5542_v15   ;;  %v8272_v15 = vadd.f32 %v7903_v20, %v8009_v17  ;;  %v2446_v20 = vmul.f32 %v8264_v25, %v8264_v25  ;;  %v8292_v17 = vpop.permute.xlu2 %2715  ;;  %v2449_v45 = vmul.f32 %v8313_v24, %v8313_v24  ;;  %v8351_v13 = vadd.f32 %v7996_v44, %v2156_v2  ;;  %v8354_v4 = vpop.f32.mrf.mxu0 }
 0x328   : > { %10642 = vst [vmem:[#allocation82_spill] sm:$0xff] %v8292_v17  ;;  %v2451_v44 = vmul.f32 %v8338_v50, %v8338_v50 }
 0x329   : > { %v2447_v17 = vmul.f32 %v8272_v15, %v8272_v15  ;;  %v2477_v5 = vadd.f32 %v2476_v63, %v2446_v20  ;;  %v2450_v63 = vmul.f32 %v8326_v28, %v8326_v28 }
 0x32b   : > { %v8245_v21 = vpop.f32.mrf.mxu3  ;;  %3294 = vperm.xlu1 %5488, %v5543_v26   ;;  %v8315_v47 = vpop.permute.xlu1 %2719  ;;  %v2478_v20 = vadd.f32 %v2477_v5, %v2447_v17 }
 0x32c   : > { %v8359_v1 = vpop.f32.mrf.mxu1 }
 0x32d   : > { %v2479_v59 = vadd.f32 %v2478_v20, %v2448_v32 }
 0x32f   : > { %5489 = vset.pattern.permute.xlu2 %v10590_v27  ;;  %v8369_v5 = vpop.permute.xlu2 %3202 }
 0x330   : > { %2811 = vperm.xlu2 %5489, %v5543_v26   ;;  %v1739_v26 = vadd.f32 %v8039_v6, %v1513_v19  ;;  %v1515_v6 = vadd.f32 %v10646_v62, %v7673_v58  ;;  %v1516_v58 = vadd.f32 %v10647_v51, %v7691_v54  ;;  %10648 = vst [vmem:[#allocation97_spill] sm:$0xff] %v8369_v5  ;;  %v10653_v62 = vld [vmem:[#allocation45_spill] sm:$0xff]  ;;  %v10657_v51 = vld [vmem:[#allocation124_spill] sm:$0xff] }
 0x332   : > { %v1965_v35 = vadd.f32 %v8049_v0, %v1739_v26  ;;  %v1741_v49 = vadd.f32 %v8090_v8, %v1515_v6  ;;  %v1966_v0 = vadd.f32 %v8070_v12, %v1740_v16  ;;  %v1742_v54 = vadd.f32 %v8109_v7, %v1516_v58  ;;  %v10649_v8 = vld [vmem:[#allocation15_spill] sm:$0xff]  ;;  %v8377_v26 = vpop.f32.mrf.mxu2  ;;  %v10652_v16 = vld [vmem:[#allocation117_spill] sm:$0xff] }
 0x333   : > { %v8276_v38 = vpop.f32.mrf.mxu3  ;;  %5491 = vset.pattern.permute.xlu1 %v10590_v27  ;;  %v1963_v27 = vadd.f32 %v8001_v56, %v1737_v3  ;;  %v2408_v56 = vadd.f32 %v2407_v23, %v8272_v15  ;;  %v2908_v3 = vld [vmem:[#allocation3 + $0xa8] sm:$0xff]  ;;  %v1517_v12 = vadd.f32 %v10649_v8, %v7709_v39  ;;  %v8385_v34 = vpop.permute.xlu1 %2723  ;;  %v1518_v39 = vadd.f32 %v7515_v22, %v7724_v40  ;;  %v10654_v6 = vld [vmem:[#allocation81_spill] sm:$0xff]  ;;  %v10658_v58 = vld [vmem:[#allocation95_spill] sm:$0xff] }
 0x334   : > { %2819 = vperm.xlu1 %5491, %v8297_v48   ;;  %2929 = vmatpush.msra.mxu1 %v2908_v3  ;;  %v1967_v32 = vadd.f32 %v8092_v31, %v1741_v49  ;;  %v10650_v31 = vld [vmem:[#allocation109_spill] sm:$0xff]  ;;  %v1519_v22 = vadd.f32 %v10654_v6, %v10653_v62  ;;  %v10668_v6 = vld [vmem:[#allocation91_spill] sm:$0xff] }
 0x335   : > { %v2157_v55 = vadd.f32 %v8111_v53, %v1963_v27  ;;  %v2409_v17 = vadd.f32 %v2408_v56, %v8290_v10  ;;  %v2158_v53 = vadd.f32 %v8127_v52, %v1964_v30  ;;  %v2480_v27 = vadd.f32 %v2479_v59, %v2449_v45  ;;  %v10651_v45 = vld [vmem:[#allocation62_spill] sm:$0xff]  ;;  %v10655_v40 = vld [vmem:[#allocation37_spill] sm:$0xff] }
 0x336   : > { %v2159_v52 = vadd.f32 %v8144_v42, %v1965_v35  ;;  %v1743_v7 = vadd.f32 %v8129_v60, %v1517_v12  ;;  %v1968_v30 = vadd.f32 %v10650_v31, %v1742_v54  ;;  %v1744_v60 = vadd.f32 %v10652_v16, %v1518_v39  ;;  %v10664_v39 = vld [vmem:[#allocation55_spill] sm:$0xff] }
 0x337   : > { %v2410_v19 = vadd.f32 %v2409_v17, %v8313_v24  ;;  %v8366_v23 = vadd.f32 %v8019_v41, %v2157_v55  ;;  %v2481_v46 = vadd.f32 %v2480_v27, %v2450_v63  ;;  %v2452_v41 = vmul.f32 %v8351_v13, %v8351_v13  ;;  %v10660_v27 = vld [vmem:[#allocation49_spill] sm:$0xff] }
 0x338   : > { %2815 = vperm.xlu2 %5489, %v8141_v29   ;;  %v8382_v42 = vadd.f32 %v8036_v57, %v2158_v53  ;;  %v2160_v29 = vadd.f32 %v8158_v9, %v1966_v0  ;;  %v8395_v57 = vadd.f32 %v10651_v45, %v2159_v52  ;;  %v2161_v9 = vadd.f32 %v8170_v33, %v1967_v32  ;;  %v10656_v53 = vld [vmem:[#allocation110_spill] sm:$0xff]  ;;  %v10661_v52 = vld [vmem:[#allocation75_spill] sm:$0xff]  ;;  %v8428_v45 = vpop.f32.mrf.mxu1 }
 0x339   : > { %v2411_v2 = vadd.f32 %v2410_v19, %v8326_v28  ;;  %v2482_v3 = vadd.f32 %v2481_v46, %v2451_v44  ;;  %v2453_v20 = vmul.f32 %v8366_v23, %v8366_v23  ;;  %v1969_v35 = vadd.f32 %v10655_v40, %v1743_v7  ;;  %v10659_v19 = vld [vmem:[#allocation64_spill] sm:$0xff]  ;;  %v10662_v46 = vld [vmem:[#allocation69_spill] sm:$0xff] }
 0x33a   : > { %v2454_v63 = vmul.f32 %v8382_v42, %v8382_v42  ;;  %v8408_v49 = vadd.f32 %v10656_v53, %v2160_v29  ;;  %v2162_v33 = vadd.f32 %v10657_v51, %v1968_v30  ;;  %v1745_v0 = vadd.f32 %v10658_v58, %v1519_v22  ;;  %v10663_v29 = vld [vmem:[#allocation21_spill] sm:$0xff]  ;;  %v10665_v30 = vld [vmem:[#allocation44_spill] sm:$0xff]  ;;  %v10672_v53 = vld [vmem:[#allocation79_spill] sm:$0xff] }
 0x33b   : > { %v8341_v11 = vpop.f32.mrf.mxu3  ;;  %v2412_v56 = vadd.f32 %v2411_v2, %v8338_v50  ;;  %v2483_v59 = vadd.f32 %v2482_v3, %v2452_v41  ;;  %v1520_v44 = vadd.f32 %v10660_v27, %v10659_v19  ;;  %v1970_v54 = vadd.f32 %v10661_v52, %v1744_v60  ;;  %v8418_v2 = vpop.f32.mrf.mxu0  ;;  %v10673_v27 = vld [vmem:[#allocation68_spill] sm:$0xff] }
 0x33c   : > { %v2455_v32 = vmul.f32 %v8395_v57, %v8395_v57  ;;  %v8421_v41 = vadd.f32 %v10662_v46, %v2161_v9  ;;  %v2163_v7 = vadd.f32 %v10663_v29, %v1969_v35  ;;  %v2456_v9 = vmul.f32 %v8408_v49, %v8408_v49  ;;  %v8439_v35 = vpop.permute.xlu2 %3206  ;;  %v8452_v52 = vpop.permute.xlu1 %3210  ;;  %v10677_v29 = vld [vmem:[#allocation74_spill] sm:$0xff] }
 0x33d   : > { %v2413_v17 = vadd.f32 %v2412_v56, %v8351_v13  ;;  %v2484_v12 = vadd.f32 %v2483_v59, %v2453_v20  ;;  %v1746_v31 = vadd.f32 %v10664_v39, %v1520_v44  ;;  %v10666_v56 = vld [vmem:[#allocation22_spill] sm:$0xff]  ;;  %v10667_v20 = vld [vmem:[#allocation35_spill] sm:$0xff]  ;;  %v8436_v22 = vadd.f32 %v10668_v6, %v2162_v33  ;;  %10670 = vst [vmem:[#allocation54_spill] sm:$0xff] %v8439_v35 }
 0x33e   : > { %v1521_v3 = vadd.f32 %v10666_v56, %v10665_v30  ;;  %v1971_v16 = vadd.f32 %v10667_v20, %v1745_v0  ;;  %v8444_v0 = vpop.f32.mrf.mxu2  ;;  %v2457_v19 = vmul.f32 %v8421_v41, %v8421_v41  ;;  %v8449_v33 = vadd.f32 %v10673_v27, %v2163_v7  ;;  %10674 = vst [vmem:[#allocation90_spill] sm:$0xff] %v8452_v52  ;;  %v10678_v56 = vld [vmem:[#allocation113_spill] sm:$0xff] }
 0x33f   : > { %v2414_v8 = vadd.f32 %v2413_v17, %v8366_v23  ;;  %v2485_v62 = vadd.f32 %v2484_v12, %v2454_v63  ;;  %v10671_v17 = vld [vmem:[#allocation98_spill] sm:$0xff]  ;;  %v1972_v51 = vadd.f32 %v10672_v53, %v1746_v31  ;;  %v10676_v12 = vld [vmem:[#allocation53_spill] sm:$0xff]  ;;  %v2458_v30 = vmul.f32 %v8436_v22, %v8436_v22 }
 0x340   : > { %5492 = vset.pattern.permute.xlu2 %v10598_v61  ;;  %v10669_v61 = vld [vmem:[#allocation84_spill] sm:$0xff]  ;;  %v1747_v59 = vadd.f32 %v10671_v17, %v1521_v3  ;;  %v2165_v44 = vadd.f32 %v8218_v43, %v1971_v16  ;;  %v10679_v3 = vld [vmem:[#allocation39_spill] sm:$0xff]  ;;  %v2459_v17 = vmul.f32 %v8449_v33, %v8449_v33 }
 0x341   : > { %v2415_v60 = vadd.f32 %v2414_v8, %v8382_v42  ;;  %3302 = vperm.xlu2 %5492, %v8297_v48   ;;  %v2164_v40 = vadd.f32 %v10669_v61, %v1970_v54  ;;  %v2907_v48 = vld [vmem:[#allocation3 + $0xa0] sm:$0xff]  ;;  %v2486_v63 = vadd.f32 %v2485_v62, %v2455_v32  ;;  %v10675_v8 = vld [vmem:[#allocation70_spill] sm:$0xff]  ;;  %v2166_v43 = vadd.f32 %v8234_v36, %v1972_v51  ;;  %v10680_v16 = vld [vmem:[#allocation48_spill] sm:$0xff] }
 0x342   : > { %2930 = vmatpush.msra.mxu1 %v2907_v48  ;;  %v1522_v46 = vadd.f32 %v10676_v12, %v10675_v8  ;;  %v1973_v39 = vadd.f32 %v10677_v29, %v1747_v59  ;;  %v10684_v48 = vld [vmem:[#allocation13_spill] sm:$0xff]  ;;  %v10685_v36 = vld [vmem:[#allocation26_spill] sm:$0xff]  ;;  %v10687_v12 = vld [vmem:[#allocation52_spill] sm:$0xff] }
 0x343   : > { %v8398_v55 = vpop.f32.mrf.mxu3  ;;  %v2416_v58 = vadd.f32 %v2415_v60, %v8395_v57  ;;  %v2487_v32 = vadd.f32 %v2486_v63, %v2456_v9  ;;  %v8461_v7 = vadd.f32 %v10678_v56, %v2164_v40  ;;  %v10681_v60 = vld [vmem:[#allocation9_spill] sm:$0xff]  ;;  %v10682_v9 = vld [vmem:[#allocation58_spill] sm:$0xff]  ;;  %v1524_v51 = vadd.f32 %v10685_v36, %v10684_v48  ;;  %v8481_v29 = vpop.f32.mrf.mxu0 }
 0x344   : > { %v1748_v20 = vadd.f32 %v10679_v3, %v1522_v46  ;;  %v1523_v62 = vadd.f32 %v10681_v60, %v10680_v16  ;;  %v8471_v59 = vadd.f32 %v10682_v9, %v2165_v44  ;;  %v2167_v53 = vadd.f32 %v8245_v21, %v1973_v39  ;;  %v10683_v40 = vld [vmem:[#allocation86_spill] sm:$0xff]  ;;  %v10688_v46 = vld [vmem:[#allocation41_spill] sm:$0xff]  ;;  %v1710_v3 = vpop.f32.mrf.mxu1  ;;  %v10693_v9 = vld [vmem:[#allocation60_spill] sm:$0xff] }
 0x345   : > { %v2417_v31 = vadd.f32 %v2416_v58, %v8408_v49  ;;  %v2488_v61 = vadd.f32 %v2487_v32, %v2457_v19  ;;  %v10686_v63 = vld [vmem:[#allocation66_spill] sm:$0xff]  ;;  %v1525_v19 = vadd.f32 %v10688_v46, %v10687_v12  ;;  %v2460_v44 = vmul.f32 %v8461_v7, %v8461_v7  ;;  %v10689_v32 = vld [vmem:[#allocation119_spill] sm:$0xff]  ;;  %v10690_v39 = vld [vmem:[#allocation89_spill] sm:$0xff] }
 0x346   : > { %v1749_v58 = vadd.f32 %v10683_v40, %v1523_v62  ;;  %v1974_v27 = vadd.f32 %v10686_v63, %v1748_v20  ;;  %v8486_v21 = vadd.f32 %v10689_v32, %v2166_v43  ;;  %v1750_v56 = vadd.f32 %v10690_v39, %v1524_v51  ;;  %v10691_v16 = vld [vmem:[#allocation85_spill] sm:$0xff]  ;;  %v8499_v43 = vpop.permute.xlu2 %2731  ;;  %v10696_v63 = vld [vmem:[#allocation83_spill] sm:$0xff] }
 0x347   : > { %v2418_v6 = vadd.f32 %v2417_v31, %v8421_v41  ;;  %v2489_v31 = vadd.f32 %v2488_v61, %v2458_v30  ;;  %v2461_v30 = vmul.f32 %v8471_v59, %v8471_v59  ;;  %v10694_v61 = vld [vmem:[#allocation126_spill] sm:$0xff]  ;;  %10695 = vst [vmem:[#allocation120_spill] sm:$0xff] %v8499_v43  ;;  %v1751_v12 = vadd.f32 %v10696_v63, %v1525_v19  ;;  %v10699_v32 = vld [vmem:[#allocation11_spill] sm:$0xff] }
 0x348   : > { %v1975_v60 = vadd.f32 %v10691_v16, %v1749_v58  ;;  %v2168_v62 = vadd.f32 %v8276_v38, %v1974_v27  ;;  %v8497_v36 = vadd.f32 %v10694_v61, %v2167_v53  ;;  %v10697_v58 = vld [vmem:[#allocation77_spill] sm:$0xff]  ;;  %v2462_v53 = vmul.f32 %v8486_v21, %v8486_v21 }
 0x349   : > { %v2419_v8 = vadd.f32 %v2418_v6, %v8436_v22  ;;  %v10692_v6 = vld [vmem:[#allocation33_spill] sm:$0xff]  ;;  %v2490_v48 = vadd.f32 %v2489_v31, %v2459_v17  ;;  %v1976_v46 = vadd.f32 %v10697_v58, %v1750_v56  ;;  %v10698_v31 = vld [vmem:[#allocation59_spill] sm:$0xff]  ;;  %v1977_v19 = vadd.f32 %v8305_v37, %v1751_v12 }
 0x34a   : > { %v1526_v40 = vadd.f32 %v10693_v9, %v10692_v6  ;;  %v2169_v27 = vadd.f32 %v8341_v11, %v1975_v60  ;;  %v1527_v39 = vadd.f32 %v10699_v32, %v10698_v31  ;;  %v8510_v6 = vpop.permute.xlu1 %3214  ;;  %v10701_v9 = vld [vmem:[#allocation129_spill] sm:$0xff] }
 0x34b   : > { %v2121_v54 = vpop.f32.mrf.mxu3  ;;  %v2420_v20 = vadd.f32 %v2419_v8, %v8449_v33  ;;  %v1936_v8 = vpop.f32.mrf.mxu2  ;;  %v2491_v16 = vadd.f32 %v2490_v48, %v2460_v44  ;;  %10700 = vst [vmem:[#allocation92_spill] sm:$0xff] %v8510_v6  ;;  %v8515_v61 = vadd.f32 %v10701_v9, %v2168_v62  ;;  %v2170_v11 = vadd.f32 %v8398_v55, %v1976_v46  ;;  %v10702_v48 = vld [vmem:[#allocation56_spill] sm:$0xff] }
 0x34c   : > { %v1752_v17 = vadd.f32 %v8359_v1, %v1526_v40  ;;  %v1753_v1 = vadd.f32 %v8428_v45, %v1527_v39  ;;  %v2463_v44 = vmul.f32 %v8497_v36, %v8497_v36  ;;  %v8524_v63 = vadd.f32 %v10702_v48, %v2169_v27  ;;  %v10703_v45 = vld [vmem:[#allocation94_spill] sm:$0xff]  ;;  %v1713_v27 = vpop.f32.mrf.mxu1 }
 0x34d   : > { %v2421_v38 = vadd.f32 %v2420_v20, %v8461_v7  ;;  %v2492_v60 = vadd.f32 %v2491_v16, %v2461_v30  ;;  %v2171_v37 = vadd.f32 %v2121_v54, %v1977_v19  ;;  %v2464_v55 = vmul.f32 %v8515_v61, %v8515_v61  ;;  %v10704_v16 = vld [vmem:[#allocation31_spill] sm:$0xff] }
 0x34e   : > { %v1978_v20 = vadd.f32 %v8377_v26, %v1752_v17  ;;  %v1979_v12 = vadd.f32 %v8444_v0, %v1753_v1  ;;  %v8531_v30 = vadd.f32 %v10703_v45, %v2170_v11  ;;  %v2356_v26 = vpop.f32.mrf.mxu0  ;;  %v2465_v0 = vmul.f32 %v8524_v63, %v8524_v63 }
 0x34f   : > { %v2422_v56 = vadd.f32 %v2421_v38, %v8471_v59  ;;  %v2493_v62 = vadd.f32 %v2492_v60, %v2462_v53  ;;  %v2906_v38 = vld [vmem:[#allocation3 + $0x98] sm:$0xff]  ;;  %v8537_v32 = vadd.f32 %v8354_v4, %v2171_v37  ;;  %v10705_v53 = vld [vmem:[#allocation42_spill] sm:$0xff] }
 0x350   : > { %2931 = vmatpush.msra.mxu1 %v2906_v38  ;;  %v1528_v19 = vadd.f32 %v10705_v53, %v10704_v16  ;;  %v2466_v1 = vmul.f32 %v8531_v30, %v8531_v30 }
 0x351   : > { %v2423_v40 = vadd.f32 %v2422_v56, %v8486_v21  ;;  %v2494_v17 = vadd.f32 %v2493_v62, %v2463_v44  ;;  %v8541_v56 = vpop.permute.xlu2 %2735  ;;  %v2467_v48 = vmul.f32 %v8537_v32, %v8537_v32 }
 0x352   : > { %10706 = vst [vmem:[#allocation101_spill] sm:$0xff] %v8541_v56  ;;  %v1754_v44 = vadd.f32 %v1710_v3, %v1528_v19  ;;  %v3575_v56 = vld [vmem:[#allocation3 + $0x1d8] sm:$0xff] }
 0x353   : > { %v2124_v51 = vpop.f32.mrf.mxu3  ;;  %v2424_v58 = vadd.f32 %v2423_v40, %v8497_v36  ;;  %v2495_v9 = vadd.f32 %v2494_v17, %v2464_v55 }
 0x354   : > { %v2172_v46 = vadd.f32 %v2124_v51, %v1978_v20  ;;  %v1939_v51 = vpop.f32.mrf.mxu2  ;;  %v8549_v20 = vpop.permute.xlu1 %2739 }
 0x355   : > { %v2425_v54 = vadd.f32 %v2424_v58, %v8515_v61  ;;  %10707 = vst [vmem:[#allocation96_spill] sm:$0xff] %v8549_v20  ;;  %v2496_v4 = vadd.f32 %v2495_v9, %v2465_v0  ;;  %v1716_v0 = vpop.f32.mrf.mxu1 }
 0x356   : > { %v8547_v60 = vadd.f32 %v8418_v2, %v2172_v46  ;;  %v2359_v17 = vpop.f32.mrf.mxu0 }
 0x357   : > { %v2426_v11 = vadd.f32 %v2425_v54, %v8524_v63  ;;  %v2497_v62 = vadd.f32 %v2496_v4, %v2466_v1  ;;  %v10709_v54 = vld [vmem:[#allocation29_spill] sm:$0xff] }
 0x358   : > { %v2468_v2 = vmul.f32 %v8547_v60, %v8547_v60 }
 0x359   : > { %v2427_v40 = vadd.f32 %v2426_v11, %v8531_v30  ;;  %v2498_v3 = vadd.f32 %v2497_v62, %v2467_v48  ;;  %v8568_v53 = vpop.permute.xlu2 %3222 }
 0x35a   : > { %10710 = vst [vmem:[#allocation104_spill] sm:$0xff] %v8568_v53  ;;  %v3578_v53 = vld [vmem:[#allocation3 + $0x1f0] sm:$0xff] }
 0x35b   : > { %v2127_v31 = vpop.f32.mrf.mxu3  ;;  %v2428_v58 = vadd.f32 %v2427_v40, %v8537_v32 }
 0x35c   : > { %v2173_v39 = vadd.f32 %v2127_v31, %v1979_v12  ;;  %v1980_v12 = vadd.f32 %v1936_v8, %v1754_v44  ;;  %v10708_v31 = vld [vmem:[#allocation57_spill] sm:$0xff]  ;;  %v2499_v8 = vadd.f32 %v2498_v3, %v2468_v2  ;;  %v1942_v9 = vpop.f32.mrf.mxu2  ;;  %v8573_v4 = vpop.permute.xlu1 %2743  ;;  %v10713_v2 = vld [vmem:[#allocation46_spill] sm:$0xff] }
 0x35d   : > { %v2429_v45 = vadd.f32 %v2428_v58, %v8547_v60  ;;  %10711 = vst [vmem:[#allocation105_spill] sm:$0xff] %v8573_v4  ;;  %v2854_v4 = vld [vmem:[#allocation3] sm:$0xff] }
 0x35e   : > { %v8555_v37 = vadd.f32 %v8481_v29, %v2173_v39  ;;  %v1529_v29 = vadd.f32 %v10709_v54, %v10708_v31 }
 0x360   : > { %v2469_v46 = vmul.f32 %v8555_v37, %v8555_v37  ;;  %v2430_v39 = vadd.f32 %v2429_v45, %v8555_v37  ;;  %v1755_v19 = vadd.f32 %v1713_v27, %v1529_v29  ;;  %v2362_v27 = vpop.f32.mrf.mxu0 }
 0x361   : > { %v8582_v54 = vpop.permute.xlu2 %3226 }
 0x362   : > { %v2500_v11 = vadd.f32 %v2499_v8, %v2469_v46  ;;  %v1981_v40 = vadd.f32 %v1939_v51, %v1755_v19  ;;  %v1719_v46 = vpop.f32.mrf.mxu1  ;;  %10714 = vst [vmem:[#allocation20_spill] sm:$0xff] %v8582_v54 }
 0x363   : > { %v2130_v55 = vpop.f32.mrf.mxu3 }
 0x364   : > { %v2174_v38 = vadd.f32 %v2130_v55, %v1980_v12  ;;  %v2905_v12 = vld [vmem:[#allocation3 + $0x90] sm:$0xff]  ;;  %v1945_v29 = vpop.f32.mrf.mxu2 }
 0x365   : > { %2932 = vmatpush.msra.mxu1 %v2905_v12 }
 0x366   : > { %v8566_v16 = vadd.f32 %v2356_v26, %v2174_v38  ;;  %v10712_v26 = vld [vmem:[#allocation63_spill] sm:$0xff] }
 0x367   : > { %v1530_v55 = vadd.f32 %v10713_v2, %v10712_v26 }
 0x368   : > { %v2431_v1 = vadd.f32 %v2430_v39, %v8566_v16  ;;  %v2470_v44 = vmul.f32 %v8566_v16, %v8566_v16  ;;  %v8584_v39 = vpop.permute.xlu1 %3230 }
 0x369   : > { %v1756_v45 = vadd.f32 %v1716_v0, %v1530_v55  ;;  %10715 = vst [vmem:[#allocation93_spill] sm:$0xff] %v8584_v39  ;;  %v10724_v39 = vld [vmem:[#allocation80_spill] sm:$0xff] }
 0x36a   : > { %v2501_v48 = vadd.f32 %v2500_v11, %v2470_v44  ;;  %v10716_v44 = vld [vmem:[#allocation51_spill] sm:$0xff]  ;;  %v1722_v26 = vpop.f32.mrf.mxu1 }
 0x36b   : > { %v2133_v62 = vpop.f32.mrf.mxu3  ;;  %v1982_v51 = vadd.f32 %v1942_v9, %v1756_v45 }
 0x36c   : > { %v2175_v58 = vadd.f32 %v2133_v62, %v1981_v40 }
 0x36e   : > { %v8577_v3 = vadd.f32 %v2359_v17, %v2175_v58  ;;  %v10717_v17 = vld [vmem:[#allocation27_spill] sm:$0xff]  ;;  %v2365_v58 = vpop.f32.mrf.mxu0 }
 0x36f   : > { %v1531_v40 = vadd.f32 %v10717_v17, %v10716_v44 }
 0x370   : > { %v2432_v38 = vadd.f32 %v2431_v1, %v8577_v3  ;;  %v2471_v31 = vmul.f32 %v8577_v3, %v8577_v3 }
 0x371   : > { %v1757_v0 = vadd.f32 %v1719_v46, %v1531_v40 }
 0x372   : > { %v2502_v8 = vadd.f32 %v2501_v48, %v2471_v31  ;;  %v8593_v48 = vpop.permute.xlu2 %2751  ;;  %v1948_v31 = vpop.f32.mrf.mxu2 }
 0x373   : > { %v2136_v19 = vpop.f32.mrf.mxu3  ;;  %v1983_v9 = vadd.f32 %v1945_v29, %v1757_v0  ;;  %10718 = vst [vmem:[#allocation19_spill] sm:$0xff] %v8593_v48 }
 0x374   : > { %v2176_v11 = vadd.f32 %v2136_v19, %v1982_v51  ;;  %v8595_v51 = vpop.permute.xlu1 %3234  ;;  %v10720_v19 = vld [vmem:[#allocation88_spill] sm:$0xff] }
 0x375   : > { %10719 = vst [vmem:[#allocation107_spill] sm:$0xff] %v8595_v51  ;;  %v10723_v51 = vld [vmem:[#allocation17_spill] sm:$0xff] }
 0x376   : > { %v8588_v12 = vadd.f32 %v2362_v27, %v2176_v11  ;;  %v10721_v27 = vld [vmem:[#allocation76_spill] sm:$0xff]  ;;  %v2368_v40 = vpop.f32.mrf.mxu0  ;;  %v1533_v48 = vadd.f32 %v10724_v39, %v10723_v51 }
 0x377   : > { %v1532_v11 = vadd.f32 %v10721_v27, %v10720_v19  ;;  %v8608_v19 = vpop.permute.xlu0 %3178 }
 0x378   : > { %v2433_v1 = vadd.f32 %v2432_v38, %v8588_v12  ;;  %v2472_v62 = vmul.f32 %v8588_v12, %v8588_v12  ;;  %10725 = vst [vmem:[#allocation99_spill] sm:$0xff] %v8608_v19 }
 0x379   : > { %v1758_v38 = vadd.f32 %v1722_v26, %v1532_v11  ;;  %v2868_v11 = vld [vmem:[#allocation3 + $0x70] sm:$0xff] }
 0x37a   : > { %v2503_v2 = vadd.f32 %v2502_v8, %v2472_v62  ;;  %v1951_v26 = vpop.f32.mrf.mxu2 }
 0x37b   : > { %v2139_v55 = vpop.f32.mrf.mxu3  ;;  %v1984_v29 = vadd.f32 %v1948_v31, %v1758_v38 }
 0x37c   : > { %v2177_v45 = vadd.f32 %v2139_v55, %v1983_v9  ;;  %v1725_v9 = vpop.f32.mrf.mxu1  ;;  %v8604_v55 = vpop.permute.xlu2 %2755 }
 0x37d   : > { %10722 = vst [vmem:[#allocation25_spill] sm:$0xff] %v8604_v55  ;;  %v1759_v27 = vadd.f32 %v1725_v9, %v1533_v48  ;;  %v3349_v55 = vld [vmem:[#allocation3 + $0x158] sm:$0xff] }
 0x37e   : > { %v8599_v46 = vadd.f32 %v2365_v58, %v2177_v45  ;;  %v2869_v45 = vld [vmem:[#allocation3 + $0x78] sm:$0xff] }
 0x37f   : > { %3032 = vmatpush.msrb.mxu2 %v2869_v45  ;;  %v1985_v38 = vadd.f32 %v1951_v26, %v1759_v27  ;;  %v8621_v48 = vpop.permute.xlu0 %2707  ;;  %v3352_v45 = vld [vmem:[#allocation3 + $0x170] sm:$0xff] }
 0x380   : > { %v2434_v44 = vadd.f32 %v2433_v1, %v8599_v46  ;;  %v2473_v17 = vmul.f32 %v8599_v46, %v8599_v46  ;;  %v8612_v1 = vpop.permute.xlu1 %2759  ;;  %10728 = vst [vmem:[#allocation16_spill] sm:$0xff] %v8621_v48 }
 0x381   : > { %10726 = vst [vmem:[#allocation43_spill] sm:$0xff] %v8612_v1  ;;  %3033 = vmatpush.msrb.mxu2 %v2868_v11  ;;  %v2866_v11 = vld [vmem:[#allocation3 + $0x60] sm:$0xff]  ;;  %v2864_v1 = vld [vmem:[#allocation3 + $0x50] sm:$0xff] }
 0x382   : > { %v2504_v8 = vadd.f32 %v2503_v2, %v2473_v17 }
 0x383   : > { %v2142_v0 = vpop.f32.mrf.mxu3 }
 0x384   : > { %v2178_v62 = vadd.f32 %v2142_v0, %v1984_v29  ;;  %v2371_v29 = vpop.f32.mrf.mxu0 }
 0x386   : > { %v8610_v58 = vadd.f32 %v2368_v40, %v2178_v62  ;;  %v3353_v40 = vld [vmem:[#allocation3 + $0x178] sm:$0xff]  ;;  %v8619_v62 = vpop.permute.xlu2 %3242 }
 0x387   : > { %3354 = vmatpush.msrb.mxu3 %v3353_v40  ;;  %10727 = vst [vmem:[#allocation112_spill] sm:$0xff] %v8619_v62  ;;  %v3350_v40 = vld [vmem:[#allocation3 + $0x160] sm:$0xff] }
 0x388   : > { %v2435_v2 = vadd.f32 %v2434_v44, %v8610_v58  ;;  %v2474_v31 = vmul.f32 %v8610_v58, %v8610_v58  ;;  %v8626_v26 = vpop.permute.xlu1 %2763 }
 0x389   : > { %10729 = vst [vmem:[#allocation100_spill] sm:$0xff] %v8626_v26  ;;  %3355 = vmatpush.msrb.mxu3 %v3352_v45 }
 0x38a   : > { %v2505_v17 = vadd.f32 %v2504_v8, %v2474_v31  ;;  %v2867_v8 = vld [vmem:[#allocation3 + $0x68] sm:$0xff] }
 0x38b   : > { %v2145_v39 = vpop.f32.mrf.mxu3  ;;  %3034 = vmatpush.msrb.mxu2 %v2867_v8 }
 0x38c   : > { %v2179_v51 = vadd.f32 %v2145_v39, %v1985_v38  ;;  %v3351_v38 = vld [vmem:[#allocation3 + $0x168] sm:$0xff] }
 0x38d   : > { %3035 = vmatpush.msrb.mxu2 %v2866_v11  ;;  %3356 = vmatpush.msrb.mxu3 %v3351_v38  ;;  %v2863_v38 = vld [vmem:[#allocation3 + $0x48] sm:$0xff] }
 0x38e   : > { %v8617_v0 = vadd.f32 %v2371_v29, %v2179_v51  ;;  %v2865_v29 = vld [vmem:[#allocation3 + $0x58] sm:$0xff] }
 0x38f   : > { %3036 = vmatpush.msrb.mxu2 %v2865_v29  ;;  %3357 = vmatpush.msrb.mxu3 %v3350_v40  ;;  %v2862_v40 = vld [vmem:[#allocation3 + $0x40] sm:$0xff] }
 0x390   : > { %v2436_v44 = vadd.f32 %v2435_v2, %v8617_v0  ;;  %v2475_v9 = vmul.f32 %v8617_v0, %v8617_v0  ;;  %v8632_v11 = vpop.permute.xlu1 %3250 }
 0x391   : > { %3037 = vmatpush.msrb.mxu2 %v2864_v1  ;;  %3358 = vmatpush.msrb.mxu3 %v3349_v55  ;;  %10732 = vst [vmem:[#allocation23_spill] sm:$0xff] %v8632_v11  ;;  %v3347_v1 = vld [vmem:[#allocation3 + $0x148] sm:$0xff] }
 0x392   : > { %v2437_v27 = vrot.slane %v2436_v44, 4  ;;  %v2506_v31 = vadd.f32 %v2505_v17, %v2475_v9  ;;  %v8628_v17 = vpop.permute.xlu2 %3246  ;;  %v8630_v9 = vpop.permute.xlu0 %3198 }
 0x393   : > { %10730 = vst [vmem:[#allocation47_spill] sm:$0xff] %v8628_v17  ;;  %3038 = vmatpush.msrb.mxu2 %v2863_v38  ;;  %v3345_v38 = vld [vmem:[#allocation3 + $0x138] sm:$0xff]  ;;  %v10739_v17 = vld [vmem:[#allocation61_spill] sm:$0xff] }
 0x394   : > { %v2438_v39 = vadd.f32 %v2437_v27, %v2436_v44  ;;  %v2507_v51 = vrot.slane %v2506_v31, 4  ;;  %10731 = vst [vmem:[#allocation116_spill] sm:$0xff] %v8630_v9  ;;  %v3348_v27 = vld [vmem:[#allocation3 + $0x150] sm:$0xff] }
 0x395   : > { %3359 = vmatpush.msrb.mxu3 %v3348_v27  ;;  %3039 = vmatpush.msrb.mxu2 %v2862_v40  ;;  %v3346_v27 = vld [vmem:[#allocation3 + $0x140] sm:$0xff] }
 0x396   : > { %v2439_v2 = vrot.slane %v2438_v39, 2  ;;  %v2508_v62 = vadd.f32 %v2507_v51, %v2506_v31 }
 0x397   : > { %3360 = vmatpush.msrb.mxu3 %v3347_v1  ;;  %v2859_v1 = vld [vmem:[#allocation3 + $0x28] sm:$0xff] }
 0x398   : > { %v2440_v26 = vadd.f32 %v2439_v2, %v2438_v39  ;;  %v2509_v45 = vrot.slane %v2508_v62, 2  ;;  %v8644_v40 = vpop.permute.xlu1 %3254 }
 0x399   : > { %3361 = vmatpush.msrb.mxu3 %v3346_v27  ;;  %10735 = vst [vmem:[#allocation10_spill] sm:$0xff] %v8644_v40  ;;  %v2858_v27 = vld [vmem:[#allocation3 + $0x20] sm:$0xff] }
 0x39a   : > { %v2441_v44 = vrot.slane %v2440_v26, 1  ;;  %v2510_v8 = vadd.f32 %v2509_v45, %v2508_v62  ;;  %v2861_v45 = vld [vmem:[#allocation3 + $0x38] sm:$0xff] }
 0x39b   : > { %3040 = vmatpush.msrb.mxu2 %v2861_v45  ;;  %3362 = vmatpush.msrb.mxu3 %v3345_v38 }
 0x39c   : > { %v2442_v31 = vadd.f32 %v2441_v44, %v2440_v26  ;;  %v2511_v51 = vrot.slane %v2510_v8, 1  ;;  %v2860_v44 = vld [vmem:[#allocation3 + $0x30] sm:$0xff] }
 0x39d   : > { %3041 = vmatpush.msrb.mxu2 %v2860_v44  ;;  %v3145_v44 = vld [vmem:[#allocation2 + $0x2] sm:$0xff] }
 0x39e   : > { %v8634_v29 = vmul.f32 0.00390625, %v2442_v31  ;;  %v2512_v39 = vadd.f32 %v2511_v51, %v2510_v8  ;;  %v8640_v31 = vpop.permute.xlu2 %2771  ;;  %v8642_v8 = vpop.permute.xlu0 %2727 }
 0x39f   : > { %10733 = vst [vmem:[#allocation103_spill] sm:$0xff] %v8640_v31  ;;  %3042 = vmatpush.msrb.mxu2 %v2859_v1  ;;  %v3342_v1 = vld [vmem:[#allocation3 + $0x120] sm:$0xff]  ;;  %v2855_v31 = vld [vmem:[#allocation3 + $0x8] sm:$0xff] }
 0x3a0   : > { %v2513_v55 = vmul.f32 0.00390625, %v2512_v39  ;;  %v2514_v2 = vmul.f32 %v8634_v29, %v8634_v29  ;;  %10734 = vst [vmem:[#allocation123_spill] sm:$0xff] %v8642_v8  ;;  %v3344_v39 = vld [vmem:[#allocation3 + $0x130] sm:$0xff]  ;;  %v8665_v38 = vpop.permute.xlu1 %2779 }
 0x3a1   : > { %3363 = vmatpush.msrb.mxu3 %v3344_v39  ;;  %3043 = vmatpush.msrb.mxu2 %v2858_v27  ;;  %v2857_v39 = vld [vmem:[#allocation3 + $0x18] sm:$0xff]  ;;  %10738 = vst [vmem:[#allocation12_spill] sm:$0xff] %v8665_v38  ;;  %v2904_v27 = vld [vmem:[#allocation3 + $0x88] sm:$0xff] }
 0x3a2   : > { %v2515_v26 = vsub.f32 %v2513_v55, %v2514_v2  ;;  %v2856_v2 = vld [vmem:[#allocation3 + $0x10] sm:$0xff]  ;;  %v3341_v55 = vld [vmem:[#allocation3 + $0x118] sm:$0xff]  ;;  %2933 = vmatpush.msra.mxu1 %v2904_v27  ;;  %v2529_v27 = vsub.f32 %v8421_v41, %v8634_v29  ;;  %v2534_v41 = vsub.f32 %v8486_v21, %v8634_v29  ;;  %v2540_v21 = vsub.f32 %v8547_v60, %v8634_v29 }
 0x3a3   : > { %3044 = vmatpush.msrb.mxu2 %v2857_v39  ;;  %v2822_v39 = vmul.f32 0.0, %v10739_v17 }
 0x3a4   : > { %v2548_v51 = vmax.f32 %v2515_v26, 0.0  ;;  %v3343_v26 = vld [vmem:[#allocation3 + $0x128] sm:$0xff] }
 0x3a5   : > { %3364 = vmatpush.msrb.mxu3 %v3343_v26  ;;  %3045 = vmatpush.msrb.mxu2 %v2856_v2  ;;  %v3340_v26 = vld [vmem:[#allocation3 + $0x110] sm:$0xff] }
 0x3a6   : > { %v8646_v11 = vadd.f32 1e-05, %v2548_v51  ;;  %v8661_v45 = vpop.permute.xlu2 %2775  ;;  %v8663_v40 = vpop.permute.xlu0 %3218 }
 0x3a7   : > { %3365 = vmatpush.msrb.mxu3 %v3342_v1  ;;  %10736 = vst [vmem:[#allocation106_spill] sm:$0xff] %v8661_v45  ;;  %v10740_v1 = vld [vmem:[#allocation114_spill] sm:$0xff]  ;;  %3046 = vmatpush.msrb.mxu2 %v2855_v31  ;;  %v2516_v45 = vsub.f32 %v8260_v18, %v8634_v29  ;;  %v2526_v18 = vsub.f32 %v8382_v42, %v8634_v29 }
 0x3a8   : > { %5493 = vrsqrt.f32 %v8646_v11  ;;  %10737 = vst [vmem:[#allocation127_spill] sm:$0xff] %v8663_v40  ;;  %v8670_v54 = vmul.f32 0.0, %v10740_v1  ;;  %v3339_v40 = vld [vmem:[#allocation3 + $0x108] sm:$0xff]  ;;  %vm2556_vm1 = vweird.f32 %v8646_v11 }
 0x3a9   : > { %3366 = vmatpush.msrb.mxu3 %v3341_v55  ;;  %v3305_v55 = vmul.f32 %v8608_v19, %v3145_v44  ;;  %3047 = vmatpush.msrb.mxu2 %v2854_v4  ;;  %v3338_v44 = vld [vmem:[#allocation3 + $0x100] sm:$0xff]  ;;  %v2527_v4 = vsub.f32 %v8395_v57, %v8634_v29  ;;  %v2532_v57 = vsub.f32 %v8461_v7, %v8634_v29 }
 0x3aa   : > { %3048 = vmatmul.f32.vlgmr.msrb.gmra.mxu2 %v2822_v39  ;;  %v2903_v39 = vld [vmem:[#allocation3 + $0x80] sm:$0xff] }
 0x3ab   : > { %3367 = vmatpush.msrb.mxu3 %v3340_v26  ;;  %v3579_v26 = vld [vmem:[#allocation3 + $0x1f8] sm:$0xff]  ;;  %2934 = vmatpush.msra.mxu1 %v2903_v39 }
 0x3ac   : > { %3580 = vmatpush.msrb.mxu0 %v3579_v26  ;;  %v2528_v26 = vsub.f32 %v8408_v49, %v8634_v29  ;;  %v2533_v49 = vsub.f32 %v8471_v59, %v8634_v29 }
 0x3ad   : > { %3368 = vmatpush.msrb.mxu3 %v3339_v40  ;;  %v2530_v40 = vsub.f32 %v8436_v22, %v8634_v29  ;;  %v2535_v22 = vsub.f32 %v8497_v36, %v8634_v29  ;;  %v8729_v36 = vpop.permute.xlu1 %2783 }
 0x3ae   : > { %v5494_v62 = vpop.eup %5493  ;;  %3581 = vmatpush.msrb.mxu0 %v3578_v53  ;;  %v8705_v42 = vpop.permute.xlu2 %3262  ;;  %v2537_v53 = vsub.f32 %v8524_v63, %v8634_v29 }
 0x3af   : > { %v2551_v51 = vmul.f32 %v5494_v62, %v8646_v11  ;;  %vm2557_vm0 = vweird.f32 %v5494_v62  ;;  %3369 = vmatpush.msrb.mxu3 %v3338_v44  ;;  %10741 = vst [vmem:[#allocation108_spill] sm:$0xff] %v8705_v42  ;;  %v8721_v7 = vpop.permute.xlu0 %2747  ;;  %v2538_v11 = vsub.f32 %v8531_v30, %v8634_v29 }
 0x3b0   : > { %vm2558_vm2 = vmor %vm2556_vm1, %vm2557_vm0  ;;  %3370 = vmatmul.f32.vlgmr.msrb.gmra.mxu3 %v3305_v55  ;;  %v3576_v55 = vld [vmem:[#allocation3 + $0x1e0] sm:$0xff] }
 0x3b1   : > { %v2552_v2 = vmul.f32 %v5494_v62, %v2551_v51 }
 0x3b2   : > { %3051 = vmatmul.f32.gmra.mxu2 %v8670_v54  ;;  %v10746_v54 = vsub.f32 %v8290_v10, %v8634_v29  ;;  %v10750_v10 = vsub.f32 %v8351_v13, %v8634_v29 }
 0x3b3   : > { %v2553_v20 = vmul.f32 0.5, %v2552_v2  ;;  %v3577_v2 = vld [vmem:[#allocation3 + $0x1e8] sm:$0xff] }
 0x3b4   : > { %3582 = vmatpush.msrb.mxu0 %v3577_v2 }
 0x3b5   : > { %v2554_v38 = vsub.f32 1.5, %v2553_v20  ;;  %v2531_v20 = vsub.f32 %v8449_v33, %v8634_v29  ;;  %v2536_v33 = vsub.f32 %v8515_v61, %v8634_v29  ;;  %v10742_v61 = vsub.f32 %v8617_v0, %v8634_v29 }
 0x3b6   : > { %3583 = vmatpush.msrb.mxu0 %v3576_v55  ;;  %v3574_v55 = vld [vmem:[#allocation3 + $0x1d0] sm:$0xff] }
 0x3b7   : > { %v2555_v51 = vmul.f32 %v5494_v62, %v2554_v38  ;;  %v2539_v38 = vsub.f32 %v8537_v32, %v8634_v29  ;;  %v2870_v32 = vld [vmem:[#allocation2 + $0x1] sm:$0xff] }
 0x3b8   : > { %2935 = vmatmul.f32.vlgmr.msra.gmra.mxu1 %v2870_v32  ;;  %3584 = vmatpush.msrb.mxu0 %v3575_v56 }
 0x3b9   : > { %v2559_v59 = vsel %vm2558_vm2, %v5494_v62, %v2555_v51 }
 0x3ba   : > { %v2591_v44 = vmul.f32 %v2559_v59, %v10742_v61  ;;  %v2570_v63 = vmul.f32 %v2559_v59, %v2526_v18  ;;  %v2571_v2 = vmul.f32 %v2559_v59, %v2527_v4  ;;  %v2572_v39 = vmul.f32 %v2559_v59, %v2528_v26  ;;  %3585 = vmatpush.msrb.mxu0 %v3574_v55 }
 0x3bb   : > { %v2573_v62 = vmul.f32 %v2559_v59, %v2529_v27  ;;  %v2574_v51 = vmul.f32 %v2559_v59, %v2530_v40  ;;  %v2575_v31 = vmul.f32 %v2559_v59, %v2531_v20  ;;  %v8734_v30 = vmul.f32 %v2559_v59, %v2516_v45 }
 0x3bc   : > { %v2623_v19 = vmax.f32 %v2591_v44, 0.0  ;;  %v2602_v42 = vmax.f32 %v2570_v63, 0.0  ;;  %v2603_v60 = vmax.f32 %v2571_v2, 0.0  ;;  %v2604_v6 = vmax.f32 %v2572_v39, 0.0 }
 0x3bd   : > { %v2605_v0 = vmax.f32 %v2573_v62, 0.0  ;;  %v2606_v18 = vmax.f32 %v2574_v51, 0.0  ;;  %v2607_v4 = vmax.f32 %v2575_v31, 0.0  ;;  %v10743_v27 = vsub.f32 %v8256_v14, %v8634_v29 }
 0x3be   : > { %2661 = vst [vmem:[#allocation2 + $0x109] sm:$0xff] %v2623_v19  ;;  %v10744_v45 = vsub.f32 %v8264_v25, %v8634_v29  ;;  %v10745_v20 = vsub.f32 %v8272_v15, %v8634_v29  ;;  %v8755_v31 = vmul.f32 %v2559_v59, %v10746_v54  ;;  %v10747_v14 = vsub.f32 %v8313_v24, %v8634_v29  ;;  %v3572_v54 = vld [vmem:[#allocation3 + $0x1c0] sm:$0xff] }
 0x3bf   : > { %v8740_v26 = vmul.f32 %v2559_v59, %v10743_v27  ;;  %2640 = vst [vmem:[#allocation2 + $0x61] sm:$0xff] %v2602_v42  ;;  %v10748_v25 = vsub.f32 %v8326_v28, %v8634_v29  ;;  %v10749_v15 = vsub.f32 %v8338_v50, %v8634_v29  ;;  %v8775_v63 = vmul.f32 %v2559_v59, %v10750_v10  ;;  %v8788_v27 = vpop.permute.xlu2 %3266 }
 0x3c0   : > { %v8745_v40 = vmul.f32 %v2559_v59, %v10744_v45  ;;  %v8750_v61 = vmul.f32 %v2559_v59, %v10745_v20  ;;  %v8760_v56 = vmul.f32 %v2559_v59, %v10747_v14  ;;  %v10751_v24 = vsub.f32 %v8366_v23, %v8634_v29  ;;  %2641 = vst [vmem:[#allocation2 + $0x69] sm:$0xff] %v2603_v60  ;;  %v8820_v45 = vpop.permute.xlu1 %3270 }
 0x3c1   : > { %v8765_v19 = vmul.f32 %v2559_v59, %v10748_v25  ;;  %v8770_v44 = vmul.f32 %v2559_v59, %v10749_v15  ;;  %v8782_v42 = vmul.f32 %v2559_v59, %v2532_v57  ;;  %v8784_v28 = vmul.f32 %v2559_v59, %v2533_v49  ;;  %2642 = vst [vmem:[#allocation2 + $0x71] sm:$0xff] %v2604_v6  ;;  %v3571_v25 = vld [vmem:[#allocation3 + $0x1b8] sm:$0xff] }
 0x3c2   : > { %v8780_v2 = vmul.f32 %v2559_v59, %v10751_v24  ;;  %v8786_v39 = vmul.f32 %v2559_v59, %v2534_v41  ;;  %v2579_v50 = vmul.f32 %v2559_v59, %v2535_v22  ;;  %v2580_v62 = vmul.f32 %v2559_v59, %v2536_v33  ;;  %2643 = vst [vmem:[#allocation2 + $0x79] sm:$0xff] %v2605_v0  ;;  %v8803_v33 = vpop.permute.xlu0 %3238 }
 0x3c3   : > { %v2581_v51 = vmul.f32 %v2559_v59, %v2537_v53  ;;  %v2582_v13 = vmul.f32 %v2559_v59, %v2538_v11  ;;  %v2583_v32 = vmul.f32 %v2559_v59, %v2539_v38  ;;  %v2584_v23 = vmul.f32 %v2559_v59, %v2540_v21  ;;  %10755 = vst [vmem:[#allocation128_spill] sm:$0xff] %v8803_v33  ;;  %v3573_v53 = vld [vmem:[#allocation3 + $0x1c8] sm:$0xff] }
 0x3c4   : > { %v10752_v60 = vsub.f32 %v8555_v37, %v8634_v29  ;;  %v10753_v49 = vsub.f32 %v8566_v16, %v8634_v29  ;;  %v10754_v6 = vsub.f32 %v8577_v3, %v8634_v29  ;;  %2644 = vst [vmem:[#allocation2 + $0x81] sm:$0xff] %v2606_v18  ;;  %v10756_v11 = vsub.f32 %v8588_v12, %v8634_v29 }
 0x3c5   : > { %v10757_v37 = vsub.f32 %v8599_v46, %v8634_v29  ;;  %v10758_v21 = vsub.f32 %v8610_v58, %v8634_v29  ;;  %v2612_v0 = vmax.f32 %v2580_v62, 0.0  ;;  %2645 = vst [vmem:[#allocation2 + $0x89] sm:$0xff] %v2607_v4  ;;  %v2613_v18 = vmax.f32 %v2581_v51, 0.0  ;;  %3586 = vmatpush.msrb.mxu0 %v3573_v53 }
 0x3c6   : > { %v2585_v57 = vmul.f32 %v2559_v59, %v10752_v60  ;;  %v8796_v41 = vmul.f32 %v2559_v59, %v10753_v49  ;;  %v8801_v22 = vmul.f32 %v2559_v59, %v10754_v6  ;;  %v8808_v38 = vmul.f32 %v2559_v59, %v10756_v11 }
 0x3c7   : > { %v8813_v16 = vmul.f32 %v2559_v59, %v10757_v37  ;;  %v8818_v3 = vmul.f32 %v2559_v59, %v10758_v21  ;;  %v2614_v20 = vmax.f32 %v2582_v13, 0.0  ;;  %v2615_v12 = vmax.f32 %v2583_v32, 0.0  ;;  %2650 = vst [vmem:[#allocation2 + $0xb1] sm:$0xff] %v2612_v0  ;;  %3587 = vmatpush.msrb.mxu0 %v3572_v54  ;;  %v8828_v24 = vpop.permute.xlu2 %2791 }
 0x3c8   : > { %v2616_v14 = vmax.f32 %v2584_v23, 0.0  ;;  %v2617_v46 = vmax.f32 %v2585_v57, 0.0  ;;  %2651 = vst [vmem:[#allocation2 + $0xb9] sm:$0xff] %v2613_v18  ;;  %v2592_v58 = vmax.f32 %v8734_v30, 0.0  ;;  %v10239_v29 = vmax.f32 %v8740_v26, 0.0  ;;  %v8842_v13 = vpop.permute.xlu1 %3274 }
 0x3c9   : > { %2652 = vst [vmem:[#allocation2 + $0xc1] sm:$0xff] %v2614_v20  ;;  %v2611_v59 = vmax.f32 %v2579_v50, 0.0  ;;  %3588 = vmatpush.msrb.mxu0 %v3571_v25  ;;  %v10238_v4 = vmax.f32 %v8745_v40, 0.0  ;;  %v10237_v10 = vmax.f32 %v8750_v61, 0.0  ;;  %v10236_v62 = vmax.f32 %v8755_v31, 0.0  ;;  %v3773_v25 = vld [vmem:[#allocation3 + $0x278] sm:$0xff] }
 0x3ca   : > { %2653 = vst [vmem:[#allocation2 + $0xc9] sm:$0xff] %v2615_v12  ;;  %v8837_v50 = vpop.permute.xlu0 %2767  ;;  %v10235_v51 = vmax.f32 %v8760_v56, 0.0  ;;  %v10234_v32 = vmax.f32 %v8765_v19, 0.0  ;;  %v10233_v60 = vmax.f32 %v8770_v44, 0.0  ;;  %v10232_v49 = vmax.f32 %v8775_v63, 0.0  ;;  %3774 = vmatpush.msrb.mxu1 %v3773_v25  ;;  %v3565_v25 = vld [vmem:[#allocation3 + $0x188] sm:$0xff] }
 0x3cb   : > { %2654 = vst [vmem:[#allocation2 + $0xd1] sm:$0xff] %v2616_v14  ;;  %v10231_v11 = vmax.f32 %v8780_v2, 0.0  ;;  %v2608_v21 = vmax.f32 %v8782_v42, 0.0  ;;  %v2609_v18 = vmax.f32 %v8784_v28, 0.0  ;;  %v2610_v20 = vmax.f32 %v8786_v39, 0.0 }
 0x3cc   : > { %2655 = vst [vmem:[#allocation2 + $0xd9] sm:$0xff] %v2617_v46  ;;  %v8825_v15 = vld [vmem:[#allocation2 + $0x88] sm:$0xff]  ;;  %v2618_v12 = vmax.f32 %v8796_v41, 0.0  ;;  %v2619_v54 = vmax.f32 %v8801_v22, 0.0  ;;  %v2620_v28 = vmax.f32 %v8808_v38, 0.0  ;;  %v2621_v39 = vmax.f32 %v8813_v16, 0.0 }
 0x3cd   : > { %2649 = vst [vmem:[#allocation2 + $0xa9] sm:$0xff] %v2611_v59  ;;  %v8832_v55 = vmul.f32 %v8825_v15, %v8721_v7  ;;  %v2622_v41 = vmax.f32 %v8818_v3, 0.0  ;;  %v3570_v59 = vld [vmem:[#allocation3 + $0x1b0] sm:$0xff]  ;;  %v10763_v16 = vld [vmem:[#allocation78_spill] sm:$0xff]  ;;  %v3568_v3 = vld [vmem:[#allocation3 + $0x1a0] sm:$0xff] }
 0x3ce   : > { %2630 = vst [vmem:[#allocation2 + $0x11] sm:$0xff] %v2592_v58  ;;  %3589 = vmatpush.msrb.mxu0 %v3570_v59  ;;  %v3771_v59 = vld [vmem:[#allocation3 + $0x268] sm:$0xff] }
 0x3cf   : > { %10759 = vst [vmem:[#allocation30_spill] sm:$0xff] %v8832_v55  ;;  %v8886_v42 = vpop.permute.xlu2 %2795 }
 0x3d0   : > { %2631 = vst [vmem:[#allocation2 + $0x19] sm:$0xff] %v10239_v29  ;;  %v8892_v46 = vpop.permute.xlu1 %2799 }
 0x3d1   : > { %2632 = vst [vmem:[#allocation2 + $0x21] sm:$0xff] %v10238_v4  ;;  %v8847_v23 = vld [vmem:[#allocation2 + $0xc2] sm:$0xff] }
 0x3d2   : > { %2633 = vst [vmem:[#allocation2 + $0x29] sm:$0xff] %v10237_v10  ;;  %v8854_v57 = vmul.f32 %v8847_v23, %v8788_v27  ;;  %v8857_v6 = vld [vmem:[#allocation2 + $0xd0] sm:$0xff]  ;;  %v8889_v14 = vpop.permute.xlu0 %3258  ;;  %v3770_v10 = vld [vmem:[#allocation3 + $0x260] sm:$0xff] }
 0x3d3   : > { %2634 = vst [vmem:[#allocation2 + $0x31] sm:$0xff] %v10236_v62  ;;  %v8861_v53 = vld [vmem:[#allocation2 + $0xd2] sm:$0xff]  ;;  %v8873_v0 = vmul.f32 %v8857_v6, %v8729_v36 }
 0x3d4   : > { %10760 = vst [vmem:[#allocation111_spill] sm:$0xff] %v8854_v57  ;;  %v8868_v37 = vmul.f32 %v8861_v53, %v8788_v27  ;;  %v8935_v4 = vmul.f32 %v8861_v53, %v8842_v13 }
 0x3d5   : > { %2635 = vst [vmem:[#allocation2 + $0x39] sm:$0xff] %v10235_v51  ;;  %v2664_v22 = vld [vmem:[#allocation2 + $0x10] sm:$0xff] }
 0x3d6   : > { %10761 = vst [vmem:[#allocation131_spill] sm:$0xff] %v8868_v37  ;;  %v3146_v38 = vld [vmem:[#allocation2 + $0xa] sm:$0xff]  ;;  %v3531_v51 = vmul.f32 %v10739_v17, %v2664_v22  ;;  %v8951_v37 = vmul.f32 %v8847_v23, %v8889_v14  ;;  %v10784_v17 = vld [vmem:[#allocation87_spill] sm:$0xff] }
 0x3d7   : > { %10762 = vst [vmem:[#allocation28_spill] sm:$0xff] %v8873_v0 }
 0x3d8   : > { %2636 = vst [vmem:[#allocation2 + $0x41] sm:$0xff] %v10234_v32  ;;  %v2665_v32 = vld [vmem:[#allocation2 + $0x18] sm:$0xff]  ;;  %v2666_v57 = vld [vmem:[#allocation2 + $0x20] sm:$0xff] }
 0x3d9   : > { %2637 = vst [vmem:[#allocation2 + $0x49] sm:$0xff] %v10233_v60 }
 0x3da   : > { %2638 = vst [vmem:[#allocation2 + $0x51] sm:$0xff] %v10232_v49  ;;  %v3772_v49 = vld [vmem:[#allocation3 + $0x270] sm:$0xff]  ;;  %v8899_v60 = vpop.permute.xlu0 %2787 }
 0x3db   : > { %2639 = vst [vmem:[#allocation2 + $0x59] sm:$0xff] %v10231_v11  ;;  %v3569_v11 = vld [vmem:[#allocation3 + $0x1a8] sm:$0xff]  ;;  %3775 = vmatpush.msrb.mxu1 %v3772_v49 }
 0x3dc   : > { %2646 = vst [vmem:[#allocation2 + $0x91] sm:$0xff] %v2608_v21  ;;  %v2871_v21 = vld [vmem:[#allocation2 + $0x9] sm:$0xff]  ;;  %3590 = vmatpush.msrb.mxu0 %v3569_v11 }
 0x3dd   : > { %2647 = vst [vmem:[#allocation2 + $0x99] sm:$0xff] %v2609_v18  ;;  %v8896_v18 = vpop.permute.xlu2 %3282  ;;  %2938 = vmatmul.f32.gmra.mxu1 %v2871_v21  ;;  %v3564_v21 = vld [vmem:[#allocation3 + $0x180] sm:$0xff]  ;;  %v8907_v11 = vld [vmem:[#allocation2 + $0xb0] sm:$0xff] }
 0x3de   : > { %2648 = vst [vmem:[#allocation2 + $0xa1] sm:$0xff] %v2610_v20  ;;  %v2824_v20 = vmul.f32 %v10763_v16, %v2664_v22  ;;  %3591 = vmatpush.msrb.mxu0 %v3568_v3  ;;  %3776 = vmatpush.msrb.mxu1 %v3771_v59  ;;  %v8915_v3 = vld [vmem:[#allocation2 + $0xb2] sm:$0xff] }
 0x3df   : > { %2656 = vst [vmem:[#allocation2 + $0xe1] sm:$0xff] %v2618_v12  ;;  %v8901_v12 = vpop.permute.xlu1 %2803 }
 0x3e0   : > { %2657 = vst [vmem:[#allocation2 + $0xe9] sm:$0xff] %v2619_v54  ;;  %v10764_v54 = vld [vmem:[#allocation102_spill] sm:$0xff]  ;;  %3054 = vmatmul.f32.gmra.mxu2 %v2824_v20  ;;  %3777 = vmatpush.msrb.mxu1 %v3770_v10 }
 0x3e1   : > { %2658 = vst [vmem:[#allocation2 + $0xf1] sm:$0xff] %v2620_v28  ;;  %v3306_v28 = vmul.f32 %v10764_v54, %v3146_v38  ;;  %v3147_v38 = vld [vmem:[#allocation2 + $0x12] sm:$0xff] }
 0x3e2   : > { %2659 = vst [vmem:[#allocation2 + $0xf9] sm:$0xff] %v2621_v39  ;;  %v3567_v39 = vld [vmem:[#allocation3 + $0x198] sm:$0xff]  ;;  %v8913_v20 = vpop.permute.xlu0 %3278 }
 0x3e3   : > { %2660 = vst [vmem:[#allocation2 + $0x101] sm:$0xff] %v2622_v41  ;;  %v3566_v41 = vld [vmem:[#allocation3 + $0x190] sm:$0xff]  ;;  %3592 = vmatpush.msrb.mxu0 %v3567_v39  ;;  %3373 = vmatmul.f32.gmra.mxu3 %v3306_v28  ;;  %v2825_v28 = vmul.f32 %v8621_v48, %v2665_v32 }
 0x3e4   : > { %10769 = vst [vmem:[#allocation34_spill] sm:$0xff] %v8935_v4 }
 0x3e5   : > { %3593 = vmatpush.msrb.mxu0 %v3566_v41  ;;  %2941 = vmatmul.f32.gmra.mxu1 %v2592_v58  ;;  %v8909_v62 = vpop.permute.xlu2 %3286  ;;  %v10766_v58 = vld [vmem:[#allocation65_spill] sm:$0xff]  ;;  %v8925_v41 = vmul.f32 %v8837_v50, %v8907_v11  ;;  %10773 = vst [vmem:[#allocation18_spill] sm:$0xff] %v8951_v37 }
 0x3e6   : > { %v3307_v39 = vmul.f32 %v10766_v58, %v3147_v38 }
 0x3e7   : > { %3594 = vmatpush.msrb.mxu0 %v3565_v25  ;;  %v8911_v49 = vld [vmem:[#allocation2 + $0xe8] sm:$0xff]  ;;  %v8920_v30 = vpop.permute.xlu1 %3290  ;;  %10767 = vst [vmem:[#allocation14_spill] sm:$0xff] %v8925_v41  ;;  %v8975_v41 = vld [vmem:[#allocation2 + $0x1a] sm:$0xff] }
 0x3e8   : > { %v8918_v22 = vld [vmem:[#allocation2 + $0xe2] sm:$0xff]  ;;  %v8931_v59 = vmul.f32 %v8911_v49, %v8886_v42  ;;  %v8937_v29 = vld [vmem:[#allocation2 + $0xf0] sm:$0xff]  ;;  %3057 = vmatmul.f32.gmra.mxu2 %v2825_v28 }
 0x3e9   : > { %10765 = vst [vmem:[#allocation118_spill] sm:$0xff] %v8918_v22  ;;  %3595 = vmatpush.msrb.mxu0 %v3564_v21  ;;  %v8927_v25 = vld [vmem:[#allocation2 + $0xf2] sm:$0xff]  ;;  %v8943_v38 = vmul.f32 %v8918_v22, %v8842_v13  ;;  %v8959_v28 = vmul.f32 %v8918_v22, %v8896_v18  ;;  %v8971_v37 = vmul.f32 %v8937_v29, %v8892_v46  ;;  %v4594_v22 = vld [vmem:[#allocation2 + $0x10a] sm:$0xff] }
 0x3ea   : > { %3596 = vmatmul.f32.vlgmr.msrb.gmra.mxu0 %v3531_v51  ;;  %10768 = vst [vmem:[#allocation125_spill] sm:$0xff] %v8931_v59  ;;  %v8939_v21 = vld [vmem:[#allocation2 + $0xd8] sm:$0xff]  ;;  %v8947_v51 = vmul.f32 %v8889_v14, %v8915_v3  ;;  %v8953_v59 = vld [vmem:[#allocation2 + $0xea] sm:$0xff]  ;;  %v4593_v58 = vld [vmem:[#allocation2 + $0x102] sm:$0xff] }
 0x3eb   : > { %10770 = vst [vmem:[#allocation115_spill] sm:$0xff] %v8937_v29  ;;  %v8955_v4 = vld [vmem:[#allocation2 + $0xfa] sm:$0xff]  ;;  %3376 = vmatmul.f32.gmra.mxu3 %v3307_v39  ;;  %v10779_v39 = vmax.f32 %v8740_v26, 0.0  ;;  %v4174_v55 = vld [vmem:[#allocation2 + $0x108] sm:$0xff]  ;;  %v9017_v29 = vmul.f32 %v4593_v58, %v8920_v30 }
 0x3ec   : > { %10771 = vst [vmem:[#allocation32_spill] sm:$0xff] %v8943_v38  ;;  %v8963_v38 = vmul.f32 %v8927_v25, %v8896_v18  ;;  %v8965_v0 = vld [vmem:[#allocation2 + $0xf8] sm:$0xff]  ;;  %v8987_v10 = vmul.f32 %v8955_v4, %v8909_v62  ;;  %v9034_v58 = vld [vmem:[#allocation2 + $0x28] sm:$0xff] }
 0x3ed   : > { %10772 = vst [vmem:[#allocation130_spill] sm:$0xff] %v8947_v51  ;;  %v8967_v51 = vld [vmem:[#allocation2 + $0xda] sm:$0xff]  ;;  %2944 = vmatmul.f32.gmra.mxu1 %v10779_v39  ;;  %v8992_v26 = vmul.f32 %v8965_v0, %v8901_v12 }
 0x3ee   : > { %10774 = vst [vmem:[#allocation67_spill] sm:$0xff] %v8953_v59  ;;  %v8994_v39 = vld [vmem:[#allocation2 + $0x100] sm:$0xff]  ;;  %v8999_v54 = vmul.f32 %v8967_v51, %v8913_v20 }
 0x3ef   : > { %10775 = vst [vmem:[#allocation38_spill] sm:$0xff] %v8959_v28  ;;  %v8979_v28 = vmul.f32 %v8939_v21, %v8899_v60 }
 0x3f0   : > { %10776 = vst [vmem:[#allocation122_spill] sm:$0xff] %v8963_v38  ;;  %v8983_v38 = vmul.f32 %v8953_v59, %v8909_v62 }
 0x3f1   : > { %10777 = vst [vmem:[#allocation36_spill] sm:$0xff] %v8965_v0 }
 0x3f2   : > { %10778 = vst [vmem:[#allocation50_spill] sm:$0xff] %v8971_v37  ;;  %v3532_v37 = vmul.f32 %v10740_v1, %v2665_v32  ;;  %v10787_v32 = vld [vmem:[#allocation72_spill] sm:$0xff] }
 0x3f3   : > { %10780 = vst [vmem:[#allocation132_spill] sm:$0xff] %v8979_v28  ;;  %v2826_v28 = vmul.f32 %v10784_v17, %v2666_v57  ;;  %v3308_v1 = vmul.f32 %v10787_v32, %v8975_v41 }
 0x3f4   : > { %10781 = vst [vmem:[#allocation73_spill] sm:$0xff] %v8983_v38  ;;  %v9003_v38 = vmul.f32 %v8953_v59, %v8913_v20  ;;  %3599 = vmatmul.f32.gmra.mxu0 %v3532_v37  ;;  %v9025_v59 = vpop.permute.xlu1 %3294  ;;  %v3769_v37 = vld [vmem:[#allocation3 + $0x258] sm:$0xff] }
 0x3f5   : > { %10782 = vst [vmem:[#allocation133_spill] sm:$0xff] %v8987_v10  ;;  %v9005_v10 = vpop.permute.xlu2 %2811  ;;  %3060 = vmatmul.f32.gmra.mxu2 %v2826_v28  ;;  %3379 = vmatmul.f32.gmra.mxu3 %v3308_v1  ;;  %v10795_v28 = vld [vmem:[#allocation82_spill] sm:$0xff] }
 0x3f6   : > { %10783 = vst [vmem:[#allocation40_spill] sm:$0xff] %v8992_v26  ;;  %v9010_v0 = vmul.f32 %v4174_v55, %v9005_v10  ;;  %v9014_v26 = vmul.f32 %v8927_v25, %v8920_v30  ;;  %v9029_v55 = vmul.f32 %v8955_v4, %v9025_v59  ;;  %3778 = vmatpush.msrb.mxu1 %v3769_v37 }
 0x3f7   : > { %10785 = vst [vmem:[#allocation71_spill] sm:$0xff] %v8999_v54  ;;  %v9019_v54 = vpop.permute.xlu0 %2807  ;;  %v2827_v32 = vmul.f32 %v10795_v28, %v9034_v58  ;;  %v3534_v37 = vmul.f32 %v8621_v48, %v9034_v58 }
 0x3f8   : > { %10786 = vst [vmem:[#allocation24_spill] sm:$0xff] %v9003_v38  ;;  %v9023_v38 = vmul.f32 %v8994_v39, %v9019_v54 }
 0x3f9   : > { %10788 = vst [vmem:[#allocation15_spill] sm:$0xff] %v9010_v0  ;;  %v9032_v0 = vmul.f32 %v4594_v22, %v9025_v59  ;;  %v9045_v22 = vld [vmem:[#allocation2 + $0x30] sm:$0xff] }
 0x3fa   : > { %10789 = vst [vmem:[#allocation109_spill] sm:$0xff] %v9014_v26  ;;  %v9038_v26 = vld [vmem:[#allocation2 + $0x22] sm:$0xff] }
 0x3fb   : > { %10790 = vst [vmem:[#allocation62_spill] sm:$0xff] %v9017_v29  ;;  %v10794_v29 = vmax.f32 %v8745_v40, 0.0  ;;  %v10797_v40 = vmax.f32 %v8750_v61, 0.0  ;;  %v3768_v61 = vld [vmem:[#allocation3 + $0x250] sm:$0xff] }
 0x3fc   : > { %10791 = vst [vmem:[#allocation117_spill] sm:$0xff] %v9023_v38  ;;  %v3533_v38 = vmul.f32 %v10763_v16, %v2666_v57  ;;  %v2828_v57 = vmul.f32 %v8315_v47, %v9045_v22  ;;  %3779 = vmatpush.msrb.mxu1 %v3768_v61 }
 0x3fd   : > { %10792 = vst [vmem:[#allocation45_spill] sm:$0xff] %v9029_v55  ;;  %2947 = vmatmul.f32.gmra.mxu1 %v10794_v29  ;;  %v10796_v55 = vld [vmem:[#allocation121_spill] sm:$0xff]  ;;  %3063 = vmatmul.f32.gmra.mxu2 %v2827_v32  ;;  %v10798_v32 = vmax.f32 %v8755_v31, 0.0  ;;  %v10799_v31 = vmax.f32 %v8760_v56, 0.0 }
 0x3fe   : > { %10793 = vst [vmem:[#allocation81_spill] sm:$0xff] %v9032_v0  ;;  %v3309_v1 = vmul.f32 %v10796_v55, %v9038_v26  ;;  %3602 = vmatmul.f32.gmra.mxu0 %v3533_v38  ;;  %v9049_v29 = vld [vmem:[#allocation2 + $0x2a] sm:$0xff]  ;;  %v9057_v38 = vld [vmem:[#allocation2 + $0x38] sm:$0xff]  ;;  %v3153_v56 = vld [vmem:[#allocation2 + $0x42] sm:$0xff] }
 0x3ff   : > { %v3310_v0 = vmul.f32 %v8630_v9, %v9049_v29  ;;  %v2829_v48 = vmul.f32 %v8385_v34, %v9057_v38  ;;  %v10803_v9 = vld [vmem:[#allocation92_spill] sm:$0xff] }
 0x400   : > { %3382 = vmatmul.f32.gmra.mxu3 %v3309_v1  ;;  %v9061_v1 = vld [vmem:[#allocation2 + $0x32] sm:$0xff] }
 0x405   : > { %2950 = vmatmul.f32.gmra.mxu1 %v10797_v40  ;;  %3066 = vmatmul.f32.gmra.mxu2 %v2828_v57  ;;  %v3535_v40 = vmul.f32 %v10784_v17, %v9045_v22  ;;  %v9071_v57 = vld [vmem:[#allocation2 + $0x3a] sm:$0xff] }
 0x406   : > { %3605 = vmatmul.f32.gmra.mxu0 %v3534_v37  ;;  %v3311_v37 = vmul.f32 %v8369_v5, %v9061_v1  ;;  %v3312_v17 = vmul.f32 %v8439_v35, %v9071_v57  ;;  %v2672_v35 = vld [vmem:[#allocation2 + $0x50] sm:$0xff] }
 0x408   : > { %3385 = vmatmul.f32.gmra.mxu3 %v3310_v0  ;;  %v2670_v0 = vld [vmem:[#allocation2 + $0x40] sm:$0xff] }
 0x409   : > { %v2830_v61 = vmul.f32 %v8642_v8, %v2670_v0 }
 0x40d   : > { %2953 = vmatmul.f32.gmra.mxu1 %v10798_v32  ;;  %3069 = vmatmul.f32.gmra.mxu2 %v2829_v48  ;;  %v3536_v32 = vmul.f32 %v10795_v28, %v9057_v38  ;;  %v10800_v48 = vmax.f32 %v8765_v19, 0.0  ;;  %v3313_v28 = vmul.f32 %v8452_v52, %v3153_v56  ;;  %v10804_v56 = vmax.f32 %v8775_v63, 0.0  ;;  %v10806_v52 = vld [vmem:[#allocation127_spill] sm:$0xff] }
 0x40e   : > { %3608 = vmatmul.f32.gmra.mxu0 %v3535_v40  ;;  %v2671_v40 = vld [vmem:[#allocation2 + $0x48] sm:$0xff] }
 0x40f   : > { %v2831_v5 = vmul.f32 %v8499_v43, %v2671_v40  ;;  %v3538_v19 = vmul.f32 %v8385_v34, %v2671_v40 }
 0x410   : > { %3388 = vmatmul.f32.gmra.mxu3 %v3311_v37  ;;  %v3767_v37 = vld [vmem:[#allocation3 + $0x248] sm:$0xff] }
 0x411   : > { %3780 = vmatpush.msrb.mxu1 %v3767_v37 }
 0x415   : > { %2956 = vmatmul.f32.gmra.mxu1 %v10799_v31  ;;  %3072 = vmatmul.f32.gmra.mxu2 %v2830_v61  ;;  %v3537_v31 = vmul.f32 %v8315_v47, %v2670_v0  ;;  %v10802_v61 = vld [vmem:[#allocation101_spill] sm:$0xff]  ;;  %v2673_v0 = vld [vmem:[#allocation2 + $0x58] sm:$0xff] }
 0x416   : > { %3611 = vmatmul.f32.gmra.mxu0 %v3536_v32  ;;  %v10801_v32 = vmax.f32 %v8770_v44, 0.0  ;;  %v3539_v44 = vmul.f32 %v8642_v8, %v2672_v35  ;;  %v3540_v63 = vmul.f32 %v8499_v43, %v2673_v0  ;;  %v2675_v8 = vld [vmem:[#allocation2 + $0x68] sm:$0xff] }
 0x418   : > { %3391 = vmatmul.f32.gmra.mxu3 %v3312_v17  ;;  %v3154_v17 = vld [vmem:[#allocation2 + $0x4a] sm:$0xff] }
 0x419   : > { %v3314_v37 = vmul.f32 %v10803_v9, %v3154_v17  ;;  %v2674_v17 = vld [vmem:[#allocation2 + $0x60] sm:$0xff] }
 0x41a   : > { %v10809_v9 = vld [vmem:[#allocation104_spill] sm:$0xff] }
 0x41d   : > { %2959 = vmatmul.f32.gmra.mxu1 %v10800_v48  ;;  %3075 = vmatmul.f32.gmra.mxu2 %v2831_v5  ;;  %v2832_v48 = vmul.f32 %v10802_v61, %v2672_v35  ;;  %v3766_v5 = vld [vmem:[#allocation3 + $0x240] sm:$0xff] }
 0x41e   : > { %3614 = vmatmul.f32.gmra.mxu0 %v3537_v31  ;;  %3781 = vmatpush.msrb.mxu1 %v3766_v5  ;;  %v10805_v31 = vld [vmem:[#allocation96_spill] sm:$0xff] }
 0x41f   : > { %v2882_v35 = vld [vmem:[#allocation2 + $0x61] sm:$0xff] }
 0x420   : > { %3394 = vmatmul.f32.gmra.mxu3 %v3313_v28  ;;  %v3155_v28 = vld [vmem:[#allocation2 + $0x52] sm:$0xff] }
 0x421   : > { %v3315_v40 = vmul.f32 %v10806_v52, %v3155_v28  ;;  %v3765_v28 = vld [vmem:[#allocation3 + $0x238] sm:$0xff] }
 0x422   : > { %3782 = vmatpush.msrb.mxu1 %v3765_v28  ;;  %v3512_v28 = vld [vmem:[#allocation2 + $0x78] sm:$0xff] }
 0x425   : > { %2962 = vmatmul.f32.gmra.mxu1 %v10801_v32  ;;  %3078 = vmatmul.f32.gmra.mxu2 %v2832_v48  ;;  %v2833_v32 = vmul.f32 %v10805_v31, %v2673_v0  ;;  %v3156_v48 = vld [vmem:[#allocation2 + $0x5a] sm:$0xff]  ;;  %v2883_v0 = vld [vmem:[#allocation2 + $0x69] sm:$0xff] }
 0x426   : > { %3617 = vmatmul.f32.gmra.mxu0 %v3538_v19  ;;  %v10807_v19 = vmax.f32 %v8780_v2, 0.0  ;;  %v3316_v5 = vmul.f32 %v10809_v9, %v3156_v48  ;;  %v2835_v2 = vmul.f32 %v8721_v7, %v2675_v8  ;;  %v2676_v48 = vld [vmem:[#allocation2 + $0x70] sm:$0xff]  ;;  %v10812_v9 = vld [vmem:[#allocation93_spill] sm:$0xff] }
 0x428   : > { %3397 = vmatmul.f32.gmra.mxu3 %v3314_v37  ;;  %v10808_v37 = vld [vmem:[#allocation105_spill] sm:$0xff] }
 0x42d   : > { %2965 = vmatmul.f32.gmra.mxu1 %v10804_v56  ;;  %3081 = vmatmul.f32.gmra.mxu2 %v2833_v32  ;;  %v2834_v56 = vmul.f32 %v10808_v37, %v2674_v17  ;;  %v3541_v32 = vmul.f32 %v10802_v61, %v2674_v17  ;;  %v2884_v17 = vld [vmem:[#allocation2 + $0x71] sm:$0xff] }
 0x42e   : > { %3620 = vmatmul.f32.gmra.mxu0 %v3539_v44  ;;  %v3157_v44 = vld [vmem:[#allocation2 + $0x62] sm:$0xff] }
 0x430   : > { %3400 = vmatmul.f32.gmra.mxu3 %v3315_v40  ;;  %v10810_v40 = vld [vmem:[#allocation20_spill] sm:$0xff] }
 0x435   : > { %2968 = vmatmul.f32.gmra.mxu1 %v10807_v19  ;;  %3084 = vmatmul.f32.gmra.mxu2 %v2834_v56  ;;  %v3317_v19 = vmul.f32 %v10810_v40, %v3157_v44  ;;  %v3542_v56 = vmul.f32 %v10805_v31, %v2675_v8  ;;  %v3159_v44 = vld [vmem:[#allocation2 + $0x72] sm:$0xff]  ;;  %v3762_v31 = vld [vmem:[#allocation3 + $0x220] sm:$0xff] }
 0x436   : > { %3623 = vmatmul.f32.gmra.mxu0 %v3540_v63  ;;  %v3158_v63 = vld [vmem:[#allocation2 + $0x6a] sm:$0xff]  ;;  %v2885_v8 = vld [vmem:[#allocation2 + $0x79] sm:$0xff] }
 0x437   : > { %v3318_v43 = vmul.f32 %v10812_v9, %v3158_v63  ;;  %v2678_v63 = vld [vmem:[#allocation2 + $0x80] sm:$0xff]  ;;  %v9109_v9 = vpop.f32.mrf.mxu1 }
 0x438   : > { %3403 = vmatmul.f32.gmra.mxu3 %v3316_v5  ;;  %v10811_v5 = vld [vmem:[#allocation19_spill] sm:$0xff]  ;;  %10816 = vst [vmem:[#allocation37_spill] sm:$0xff] %v9109_v9 }
 0x43d   : > { %2971 = vmatmul.f32.gmra.mxu1 %v2882_v35  ;;  %3087 = vmatmul.f32.gmra.mxu2 %v2835_v2  ;;  %v2836_v35 = vmul.f32 %v10811_v5, %v2676_v48  ;;  %v3764_v2 = vld [vmem:[#allocation3 + $0x230] sm:$0xff] }
 0x43e   : > { %3626 = vmatmul.f32.gmra.mxu0 %v3541_v32  ;;  %v3543_v32 = vmul.f32 %v10808_v37, %v2676_v48  ;;  %3783 = vmatpush.msrb.mxu1 %v3764_v2  ;;  %v9112_v37 = vpop.f32.mrf.mxu2  ;;  %v10818_v2 = vld [vmem:[#allocation100_spill] sm:$0xff] }
 0x43f   : > { %10817 = vst [vmem:[#allocation110_spill] sm:$0xff] %v9112_v37 }
 0x440   : > { %3406 = vmatmul.f32.gmra.mxu3 %v3317_v19  ;;  %v10813_v19 = vld [vmem:[#allocation25_spill] sm:$0xff] }
 0x441   : > { %v2837_v40 = vmul.f32 %v3512_v28, %v10813_v19 }
 0x445   : > { %2974 = vmatmul.f32.gmra.mxu1 %v2883_v0  ;;  %3090 = vmatmul.f32.gmra.mxu2 %v2836_v35  ;;  %v10814_v0 = vld [vmem:[#allocation107_spill] sm:$0xff] }
 0x446   : > { %3629 = vmatmul.f32.gmra.mxu0 %v3542_v56  ;;  %v3319_v61 = vmul.f32 %v10814_v0, %v3159_v44  ;;  %v3932_v56 = vld [vmem:[#allocation2 + $0x7a] sm:$0xff] }
 0x447   : > { %v10815_v35 = vld [vmem:[#allocation43_spill] sm:$0xff]  ;;  %v3320_v48 = vmul.f32 %v3932_v56, %v8803_v33  ;;  %v2886_v44 = vld [vmem:[#allocation2 + $0x81] sm:$0xff]  ;;  %v3052_v56 = vpop.f32.mrf.mxu2 }
 0x448   : > { %3409 = vmatmul.f32.gmra.mxu3 %v3318_v43  ;;  %v3544_v43 = vmul.f32 %v3512_v28, %v8721_v7  ;;  %v2839_v7 = vmul.f32 %v8825_v15, %v10818_v2  ;;  %v10819_v28 = vld [vmem:[#allocation112_spill] sm:$0xff]  ;;  %v3163_v33 = vld [vmem:[#allocation2 + $0x92] sm:$0xff] }
 0x44d   : > { %2977 = vmatmul.f32.gmra.mxu1 %v2884_v17  ;;  %3093 = vmatmul.f32.gmra.mxu2 %v2837_v40  ;;  %v2838_v17 = vmul.f32 %v10815_v35, %v2678_v63  ;;  %v3545_v40 = vmul.f32 %v10811_v5, %v2678_v63  ;;  %v3546_v63 = vmul.f32 %v8825_v15, %v10813_v19  ;;  %v10821_v5 = vld [vmem:[#allocation47_spill] sm:$0xff] }
 0x44e   : > { %3632 = vmatmul.f32.gmra.mxu0 %v3543_v32  ;;  %v3763_v32 = vld [vmem:[#allocation3 + $0x228] sm:$0xff] }
 0x44f   : > { %3784 = vmatpush.msrb.mxu1 %v3763_v32 }
 0x450   : > { %3412 = vmatmul.f32.gmra.mxu3 %v3319_v61  ;;  %v3161_v61 = vld [vmem:[#allocation2 + $0x82] sm:$0xff] }
 0x451   : > { %3785 = vmatpush.msrb.mxu1 %v3762_v31  ;;  %v10828_v31 = vld [vmem:[#allocation106_spill] sm:$0xff] }
 0x455   : > { %2980 = vmatmul.f32.gmra.mxu1 %v2885_v8  ;;  %3096 = vmatmul.f32.gmra.mxu2 %v2838_v17  ;;  %v3321_v8 = vmul.f32 %v10819_v28, %v3161_v61  ;;  %v3515_v17 = vld [vmem:[#allocation2 + $0x90] sm:$0xff] }
 0x456   : > { %3635 = vmatmul.f32.gmra.mxu0 %v3544_v43  ;;  %v2887_v43 = vld [vmem:[#allocation2 + $0x89] sm:$0xff]  ;;  %v2840_v37 = vmul.f32 %v3515_v17, %v8837_v50  ;;  %v3547_v15 = vmul.f32 %v3515_v17, %v10815_v35 }
 0x457   : > { %v3937_v35 = vld [vmem:[#allocation2 + $0xa2] sm:$0xff] }
 0x458   : > { %3415 = vmatmul.f32.gmra.mxu3 %v3320_v48  ;;  %v3162_v48 = vld [vmem:[#allocation2 + $0x8a] sm:$0xff] }
 0x459   : > { %v3322_v32 = vmul.f32 %v10821_v5, %v3162_v48  ;;  %v10824_v48 = vld [vmem:[#allocation103_spill] sm:$0xff] }
 0x45a   : > { %v2939_v9 = vpop.f32.mrf.mxu1 }
 0x45b   : > { %v3053_v28 = vadd.f32 %v3052_v56, %v2939_v9  ;;  %v2889_v9 = vld [vmem:[#allocation2 + $0x99] sm:$0xff] }
 0x45c   : > { %v2682_v56 = vld [vmem:[#allocation2 + $0xa0] sm:$0xff] }
 0x45d   : > { %2983 = vmatmul.f32.gmra.mxu1 %v2886_v44  ;;  %3099 = vmatmul.f32.gmra.mxu2 %v2839_v7  ;;  %v9118_v44 = vpop.f32.mrf.mxu3 }
 0x45e   : > { %3638 = vmatmul.f32.gmra.mxu0 %v3545_v40  ;;  %10820 = vst [vmem:[#allocation124_spill] sm:$0xff] %v9118_v44  ;;  %v2888_v40 = vld [vmem:[#allocation2 + $0x91] sm:$0xff] }
 0x460   : > { %3418 = vmatmul.f32.gmra.mxu3 %v3321_v8  ;;  %v2681_v8 = vld [vmem:[#allocation2 + $0x98] sm:$0xff] }
 0x462   : > { %v2942_v61 = vpop.f32.mrf.mxu1 }
 0x463   : > { %v3055_v7 = vpop.f32.mrf.mxu2 }
 0x465   : > { %2986 = vmatmul.f32.gmra.mxu1 %v2887_v43  ;;  %3102 = vmatmul.f32.gmra.mxu2 %v2840_v37  ;;  %v3056_v43 = vadd.f32 %v3055_v7, %v2942_v61  ;;  %v10825_v37 = vld [vmem:[#allocation23_spill] sm:$0xff] }
 0x466   : > { %3641 = vmatmul.f32.gmra.mxu0 %v3546_v63  ;;  %v3374_v44 = vpop.f32.mrf.mxu3  ;;  %v2841_v63 = vmul.f32 %v10824_v48, %v2681_v8 }
 0x467   : > { %v9124_v0 = vpop.f32.mrf.mxu0  ;;  %v9127_v19 = vadd.f32 %v3374_v44, %v3053_v28  ;;  %v3548_v44 = vmul.f32 %v10818_v2, %v2681_v8  ;;  %v3549_v8 = vmul.f32 %v8837_v50, %v2682_v56 }
 0x468   : > { %3421 = vmatmul.f32.gmra.mxu3 %v3322_v32  ;;  %10822 = vst [vmem:[#allocation95_spill] sm:$0xff] %v9124_v0  ;;  %v3323_v32 = vmul.f32 %v10825_v37, %v3163_v33  ;;  %v2842_v0 = vmul.f32 %v10828_v31, %v2682_v56  ;;  %v10829_v33 = vld [vmem:[#allocation10_spill] sm:$0xff] }
 0x469   : > { %10823 = vst [vmem:[#allocation64_spill] sm:$0xff] %v9127_v19 }
 0x46a   : > { %v2945_v5 = vpop.f32.mrf.mxu1 }
 0x46b   : > { %v3058_v61 = vpop.f32.mrf.mxu2 }
 0x46c   : > { %v3059_v17 = vadd.f32 %v3058_v61, %v2945_v5 }
 0x46d   : > { %2989 = vmatmul.f32.gmra.mxu1 %v2888_v40  ;;  %3105 = vmatmul.f32.gmra.mxu2 %v2841_v63  ;;  %v3164_v40 = vld [vmem:[#allocation2 + $0x9a] sm:$0xff] }
 0x46e   : > { %3644 = vmatmul.f32.gmra.mxu0 %v3547_v15  ;;  %v3377_v28 = vpop.f32.mrf.mxu3  ;;  %v3324_v15 = vmul.f32 %v10829_v33, %v3164_v40  ;;  %v3166_v33 = vld [vmem:[#allocation2 + $0xaa] sm:$0xff] }
 0x46f   : > { %v9134_v19 = vadd.f32 %v3377_v28, %v3056_v43  ;;  %v3761_v28 = vld [vmem:[#allocation3 + $0x218] sm:$0xff] }
 0x470   : > { %3424 = vmatmul.f32.gmra.mxu3 %v3323_v32  ;;  %v2890_v32 = vld [vmem:[#allocation2 + $0xa1] sm:$0xff]  ;;  %3786 = vmatpush.msrb.mxu1 %v3761_v28  ;;  %v2892_v28 = vld [vmem:[#allocation2 + $0xb1] sm:$0xff] }
 0x471   : > { %v9131_v7 = vpop.f32.mrf.mxu0  ;;  %10827 = vst [vmem:[#allocation75_spill] sm:$0xff] %v9134_v19  ;;  %v10830_v19 = vld [vmem:[#allocation12_spill] sm:$0xff] }
 0x472   : > { %10826 = vst [vmem:[#allocation49_spill] sm:$0xff] %v9131_v7 }
 0x475   : > { %2992 = vmatmul.f32.gmra.mxu1 %v2889_v9  ;;  %3108 = vmatmul.f32.gmra.mxu2 %v2842_v0  ;;  %v2683_v9 = vld [vmem:[#allocation2 + $0xa8] sm:$0xff]  ;;  %v3325_v0 = vmul.f32 %v3937_v35, %v8889_v14  ;;  %v10831_v14 = vld [vmem:[#allocation108_spill] sm:$0xff] }
 0x476   : > { %3647 = vmatmul.f32.gmra.mxu0 %v3548_v44  ;;  %v2843_v40 = vmul.f32 %v10830_v19, %v2683_v9  ;;  %v3550_v56 = vmul.f32 %v10824_v48, %v2683_v9  ;;  %v3326_v35 = vmul.f32 %v10831_v14, %v3166_v33  ;;  %v3551_v9 = vmul.f32 %v10828_v31, %v8907_v11 }
 0x478   : > { %3427 = vmatmul.f32.gmra.mxu3 %v3324_v15  ;;  %v3061_v37 = vpop.f32.mrf.mxu2  ;;  %v3380_v61 = vpop.f32.mrf.mxu3  ;;  %v2891_v15 = vld [vmem:[#allocation2 + $0xa9] sm:$0xff] }
 0x479   : > { %v9141_v43 = vadd.f32 %v3380_v61, %v3059_v17  ;;  %v2844_v61 = vmul.f32 %v8729_v36, %v8907_v11 }
 0x47a   : > { %v2948_v63 = vpop.f32.mrf.mxu1 }
 0x47b   : > { %v9138_v7 = vpop.f32.mrf.mxu0  ;;  %v3062_v5 = vadd.f32 %v3061_v37, %v2948_v63 }
 0x47d   : > { %2995 = vmatmul.f32.gmra.mxu1 %v2890_v32  ;;  %3111 = vmatmul.f32.gmra.mxu2 %v2843_v40  ;;  %v3520_v40 = vld [vmem:[#allocation2 + $0xb8] sm:$0xff] }
 0x47e   : > { %3650 = vmatmul.f32.gmra.mxu0 %v3549_v8  ;;  %v2845_v33 = vmul.f32 %v3520_v40, %v8899_v60 }
 0x480   : > { %3430 = vmatmul.f32.gmra.mxu3 %v3325_v0  ;;  %v3064_v32 = vpop.f32.mrf.mxu2 }
 0x482   : > { %v2951_v44 = vpop.f32.mrf.mxu1 }
 0x483   : > { %v9145_v37 = vpop.f32.mrf.mxu0  ;;  %v3065_v63 = vadd.f32 %v3064_v32, %v2951_v44  ;;  %v3383_v50 = vpop.f32.mrf.mxu3 }
 0x484   : > { %v9148_v17 = vadd.f32 %v3383_v50, %v3062_v5  ;;  %v3760_v50 = vld [vmem:[#allocation3 + $0x210] sm:$0xff] }
 0x485   : > { %2998 = vmatmul.f32.gmra.mxu1 %v2891_v15  ;;  %3114 = vmatmul.f32.gmra.mxu2 %v2844_v61 }
 0x486   : > { %3653 = vmatmul.f32.gmra.mxu0 %v3550_v56  ;;  %3787 = vmatpush.msrb.mxu1 %v3760_v50  ;;  %v3327_v56 = vmul.f32 %v8788_v27, %v8915_v3 }
 0x488   : > { %3433 = vmatmul.f32.gmra.mxu3 %v3326_v35  ;;  %v3067_v0 = vpop.f32.mrf.mxu2  ;;  %v2893_v35 = vld [vmem:[#allocation2 + $0xb9] sm:$0xff] }
 0x48a   : > { %v2954_v8 = vpop.f32.mrf.mxu1 }
 0x48b   : > { %v9153_v15 = vpop.f32.mrf.mxu0  ;;  %v3068_v44 = vadd.f32 %v3067_v0, %v2954_v8  ;;  %v3386_v32 = vpop.f32.mrf.mxu3  ;;  %v3940_v0 = vld [vmem:[#allocation2 + $0xba] sm:$0xff] }
 0x48c   : > { %v9157_v5 = vadd.f32 %v3386_v32, %v3065_v63  ;;  %v3552_v32 = vmul.f32 %v3520_v40, %v10830_v19  ;;  %v3328_v27 = vmul.f32 %v3940_v0, %v8820_v45  ;;  %v3329_v0 = vmul.f32 %v8847_v23, %v8842_v13  ;;  %v3997_v13 = vld [vmem:[#allocation3 + $0x2e8] sm:$0xff] }
 0x48d   : > { %3001 = vmatmul.f32.gmra.mxu1 %v2892_v28  ;;  %3117 = vmatmul.f32.gmra.mxu2 %v2845_v33  ;;  %v4165_v28 = vld [vmem:[#allocation2 + $0xc0] sm:$0xff]  ;;  %v4166_v33 = vld [vmem:[#allocation2 + $0xc8] sm:$0xff]  ;;  %v2848_v23 = vmul.f32 %v8857_v6, %v8892_v46 }
 0x48e   : > { %10832 = vst [vmem:[#allocation69_spill] sm:$0xff] %v9157_v5  ;;  %3656 = vmatmul.f32.gmra.mxu0 %v3551_v9  ;;  %v2846_v50 = vmul.f32 %v4165_v28, %v8828_v24  ;;  %v2894_v9 = vld [vmem:[#allocation2 + $0xc1] sm:$0xff]  ;;  %v3553_v40 = vmul.f32 %v4165_v28, %v8729_v36  ;;  %v4586_v36 = vld [vmem:[#allocation2 + $0xca] sm:$0xff] }
 0x490   : > { %3436 = vmatmul.f32.gmra.mxu3 %v3327_v56  ;;  %v3070_v8 = vpop.f32.mrf.mxu2 }
 0x492   : > { %v2957_v61 = vpop.f32.mrf.mxu1 }
 0x493   : > { %v9162_v14 = vpop.f32.mrf.mxu0  ;;  %v3071_v11 = vadd.f32 %v3070_v8, %v2957_v61  ;;  %v3389_v63 = vpop.f32.mrf.mxu3 }
 0x494   : > { %v9165_v5 = vadd.f32 %v3389_v63, %v3068_v44  ;;  %v3759_v63 = vld [vmem:[#allocation3 + $0x208] sm:$0xff] }
 0x495   : > { %3004 = vmatmul.f32.gmra.mxu1 %v2893_v35  ;;  %3120 = vmatmul.f32.gmra.mxu2 %v2846_v50 }
 0x496   : > { %10833 = vst [vmem:[#allocation21_spill] sm:$0xff] %v9165_v5  ;;  %3659 = vmatmul.f32.gmra.mxu0 %v3552_v32  ;;  %v2847_v5 = vmul.f32 %v4166_v33, %v8886_v42  ;;  %3788 = vmatpush.msrb.mxu1 %v3759_v63  ;;  %v3999_v32 = vld [vmem:[#allocation3 + $0x2f8] sm:$0xff] }
 0x497   : > { %4000 = vmatpush.msra.mxu2 %v3999_v32 }
 0x498   : > { %3439 = vmatmul.f32.gmra.mxu3 %v3328_v27  ;;  %v3073_v56 = vpop.f32.mrf.mxu2  ;;  %v3998_v27 = vld [vmem:[#allocation3 + $0x2f0] sm:$0xff] }
 0x499   : > { %4001 = vmatpush.msra.mxu2 %v3998_v27  ;;  %v3995_v27 = vld [vmem:[#allocation3 + $0x2d8] sm:$0xff] }
 0x49a   : > { %v2960_v3 = vpop.f32.mrf.mxu1 }
 0x49b   : > { %v9169_v35 = vpop.f32.mrf.mxu0  ;;  %v3074_v61 = vadd.f32 %v3073_v56, %v2960_v3  ;;  %v3392_v8 = vpop.f32.mrf.mxu3  ;;  %v2895_v3 = vld [vmem:[#allocation2 + $0xc9] sm:$0xff]  ;;  %4002 = vmatpush.msra.mxu2 %v3997_v13 }
 0x49c   : > { %v9172_v44 = vadd.f32 %v3392_v8, %v3071_v11  ;;  %v3554_v8 = vmul.f32 %v4166_v33, %v8899_v60  ;;  %v2896_v60 = vld [vmem:[#allocation2 + $0xd1] sm:$0xff] }
 0x49d   : > { %3007 = vmatmul.f32.gmra.mxu1 %v2894_v9  ;;  %3123 = vmatmul.f32.gmra.mxu2 %v2847_v5  ;;  %v3996_v5 = vld [vmem:[#allocation3 + $0x2e0] sm:$0xff]  ;;  %v3994_v33 = vld [vmem:[#allocation3 + $0x2d0] sm:$0xff]  ;;  %v4223_v13 = vld [vmem:[#allocation3 + $0x368] sm:$0xff] }
 0x49e   : > { %3662 = vmatmul.f32.gmra.mxu0 %v3553_v40  ;;  %v3330_v40 = vmul.f32 %v4586_v36, %v8913_v20  ;;  %4003 = vmatpush.msra.mxu2 %v3996_v5  ;;  %v3555_v20 = vmul.f32 %v8857_v6, %v8828_v24  ;;  %v2849_v5 = vmul.f32 %v8939_v21, %v8901_v12  ;;  %v4419_v6 = vld [vmem:[#allocation3 + $0x3f8] sm:$0xff] }
 0x49f   : > { %4420 = vmatpush.msra.mxu0 %v4419_v6  ;;  %v3988_v6 = vld [vmem:[#allocation3 + $0x2a0] sm:$0xff] }
 0x4a0   : > { %3442 = vmatmul.f32.gmra.mxu3 %v3329_v0  ;;  %v3076_v9 = vpop.f32.mrf.mxu2  ;;  %v4225_v0 = vld [vmem:[#allocation3 + $0x378] sm:$0xff]  ;;  %4004 = vmatpush.msra.mxu2 %v3995_v27 }
 0x4a1   : > { %4226 = vmatpush.msra.mxu3 %v4225_v0  ;;  %v4222_v0 = vld [vmem:[#allocation3 + $0x360] sm:$0xff]  ;;  %v4221_v27 = vld [vmem:[#allocation3 + $0x358] sm:$0xff] }
 0x4a2   : > { %v2963_v50 = vpop.f32.mrf.mxu1  ;;  %4005 = vmatpush.msra.mxu2 %v3994_v33  ;;  %v4418_v33 = vld [vmem:[#allocation3 + $0x3f0] sm:$0xff] }
 0x4a3   : > { %v9177_v28 = vpop.f32.mrf.mxu0  ;;  %v3077_v11 = vadd.f32 %v3076_v9, %v2963_v50  ;;  %v3395_v56 = vpop.f32.mrf.mxu3  ;;  %v4224_v50 = vld [vmem:[#allocation3 + $0x370] sm:$0xff]  ;;  %4421 = vmatpush.msra.mxu0 %v4418_v33  ;;  %v4415_v33 = vld [vmem:[#allocation3 + $0x3d8] sm:$0xff] }
 0x4a4   : > { %v9180_v63 = vadd.f32 %v3395_v56, %v3074_v61  ;;  %4227 = vmatpush.msra.mxu3 %v4224_v50  ;;  %v3991_v50 = vld [vmem:[#allocation3 + $0x2b8] sm:$0xff] }
 0x4a5   : > { %3010 = vmatmul.f32.gmra.mxu1 %v2895_v3  ;;  %3126 = vmatmul.f32.gmra.mxu2 %v2848_v23  ;;  %v3758_v23 = vld [vmem:[#allocation3 + $0x200] sm:$0xff] }
 0x4a6   : > { %3665 = vmatmul.f32.gmra.mxu0 %v3554_v8  ;;  %v3993_v8 = vld [vmem:[#allocation3 + $0x2c8] sm:$0xff]  ;;  %4228 = vmatpush.msra.mxu3 %v4223_v13  ;;  %v9195_v13 = vld [vmem:[#allocation2 + $0xe0] sm:$0xff] }
 0x4a7   : > { %3789 = vmatpush.msrb.mxu1 %v3758_v23  ;;  %4006 = vmatpush.msra.mxu2 %v3993_v8  ;;  %v3556_v23 = vmul.f32 %v8939_v21, %v8886_v42  ;;  %v4217_v42 = vld [vmem:[#allocation3 + $0x338] sm:$0xff] }
 0x4a8   : > { %3445 = vmatmul.f32.gmra.mxu3 %v3330_v40  ;;  %v3079_v61 = vpop.f32.mrf.mxu2  ;;  %v3992_v40 = vld [vmem:[#allocation3 + $0x2c0] sm:$0xff] }
 0x4a9   : > { %4229 = vmatpush.msra.mxu3 %v4222_v0  ;;  %4007 = vmatpush.msra.mxu2 %v3992_v40  ;;  %v3989_v40 = vld [vmem:[#allocation3 + $0x2a8] sm:$0xff] }
 0x4aa   : > { %v2966_v32 = vpop.f32.mrf.mxu1  ;;  %v4219_v0 = vld [vmem:[#allocation3 + $0x348] sm:$0xff] }
 0x4ab   : > { %v9185_v3 = vpop.f32.mrf.mxu0  ;;  %v3080_v9 = vadd.f32 %v3079_v61, %v2966_v32  ;;  %v3398_v56 = vpop.f32.mrf.mxu3  ;;  %v3331_v32 = vmul.f32 %v8861_v53, %v8896_v18  ;;  %v2897_v61 = vld [vmem:[#allocation2 + $0xd9] sm:$0xff]  ;;  %4230 = vmatpush.msra.mxu3 %v4221_v27  ;;  %4008 = vmatpush.msra.mxu2 %v3991_v50  ;;  %v2850_v27 = vmul.f32 %v9195_v13, %v9019_v54  ;;  %v4218_v50 = vld [vmem:[#allocation3 + $0x340] sm:$0xff] }
 0x4ac   : > { %v9189_v36 = vadd.f32 %v3398_v56, %v3077_v11  ;;  %v3990_v56 = vld [vmem:[#allocation3 + $0x2b0] sm:$0xff] }
 0x4ad   : > { %3013 = vmatmul.f32.gmra.mxu1 %v2896_v60  ;;  %3129 = vmatmul.f32.gmra.mxu2 %v2849_v5  ;;  %v4220_v60 = vld [vmem:[#allocation3 + $0x350] sm:$0xff] }
 0x4ae   : > { %3668 = vmatmul.f32.gmra.mxu0 %v3555_v20  ;;  %4231 = vmatpush.msra.mxu3 %v4220_v60  ;;  %v4416_v60 = vld [vmem:[#allocation3 + $0x3e0] sm:$0xff] }
 0x4af   : > { %4009 = vmatpush.msra.mxu2 %v3990_v56  ;;  %v2898_v56 = vld [vmem:[#allocation2 + $0xe1] sm:$0xff] }
 0x4b0   : > { %3448 = vmatmul.f32.gmra.mxu3 %v3331_v32  ;;  %v3082_v53 = vpop.f32.mrf.mxu2  ;;  %v4417_v32 = vld [vmem:[#allocation3 + $0x3e8] sm:$0xff] }
 0x4b1   : > { %4232 = vmatpush.msra.mxu3 %v4219_v0  ;;  %4422 = vmatpush.msra.mxu0 %v4417_v32  ;;  %v3557_v0 = vmul.f32 %v9195_v13, %v8892_v46 }
 0x4b2   : > { %v2969_v11 = vpop.f32.mrf.mxu1  ;;  %4010 = vmatpush.msra.mxu2 %v3989_v40 }
 0x4b3   : > { %v9197_v18 = vpop.f32.mrf.mxu0  ;;  %v3083_v20 = vadd.f32 %v3082_v53, %v2969_v11  ;;  %v3401_v8 = vpop.f32.mrf.mxu3  ;;  %v3332_v11 = vmul.f32 %v8967_v51, %v8909_v62  ;;  %4233 = vmatpush.msra.mxu3 %v4218_v50  ;;  %4423 = vmatpush.msra.mxu0 %v4416_v60  ;;  %v3986_v53 = vld [vmem:[#allocation3 + $0x290] sm:$0xff]  ;;  %v4413_v50 = vld [vmem:[#allocation3 + $0x3c8] sm:$0xff]  ;;  %v4645_v60 = vld [vmem:[#allocation3 + $0x478] sm:$0xff] }
 0x4b4   : > { %v9201_v5 = vadd.f32 %v3401_v8, %v3080_v9  ;;  %v3987_v9 = vld [vmem:[#allocation3 + $0x298] sm:$0xff]  ;;  %4011 = vmatpush.msra.mxu2 %v3988_v6  ;;  %v4414_v62 = vld [vmem:[#allocation3 + $0x3d0] sm:$0xff]  ;;  %v4215_v6 = vld [vmem:[#allocation3 + $0x328] sm:$0xff]  ;;  %4646 = vmatpush.msra.mxu1 %v4645_v60 }
 0x4b5   : > { %3016 = vmatmul.f32.gmra.mxu1 %v2897_v61  ;;  %3132 = vmatmul.f32.gmra.mxu2 %v2850_v27  ;;  %v4216_v61 = vld [vmem:[#allocation3 + $0x330] sm:$0xff]  ;;  %v3985_v27 = vld [vmem:[#allocation3 + $0x288] sm:$0xff] }
 0x4b6   : > { %3671 = vmatmul.f32.gmra.mxu0 %v3556_v23  ;;  %4234 = vmatpush.msra.mxu3 %v4217_v42  ;;  %v10834_v42 = vld [vmem:[#allocation118_spill] sm:$0xff]  ;;  %v10835_v60 = vld [vmem:[#allocation115_spill] sm:$0xff] }
 0x4b7   : > { %4012 = vmatpush.msra.mxu2 %v3987_v9  ;;  %4424 = vmatpush.msra.mxu0 %v4415_v33  ;;  %v3984_v9 = vld [vmem:[#allocation3 + $0x280] sm:$0xff] }
 0x4b8   : > { %3451 = vmatmul.f32.gmra.mxu3 %v3332_v11  ;;  %v3085_v8 = vpop.f32.mrf.mxu2  ;;  %v2851_v11 = vmul.f32 %v8911_v49, %v9005_v10  ;;  %v4214_v33 = vld [vmem:[#allocation3 + $0x320] sm:$0xff] }
 0x4b9   : > { %4235 = vmatpush.msra.mxu3 %v4216_v61  ;;  %4013 = vmatpush.msra.mxu2 %v3986_v53  ;;  %v4213_v61 = vld [vmem:[#allocation3 + $0x318] sm:$0xff] }
 0x4ba   : > { %v2972_v21 = vpop.f32.mrf.mxu1  ;;  %4425 = vmatpush.msra.mxu0 %v4414_v62  ;;  %v4411_v53 = vld [vmem:[#allocation3 + $0x3b8] sm:$0xff]  ;;  %v4212_v62 = vld [vmem:[#allocation3 + $0x310] sm:$0xff] }
 0x4bb   : > { %v9207_v51 = vpop.f32.mrf.mxu0  ;;  %v3086_v23 = vadd.f32 %v3085_v8, %v2972_v21  ;;  %v3404_v40 = vpop.f32.mrf.mxu3  ;;  %4236 = vmatpush.msra.mxu3 %v4215_v6  ;;  %v3333_v21 = vmul.f32 %v10834_v42, %v8920_v30  ;;  %4014 = vmatpush.msra.mxu2 %v3985_v27  ;;  %v3558_v27 = vmul.f32 %v8911_v49, %v8901_v12  ;;  %v4210_v12 = vld [vmem:[#allocation3 + $0x300] sm:$0xff] }
 0x4bc   : > { %v9211_v32 = vadd.f32 %v3404_v40, %v3083_v20  ;;  %4426 = vmatpush.msra.mxu0 %v4413_v50  ;;  %v4412_v20 = vld [vmem:[#allocation3 + $0x3c0] sm:$0xff]  ;;  %v9221_v6 = vpop.permute.xlu2 %2815 }
 0x4bd   : > { %3019 = vmatmul.f32.gmra.mxu1 %v2898_v56  ;;  %3135 = vmatmul.f32.gmra.mxu2 %v2851_v11  ;;  %v2899_v56 = vld [vmem:[#allocation2 + $0xe9] sm:$0xff]  ;;  %v4410_v11 = vld [vmem:[#allocation3 + $0x3b0] sm:$0xff]  ;;  %v2852_v42 = vmul.f32 %v10835_v60, %v9221_v6 }
 0x4be   : > { %3674 = vmatmul.f32.gmra.mxu0 %v3557_v0  ;;  %4015 = vmatpush.msra.mxu2 %v3984_v9  ;;  %v4408_v49 = vld [vmem:[#allocation3 + $0x3a0] sm:$0xff] }
 0x4bf   : > { %4237 = vmatpush.msra.mxu3 %v4214_v33  ;;  %4427 = vmatpush.msra.mxu0 %v4412_v20  ;;  %v4211_v33 = vld [vmem:[#allocation3 + $0x308] sm:$0xff] }
 0x4c0   : > { %3454 = vmatmul.f32.gmra.mxu3 %v3333_v21  ;;  %v3088_v8 = vpop.f32.mrf.mxu2  ;;  %v10836_v21 = vld [vmem:[#allocation67_spill] sm:$0xff] }
 0x4c1   : > { %4238 = vmatpush.msra.mxu3 %v4213_v61  ;;  %4428 = vmatpush.msra.mxu0 %v4411_v53  ;;  %v3334_v9 = vmul.f32 %v10836_v21, %v9025_v59  ;;  %v9231_v61 = vld [vmem:[#allocation2 + $0xf1] sm:$0xff]  ;;  %v4407_v53 = vld [vmem:[#allocation3 + $0x398] sm:$0xff] }
 0x4c2   : > { %v2975_v46 = vpop.f32.mrf.mxu1  ;;  %v4644_v21 = vld [vmem:[#allocation3 + $0x470] sm:$0xff] }
 0x4c3   : > { %v9217_v30 = vpop.f32.mrf.mxu0  ;;  %v3089_v40 = vadd.f32 %v3088_v8, %v2975_v46  ;;  %v3407_v0 = vpop.f32.mrf.mxu3  ;;  %4239 = vmatpush.msra.mxu3 %v4212_v62  ;;  %v4409_v46 = vld [vmem:[#allocation3 + $0x3a8] sm:$0xff]  ;;  %4429 = vmatpush.msra.mxu0 %v4410_v11 }
 0x4c4   : > { %v9223_v50 = vadd.f32 %v3407_v0, %v3086_v23  ;;  %v9229_v23 = vpop.permute.xlu0 %3298  ;;  %4647 = vmatpush.msra.mxu1 %v4644_v21  ;;  %v10840_v21 = vld [vmem:[#allocation99_spill] sm:$0xff] }
 0x4c5   : > { %3022 = vmatmul.f32.gmra.mxu1 %v2899_v56  ;;  %3138 = vmatmul.f32.gmra.mxu2 %v2852_v42  ;;  %10837 = vst [vmem:[#allocation55_spill] sm:$0xff] %v9229_v23  ;;  %v9233_v56 = vpop.permute.xlu1 %2819  ;;  %v4406_v42 = vld [vmem:[#allocation3 + $0x390] sm:$0xff] }
 0x4c6   : > { %3677 = vmatmul.f32.gmra.mxu0 %v3558_v27  ;;  %4240 = vmatpush.msra.mxu3 %v4211_v33  ;;  %v3559_v27 = vmul.f32 %v10835_v60, %v9019_v54  ;;  %v9246_v54 = vld [vmem:[#allocation2 + $0xf9] sm:$0xff] }
 0x4c7   : > { %4430 = vmatpush.msra.mxu0 %v4409_v46  ;;  %v3335_v46 = vmul.f32 %v8927_v25, %v9229_v23  ;;  %10839 = vst [vmem:[#allocation44_spill] sm:$0xff] %v9246_v54  ;;  %v3725_v23 = vld [vmem:[#allocation2 + $0x11] sm:$0xff] }
 0x4c8   : > { %3457 = vmatmul.f32.gmra.mxu3 %v3334_v9  ;;  %v3091_v59 = vpop.f32.mrf.mxu2  ;;  %v10838_v9 = vld [vmem:[#allocation36_spill] sm:$0xff] }
 0x4c9   : > { %4241 = vmatpush.msra.mxu3 %v4210_v12  ;;  %4431 = vmatpush.msra.mxu0 %v4408_v49  ;;  %v2853_v33 = vmul.f32 %v10838_v9, %v9233_v56  ;;  %v4404_v12 = vld [vmem:[#allocation3 + $0x380] sm:$0xff]  ;;  %v3560_v25 = vmul.f32 %v10838_v9, %v9005_v10  ;;  %v3561_v10 = vmul.f32 %v8994_v39, %v9221_v6  ;;  %v4643_v9 = vld [vmem:[#allocation3 + $0x468] sm:$0xff] }
 0x4ca   : > { %v2978_v20 = vpop.f32.mrf.mxu1  ;;  %4648 = vmatpush.msra.mxu1 %v4643_v9 }
 0x4cb   : > { %v9236_v8 = vpop.f32.mrf.mxu0  ;;  %v3092_v62 = vadd.f32 %v3091_v59, %v2978_v20  ;;  %v3410_v0 = vpop.f32.mrf.mxu3  ;;  %4432 = vmatpush.msra.mxu0 %v4407_v53  ;;  %v4405_v20 = vld [vmem:[#allocation3 + $0x388] sm:$0xff] }
 0x4cc   : > { %v9240_v11 = vadd.f32 %v3410_v0, %v3089_v40  ;;  %v9248_v40 = vpop.permute.xlu2 %3302 }
 0x4cd   : > { %3025 = vmatmul.f32.gmra.mxu1 %v9231_v61  ;;  %3141 = vmatmul.f32.gmra.mxu2 %v2853_v33 }
 0x4ce   : > { %3680 = vmatmul.f32.gmra.mxu0 %v3559_v27 }
 0x4cf   : > { %4433 = vmatpush.msra.mxu0 %v4406_v42  ;;  %v5545_v42 = vld [vmem:[#allocation2 + $0x12] sm:$0xff] }
 0x4d0   : > { %3460 = vmatmul.f32.gmra.mxu3 %v3335_v46  ;;  %v3094_v60 = vpop.f32.mrf.mxu2  ;;  %v3951_v33 = vmul.f32 %v5545_v42, %v10840_v21  ;;  %v3336_v46 = vmul.f32 %v8955_v4, %v9248_v40  ;;  %v10843_v42 = vld [vmem:[#allocation61_spill] sm:$0xff] }
 0x4d1   : > { %4434 = vmatpush.msra.mxu0 %v4405_v20 }
 0x4d2   : > { %v2981_v59 = vpop.f32.mrf.mxu1 }
 0x4d3   : > { %v9251_v49 = vpop.f32.mrf.mxu0  ;;  %v3095_v53 = vadd.f32 %v3094_v60, %v2981_v59  ;;  %v3413_v0 = vpop.f32.mrf.mxu3  ;;  %4435 = vmatpush.msra.mxu0 %v4404_v12 }
 0x4d4   : > { %v9255_v27 = vadd.f32 %v3413_v0, %v3092_v62  ;;  %v10842_v0 = vld [vmem:[#allocation102_spill] sm:$0xff] }
 0x4d5   : > { %3028 = vmatmul.f32.gmra.mxu1 %v9246_v54  ;;  %4016 = vmatmul.f32.vlgmr.msra.gmra.mxu2 %v3951_v33  ;;  %v3952_v4 = vmul.f32 %v10842_v0, %v8975_v41  ;;  %v10844_v41 = vld [vmem:[#allocation65_spill] sm:$0xff] }
 0x4d6   : > { %3683 = vmatmul.f32.gmra.mxu0 %v3560_v25  ;;  %v5546_v25 = vld [vmem:[#allocation2 + $0x20] sm:$0xff]  ;;  %v3953_v9 = vmul.f32 %v10844_v41, %v9038_v26 }
 0x4d7   : > { %v4177_v33 = vmul.f32 %v5546_v25, %v10843_v42  ;;  %v3727_v42 = vld [vmem:[#allocation2 + $0x21] sm:$0xff] }
 0x4d8   : > { %3463 = vmatmul.f32.gmra.mxu3 %v3336_v46  ;;  %v3097_v59 = vpop.f32.mrf.mxu2  ;;  %v3726_v46 = vld [vmem:[#allocation2 + $0x19] sm:$0xff] }
 0x4da   : > { %v2984_v20 = vpop.f32.mrf.mxu1 }
 0x4db   : > { %v9260_v60 = vpop.f32.mrf.mxu0  ;;  %v3098_v12 = vadd.f32 %v3097_v59, %v2984_v20  ;;  %v3416_v54 = vpop.f32.mrf.mxu3 }
 0x4dc   : > { %v9264_v62 = vadd.f32 %v3416_v54, %v3095_v53  ;;  %v5547_v53 = vld [vmem:[#allocation2 + $0x108] sm:$0xff] }
 0x4dd   : > { %3790 = vmatmul.f32.vlgmr.msrb.gmra.mxu1 %v3725_v23  ;;  %4019 = vmatmul.f32.gmra.mxu2 %v3952_v4  ;;  %v3562_v21 = vmul.f32 %v5547_v53, %v9233_v56 }
 0x4de   : > { %10841 = vst [vmem:[#allocation22_spill] sm:$0xff] %v9264_v62  ;;  %3686 = vmatmul.f32.gmra.mxu0 %v3561_v10  ;;  %v10845_v10 = vld [vmem:[#allocation114_spill] sm:$0xff] }
 0x4df   : > { %v4178_v25 = vmul.f32 %v10845_v10, %v9034_v58  ;;  %v4179_v58 = vmul.f32 %v10763_v16, %v9045_v22  ;;  %v3729_v22 = vld [vmem:[#allocation2 + $0x31] sm:$0xff] }
 0x4e0   : > { %4242 = vmatmul.f32.vlgmr.msra.gmra.mxu3 %v4177_v33  ;;  %v3100_v20 = vpop.f32.mrf.mxu2 }
 0x4e2   : > { %v2987_v23 = vpop.f32.mrf.mxu1 }
 0x4e3   : > { %v9269_v59 = vpop.f32.mrf.mxu0  ;;  %v3101_v39 = vadd.f32 %v3100_v20, %v2987_v23  ;;  %v3419_v54 = vpop.f32.mrf.mxu3 }
 0x4e4   : > { %v9272_v62 = vadd.f32 %v3419_v54, %v3098_v12  ;;  %v4642_v12 = vld [vmem:[#allocation3 + $0x460] sm:$0xff]  ;;  %v10846_v54 = vld [vmem:[#allocation72_spill] sm:$0xff] }
 0x4e5   : > { %3793 = vmatmul.f32.gmra.mxu1 %v3726_v46  ;;  %4022 = vmatmul.f32.gmra.mxu2 %v3953_v9  ;;  %v3954_v26 = vmul.f32 %v10846_v54, %v9049_v29  ;;  %v3728_v9 = vld [vmem:[#allocation2 + $0x29] sm:$0xff]  ;;  %v3955_v29 = vmul.f32 %v10796_v55, %v9061_v1  ;;  %v5548_v55 = vld [vmem:[#allocation2 + $0x40] sm:$0xff] }
 0x4e6   : > { %3689 = vmatmul.f32.gmra.mxu0 %v3562_v21  ;;  %4649 = vmatpush.msra.mxu1 %v4642_v12 }
 0x4e8   : > { %4245 = vmatmul.f32.gmra.mxu3 %v4178_v25  ;;  %v3103_v33 = vpop.f32.mrf.mxu2 }
 0x4ea   : > { %v2990_v4 = vpop.f32.mrf.mxu1 }
 0x4eb   : > { %v9278_v23 = vpop.f32.mrf.mxu0  ;;  %v3104_v46 = vadd.f32 %v3103_v33, %v2990_v4  ;;  %v3422_v20 = vpop.f32.mrf.mxu3 }
 0x4ec   : > { %v9280_v53 = vadd.f32 %v3422_v20, %v3101_v39  ;;  %v10847_v20 = vld [vmem:[#allocation16_spill] sm:$0xff] }
 0x4ed   : > { %3796 = vmatmul.f32.gmra.mxu1 %v3727_v42  ;;  %4025 = vmatmul.f32.gmra.mxu2 %v3954_v26  ;;  %v4180_v12 = vmul.f32 %v10847_v20, %v9057_v38  ;;  %v10850_v38 = vld [vmem:[#allocation87_spill] sm:$0xff] }
 0x4ee   : > { %4436 = vmatmul.f32.vlgmr.msra.gmra.mxu0 %v3727_v42  ;;  %v3730_v20 = vld [vmem:[#allocation2 + $0x39] sm:$0xff] }
 0x4f0   : > { %4248 = vmatmul.f32.gmra.mxu3 %v4179_v58  ;;  %v3106_v10 = vpop.f32.mrf.mxu2 }
 0x4f2   : > { %v2993_v21 = vpop.f32.mrf.mxu1 }
 0x4f3   : > { %v9286_v25 = vpop.f32.mrf.mxu0  ;;  %v3107_v4 = vadd.f32 %v3106_v10, %v2993_v21  ;;  %v3425_v39 = vpop.f32.mrf.mxu3 }
 0x4f4   : > { %v9288_v33 = vadd.f32 %v3425_v39, %v3104_v46  ;;  %v4641_v46 = vld [vmem:[#allocation3 + $0x458] sm:$0xff] }
 0x4f5   : > { %3799 = vmatmul.f32.gmra.mxu1 %v3728_v9  ;;  %4028 = vmatmul.f32.gmra.mxu2 %v3955_v29  ;;  %v10849_v39 = vld [vmem:[#allocation116_spill] sm:$0xff] }
 0x4f6   : > { %4439 = vmatmul.f32.gmra.mxu0 %v3728_v9  ;;  %v3956_v1 = vmul.f32 %v10849_v39, %v9071_v57  ;;  %4650 = vmatpush.msra.mxu1 %v4641_v46  ;;  %v4181_v9 = vmul.f32 %v5548_v55, %v10850_v38  ;;  %v10854_v57 = vld [vmem:[#allocation97_spill] sm:$0xff]  ;;  %v10855_v55 = vld [vmem:[#allocation82_spill] sm:$0xff] }
 0x4f7   : > { %v5550_v39 = vld [vmem:[#allocation2 + $0x48] sm:$0xff] }
 0x4f8   : > { %4251 = vmatmul.f32.gmra.mxu3 %v4180_v12  ;;  %v3109_v42 = vpop.f32.mrf.mxu2  ;;  %v3731_v38 = vld [vmem:[#allocation2 + $0x41] sm:$0xff] }
 0x4fa   : > { %v2996_v16 = vpop.f32.mrf.mxu1 }
 0x4fb   : > { %v9294_v26 = vpop.f32.mrf.mxu0  ;;  %v3110_v58 = vadd.f32 %v3109_v42, %v2996_v16  ;;  %v3428_v21 = vpop.f32.mrf.mxu3 }
 0x4fc   : > { %v9296_v10 = vadd.f32 %v3428_v21, %v3107_v4  ;;  %v9305_v21 = vld [vmem:[#allocation2 + $0x42] sm:$0xff] }
 0x4fd   : > { %3802 = vmatmul.f32.gmra.mxu1 %v3729_v22  ;;  %4031 = vmatmul.f32.gmra.mxu2 %v3956_v1  ;;  %10853 = vst [vmem:[#allocation98_spill] sm:$0xff] %v9305_v21  ;;  %v3957_v46 = vmul.f32 %v9305_v21, %v10854_v57  ;;  %v10859_v57 = vld [vmem:[#allocation54_spill] sm:$0xff] }
 0x4fe   : > { %10848 = vst [vmem:[#allocation35_spill] sm:$0xff] %v9296_v10  ;;  %4442 = vmatmul.f32.gmra.mxu0 %v3729_v22  ;;  %v4182_v22 = vmul.f32 %v5550_v39, %v10855_v55  ;;  %v5552_v39 = vld [vmem:[#allocation2 + $0x50] sm:$0xff] }
 0x4ff   : > { %v3732_v55 = vld [vmem:[#allocation2 + $0x49] sm:$0xff] }
 0x500   : > { %4254 = vmatmul.f32.gmra.mxu3 %v4181_v9  ;;  %v3112_v12 = vpop.f32.mrf.mxu2 }
 0x502   : > { %v2999_v29 = vpop.f32.mrf.mxu1 }
 0x503   : > { %v9301_v54 = vpop.f32.mrf.mxu0  ;;  %v3113_v16 = vadd.f32 %v3112_v12, %v2999_v29  ;;  %v3431_v4 = vpop.f32.mrf.mxu3 }
 0x504   : > { %10851 = vst [vmem:[#allocation91_spill] sm:$0xff] %v9301_v54  ;;  %v9303_v42 = vadd.f32 %v3431_v4, %v3110_v58  ;;  %v4640_v4 = vld [vmem:[#allocation3 + $0x450] sm:$0xff] }
 0x505   : > { %3805 = vmatmul.f32.gmra.mxu1 %v3730_v20  ;;  %4034 = vmatmul.f32.gmra.mxu2 %v3957_v46 }
 0x506   : > { %10852 = vst [vmem:[#allocation84_spill] sm:$0xff] %v9303_v42  ;;  %4445 = vmatmul.f32.gmra.mxu0 %v3730_v20  ;;  %v9314_v42 = vld [vmem:[#allocation2 + $0x4a] sm:$0xff]  ;;  %4651 = vmatpush.msra.mxu1 %v4640_v4  ;;  %v4183_v20 = vmul.f32 %v5552_v39, %v8315_v47 }
 0x507   : > { %10858 = vst [vmem:[#allocation70_spill] sm:$0xff] %v9314_v42  ;;  %v3958_v21 = vmul.f32 %v9314_v42, %v10859_v57  ;;  %v10863_v57 = vld [vmem:[#allocation90_spill] sm:$0xff]  ;;  %v5554_v42 = vld [vmem:[#allocation2 + $0x58] sm:$0xff] }
 0x508   : > { %4257 = vmatmul.f32.gmra.mxu3 %v4182_v22  ;;  %v3115_v9 = vpop.f32.mrf.mxu2  ;;  %v4184_v47 = vmul.f32 %v5554_v42, %v8385_v34  ;;  %v5556_v34 = vld [vmem:[#allocation2 + $0x60] sm:$0xff]  ;;  %v10868_v42 = vld [vmem:[#allocation123_spill] sm:$0xff] }
 0x50a   : > { %v3002_v1 = vpop.f32.mrf.mxu1 }
 0x50b   : > { %v9310_v54 = vpop.f32.mrf.mxu0  ;;  %v3116_v29 = vadd.f32 %v3115_v9, %v3002_v1  ;;  %v3434_v58 = vpop.f32.mrf.mxu3 }
 0x50c   : > { %10856 = vst [vmem:[#allocation79_spill] sm:$0xff] %v9310_v54  ;;  %v9312_v12 = vadd.f32 %v3434_v58, %v3113_v16  ;;  %v10912_v54 = vld [vmem:[#allocation64_spill] sm:$0xff] }
 0x50d   : > { %3808 = vmatmul.f32.gmra.mxu1 %v3731_v38  ;;  %4037 = vmatmul.f32.gmra.mxu2 %v3958_v21 }
 0x50e   : > { %10857 = vst [vmem:[#allocation68_spill] sm:$0xff] %v9312_v12  ;;  %4448 = vmatmul.f32.gmra.mxu0 %v3731_v38  ;;  %v9323_v12 = vld [vmem:[#allocation2 + $0x52] sm:$0xff] }
 0x50f   : > { %10862 = vst [vmem:[#allocation113_spill] sm:$0xff] %v9323_v12  ;;  %v3959_v4 = vmul.f32 %v9323_v12, %v10863_v57  ;;  %v3733_v38 = vld [vmem:[#allocation2 + $0x51] sm:$0xff] }
 0x510   : > { %4260 = vmatmul.f32.gmra.mxu3 %v4183_v20  ;;  %v3118_v22 = vpop.f32.mrf.mxu2 }
 0x512   : > { %v3005_v46 = vpop.f32.mrf.mxu1 }
 0x513   : > { %v9319_v1 = vpop.f32.mrf.mxu0  ;;  %v3119_v16 = vadd.f32 %v3118_v22, %v3005_v46  ;;  %v3437_v9 = vpop.f32.mrf.mxu3 }
 0x514   : > { %10860 = vst [vmem:[#allocation53_spill] sm:$0xff] %v9319_v1  ;;  %v9321_v58 = vadd.f32 %v3437_v9, %v3116_v29  ;;  %v4639_v9 = vld [vmem:[#allocation3 + $0x448] sm:$0xff]  ;;  %v10867_v1 = vld [vmem:[#allocation92_spill] sm:$0xff] }
 0x515   : > { %3811 = vmatmul.f32.gmra.mxu1 %v3732_v55  ;;  %4040 = vmatmul.f32.gmra.mxu2 %v3959_v4 }
 0x516   : > { %10861 = vst [vmem:[#allocation74_spill] sm:$0xff] %v9321_v58  ;;  %4451 = vmatmul.f32.gmra.mxu0 %v3732_v55  ;;  %v9332_v58 = vld [vmem:[#allocation2 + $0x5a] sm:$0xff]  ;;  %4652 = vmatpush.msra.mxu1 %v4639_v9  ;;  %v4185_v55 = vmul.f32 %v5556_v34, %v10868_v42 }
 0x517   : > { %10866 = vst [vmem:[#allocation9_spill] sm:$0xff] %v9332_v58  ;;  %v3960_v57 = vmul.f32 %v9332_v58, %v10867_v1  ;;  %v5558_v1 = vld [vmem:[#allocation2 + $0x68] sm:$0xff]  ;;  %v10872_v34 = vld [vmem:[#allocation120_spill] sm:$0xff] }
 0x518   : > { %4263 = vmatmul.f32.gmra.mxu3 %v4184_v47  ;;  %v3121_v39 = vpop.f32.mrf.mxu2  ;;  %v3734_v47 = vld [vmem:[#allocation2 + $0x59] sm:$0xff]  ;;  %v5559_v42 = vld [vmem:[#allocation2 + $0x61] sm:$0xff] }
 0x51a   : > { %v3008_v21 = vpop.f32.mrf.mxu1 }
 0x51b   : > { %v9328_v20 = vpop.f32.mrf.mxu0  ;;  %v3122_v46 = vadd.f32 %v3121_v39, %v3008_v21  ;;  %v3440_v29 = vpop.f32.mrf.mxu3 }
 0x51c   : > { %10864 = vst [vmem:[#allocation39_spill] sm:$0xff] %v9328_v20  ;;  %v9330_v22 = vadd.f32 %v3440_v29, %v3119_v16  ;;  %v9341_v20 = vld [vmem:[#allocation2 + $0x62] sm:$0xff] }
 0x51d   : > { %3814 = vmatmul.f32.gmra.mxu1 %v3733_v38  ;;  %4043 = vmatmul.f32.gmra.mxu2 %v3960_v57  ;;  %10871 = vst [vmem:[#allocation13_spill] sm:$0xff] %v9341_v20  ;;  %v3961_v9 = vmul.f32 %v9341_v20, %v10806_v52  ;;  %v10876_v52 = vld [vmem:[#allocation104_spill] sm:$0xff] }
 0x51e   : > { %10865 = vst [vmem:[#allocation48_spill] sm:$0xff] %v9330_v22  ;;  %4454 = vmatmul.f32.gmra.mxu0 %v3733_v38  ;;  %v4186_v38 = vmul.f32 %v5558_v1, %v10872_v34  ;;  %v5561_v1 = vld [vmem:[#allocation2 + $0x70] sm:$0xff] }
 0x520   : > { %4266 = vmatmul.f32.gmra.mxu3 %v4185_v55  ;;  %v3124_v21 = vpop.f32.mrf.mxu2 }
 0x522   : > { %v3011_v4 = vpop.f32.mrf.mxu1 }
 0x523   : > { %v9337_v39 = vpop.f32.mrf.mxu0  ;;  %v3125_v16 = vadd.f32 %v3124_v21, %v3011_v4  ;;  %v3443_v29 = vpop.f32.mrf.mxu3 }
 0x524   : > { %10869 = vst [vmem:[#allocation58_spill] sm:$0xff] %v9337_v39  ;;  %v9339_v22 = vadd.f32 %v3443_v29, %v3122_v46  ;;  %v4638_v29 = vld [vmem:[#allocation3 + $0x440] sm:$0xff] }
 0x525   : > { %3817 = vmatmul.f32.gmra.mxu1 %v3734_v47  ;;  %4046 = vmatmul.f32.gmra.mxu2 %v3961_v9 }
 0x526   : > { %10870 = vst [vmem:[#allocation86_spill] sm:$0xff] %v9339_v22  ;;  %4457 = vmatmul.f32.gmra.mxu0 %v3734_v47  ;;  %v9350_v22 = vld [vmem:[#allocation2 + $0x6a] sm:$0xff]  ;;  %4653 = vmatpush.msra.mxu1 %v4638_v29 }
 0x527   : > { %10875 = vst [vmem:[#allocation52_spill] sm:$0xff] %v9350_v22  ;;  %v3962_v20 = vmul.f32 %v9350_v22, %v10876_v52  ;;  %v10877_v47 = vld [vmem:[#allocation101_spill] sm:$0xff]  ;;  %v10881_v52 = vld [vmem:[#allocation20_spill] sm:$0xff]  ;;  %v5564_v22 = vld [vmem:[#allocation2 + $0x78] sm:$0xff] }
 0x528   : > { %4269 = vmatmul.f32.gmra.mxu3 %v4186_v38  ;;  %v3127_v55 = vpop.f32.mrf.mxu2  ;;  %v4187_v9 = vmul.f32 %v5561_v1, %v10877_v47  ;;  %v5562_v38 = vld [vmem:[#allocation2 + $0x69] sm:$0xff]  ;;  %v10882_v1 = vld [vmem:[#allocation96_spill] sm:$0xff]  ;;  %v5565_v47 = vld [vmem:[#allocation2 + $0x71] sm:$0xff] }
 0x52a   : > { %v3014_v57 = vpop.f32.mrf.mxu1 }
 0x52b   : > { %v9346_v39 = vpop.f32.mrf.mxu0  ;;  %v3128_v4 = vadd.f32 %v3127_v55, %v3014_v57  ;;  %v3446_v46 = vpop.f32.mrf.mxu3 }
 0x52c   : > { %10873 = vst [vmem:[#allocation26_spill] sm:$0xff] %v9346_v39  ;;  %v9348_v21 = vadd.f32 %v3446_v46, %v3125_v16  ;;  %v9359_v39 = vld [vmem:[#allocation2 + $0x72] sm:$0xff] }
 0x52d   : > { %3820 = vmatmul.f32.gmra.mxu1 %v5559_v42  ;;  %4049 = vmatmul.f32.gmra.mxu2 %v3962_v20  ;;  %10880 = vst [vmem:[#allocation89_spill] sm:$0xff] %v9359_v39  ;;  %v3963_v29 = vmul.f32 %v9359_v39, %v10881_v52  ;;  %v10886_v52 = vld [vmem:[#allocation93_spill] sm:$0xff] }
 0x52e   : > { %10874 = vst [vmem:[#allocation66_spill] sm:$0xff] %v9348_v21  ;;  %4460 = vmatmul.f32.gmra.mxu0 %v5559_v42  ;;  %v4188_v42 = vmul.f32 %v5564_v22, %v10882_v1  ;;  %v5567_v22 = vld [vmem:[#allocation2 + $0x80] sm:$0xff] }
 0x530   : > { %4272 = vmatmul.f32.gmra.mxu3 %v4187_v9  ;;  %v3130_v57 = vpop.f32.mrf.mxu2 }
 0x532   : > { %v3017_v34 = vpop.f32.mrf.mxu1 }
 0x533   : > { %v9355_v55 = vpop.f32.mrf.mxu0  ;;  %v3131_v16 = vadd.f32 %v3130_v57, %v3017_v34  ;;  %v3449_v46 = vpop.f32.mrf.mxu3 }
 0x534   : > { %10878 = vst [vmem:[#allocation41_spill] sm:$0xff] %v9355_v55  ;;  %v9357_v21 = vadd.f32 %v3449_v46, %v3128_v4  ;;  %v4637_v46 = vld [vmem:[#allocation3 + $0x438] sm:$0xff] }
 0x535   : > { %3823 = vmatmul.f32.gmra.mxu1 %v5562_v38  ;;  %4052 = vmatmul.f32.gmra.mxu2 %v3963_v29 }
 0x536   : > { %10879 = vst [vmem:[#allocation119_spill] sm:$0xff] %v9357_v21  ;;  %4463 = vmatmul.f32.gmra.mxu0 %v5562_v38  ;;  %v9368_v21 = vld [vmem:[#allocation2 + $0x7a] sm:$0xff]  ;;  %4654 = vmatpush.msra.mxu1 %v4637_v46  ;;  %v10887_v38 = vld [vmem:[#allocation105_spill] sm:$0xff] }
 0x537   : > { %10885 = vst [vmem:[#allocation60_spill] sm:$0xff] %v9368_v21  ;;  %v3964_v39 = vmul.f32 %v9368_v21, %v10886_v52  ;;  %v4189_v29 = vmul.f32 %v5567_v22, %v10887_v38  ;;  %v10891_v52 = vld [vmem:[#allocation107_spill] sm:$0xff]  ;;  %v5573_v21 = vld [vmem:[#allocation2 + $0x89] sm:$0xff] }
 0x538   : > { %4275 = vmatmul.f32.gmra.mxu3 %v4188_v42  ;;  %v3133_v9 = vpop.f32.mrf.mxu2  ;;  %v5568_v42 = vld [vmem:[#allocation2 + $0x79] sm:$0xff] }
 0x53a   : > { %v3020_v20 = vpop.f32.mrf.mxu1 }
 0x53b   : > { %v9364_v55 = vpop.f32.mrf.mxu0  ;;  %v3134_v34 = vadd.f32 %v3133_v9, %v3020_v20  ;;  %v3452_v4 = vpop.f32.mrf.mxu3 }
 0x53c   : > { %10883 = vst [vmem:[#allocation85_spill] sm:$0xff] %v9364_v55  ;;  %v9366_v57 = vadd.f32 %v3452_v4, %v3131_v16  ;;  %v9377_v55 = vld [vmem:[#allocation2 + $0x82] sm:$0xff] }
 0x53d   : > { %3826 = vmatmul.f32.gmra.mxu1 %v5565_v47  ;;  %4055 = vmatmul.f32.gmra.mxu2 %v3964_v39  ;;  %10890 = vst [vmem:[#allocation77_spill] sm:$0xff] %v9377_v55  ;;  %v3965_v46 = vmul.f32 %v9377_v55, %v10891_v52  ;;  %v5570_v39 = vld [vmem:[#allocation2 + $0x81] sm:$0xff] }
 0x53e   : > { %10884 = vst [vmem:[#allocation33_spill] sm:$0xff] %v9366_v57  ;;  %4466 = vmatmul.f32.gmra.mxu0 %v5565_v47  ;;  %v10892_v47 = vld [vmem:[#allocation30_spill] sm:$0xff] }
 0x540   : > { %4278 = vmatmul.f32.gmra.mxu3 %v4189_v29  ;;  %v3136_v20 = vpop.f32.mrf.mxu2 }
 0x542   : > { %v3023_v1 = vpop.f32.mrf.mxu1 }
 0x543   : > { %v9373_v9 = vpop.f32.mrf.mxu0  ;;  %v3137_v16 = vadd.f32 %v3136_v20, %v3023_v1  ;;  %v3455_v4 = vpop.f32.mrf.mxu3 }
 0x544   : > { %10888 = vst [vmem:[#allocation126_spill] sm:$0xff] %v9373_v9  ;;  %v9375_v57 = vadd.f32 %v3455_v4, %v3134_v34  ;;  %v4636_v34 = vld [vmem:[#allocation3 + $0x430] sm:$0xff]  ;;  %v9386_v4 = vld [vmem:[#allocation2 + $0x8a] sm:$0xff] }
 0x545   : > { %3829 = vmatmul.f32.gmra.mxu1 %v5568_v42  ;;  %4058 = vmatmul.f32.gmra.mxu2 %v3965_v46  ;;  %10895 = vst [vmem:[#allocation129_spill] sm:$0xff] %v9386_v4  ;;  %v10897_v46 = vld [vmem:[#allocation19_spill] sm:$0xff] }
 0x546   : > { %10889 = vst [vmem:[#allocation83_spill] sm:$0xff] %v9375_v57  ;;  %4469 = vmatmul.f32.gmra.mxu0 %v5568_v42  ;;  %v10896_v57 = vld [vmem:[#allocation128_spill] sm:$0xff]  ;;  %4655 = vmatpush.msra.mxu1 %v4636_v34  ;;  %v5572_v42 = vld [vmem:[#allocation2 + $0x90] sm:$0xff] }
 0x547   : > { %v3966_v52 = vmul.f32 %v9386_v4, %v10896_v57  ;;  %v4191_v55 = vmul.f32 %v5572_v42, %v10897_v46  ;;  %v10901_v57 = vld [vmem:[#allocation112_spill] sm:$0xff]  ;;  %v5575_v4 = vld [vmem:[#allocation2 + $0x98] sm:$0xff]  ;;  %v10902_v42 = vld [vmem:[#allocation25_spill] sm:$0xff] }
 0x548   : > { %4281 = vmatmul.f32.gmra.mxu3 %v10892_v47  ;;  %v3139_v38 = vpop.f32.mrf.mxu2  ;;  %v10904_v46 = vld [vmem:[#allocation110_spill] sm:$0xff] }
 0x54a   : > { %v3026_v22 = vpop.f32.mrf.mxu1 }
 0x54b   : > { %v9382_v29 = vpop.f32.mrf.mxu0  ;;  %v3140_v9 = vadd.f32 %v3139_v38, %v3026_v22  ;;  %v3458_v1 = vpop.f32.mrf.mxu3 }
 0x54c   : > { %10893 = vst [vmem:[#allocation59_spill] sm:$0xff] %v9382_v29  ;;  %v9384_v20 = vadd.f32 %v3458_v1, %v3137_v16  ;;  %v9395_v29 = vld [vmem:[#allocation2 + $0x92] sm:$0xff] }
 0x54d   : > { %3832 = vmatmul.f32.gmra.mxu1 %v5570_v39  ;;  %4061 = vmatmul.f32.gmra.mxu2 %v3966_v52  ;;  %10900 = vst [vmem:[#allocation31_spill] sm:$0xff] %v9395_v29  ;;  %v3967_v34 = vmul.f32 %v9395_v29, %v10901_v57  ;;  %v4635_v57 = vld [vmem:[#allocation3 + $0x428] sm:$0xff]  ;;  %v9407_v29 = vld [vmem:[#allocation2 + $0x9a] sm:$0xff] }
 0x54e   : > { %10894 = vst [vmem:[#allocation11_spill] sm:$0xff] %v9384_v20  ;;  %4472 = vmatmul.f32.gmra.mxu0 %v5570_v39  ;;  %v4192_v39 = vmul.f32 %v5575_v4, %v10902_v42  ;;  %4656 = vmatpush.msra.mxu1 %v4635_v57  ;;  %v10910_v42 = vld [vmem:[#allocation43_spill] sm:$0xff] }
 0x54f   : > { %10908 = vst [vmem:[#allocation29_spill] sm:$0xff] %v9407_v29 }
 0x550   : > { %4284 = vmatmul.f32.gmra.mxu3 %v4191_v55  ;;  %v3142_v22 = vpop.f32.mrf.mxu2  ;;  %v10903_v55 = vld [vmem:[#allocation37_spill] sm:$0xff] }
 0x551   : > { %v3050_v58 = vadd.f32 %v10904_v46, %v10903_v55  ;;  %v10911_v55 = vld [vmem:[#allocation95_spill] sm:$0xff] }
 0x552   : > { %v3029_v47 = vpop.f32.mrf.mxu1 }
 0x553   : > { %v9391_v38 = vpop.f32.mrf.mxu0  ;;  %v3143_v16 = vadd.f32 %v3142_v22, %v3029_v47  ;;  %v3461_v1 = vpop.f32.mrf.mxu3 }
 0x554   : > { %10898 = vst [vmem:[#allocation56_spill] sm:$0xff] %v9391_v38  ;;  %v9393_v20 = vadd.f32 %v3461_v1, %v3140_v9  ;;  %v5576_v38 = vld [vmem:[#allocation2 + $0x91] sm:$0xff]  ;;  %v10906_v1 = vld [vmem:[#allocation124_spill] sm:$0xff] }
 0x555   : > { %3835 = vmatmul.f32.gmra.mxu1 %v5573_v21  ;;  %4064 = vmatmul.f32.gmra.mxu2 %v3967_v34  ;;  %v5578_v34 = vld [vmem:[#allocation2 + $0xa0] sm:$0xff] }
 0x556   : > { %10899 = vst [vmem:[#allocation94_spill] sm:$0xff] %v9393_v20  ;;  %4475 = vmatmul.f32.gmra.mxu0 %v5573_v21  ;;  %v3467_v20 = vadd.f32 %v10906_v1, %v3050_v58  ;;  %v10909_v21 = vld [vmem:[#allocation47_spill] sm:$0xff] }
 0x557   : > { %v3968_v4 = vmul.f32 %v9407_v29, %v10909_v21  ;;  %v5579_v1 = vld [vmem:[#allocation2 + $0x99] sm:$0xff] }
 0x558   : > { %4287 = vmatmul.f32.gmra.mxu3 %v4192_v39  ;;  %v4017_v47 = vpop.f32.mrf.mxu2  ;;  %v4193_v39 = vmul.f32 %v5578_v34, %v10910_v42  ;;  %v3693_v46 = vadd.f32 %v10911_v55, %v3467_v20  ;;  %v9419_v20 = vld [vmem:[#allocation2 + $0xa2] sm:$0xff] }
 0x55a   : > { %v3791_v52 = vpop.f32.mrf.mxu1 }
 0x55b   : > { %v9402_v9 = vpop.f32.mrf.mxu0  ;;  %v3464_v22 = vpop.f32.mrf.mxu3  ;;  %v3887_v58 = vadd.f32 %v3791_v52, %v3693_v46 }
 0x55c   : > { %10905 = vst [vmem:[#allocation42_spill] sm:$0xff] %v9402_v9  ;;  %v9405_v12 = vadd.f32 %v3464_v22, %v3143_v16  ;;  %v10913_v9 = vld [vmem:[#allocation49_spill] sm:$0xff] }
 0x55d   : > { %3838 = vmatmul.f32.gmra.mxu1 %v5576_v38  ;;  %v3694_v10 = vadd.f32 %v10913_v9, %v10912_v54  ;;  %4067 = vmatmul.f32.gmra.mxu2 %v3968_v4  ;;  %v4113_v22 = vadd.f32 %v4017_v47, %v3887_v58  ;;  %v5581_v9 = vld [vmem:[#allocation2 + $0xa8] sm:$0xff] }
 0x55e   : > { %10907 = vst [vmem:[#allocation57_spill] sm:$0xff] %v9405_v12  ;;  %4478 = vmatmul.f32.gmra.mxu0 %v5576_v38  ;;  %v10915_v38 = vld [vmem:[#allocation23_spill] sm:$0xff]  ;;  %v4194_v52 = vmul.f32 %v5581_v9, %v10818_v2  ;;  %v4634_v58 = vld [vmem:[#allocation3 + $0x420] sm:$0xff]  ;;  %v10917_v2 = vld [vmem:[#allocation10_spill] sm:$0xff] }
 0x55f   : > { %v3969_v54 = vmul.f32 %v9419_v20, %v10915_v38  ;;  %4657 = vmatpush.msra.mxu1 %v4634_v58 }
 0x560   : > { %4290 = vmatmul.f32.gmra.mxu3 %v4193_v39  ;;  %v4020_v12 = vpop.f32.mrf.mxu2 }
 0x562   : > { %v3794_v41 = vpop.f32.mrf.mxu1 }
 0x563   : > { %v3888_v16 = vadd.f32 %v3794_v41, %v3694_v10  ;;  %v9415_v21 = vpop.f32.mrf.mxu0  ;;  %v4243_v29 = vpop.f32.mrf.mxu3  ;;  %v10916_v41 = vld [vmem:[#allocation75_spill] sm:$0xff] }
 0x564   : > { %10914 = vst [vmem:[#allocation63_spill] sm:$0xff] %v9415_v21  ;;  %v9417_v34 = vadd.f32 %v4243_v29, %v4113_v22  ;;  %v3695_v10 = vadd.f32 %v9138_v7, %v10916_v41  ;;  %v3696_v7 = vadd.f32 %v9145_v37, %v9141_v43  ;;  %v3697_v43 = vadd.f32 %v9153_v15, %v9148_v17  ;;  %v4389_v15 = vld [vmem:[#allocation2 + $0xb1] sm:$0xff] }
 0x565   : > { %3841 = vmatmul.f32.gmra.mxu1 %v5579_v1  ;;  %v4114_v57 = vadd.f32 %v4020_v12, %v3888_v16  ;;  %4070 = vmatmul.f32.gmra.mxu2 %v3969_v54  ;;  %v5582_v12 = vld [vmem:[#allocation2 + $0xa1] sm:$0xff]  ;;  %v9430_v16 = vld [vmem:[#allocation2 + $0xaa] sm:$0xff] }
 0x566   : > { %4481 = vmatmul.f32.gmra.mxu0 %v5579_v1  ;;  %v3970_v22 = vmul.f32 %v9430_v16, %v10917_v2  ;;  %v10918_v54 = vld [vmem:[#allocation14_spill] sm:$0xff] }
 0x568   : > { %4293 = vmatmul.f32.gmra.mxu3 %v4194_v52  ;;  %v4023_v29 = vpop.f32.mrf.mxu2  ;;  %v5584_v52 = vld [vmem:[#allocation2 + $0xa9] sm:$0xff] }
 0x56a   : > { %v3797_v47 = vpop.f32.mrf.mxu1 }
 0x56b   : > { %v3889_v4 = vadd.f32 %v3797_v47, %v3695_v10  ;;  %v9426_v42 = vpop.f32.mrf.mxu0  ;;  %v4246_v55 = vpop.f32.mrf.mxu3 }
 0x56c   : > { %v9428_v46 = vadd.f32 %v4246_v55, %v4114_v57  ;;  %v10919_v55 = vld [vmem:[#allocation130_spill] sm:$0xff] }
 0x56d   : > { %3844 = vmatmul.f32.gmra.mxu1 %v5582_v12  ;;  %v4115_v39 = vadd.f32 %v4023_v29, %v3889_v4  ;;  %4073 = vmatmul.f32.gmra.mxu2 %v3970_v22  ;;  %v5585_v29 = vld [vmem:[#allocation2 + $0xb8] sm:$0xff] }
 0x56e   : > { %4484 = vmatmul.f32.gmra.mxu0 %v5582_v12  ;;  %v4196_v12 = vmul.f32 %v5585_v29, %v10824_v48  ;;  %v5586_v22 = vld [vmem:[#allocation2 + $0xb1] sm:$0xff]  ;;  %v9449_v48 = vld [vmem:[#allocation2 + $0xba] sm:$0xff] }
 0x570   : > { %4296 = vmatmul.f32.gmra.mxu3 %v10918_v54  ;;  %v4026_v57 = vpop.f32.mrf.mxu2 }
 0x572   : > { %v3800_v1 = vpop.f32.mrf.mxu1 }
 0x573   : > { %v3890_v9 = vadd.f32 %v3800_v1, %v3696_v7  ;;  %v9437_v41 = vpop.f32.mrf.mxu0  ;;  %v4249_v47 = vpop.f32.mrf.mxu3 }
 0x574   : > { %v9439_v4 = vadd.f32 %v4249_v47, %v4115_v39  ;;  %v5588_v47 = vld [vmem:[#allocation2 + $0xc0] sm:$0xff] }
 0x575   : > { %3847 = vmatmul.f32.gmra.mxu1 %v5584_v52  ;;  %v4116_v10 = vadd.f32 %v4026_v57, %v3890_v9  ;;  %4076 = vmatmul.f32.gmra.mxu2 %v10919_v55  ;;  %v4633_v57 = vld [vmem:[#allocation3 + $0x418] sm:$0xff]  ;;  %v4197_v29 = vmul.f32 %v5588_v47, %v10828_v31  ;;  %v10924_v47 = vld [vmem:[#allocation111_spill] sm:$0xff] }
 0x576   : > { %4487 = vmatmul.f32.gmra.mxu0 %v5584_v52  ;;  %v10921_v52 = vld [vmem:[#allocation108_spill] sm:$0xff]  ;;  %4658 = vmatpush.msra.mxu1 %v4633_v57 }
 0x577   : > { %v3972_v17 = vmul.f32 %v9449_v48, %v10921_v52  ;;  %v5589_v55 = vld [vmem:[#allocation2 + $0xb9] sm:$0xff] }
 0x578   : > { %4299 = vmatmul.f32.gmra.mxu3 %v4196_v12  ;;  %v4029_v7 = vpop.f32.mrf.mxu2  ;;  %v10922_v12 = vld [vmem:[#allocation69_spill] sm:$0xff]  ;;  %v4390_v57 = vld [vmem:[#allocation2 + $0xb9] sm:$0xff] }
 0x57a   : > { %v3803_v37 = vpop.f32.mrf.mxu1 }
 0x57b   : > { %v3891_v58 = vadd.f32 %v3803_v37, %v3697_v43  ;;  %v9445_v1 = vpop.f32.mrf.mxu0  ;;  %v4252_v39 = vpop.f32.mrf.mxu3  ;;  %v3698_v43 = vadd.f32 %v9162_v14, %v10922_v12  ;;  %v3747_v12 = vld [vmem:[#allocation2 + $0xc1] sm:$0xff] }
 0x57c   : > { %v9447_v9 = vadd.f32 %v4252_v39, %v4116_v10 }
 0x57d   : > { %3850 = vmatmul.f32.gmra.mxu1 %v5586_v22  ;;  %v4117_v54 = vadd.f32 %v4029_v7, %v3891_v58  ;;  %4079 = vmatmul.f32.gmra.mxu2 %v3972_v17 }
 0x57e   : > { %10920 = vst [vmem:[#allocation46_spill] sm:$0xff] %v9447_v9  ;;  %4490 = vmatmul.f32.gmra.mxu0 %v4389_v15  ;;  %v5590_v9 = vld [vmem:[#allocation2 + $0xc8] sm:$0xff] }
 0x57f   : > { %v4198_v31 = vmul.f32 %v5590_v9, %v10830_v19  ;;  %v10923_v15 = vld [vmem:[#allocation21_spill] sm:$0xff]  ;;  %v3700_v9 = vadd.f32 %v9177_v28, %v9172_v44  ;;  %v10926_v44 = vld [vmem:[#allocation34_spill] sm:$0xff]  ;;  %v10927_v28 = vld [vmem:[#allocation132_spill] sm:$0xff] }
 0x580   : > { %4302 = vmatmul.f32.gmra.mxu3 %v4197_v29  ;;  %v4032_v58 = vpop.f32.mrf.mxu2  ;;  %v3699_v14 = vadd.f32 %v9169_v35, %v10923_v15  ;;  %v9468_v19 = vld [vmem:[#allocation2 + $0xca] sm:$0xff] }
 0x581   : > { %v3974_v35 = vmul.f32 %v9468_v19, %v8820_v45  ;;  %v3748_v15 = vld [vmem:[#allocation2 + $0xc9] sm:$0xff] }
 0x582   : > { %v3806_v37 = vpop.f32.mrf.mxu1 }
 0x583   : > { %v3892_v10 = vadd.f32 %v3806_v37, %v3698_v43  ;;  %v9456_v22 = vpop.f32.mrf.mxu0  ;;  %v4255_v39 = vpop.f32.mrf.mxu3 }
 0x584   : > { %v9458_v21 = vadd.f32 %v4255_v39, %v4117_v54 }
 0x585   : > { %3853 = vmatmul.f32.gmra.mxu1 %v5589_v55  ;;  %v4118_v7 = vadd.f32 %v4032_v58, %v3892_v10  ;;  %4082 = vmatmul.f32.gmra.mxu2 %v10924_v47  ;;  %v4632_v58 = vld [vmem:[#allocation3 + $0x410] sm:$0xff] }
 0x586   : > { %4493 = vmatmul.f32.gmra.mxu0 %v4390_v57  ;;  %4659 = vmatpush.msra.mxu1 %v4632_v58  ;;  %v10925_v57 = vld [vmem:[#allocation28_spill] sm:$0xff]  ;;  %v3749_v58 = vld [vmem:[#allocation2 + $0xd1] sm:$0xff] }
 0x588   : > { %4305 = vmatmul.f32.gmra.mxu3 %v4198_v31  ;;  %v4035_v43 = vpop.f32.mrf.mxu2 }
 0x58a   : > { %v3809_v17 = vpop.f32.mrf.mxu1 }
 0x58b   : > { %v3893_v29 = vadd.f32 %v3809_v17, %v3699_v14  ;;  %v9464_v37 = vpop.f32.mrf.mxu0  ;;  %v4258_v10 = vpop.f32.mrf.mxu3 }
 0x58c   : > { %v9466_v55 = vadd.f32 %v4258_v10, %v4118_v7 }
 0x58d   : > { %3856 = vmatmul.f32.gmra.mxu1 %v3747_v12  ;;  %v4119_v54 = vadd.f32 %v4035_v43, %v3893_v29  ;;  %4085 = vmatmul.f32.gmra.mxu2 %v3974_v35 }
 0x58e   : > { %4496 = vmatmul.f32.gmra.mxu0 %v3747_v12  ;;  %v3701_v12 = vadd.f32 %v9185_v3, %v9180_v63  ;;  %v4201_v63 = vmul.f32 %v9195_v13, %v8828_v24  ;;  %v3702_v3 = vadd.f32 %v9197_v18, %v9189_v36  ;;  %v3703_v24 = vadd.f32 %v9207_v51, %v9201_v5  ;;  %v10930_v36 = vld [vmem:[#allocation125_spill] sm:$0xff] }
 0x58f   : > { %v3704_v5 = vadd.f32 %v9217_v30, %v9211_v32  ;;  %v10933_v30 = vld [vmem:[#allocation109_spill] sm:$0xff] }
 0x590   : > { %4308 = vmatmul.f32.gmra.mxu3 %v10925_v57  ;;  %v4038_v7 = vpop.f32.mrf.mxu2 }
 0x592   : > { %v3812_v39 = vpop.f32.mrf.mxu1 }
 0x593   : > { %v3894_v31 = vadd.f32 %v3812_v39, %v3700_v9  ;;  %v9475_v14 = vpop.f32.mrf.mxu0  ;;  %v4261_v47 = vpop.f32.mrf.mxu3 }
 0x594   : > { %v9477_v29 = vadd.f32 %v4261_v47, %v4119_v54  ;;  %v4631_v54 = vld [vmem:[#allocation3 + $0x408] sm:$0xff] }
 0x595   : > { %3859 = vmatmul.f32.gmra.mxu1 %v3748_v15  ;;  %v4120_v17 = vadd.f32 %v4038_v7, %v3894_v31  ;;  %4088 = vmatmul.f32.gmra.mxu2 %v10926_v44  ;;  %v10928_v7 = vld [vmem:[#allocation71_spill] sm:$0xff] }
 0x596   : > { %4499 = vmatmul.f32.gmra.mxu0 %v3748_v15  ;;  %4660 = vmatpush.msra.mxu1 %v4631_v54 }
 0x598   : > { %4311 = vmatmul.f32.gmra.mxu3 %v10927_v28  ;;  %v4041_v35 = vpop.f32.mrf.mxu2 }
 0x59a   : > { %v3815_v43 = vpop.f32.mrf.mxu1 }
 0x59b   : > { %v3895_v10 = vadd.f32 %v3815_v43, %v3701_v12  ;;  %v9483_v9 = vpop.f32.mrf.mxu0  ;;  %v4264_v57 = vpop.f32.mrf.mxu3  ;;  %v3750_v12 = vld [vmem:[#allocation2 + $0xd9] sm:$0xff] }
 0x59c   : > { %v9485_v31 = vadd.f32 %v4264_v57, %v4120_v17 }
 0x59d   : > { %3862 = vmatmul.f32.gmra.mxu1 %v3749_v58  ;;  %v4121_v39 = vadd.f32 %v4041_v35, %v3895_v10  ;;  %4091 = vmatmul.f32.gmra.mxu2 %v10928_v7  ;;  %v3751_v35 = vld [vmem:[#allocation2 + $0xe1] sm:$0xff] }
 0x59e   : > { %4502 = vmatmul.f32.gmra.mxu0 %v3749_v58  ;;  %v10929_v58 = vld [vmem:[#allocation38_spill] sm:$0xff] }
 0x5a0   : > { %4314 = vmatmul.f32.gmra.mxu3 %v4201_v63  ;;  %v4044_v43 = vpop.f32.mrf.mxu2 }
 0x5a2   : > { %v3818_v15 = vpop.f32.mrf.mxu1 }
 0x5a3   : > { %v3896_v47 = vadd.f32 %v3818_v15, %v3702_v3  ;;  %v9492_v44 = vpop.f32.mrf.mxu0  ;;  %v4267_v28 = vpop.f32.mrf.mxu3 }
 0x5a4   : > { %v4347_v10 = vadd.f32 %v4267_v28, %v4121_v39  ;;  %v4630_v39 = vld [vmem:[#allocation3 + $0x400] sm:$0xff] }
 0x5a5   : > { %3865 = vmatmul.f32.gmra.mxu1 %v3750_v12  ;;  %v4122_v17 = vadd.f32 %v4044_v43, %v3896_v47  ;;  %4094 = vmatmul.f32.gmra.mxu2 %v10929_v58  ;;  %v10931_v47 = vld [vmem:[#allocation73_spill] sm:$0xff] }
 0x5a6   : > { %4505 = vmatmul.f32.gmra.mxu0 %v3750_v12  ;;  %4661 = vmatpush.msra.mxu1 %v4630_v39  ;;  %v10932_v12 = vld [vmem:[#allocation50_spill] sm:$0xff] }
 0x5a7   : > { %v3752_v28 = vld [vmem:[#allocation2 + $0xe9] sm:$0xff] }
 0x5a8   : > { %4317 = vmatmul.f32.gmra.mxu3 %v10930_v36  ;;  %v4047_v57 = vpop.f32.mrf.mxu2 }
 0x5aa   : > { %v3821_v13 = vpop.f32.mrf.mxu1 }
 0x5ab   : > { %v3897_v18 = vadd.f32 %v3821_v13, %v3703_v24  ;;  %v4461_v54 = vpop.f32.mrf.mxu0  ;;  %v4270_v3 = vpop.f32.mrf.mxu3 }
 0x5ac   : > { %v9498_v15 = vadd.f32 %v4461_v54, %v4347_v10  ;;  %v4348_v7 = vadd.f32 %v4270_v3, %v4122_v17 }
 0x5ad   : > { %3868 = vmatmul.f32.gmra.mxu1 %v3751_v35  ;;  %v4123_v63 = vadd.f32 %v4047_v57, %v3897_v18  ;;  %4097 = vmatmul.f32.gmra.mxu2 %v10931_v47  ;;  %v3705_v18 = vadd.f32 %v9236_v8, %v9223_v50  ;;  %v3706_v50 = vadd.f32 %v9251_v49, %v9240_v11  ;;  %v10936_v47 = vld [vmem:[#allocation117_spill] sm:$0xff] }
 0x5ae   : > { %4508 = vmatmul.f32.gmra.mxu0 %v3751_v35  ;;  %v10934_v35 = vld [vmem:[#allocation40_spill] sm:$0xff]  ;;  %v3707_v11 = vadd.f32 %v9260_v60, %v9255_v27  ;;  %v10940_v60 = vld [vmem:[#allocation22_spill] sm:$0xff] }
 0x5b0   : > { %4320 = vmatmul.f32.gmra.mxu3 %v10932_v12  ;;  %v4050_v24 = vpop.f32.mrf.mxu2 }
 0x5b2   : > { %v3824_v51 = vpop.f32.mrf.mxu1 }
 0x5b3   : > { %v3898_v43 = vadd.f32 %v3824_v51, %v3704_v5  ;;  %v4464_v13 = vpop.f32.mrf.mxu0  ;;  %v4273_v10 = vpop.f32.mrf.mxu3 }
 0x5b4   : > { %v9504_v36 = vadd.f32 %v4464_v13, %v4348_v7  ;;  %v4349_v17 = vadd.f32 %v4273_v10, %v4123_v63  ;;  %v10935_v63 = vld [vmem:[#allocation45_spill] sm:$0xff] }
 0x5b5   : > { %3871 = vmatmul.f32.gmra.mxu1 %v3752_v28  ;;  %v4124_v58 = vadd.f32 %v4050_v24, %v3898_v43  ;;  %4100 = vmatmul.f32.gmra.mxu2 %v10933_v30  ;;  %v10937_v43 = vld [vmem:[#allocation44_spill] sm:$0xff]  ;;  %v10939_v30 = vld [vmem:[#allocation15_spill] sm:$0xff] }
 0x5b6   : > { %4511 = vmatmul.f32.gmra.mxu0 %v3752_v28 }
 0x5b8   : > { %4323 = vmatmul.f32.gmra.mxu3 %v10934_v35  ;;  %v4053_v54 = vpop.f32.mrf.mxu2 }
 0x5ba   : > { %v3827_v32 = vpop.f32.mrf.mxu1 }
 0x5bb   : > { %v3899_v57 = vadd.f32 %v3827_v32, %v3705_v18  ;;  %v4467_v3 = vpop.f32.mrf.mxu0  ;;  %v4276_v5 = vpop.f32.mrf.mxu3  ;;  %v5592_v18 = vld [vmem:[#allocation2 + $0x102] sm:$0xff] }
 0x5bc   : > { %v9511_v51 = vadd.f32 %v4467_v3, %v4349_v17  ;;  %v4350_v7 = vadd.f32 %v4276_v5, %v4124_v58  ;;  %v4175_v3 = vld [vmem:[#allocation2 + $0x110] sm:$0xff] }
 0x5bd   : > { %3874 = vmatmul.f32.gmra.mxu1 %v9231_v61  ;;  %v4125_v39 = vadd.f32 %v4053_v54, %v3899_v57  ;;  %4103 = vmatmul.f32.gmra.mxu2 %v10935_v63  ;;  %v3755_v57 = vld [vmem:[#allocation2 + $0x101] sm:$0xff]  ;;  %v5593_v63 = vld [vmem:[#allocation2 + $0x10a] sm:$0xff]  ;;  %v4207_v27 = vmul.f32 %v4175_v3, %v9221_v6 }
 0x5be   : > { %4514 = vmatmul.f32.gmra.mxu0 %v9231_v61  ;;  %v10938_v61 = vld [vmem:[#allocation55_spill] sm:$0xff] }
 0x5bf   : > { %v3981_v32 = vmul.f32 %v5592_v18, %v10938_v61  ;;  %v4176_v18 = vld [vmem:[#allocation2 + $0x118] sm:$0xff] }
 0x5c0   : > { %4326 = vmatmul.f32.gmra.mxu3 %v10936_v47  ;;  %v4056_v28 = vpop.f32.mrf.mxu2  ;;  %v3982_v47 = vmul.f32 %v5593_v63, %v9248_v40  ;;  %v4208_v6 = vmul.f32 %v4176_v18, %v9233_v56  ;;  %v3710_v56 = vadd.f32 %v9286_v25, %v9280_v53  ;;  %v10942_v53 = vld [vmem:[#allocation65_spill] sm:$0xff] }
 0x5c2   : > { %v3830_v8 = vpop.f32.mrf.mxu1 }
 0x5c3   : > { %v3900_v12 = vadd.f32 %v3830_v8, %v3706_v50  ;;  %v4470_v24 = vpop.f32.mrf.mxu0  ;;  %v4279_v10 = vpop.f32.mrf.mxu3 }
 0x5c4   : > { %v9519_v17 = vadd.f32 %v4470_v24, %v4350_v7  ;;  %v4351_v58 = vadd.f32 %v4279_v10, %v4125_v39  ;;  %v3756_v24 = vld [vmem:[#allocation2 + $0x109] sm:$0xff] }
 0x5c5   : > { %3877 = vmatmul.f32.gmra.mxu1 %v10937_v43  ;;  %v4126_v13 = vadd.f32 %v4056_v28, %v3900_v12  ;;  %4106 = vmatmul.f32.gmra.mxu2 %v3981_v32  ;;  %v3708_v12 = vadd.f32 %v9269_v59, %v10940_v60  ;;  %v3709_v59 = vadd.f32 %v9278_v23, %v9272_v62  ;;  %v5596_v23 = vld [vmem:[#allocation2 + $0x2a] sm:$0xff] }
 0x5c6   : > { %4517 = vmatmul.f32.gmra.mxu0 %v10937_v43  ;;  %v4598_v60 = vmul.f32 %v5596_v23, %v10842_v0 }
 0x5c8   : > { %4329 = vmatmul.f32.gmra.mxu3 %v10939_v30  ;;  %v4059_v54 = vpop.f32.mrf.mxu2 }
 0x5ca   : > { %v3833_v49 = vpop.f32.mrf.mxu1 }
 0x5cb   : > { %v3901_v35 = vadd.f32 %v3833_v49, %v3707_v11  ;;  %v4473_v5 = vpop.f32.mrf.mxu0  ;;  %v4282_v39 = vpop.f32.mrf.mxu3 }
 0x5cc   : > { %v9526_v50 = vadd.f32 %v4473_v5, %v4351_v58  ;;  %v4352_v8 = vadd.f32 %v4282_v39, %v4126_v13 }
 0x5cd   : > { %3880 = vmatmul.f32.gmra.mxu1 %v3755_v57  ;;  %v4127_v7 = vadd.f32 %v4059_v54, %v3901_v35  ;;  %4109 = vmatmul.f32.gmra.mxu2 %v3982_v47  ;;  %v5594_v35 = vld [vmem:[#allocation2 + $0x22] sm:$0xff] }
 0x5ce   : > { %4520 = vmatmul.f32.gmra.mxu0 %v3755_v57  ;;  %v10941_v57 = vld [vmem:[#allocation99_spill] sm:$0xff] }
 0x5cf   : > { %v4597_v54 = vmul.f32 %v5594_v35, %v10941_v57 }
 0x5d0   : > { %4332 = vmatmul.f32.gmra.mxu3 %v4207_v27  ;;  %v4062_v10 = vpop.f32.mrf.mxu2  ;;  %v5595_v27 = vld [vmem:[#allocation2] sm:$0xff] }
 0x5d2   : > { %v3836_v43 = vpop.f32.mrf.mxu1 }
 0x5d3   : > { %v3902_v28 = vadd.f32 %v3836_v43, %v3708_v12  ;;  %v4476_v58 = vpop.f32.mrf.mxu0  ;;  %v4285_v13 = vpop.f32.mrf.mxu3 }
 0x5d4   : > { %v9532_v11 = vadd.f32 %v4476_v58, %v4352_v8  ;;  %v4353_v49 = vadd.f32 %v4285_v13, %v4127_v7 }
 0x5d5   : > { %3883 = vmatmul.f32.gmra.mxu1 %v3756_v24  ;;  %v4128_v32 = vadd.f32 %v4062_v10, %v3902_v28 }
 0x5d6   : > { %4523 = vmatmul.f32.gmra.mxu0 %v3756_v24 }
 0x5d8   : > { %4335 = vmatmul.f32.gmra.mxu3 %v4208_v6  ;;  %v4065_v5 = vpop.f32.mrf.mxu2 }
 0x5da   : > { %v3839_v30 = vpop.f32.mrf.mxu1 }
 0x5db   : > { %v3903_v3 = vadd.f32 %v3839_v30, %v3709_v59  ;;  %v4479_v39 = vpop.f32.mrf.mxu0  ;;  %v4288_v47 = vpop.f32.mrf.mxu3 }
 0x5dc   : > { %v9538_v8 = vadd.f32 %v4479_v39, %v4353_v49  ;;  %v4354_v7 = vadd.f32 %v4288_v47, %v4128_v32  ;;  %v3711_v32 = vadd.f32 %v9294_v26, %v9288_v33  ;;  %v5597_v49 = vld [vmem:[#allocation2 + $0x32] sm:$0xff]  ;;  %v5598_v47 = vld [vmem:[#allocation2 + $0x3a] sm:$0xff] }
 0x5dd   : > { %4662 = vmatmul.f32.vlgmr.msra.gmra.mxu1 %v4597_v54  ;;  %v4129_v63 = vadd.f32 %v4065_v5, %v3903_v3  ;;  %v4599_v25 = vmul.f32 %v5597_v49, %v10942_v53  ;;  %v10943_v3 = vld [vmem:[#allocation35_spill] sm:$0xff] }
 0x5de   : > { %4526 = vmatmul.f32.gmra.mxu0 %v5595_v27  ;;  %v10944_v5 = vld [vmem:[#allocation91_spill] sm:$0xff] }
 0x5df   : > { %v3712_v39 = vadd.f32 %v10944_v5, %v10943_v3 }
 0x5e0   : > { %v4068_v43 = vpop.f32.mrf.mxu2 }
 0x5e2   : > { %v3842_v62 = vpop.f32.mrf.mxu1 }
 0x5e3   : > { %v3904_v12 = vadd.f32 %v3842_v62, %v3710_v56  ;;  %v4482_v28 = vpop.f32.mrf.mxu0  ;;  %v4291_v10 = vpop.f32.mrf.mxu3 }
 0x5e4   : > { %v9543_v18 = vadd.f32 %v4482_v28, %v4354_v7  ;;  %v4355_v58 = vadd.f32 %v4291_v10, %v4129_v63  ;;  %v10945_v7 = vld [vmem:[#allocation72_spill] sm:$0xff]  ;;  %v10947_v28 = vld [vmem:[#allocation79_spill] sm:$0xff] }
 0x5e5   : > { %4665 = vmatmul.f32.gmra.mxu1 %v4598_v60  ;;  %v4130_v24 = vadd.f32 %v4068_v43, %v3904_v12  ;;  %v4600_v33 = vmul.f32 %v5598_v47, %v10945_v7  ;;  %v10946_v43 = vld [vmem:[#allocation84_spill] sm:$0xff] }
 0x5e6   : > { %4529 = vmatmul.f32.gmra.mxu0 %v5595_v27  ;;  %v3713_v10 = vadd.f32 %v10947_v28, %v10946_v43  ;;  %v10954_v43 = vld [vmem:[#allocation54_spill] sm:$0xff]  ;;  %v10955_v28 = vld [vmem:[#allocation9_spill] sm:$0xff] }
 0x5e8   : > { %v4071_v0 = vpop.f32.mrf.mxu2 }
 0x5ea   : > { %v3845_v13 = vpop.f32.mrf.mxu1 }
 0x5eb   : > { %v3905_v6 = vadd.f32 %v3845_v13, %v3711_v32  ;;  %v4485_v59 = vpop.f32.mrf.mxu0  ;;  %v4294_v35 = vpop.f32.mrf.mxu3  ;;  %v10949_v32 = vld [vmem:[#allocation98_spill] sm:$0xff] }
 0x5ec   : > { %v9548_v57 = vadd.f32 %v4485_v59, %v4355_v58  ;;  %v4356_v54 = vadd.f32 %v4294_v35, %v4130_v24  ;;  %v10948_v58 = vld [vmem:[#allocation121_spill] sm:$0xff] }
 0x5ed   : > { %4668 = vmatmul.f32.gmra.mxu1 %v4599_v25  ;;  %v4131_v30 = vadd.f32 %v4071_v0, %v3905_v6  ;;  %v4601_v13 = vmul.f32 %v10949_v32, %v10948_v58  ;;  %v10956_v58 = vld [vmem:[#allocation90_spill] sm:$0xff]  ;;  %v10957_v32 = vld [vmem:[#allocation13_spill] sm:$0xff] }
 0x5f0   : > { %v4074_v27 = vpop.f32.mrf.mxu2 }
 0x5f2   : > { %v3848_v63 = vpop.f32.mrf.mxu1 }
 0x5f3   : > { %v3906_v26 = vadd.f32 %v3848_v63, %v3712_v39  ;;  %v4488_v56 = vpop.f32.mrf.mxu0  ;;  %v4297_v23 = vpop.f32.mrf.mxu3 }
 0x5f4   : > { %v9553_v60 = vadd.f32 %v4488_v56, %v4356_v54  ;;  %v4357_v12 = vadd.f32 %v4297_v23, %v4131_v30  ;;  %v10950_v54 = vld [vmem:[#allocation116_spill] sm:$0xff]  ;;  %v10951_v30 = vld [vmem:[#allocation70_spill] sm:$0xff] }
 0x5f5   : > { %4671 = vmatmul.f32.gmra.mxu1 %v4600_v33  ;;  %v4132_v62 = vadd.f32 %v4074_v27, %v3906_v26  ;;  %v4602_v5 = vmul.f32 %v10951_v30, %v10950_v54  ;;  %v10952_v26 = vld [vmem:[#allocation97_spill] sm:$0xff] }
 0x5f6   : > { %v10953_v27 = vld [vmem:[#allocation113_spill] sm:$0xff] }
 0x5f7   : > { %v4603_v56 = vmul.f32 %v10953_v27, %v10952_v26  ;;  %v10961_v54 = vld [vmem:[#allocation89_spill] sm:$0xff]  ;;  %v10964_v27 = vld [vmem:[#allocation20_spill] sm:$0xff] }
 0x5f8   : > { %v4077_v53 = vpop.f32.mrf.mxu2 }
 0x5fa   : > { %v3851_v24 = vpop.f32.mrf.mxu1 }
 0x5fb   : > { %v3907_v49 = vadd.f32 %v3851_v24, %v3713_v10  ;;  %v4491_v25 = vpop.f32.mrf.mxu0  ;;  %v4300_v0 = vpop.f32.mrf.mxu3  ;;  %v4604_v10 = vmul.f32 %v10955_v28, %v10954_v43  ;;  %v10966_v28 = vld [vmem:[#allocation93_spill] sm:$0xff] }
 0x5fc   : > { %v9559_v59 = vadd.f32 %v4491_v25, %v4357_v12  ;;  %v4358_v35 = vadd.f32 %v4300_v0, %v4132_v62  ;;  %v10959_v25 = vld [vmem:[#allocation52_spill] sm:$0xff] }
 0x5fd   : > { %4674 = vmatmul.f32.gmra.mxu1 %v4601_v13  ;;  %v4133_v6 = vadd.f32 %v4077_v53, %v3907_v49  ;;  %v4605_v13 = vmul.f32 %v10957_v32, %v10956_v58  ;;  %v10958_v53 = vld [vmem:[#allocation92_spill] sm:$0xff] }
 0x602   : > { %v9561_v3 = vpop.f32.mrf.mxu1 }
 0x603   : > { %v4494_v39 = vpop.f32.mrf.mxu0  ;;  %v4303_v63 = vpop.f32.mrf.mxu3 }
 0x604   : > { %v9565_v47 = vadd.f32 %v4494_v39, %v4358_v35  ;;  %v4359_v7 = vadd.f32 %v4303_v63, %v4133_v6  ;;  %v4606_v6 = vmul.f32 %v10959_v25, %v10958_v53  ;;  %v10960_v35 = vld [vmem:[#allocation127_spill] sm:$0xff]  ;;  %v10962_v39 = vld [vmem:[#allocation104_spill] sm:$0xff] }
 0x605   : > { %4677 = vmatmul.f32.gmra.mxu1 %v4602_v5  ;;  %v4607_v30 = vmul.f32 %v10961_v54, %v10960_v35  ;;  %v10963_v63 = vld [vmem:[#allocation60_spill] sm:$0xff]  ;;  %v10969_v53 = vld [vmem:[#allocation31_spill] sm:$0xff]  ;;  %v10971_v54 = vld [vmem:[#allocation29_spill] sm:$0xff] }
 0x606   : > { %v10970_v35 = vld [vmem:[#allocation128_spill] sm:$0xff] }
 0x60a   : > { %v9567_v33 = vpop.f32.mrf.mxu1 }
 0x60b   : > { %v4497_v23 = vpop.f32.mrf.mxu0 }
 0x60c   : > { %v9571_v12 = vadd.f32 %v4497_v23, %v4359_v7  ;;  %v4608_v7 = vmul.f32 %v10963_v63, %v10962_v39  ;;  %v10972_v63 = vld [vmem:[#allocation112_spill] sm:$0xff] }
 0x60d   : > { %4680 = vmatmul.f32.gmra.mxu1 %v4603_v56  ;;  %v10965_v56 = vld [vmem:[#allocation77_spill] sm:$0xff] }
 0x60e   : > { %v4609_v23 = vmul.f32 %v10965_v56, %v10964_v27  ;;  %v10973_v56 = vld [vmem:[#allocation47_spill] sm:$0xff] }
 0x612   : > { %v9573_v62 = vpop.f32.mrf.mxu1 }
 0x615   : > { %4683 = vmatmul.f32.gmra.mxu1 %v4604_v10  ;;  %v10967_v10 = vld [vmem:[#allocation129_spill] sm:$0xff] }
 0x616   : > { %v4610_v58 = vmul.f32 %v10967_v10, %v10966_v28  ;;  %v5599_v10 = vld [vmem:[#allocation2 + $0xb2] sm:$0xff] }
 0x61a   : > { %v9577_v24 = vpop.f32.mrf.mxu1 }
 0x61d   : > { %4686 = vmatmul.f32.gmra.mxu1 %v4605_v13  ;;  %v10968_v13 = vld [vmem:[#allocation107_spill] sm:$0xff] }
 0x61e   : > { %v4611_v25 = vmul.f32 %v10969_v53, %v10968_v13  ;;  %v4616_v53 = vmul.f32 %v9449_v48, %v10917_v2 }
 0x622   : > { %v9581_v49 = vpop.f32.mrf.mxu1 }
 0x625   : > { %4689 = vmatmul.f32.gmra.mxu1 %v4606_v6 }
 0x62a   : > { %v9585_v0 = vpop.f32.mrf.mxu1 }
 0x62d   : > { %4692 = vmatmul.f32.gmra.mxu1 %v4607_v30  ;;  %v4612_v30 = vmul.f32 %v10971_v54, %v10970_v35 }
 0x632   : > { %v9589_v5 = vpop.f32.mrf.mxu1 }
 0x635   : > { %4695 = vmatmul.f32.gmra.mxu1 %v4608_v7  ;;  %v4613_v7 = vmul.f32 %v9419_v20, %v10972_v63  ;;  %v5600_v63 = vld [vmem:[#allocation2 + $0xda] sm:$0xff] }
 0x636   : > { %v4620_v2 = vmul.f32 %v5600_v63, %v8820_v45 }
 0x63a   : > { %v9593_v26 = vpop.f32.mrf.mxu1 }
 0x63d   : > { %4698 = vmatmul.f32.gmra.mxu1 %v4609_v23  ;;  %v4614_v23 = vmul.f32 %v9430_v16, %v10973_v56  ;;  %v4618_v16 = vmul.f32 %v9468_v19, %v10921_v52  ;;  %v10977_v56 = vld [vmem:[#allocation32_spill] sm:$0xff] }
 0x63e   : > { %v10979_v19 = vld [vmem:[#allocation24_spill] sm:$0xff] }
 0x642   : > { %v9597_v43 = vpop.f32.mrf.mxu1 }
 0x645   : > { %4701 = vmatmul.f32.gmra.mxu1 %v4610_v58  ;;  %v4615_v58 = vmul.f32 %v5599_v10, %v10915_v38  ;;  %v10975_v38 = vld [vmem:[#allocation131_spill] sm:$0xff] }
 0x64a   : > { %v9601_v32 = vpop.f32.mrf.mxu1 }
 0x64d   : > { %4704 = vmatmul.f32.gmra.mxu1 %v4611_v25  ;;  %v10974_v25 = vld [vmem:[#allocation18_spill] sm:$0xff] }
 0x652   : > { %v9605_v6 = vpop.f32.mrf.mxu1 }
 0x655   : > { %4707 = vmatmul.f32.gmra.mxu1 %v4612_v30 }
 0x65a   : > { %v9609_v39 = vpop.f32.mrf.mxu1 }
 0x65d   : > { %4710 = vmatmul.f32.gmra.mxu1 %v4613_v7 }
 0x662   : > { %v9613_v27 = vpop.f32.mrf.mxu1 }
 0x665   : > { %4713 = vmatmul.f32.gmra.mxu1 %v4614_v23 }
 0x66a   : > { %v9617_v28 = vpop.f32.mrf.mxu1 }
 0x66d   : > { %4716 = vmatmul.f32.gmra.mxu1 %v4615_v58 }
 0x672   : > { %v9620_v13 = vpop.f32.mrf.mxu1 }
 0x675   : > { %4719 = vmatmul.f32.gmra.mxu1 %v4616_v53  ;;  %v10981_v53 = vld [vmem:[#allocation122_spill] sm:$0xff] }
 0x67a   : > { %v9624_v20 = vpop.f32.mrf.mxu1 }
 0x67d   : > { %4722 = vmatmul.f32.gmra.mxu1 %v10974_v25 }
 0x682   : > { %v9627_v35 = vpop.f32.mrf.mxu1 }
 0x685   : > { %4725 = vmatmul.f32.gmra.mxu1 %v4618_v16 }
 0x68a   : > { %v9631_v54 = vpop.f32.mrf.mxu1 }
 0x68d   : > { %4728 = vmatmul.f32.gmra.mxu1 %v10975_v38 }
 0x692   : > { %v9634_v30 = vpop.f32.mrf.mxu1 }
 0x695   : > { %4731 = vmatmul.f32.gmra.mxu1 %v4620_v2 }
 0x69a   : > { %v4687_v48 = vpop.f32.mrf.mxu1 }
 0x69b   : > { %v9638_v7 = vadd.f32 %v4687_v48, %v9498_v15  ;;  %v10983_v15 = vld [vmem:[#allocation133_spill] sm:$0xff]  ;;  %v4595_v48 = vld [vmem:[#allocation2 + $0x112] sm:$0xff] }
 0x69d   : > { %10976 = vst [vmem:[#allocation51_spill] sm:$0xff] %v9638_v7  ;;  %4734 = vmatmul.f32.gmra.mxu1 %v10977_v56 }
 0x6a2   : > { %v4690_v23 = vpop.f32.mrf.mxu1 }
 0x6a3   : > { %v9642_v52 = vadd.f32 %v4690_v23, %v9504_v36  ;;  %v10985_v36 = vld [vmem:[#allocation62_spill] sm:$0xff]  ;;  %v4627_v23 = vmul.f32 %v4595_v48, %v10938_v61  ;;  %v9675_v61 = vpop.f32.mrf.mxu2 }
 0x6a5   : > { %10978 = vst [vmem:[#allocation27_spill] sm:$0xff] %v9642_v52  ;;  %4737 = vmatmul.f32.gmra.mxu1 %v10979_v19  ;;  %v4596_v19 = vld [vmem:[#allocation2 + $0x11a] sm:$0xff] }
 0x6aa   : > { %v4693_v10 = vpop.f32.mrf.mxu1 }
 0x6ab   : > { %v9646_v58 = vadd.f32 %v4693_v10, %v9511_v51  ;;  %v10987_v51 = vld [vmem:[#allocation81_spill] sm:$0xff] }
 0x6ad   : > { %10980 = vst [vmem:[#allocation88_spill] sm:$0xff] %v9646_v58  ;;  %4740 = vmatmul.f32.gmra.mxu1 %v10981_v53 }
 0x6b2   : > { %v4696_v45 = vpop.f32.mrf.mxu1 }
 0x6b3   : > { %v9650_v25 = vadd.f32 %v4696_v45, %v9519_v17 }
 0x6b5   : > { %10982 = vst [vmem:[#allocation76_spill] sm:$0xff] %v9650_v25  ;;  %4743 = vmatmul.f32.gmra.mxu1 %v10983_v15 }
 0x6ba   : > { %v4699_v16 = vpop.f32.mrf.mxu1 }
 0x6bb   : > { %v9654_v38 = vadd.f32 %v4699_v16, %v9526_v50  ;;  %v4628_v50 = vmul.f32 %v4596_v19, %v9248_v40 }
 0x6bd   : > { %10984 = vst [vmem:[#allocation17_spill] sm:$0xff] %v9654_v38  ;;  %4746 = vmatmul.f32.gmra.mxu1 %v10985_v36  ;;  %v9679_v36 = vpop.f32.mrf.mxu0 }
 0x6c2   : > { %v4702_v63 = vpop.f32.mrf.mxu1 }
 0x6c3   : > { %v9658_v2 = vadd.f32 %v4702_v63, %v9532_v11 }
 0x6c5   : > { %10986 = vst [vmem:[#allocation80_spill] sm:$0xff] %v9658_v2  ;;  %4749 = vmatmul.f32.gmra.mxu1 %v10987_v51 }
 0x6ca   : > { %v4705_v56 = vpop.f32.mrf.mxu1 }
 0x6cb   : > { %v9663_v17 = vadd.f32 %v4705_v56, %v9538_v8  ;;  %v9677_v8 = vpop.f32.mrf.mxu3 }
 0x6cd   : > { %4752 = vmatmul.f32.gmra.mxu1 %v4627_v23  ;;  %v4534_v23 = vadd.f32 %v9437_v41, %v9428_v46 }
 0x6d2   : > { %v4708_v10 = vpop.f32.mrf.mxu1 }
 0x6d3   : > { %v9667_v53 = vadd.f32 %v4708_v10, %v9543_v18  ;;  %v9684_v18 = vpop.f32.mrf.mxu2  ;;  %v9686_v51 = vpop.f32.mrf.mxu3 }
 0x6d5   : > { %4755 = vmatmul.f32.gmra.mxu1 %v4628_v50  ;;  %v4535_v50 = vadd.f32 %v9445_v1, %v9439_v4  ;;  %v4538_v1 = vadd.f32 %v9475_v14, %v9466_v55 }
 0x6d7   : > { %v9715_v41 = vadd.f32 %v9617_v28, %v4535_v50 }
 0x6da   : > { %v4711_v11 = vpop.f32.mrf.mxu1 }
 0x6db   : > { %v9670_v45 = vadd.f32 %v4711_v11, %v9548_v57  ;;  %v9693_v56 = vpop.f32.mrf.mxu2  ;;  %v9697_v19 = vpop.f32.mrf.mxu3  ;;  %v9704_v11 = vadd.f32 %v9613_v27, %v4534_v23  ;;  %v9747_v23 = vadd.f32 %v9627_v35, %v4538_v1 }
 0x6dd   : > { %v4834_v35 = vmul.f32 %v9747_v23, %v9747_v23 }
 0x6e2   : > { %v4714_v15 = vpop.f32.mrf.mxu1 }
 0x6e3   : > { %v9673_v16 = vadd.f32 %v4714_v15, %v9553_v60  ;;  %v9691_v60 = vpop.f32.mrf.mxu0  ;;  %v10988_v15 = vld [vmem:[#allocation46_spill] sm:$0xff]  ;;  %v9739_v27 = vpop.f32.mrf.mxu2 }
 0x6ea   : > { %v4717_v63 = vpop.f32.mrf.mxu1 }
 0x6eb   : > { %v9682_v40 = vadd.f32 %v4717_v63, %v9559_v59  ;;  %v4533_v59 = vadd.f32 %v9426_v42, %v9417_v34  ;;  %v4536_v63 = vadd.f32 %v9456_v22, %v10988_v15  ;;  %v4537_v34 = vadd.f32 %v9464_v37, %v9458_v21 }
 0x6ec   : > { %v4830_v42 = vmul.f32 %v9704_v11, %v9704_v11  ;;  %v4539_v37 = vadd.f32 %v9483_v9, %v9477_v29 }
 0x6ed   : > { %v9712_v46 = vadd.f32 %v9609_v39, %v4533_v59  ;;  %v9724_v4 = vadd.f32 %v9620_v13, %v4536_v63  ;;  %v4831_v39 = vmul.f32 %v9715_v41, %v9715_v41  ;;  %v9735_v21 = vadd.f32 %v9624_v20, %v4537_v34 }
 0x6ee   : > { %v4540_v20 = vadd.f32 %v9492_v44, %v9485_v31  ;;  %v9757_v50 = vadd.f32 %v9631_v54, %v4539_v37  ;;  %v9775_v37 = vpop.f32.mrf.mxu2 }
 0x6ef   : > { %v4829_v22 = vmul.f32 %v9712_v46, %v9712_v46  ;;  %v4832_v13 = vmul.f32 %v9724_v4, %v9724_v4  ;;  %v4833_v9 = vmul.f32 %v9735_v21, %v9735_v21 }
 0x6f0   : > { %10989 = vst [vmem:[#allocation78_spill] sm:$0xff] %v9757_v50  ;;  %v9763_v34 = vadd.f32 %v9634_v30, %v4540_v20  ;;  %v4835_v1 = vmul.f32 %v9757_v50, %v9757_v50 }
 0x6f1   : > { %v4861_v55 = vadd.f32 %v4830_v42, %v4829_v22 }
 0x6f2   : > { %v4720_v57 = vpop.f32.mrf.mxu1  ;;  %10990 = vst [vmem:[#allocation100_spill] sm:$0xff] %v9763_v34 }
 0x6f3   : > { %v9689_v48 = vadd.f32 %v4720_v57, %v9565_v47  ;;  %v9717_v57 = vpop.f32.mrf.mxu0  ;;  %v4862_v59 = vadd.f32 %v4861_v55, %v4831_v39  ;;  %v4836_v39 = vmul.f32 %v9763_v34, %v9763_v34 }
 0x6f5   : > { %v4863_v15 = vadd.f32 %v4862_v59, %v4832_v13 }
 0x6f7   : > { %v4864_v44 = vadd.f32 %v4863_v15, %v4833_v9 }
 0x6f9   : > { %v4865_v54 = vadd.f32 %v4864_v44, %v4834_v35 }
 0x6fa   : > { %v4723_v10 = vpop.f32.mrf.mxu1 }
 0x6fb   : > { %v9707_v47 = vadd.f32 %v4723_v10, %v9571_v12  ;;  %v4791_v12 = vadd.f32 %v9704_v11, %v9712_v46  ;;  %v9751_v10 = vpop.f32.mrf.mxu3  ;;  %v9765_v31 = vpop.f32.mrf.mxu0  ;;  %v4866_v30 = vadd.f32 %v4865_v54, %v4835_v1  ;;  %v4840_v54 = vmul.f32 %v9650_v25, %v9650_v25 }
 0x6fd   : > { %v4792_v14 = vadd.f32 %v4791_v12, %v9715_v41  ;;  %v4867_v20 = vadd.f32 %v4866_v30, %v4836_v39  ;;  %v4841_v30 = vmul.f32 %v9654_v38, %v9654_v38 }
 0x6ff   : > { %v4793_v29 = vadd.f32 %v4792_v14, %v9724_v4  ;;  %v4837_v14 = vmul.f32 %v9638_v7, %v9638_v7 }
 0x701   : > { %v4794_v63 = vadd.f32 %v4793_v29, %v9735_v21  ;;  %v4838_v29 = vmul.f32 %v9642_v52, %v9642_v52  ;;  %v4868_v9 = vadd.f32 %v4867_v20, %v4837_v14  ;;  %v10991_v14 = vld [vmem:[#allocation68_spill] sm:$0xff]  ;;  %v10992_v20 = vld [vmem:[#allocation53_spill] sm:$0xff] }
 0x702   : > { %v9741_v28 = vpop.f32.mrf.mxu1 }
 0x703   : > { %v4795_v42 = vadd.f32 %v4794_v63, %v9747_v23  ;;  %v9780_v13 = vpop.f32.mrf.mxu3  ;;  %v4839_v63 = vmul.f32 %v9646_v58, %v9646_v58  ;;  %v9788_v35 = vpop.f32.mrf.mxu0 }
 0x705   : > { %v4796_v12 = vadd.f32 %v4795_v42, %v9757_v50  ;;  %v4869_v42 = vadd.f32 %v4868_v9, %v4838_v29  ;;  %v4842_v29 = vmul.f32 %v9658_v2, %v9658_v2  ;;  %v10993_v9 = vld [vmem:[#allocation74_spill] sm:$0xff]  ;;  %v10995_v50 = vld [vmem:[#allocation48_spill] sm:$0xff] }
 0x707   : > { %v4797_v55 = vadd.f32 %v4796_v12, %v9763_v34  ;;  %v4870_v12 = vadd.f32 %v4869_v42, %v4839_v63 }
 0x709   : > { %v4798_v59 = vadd.f32 %v4797_v55, %v9638_v7  ;;  %v4095_v55 = vpop.f32.mrf.mxu2 }
 0x70a   : > { %v9770_v22 = vpop.f32.mrf.mxu1 }
 0x70b   : > { %v4799_v15 = vadd.f32 %v4798_v59, %v9642_v52  ;;  %v3714_v59 = vadd.f32 %v10992_v20, %v10991_v14  ;;  %v4871_v52 = vadd.f32 %v4870_v12, %v4840_v54  ;;  %v4321_v34 = vpop.f32.mrf.mxu3  ;;  %v10996_v14 = vld [vmem:[#allocation58_spill] sm:$0xff] }
 0x70c   : > { %v3716_v54 = vadd.f32 %v10996_v14, %v10995_v50 }
 0x70d   : > { %v4800_v1 = vadd.f32 %v4799_v15, %v9646_v58  ;;  %v10994_v15 = vld [vmem:[#allocation39_spill] sm:$0xff]  ;;  %v3908_v63 = vadd.f32 %v9561_v3, %v3714_v59  ;;  %v4872_v42 = vadd.f32 %v4871_v52, %v4841_v30  ;;  %v4844_v3 = vmul.f32 %v9667_v53, %v9667_v53  ;;  %v10997_v52 = vld [vmem:[#allocation86_spill] sm:$0xff] }
 0x70e   : > { %v3715_v58 = vadd.f32 %v10994_v15, %v10993_v9  ;;  %v10998_v30 = vld [vmem:[#allocation26_spill] sm:$0xff]  ;;  %v3910_v59 = vadd.f32 %v9573_v62, %v3716_v54 }
 0x70f   : > { %v4801_v39 = vadd.f32 %v4800_v1, %v9650_v25  ;;  %v4843_v25 = vmul.f32 %v9663_v17, %v9663_v17  ;;  %v4134_v20 = vadd.f32 %v9675_v61, %v3908_v63  ;;  %v4845_v61 = vmul.f32 %v9670_v45, %v9670_v45  ;;  %v11000_v63 = vld [vmem:[#allocation41_spill] sm:$0xff] }
 0x710   : > { %v3909_v12 = vadd.f32 %v9567_v33, %v3715_v58  ;;  %v4136_v14 = vadd.f32 %v9693_v56, %v3910_v59 }
 0x711   : > { %v4802_v7 = vadd.f32 %v4801_v39, %v9654_v38  ;;  %v4873_v38 = vadd.f32 %v4872_v42, %v4842_v29  ;;  %v4360_v50 = vadd.f32 %v9677_v8, %v4134_v20  ;;  %v10999_v29 = vld [vmem:[#allocation66_spill] sm:$0xff]  ;;  %v11002_v8 = vld [vmem:[#allocation85_spill] sm:$0xff] }
 0x712   : > { %v9790_v44 = vpop.f32.mrf.mxu1  ;;  %v4135_v15 = vadd.f32 %v9684_v18, %v3909_v12  ;;  %v3718_v42 = vadd.f32 %v11000_v63, %v10999_v29 }
 0x713   : > { %v4803_v1 = vadd.f32 %v4802_v7, %v9658_v2  ;;  %v3717_v7 = vadd.f32 %v10998_v30, %v10997_v52  ;;  %v4515_v2 = vpop.f32.mrf.mxu0  ;;  %v4874_v33 = vadd.f32 %v4873_v38, %v4843_v25  ;;  %v4846_v25 = vmul.f32 %v9673_v16, %v9673_v16  ;;  %v11001_v38 = vld [vmem:[#allocation119_spill] sm:$0xff] }
 0x714   : > { %v4361_v62 = vadd.f32 %v9686_v51, %v4135_v15  ;;  %v3719_v12 = vadd.f32 %v11002_v8, %v11001_v38  ;;  %v3912_v20 = vadd.f32 %v9581_v49, %v3718_v42  ;;  %v4362_v52 = vadd.f32 %v9697_v19, %v4136_v14  ;;  %v11003_v42 = vld [vmem:[#allocation33_spill] sm:$0xff] }
 0x715   : > { %v4804_v9 = vadd.f32 %v4803_v1, %v9663_v17  ;;  %v3911_v1 = vadd.f32 %v9577_v24, %v3717_v7  ;;  %v4875_v54 = vadd.f32 %v4874_v33, %v4844_v3  ;;  %v4098_v24 = vpop.f32.mrf.mxu2  ;;  %v4554_v56 = vadd.f32 %v9679_v36, %v4360_v50 }
 0x716   : > { %v4847_v3 = vmul.f32 %v9682_v40, %v9682_v40  ;;  %v4555_v7 = vadd.f32 %v9691_v60, %v4361_v62  ;;  %v3913_v59 = vadd.f32 %v9585_v0, %v3719_v12  ;;  %v4138_v15 = vadd.f32 %v9775_v37, %v3912_v20 }
 0x717   : > { %v4805_v58 = vadd.f32 %v4804_v9, %v9667_v53  ;;  %v4137_v9 = vadd.f32 %v9739_v27, %v3911_v1  ;;  %v4876_v30 = vadd.f32 %v4875_v54, %v4845_v61  ;;  %v4324_v27 = vpop.f32.mrf.mxu3  ;;  %v4848_v36 = vmul.f32 %v9689_v48, %v9689_v48  ;;  %v11004_v1 = vld [vmem:[#allocation126_spill] sm:$0xff] }
 0x718   : > { %v9849_v50 = vadd.f32 %v9741_v28, %v4554_v56  ;;  %v4556_v61 = vadd.f32 %v9717_v57, %v4362_v52  ;;  %v4139_v60 = vadd.f32 %v4095_v55, %v3913_v59  ;;  %v4364_v0 = vadd.f32 %v9780_v13, %v4138_v15  ;;  %v11006_v59 = vld [vmem:[#allocation59_spill] sm:$0xff] }
 0x719   : > { %v4806_v18 = vadd.f32 %v4805_v58, %v9670_v45  ;;  %v4363_v49 = vadd.f32 %v9751_v10, %v4137_v9  ;;  %v4877_v19 = vadd.f32 %v4876_v30, %v4846_v25  ;;  %v4849_v10 = vmul.f32 %v9707_v47, %v9707_v47 }
 0x71a   : > { %v4735_v39 = vpop.f32.mrf.mxu1  ;;  %v9857_v63 = vadd.f32 %v9770_v22, %v4555_v7  ;;  %v3720_v14 = vadd.f32 %v11004_v1, %v11003_v42  ;;  %v4365_v62 = vadd.f32 %v4321_v34, %v4139_v60  ;;  %v4850_v13 = vmul.f32 %v9849_v50, %v9849_v50 }
 0x71b   : > { %v4807_v51 = vadd.f32 %v4806_v18, %v9673_v16  ;;  %v4878_v29 = vadd.f32 %v4877_v19, %v4847_v3  ;;  %v4557_v28 = vadd.f32 %v9765_v31, %v4363_v49  ;;  %v4518_v54 = vpop.f32.mrf.mxu0  ;;  %v9866_v18 = vadd.f32 %v9790_v44, %v4556_v61 }
 0x71c   : > { %v3914_v25 = vadd.f32 %v9589_v5, %v3720_v14  ;;  %v4558_v22 = vadd.f32 %v9788_v35, %v4364_v0  ;;  %v4851_v34 = vmul.f32 %v9857_v63, %v9857_v63  ;;  %v4559_v20 = vadd.f32 %v4515_v2, %v4365_v62  ;;  %v11005_v2 = vld [vmem:[#allocation83_spill] sm:$0xff] }
 0x71d   : > { %v4808_v58 = vadd.f32 %v4807_v51, %v9682_v40  ;;  %v4879_v57 = vadd.f32 %v4878_v29, %v4848_v36  ;;  %v9873_v31 = vadd.f32 %v4735_v39, %v4557_v28  ;;  %v4101_v9 = vpop.f32.mrf.mxu2  ;;  %v4852_v5 = vmul.f32 %v9866_v18, %v9866_v18 }
 0x71e   : > { %v4140_v12 = vadd.f32 %v4098_v24, %v3914_v25  ;;  %v3721_v15 = vadd.f32 %v11006_v59, %v11005_v2 }
 0x71f   : > { %v4809_v37 = vadd.f32 %v4808_v58, %v9689_v48  ;;  %v4880_v38 = vadd.f32 %v4879_v57, %v4849_v10  ;;  %v4327_v51 = vpop.f32.mrf.mxu3  ;;  %v4853_v39 = vmul.f32 %v9873_v31, %v9873_v31 }
 0x720   : > { %v4366_v35 = vadd.f32 %v4324_v27, %v4140_v12  ;;  %v3915_v27 = vadd.f32 %v9593_v26, %v3721_v15 }
 0x721   : > { %v4810_v55 = vadd.f32 %v4809_v37, %v9707_v47  ;;  %v4881_v56 = vadd.f32 %v4880_v38, %v4850_v13  ;;  %v11008_v13 = vld [vmem:[#allocation56_spill] sm:$0xff] }
 0x722   : > { %v4738_v33 = vpop.f32.mrf.mxu1  ;;  %v4560_v36 = vadd.f32 %v4518_v54, %v4366_v35  ;;  %v4141_v37 = vadd.f32 %v4101_v9, %v3915_v27  ;;  %v11009_v35 = vld [vmem:[#allocation94_spill] sm:$0xff] }
 0x723   : > { %v4811_v8 = vadd.f32 %v4810_v55, %v9849_v50  ;;  %v9878_v30 = vadd.f32 %v4738_v33, %v4558_v22  ;;  %v4882_v3 = vadd.f32 %v4881_v56, %v4851_v34  ;;  %v4521_v58 = vpop.f32.mrf.mxu0  ;;  %v11007_v55 = vld [vmem:[#allocation11_spill] sm:$0xff] }
 0x724   : > { %v4367_v28 = vadd.f32 %v4327_v51, %v4141_v37  ;;  %v3722_v25 = vadd.f32 %v11008_v13, %v11007_v55  ;;  %v11010_v51 = vld [vmem:[#allocation42_spill] sm:$0xff] }
 0x725   : > { %v4812_v44 = vadd.f32 %v4811_v8, %v9857_v63  ;;  %v4883_v49 = vadd.f32 %v4882_v3, %v4852_v5  ;;  %v4854_v33 = vmul.f32 %v9878_v30, %v9878_v30  ;;  %v4104_v14 = vpop.f32.mrf.mxu2  ;;  %v3723_v3 = vadd.f32 %v11010_v51, %v11009_v35 }
 0x726   : > { %v3916_v38 = vadd.f32 %v9597_v43, %v3722_v25  ;;  %v4561_v8 = vadd.f32 %v4521_v58, %v4367_v28 }
 0x727   : > { %v4813_v7 = vadd.f32 %v4812_v44, %v9866_v18  ;;  %v4884_v61 = vadd.f32 %v4883_v49, %v4853_v39  ;;  %v4330_v57 = vpop.f32.mrf.mxu3  ;;  %v3917_v43 = vadd.f32 %v9601_v32, %v3723_v3 }
 0x729   : > { %v4814_v19 = vadd.f32 %v4813_v7, %v9873_v31  ;;  %v4885_v10 = vadd.f32 %v4884_v61, %v4854_v33  ;;  %v11012_v61 = vld [vmem:[#allocation63_spill] sm:$0xff] }
 0x72a   : > { %v4741_v52 = vpop.f32.mrf.mxu1 }
 0x72b   : > { %v9883_v24 = vadd.f32 %v4741_v52, %v4559_v20  ;;  %v4815_v60 = vadd.f32 %v4814_v19, %v9878_v30  ;;  %v4524_v34 = vpop.f32.mrf.mxu0  ;;  %v4142_v20 = vadd.f32 %v4104_v14, %v3916_v38 }
 0x72d   : > { %v4855_v0 = vmul.f32 %v9883_v24, %v9883_v24  ;;  %v4816_v42 = vadd.f32 %v4815_v60, %v9883_v24  ;;  %v4368_v52 = vadd.f32 %v4330_v57, %v4142_v20  ;;  %v4107_v5 = vpop.f32.mrf.mxu2 }
 0x72e   : > { %v4143_v15 = vadd.f32 %v4107_v5, %v3917_v43 }
 0x72f   : > { %v4886_v62 = vadd.f32 %v4885_v10, %v4855_v0  ;;  %v4333_v39 = vpop.f32.mrf.mxu3  ;;  %v4562_v2 = vadd.f32 %v4524_v34, %v4368_v52 }
 0x730   : > { %v4369_v33 = vadd.f32 %v4333_v39, %v4143_v15 }
 0x732   : > { %v4744_v29 = vpop.f32.mrf.mxu1 }
 0x733   : > { %v9895_v1 = vadd.f32 %v4744_v29, %v4560_v36  ;;  %v4527_v19 = vpop.f32.mrf.mxu0  ;;  %v11011_v36 = vld [vmem:[#allocation57_spill] sm:$0xff] }
 0x734   : > { %v3724_v60 = vadd.f32 %v11012_v61, %v11011_v36  ;;  %v4563_v32 = vadd.f32 %v4527_v19, %v4369_v33 }
 0x735   : > { %v4817_v26 = vadd.f32 %v4816_v42, %v9895_v1  ;;  %v4856_v54 = vmul.f32 %v9895_v1, %v9895_v1  ;;  %v4110_v29 = vpop.f32.mrf.mxu2 }
 0x736   : > { %v3918_v37 = vadd.f32 %v9605_v6, %v3724_v60 }
 0x737   : > { %v4887_v22 = vadd.f32 %v4886_v62, %v4856_v54  ;;  %v4336_v10 = vpop.f32.mrf.mxu3 }
 0x738   : > { %v4144_v14 = vadd.f32 %v4110_v29, %v3918_v37 }
 0x73a   : > { %v4747_v12 = vpop.f32.mrf.mxu1  ;;  %v4370_v62 = vadd.f32 %v4336_v10, %v4144_v14 }
 0x73b   : > { %v9903_v9 = vadd.f32 %v4747_v12, %v4561_v8  ;;  %v4530_v57 = vpop.f32.mrf.mxu0 }
 0x73c   : > { %v4564_v13 = vadd.f32 %v4530_v57, %v4370_v62 }
 0x73d   : > { %v4818_v56 = vadd.f32 %v4817_v26, %v9903_v9  ;;  %v4857_v44 = vmul.f32 %v9903_v9, %v9903_v9 }
 0x73f   : > { %v4888_v7 = vadd.f32 %v4887_v22, %v4857_v44 }
 0x742   : > { %v4750_v59 = vpop.f32.mrf.mxu1 }
 0x743   : > { %v9911_v49 = vadd.f32 %v4750_v59, %v4562_v2 }
 0x745   : > { %v4819_v27 = vadd.f32 %v4818_v56, %v9911_v49  ;;  %v4858_v58 = vmul.f32 %v9911_v49, %v9911_v49 }
 0x747   : > { %v4889_v0 = vadd.f32 %v4888_v7, %v4858_v58 }
 0x74a   : > { %v4753_v42 = vpop.f32.mrf.mxu1 }
 0x74b   : > { %v9919_v28 = vadd.f32 %v4753_v42, %v4563_v32 }
 0x74d   : > { %v4820_v26 = vadd.f32 %v4819_v27, %v9919_v28  ;;  %v4859_v54 = vmul.f32 %v9919_v28, %v9919_v28 }
 0x74f   : > { %v4890_v55 = vadd.f32 %v4889_v0, %v4859_v54 }
 0x752   : > { %v4756_v25 = vpop.f32.mrf.mxu1 }
 0x753   : > { %v9924_v22 = vadd.f32 %v4756_v25, %v4564_v13  ;;  %v11014_v13 = vld [vmem:[#allocation100_spill] sm:$0xff]  ;;  %v11015_v25 = vld [vmem:[#allocation51_spill] sm:$0xff] }
 0x755   : > { %v4821_v6 = vadd.f32 %v4820_v26, %v9924_v22  ;;  %v4860_v38 = vmul.f32 %v9924_v22, %v9924_v22 }
 0x757   : > { %v4822_v8 = vrot.slane %v4821_v6, 4  ;;  %v4891_v34 = vadd.f32 %v4890_v55, %v4860_v38  ;;  %v11013_v55 = vld [vmem:[#allocation78_spill] sm:$0xff] }
 0x759   : > { %v4823_v12 = vadd.f32 %v4822_v8, %v4821_v6  ;;  %v4892_v20 = vrot.slane %v4891_v34, 4  ;;  %v11017_v6 = vld [vmem:[#allocation88_spill] sm:$0xff] }
 0x75b   : > { %v4824_v52 = vrot.slane %v4823_v12, 2  ;;  %v4893_v56 = vadd.f32 %v4892_v20, %v4891_v34  ;;  %v11019_v34 = vld [vmem:[#allocation17_spill] sm:$0xff]  ;;  %v11020_v20 = vld [vmem:[#allocation80_spill] sm:$0xff] }
 0x75d   : > { %v4825_v44 = vadd.f32 %v4824_v52, %v4823_v12  ;;  %v4894_v5 = vrot.slane %v4893_v56, 2 }
 0x75f   : > { %v4826_v35 = vrot.slane %v4825_v44, 1  ;;  %v4895_v51 = vadd.f32 %v4894_v5, %v4893_v56 }
 0x761   : > { %v4827_v3 = vadd.f32 %v4826_v35, %v4825_v44  ;;  %v4896_v7 = vrot.slane %v4895_v51, 1 }
 0x763   : > { %v9929_v39 = vmul.f32 0.00390625, %v4827_v3  ;;  %v4897_v43 = vadd.f32 %v4896_v7, %v4895_v51 }
 0x765   : > { %v4898_v2 = vmul.f32 0.00390625, %v4897_v43  ;;  %v4899_v59 = vmul.f32 %v9929_v39, %v9929_v39  ;;  %v4932_v15 = vsub.f32 %v9924_v22, %v9929_v39  ;;  %v4927_v58 = vsub.f32 %v9883_v24, %v9929_v39  ;;  %v11016_v22 = vld [vmem:[#allocation27_spill] sm:$0xff] }
 0x766   : > { %v4928_v36 = vsub.f32 %v9895_v1, %v9929_v39  ;;  %v4929_v61 = vsub.f32 %v9903_v9, %v9929_v39  ;;  %v4930_v60 = vsub.f32 %v9911_v49, %v9929_v39  ;;  %v4931_v0 = vsub.f32 %v9919_v28, %v9929_v39  ;;  %v4977_v1 = vld [vmem:[%s5917_s20 + $0x11] sm:$0xff]  ;;  %v4982_v9 = vld [vmem:[%s5917_s20 + $0x39] sm:$0xff] }
 0x767   : > { %v4900_v19 = vsub.f32 %v4898_v2, %v4899_v59  ;;  %v4901_v10 = vsub.f32 %v9712_v46, %v9929_v39  ;;  %v4902_v42 = vsub.f32 %v9704_v11, %v9929_v39  ;;  %v4903_v14 = vsub.f32 %v9715_v41, %v9929_v39  ;;  %v5008_v2 = vld [vmem:[%s5917_s20 + $0x109] sm:$0xff] }
 0x768   : > { %v4904_v62 = vsub.f32 %v9724_v4, %v9929_v39  ;;  %v4905_v54 = vsub.f32 %v9735_v21, %v9929_v39  ;;  %v4906_v57 = vsub.f32 %v9747_v23, %v9929_v39  ;;  %v4907_v46 = vsub.f32 %v11013_v55, %v9929_v39  ;;  %v11018_v21 = vld [vmem:[#allocation76_spill] sm:$0xff] }
 0x769   : > { %v4933_v33 = vmax.f32 %v4900_v19, 0.0  ;;  %v4908_v11 = vsub.f32 %v11014_v13, %v9929_v39  ;;  %v4909_v41 = vsub.f32 %v11015_v25, %v9929_v39  ;;  %v4910_v4 = vsub.f32 %v11016_v22, %v9929_v39 }
 0x76a   : > { %v4911_v38 = vsub.f32 %v11017_v6, %v9929_v39  ;;  %v4912_v23 = vsub.f32 %v11018_v21, %v9929_v39  ;;  %v4913_v12 = vsub.f32 %v11019_v34, %v9929_v39  ;;  %v4914_v52 = vsub.f32 %v11020_v20, %v9929_v39  ;;  %v4981_v34 = vld [vmem:[%s5917_s20 + $0x31] sm:$0xff]  ;;  %v4983_v20 = vld [vmem:[%s5917_s20 + $0x41] sm:$0xff] }
 0x76b   : > { %v4934_v27 = vadd.f32 1e-05, %v4933_v33  ;;  %v4915_v56 = vsub.f32 %v9663_v17, %v9929_v39  ;;  %v4916_v44 = vsub.f32 %v9667_v53, %v9929_v39  ;;  %v4917_v5 = vsub.f32 %v9670_v45, %v9929_v39 }
 0x76c   : > { %v4918_v51 = vsub.f32 %v9673_v16, %v9929_v39  ;;  %v4919_v3 = vsub.f32 %v9682_v40, %v9929_v39  ;;  %v4920_v17 = vsub.f32 %v9689_v48, %v9929_v39  ;;  %v4921_v53 = vsub.f32 %v9707_v47, %v9929_v39 }
 0x76d   : > { %5495 = vrsqrt.f32 %v4934_v27  ;;  %vm4941_vm4 = vweird.f32 %v4934_v27  ;;  %v4922_v45 = vsub.f32 %v9849_v50, %v9929_v39  ;;  %v4923_v7 = vsub.f32 %v9857_v63, %v9929_v39 }
 0x76e   : > { %v4924_v16 = vsub.f32 %v9866_v18, %v9929_v39  ;;  %v4925_v40 = vsub.f32 %v9873_v31, %v9929_v39  ;;  %v4926_v48 = vsub.f32 %v9878_v30, %v9929_v39  ;;  %v4985_v39 = vld [vmem:[%s5917_s20 + $0x51] sm:$0xff] }
 0x773   : > { %v5496_v29 = vpop.eup %5495 }
 0x774   : > { %v4936_v37 = vmul.f32 %v5496_v29, %v4934_v27  ;;  %vm4942_vm3 = vweird.f32 %v5496_v29 }
 0x775   : > { %vm4943_vm5 = vmor %vm4941_vm4, %vm4942_vm3 }
 0x776   : > { %v4937_v32 = vmul.f32 %v5496_v29, %v4936_v37 }
 0x778   : > { %v4938_v26 = vmul.f32 0.5, %v4937_v32 }
 0x77a   : > { %v4939_v8 = vsub.f32 1.5, %v4938_v26 }
 0x77c   : > { %v4940_v35 = vmul.f32 %v5496_v29, %v4939_v8 }
 0x77e   : > { %v4944_v43 = vsel %vm4943_vm5, %v5496_v29, %v4940_v35 }
 0x77f   : > { %v4976_v47 = vmul.f32 %v4944_v43, %v4932_v15  ;;  %v4945_v59 = vmul.f32 %v4944_v43, %v4901_v10  ;;  %v4946_v19 = vmul.f32 %v4944_v43, %v4902_v42  ;;  %v4947_v50 = vmul.f32 %v4944_v43, %v4903_v14 }
 0x780   : > { %v4948_v33 = vmul.f32 %v4944_v43, %v4904_v62  ;;  %v4949_v27 = vmul.f32 %v4944_v43, %v4905_v54  ;;  %v4950_v63 = vmul.f32 %v4944_v43, %v4906_v57  ;;  %v4951_v29 = vmul.f32 %v4944_v43, %v4907_v46 }
 0x781   : > { %v5040_v37 = vadd.f32 %v5008_v2, %v4976_v47  ;;  %v4952_v32 = vmul.f32 %v4944_v43, %v4908_v11  ;;  %v4953_v26 = vmul.f32 %v4944_v43, %v4909_v41  ;;  %v4954_v18 = vmul.f32 %v4944_v43, %v4910_v4  ;;  %v4989_v2 = vld [vmem:[%s5917_s20 + $0x71] sm:$0xff] }
 0x782   : > { %v4955_v55 = vmul.f32 %v4944_v43, %v4911_v38  ;;  %v4956_v13 = vmul.f32 %v4944_v43, %v4912_v23  ;;  %v4957_v31 = vmul.f32 %v4944_v43, %v4913_v12  ;;  %v10001_v25 = vmul.f32 %v4944_v43, %v4914_v52  ;;  %v4980_v23 = vld [vmem:[%s5917_s20 + $0x29] sm:$0xff] }
 0x783   : > { %v5072_v30 = vmax.f32 %v5040_v37, 0.0  ;;  %v10003_v22 = vmul.f32 %v4944_v43, %v4915_v56  ;;  %v10005_v15 = vmul.f32 %v4944_v43, %v4916_v44  ;;  %v10007_v10 = vmul.f32 %v4944_v43, %v4917_v5  ;;  %v4984_v52 = vld [vmem:[%s5917_s20 + $0x49] sm:$0xff]  ;;  %v4986_v56 = vld [vmem:[%s5917_s20 + $0x59] sm:$0xff]  ;;  %v4993_v37 = vld [vmem:[%s5917_s20 + $0x91] sm:$0xff] }
 0x784   : > { %v10009_v42 = vmul.f32 %v4944_v43, %v4918_v51  ;;  %v10011_v14 = vmul.f32 %v4944_v43, %v4919_v3  ;;  %v10013_v62 = vmul.f32 %v4944_v43, %v4920_v17  ;;  %v10015_v54 = vmul.f32 %v4944_v43, %v4921_v53  ;;  %v4987_v3 = vld [vmem:[%s5917_s20 + $0x61] sm:$0xff] }
 0x785   : > { %5104 = vst [vmem:[%s10017_s11 + $0xf8] sm:$0xff] %v5072_v30  ;;  %v10020_v57 = vmul.f32 %v4944_v43, %v4922_v45  ;;  %v10022_v46 = vmul.f32 %v4944_v43, %v4923_v7  ;;  %v10024_v11 = vmul.f32 %v4944_v43, %v4924_v16  ;;  %v10026_v41 = vmul.f32 %v4944_v43, %v4925_v40  ;;  %v4988_v45 = vld [vmem:[%s5917_s20 + $0x69] sm:$0xff]  ;;  %v4995_v30 = vld [vmem:[%s5917_s20 + $0xa1] sm:$0xff] }
 0x786   : > { %v10028_v4 = vmul.f32 %v4944_v43, %v4926_v48  ;;  %v10033_v6 = vmul.f32 %v4944_v43, %v4927_v58  ;;  %v10038_v38 = vmul.f32 %v4944_v43, %v4928_v36  ;;  %v10043_v8 = vmul.f32 %v4944_v43, %v4929_v61  ;;  %v4978_v58 = vld [vmem:[%s5917_s20 + $0x19] sm:$0xff]  ;;  %v4979_v36 = vld [vmem:[%s5917_s20 + $0x21] sm:$0xff] }
 0x787   : > { %v10048_v21 = vmul.f32 %v4944_v43, %v4930_v60  ;;  %v10053_v24 = vmul.f32 %v4944_v43, %v4931_v0  ;;  %v5009_v61 = vadd.f32 %v4977_v1, %v4945_v59  ;;  %v5010_v12 = vadd.f32 %v4978_v58, %v4946_v19  ;;  %v4990_v48 = vld [vmem:[%s5917_s20 + $0x79] sm:$0xff]  ;;  %v4991_v19 = vld [vmem:[%s5917_s20 + $0x81] sm:$0xff]  ;;  %v4996_v58 = vld [vmem:[%s5917_s20 + $0xa9] sm:$0xff] }
 0x788   : > { %v5011_v49 = vadd.f32 %v4979_v36, %v4947_v50  ;;  %v5012_v60 = vadd.f32 %v4980_v23, %v4948_v33  ;;  %v5013_v28 = vadd.f32 %v4981_v34, %v4949_v27  ;;  %v5014_v0 = vadd.f32 %v4982_v9, %v4950_v63  ;;  %v4992_v27 = vld [vmem:[%s5917_s20 + $0x89] sm:$0xff]  ;;  %v4997_v23 = vld [vmem:[%s5917_s20 + $0xb1] sm:$0xff]  ;;  %v4998_v9 = vld [vmem:[%s5917_s20 + $0xb9] sm:$0xff] }
 0x789   : > { %v5015_v44 = vadd.f32 %v4983_v20, %v4951_v29  ;;  %v5041_v5 = vmax.f32 %v5009_v61, 0.0  ;;  %v5042_v35 = vmax.f32 %v5010_v12, 0.0  ;;  %v5016_v17 = vadd.f32 %v4984_v52, %v4952_v32  ;;  %v4999_v12 = vld [vmem:[%s5917_s20 + $0xc1] sm:$0xff]  ;;  %v5000_v20 = vld [vmem:[%s5917_s20 + $0xc9] sm:$0xff]  ;;  %v5001_v52 = vld [vmem:[%s5917_s20 + $0xd1] sm:$0xff] }
 0x78a   : > { %v5043_v51 = vmax.f32 %v5011_v49, 0.0  ;;  %v5044_v53 = vmax.f32 %v5012_v60, 0.0  ;;  %v5017_v7 = vadd.f32 %v4985_v39, %v4953_v26  ;;  %v5045_v43 = vmax.f32 %v5013_v28, 0.0  ;;  %v5002_v39 = vld [vmem:[%s5917_s20 + $0xd9] sm:$0xff] }
 0x78b   : > { %5073 = vst [vmem:[%s10017_s11] sm:$0xff] %v5041_v5  ;;  %v5018_v16 = vadd.f32 %v4986_v56, %v4954_v18  ;;  %v5046_v40 = vmax.f32 %v5014_v0, 0.0  ;;  %v5019_v47 = vadd.f32 %v4987_v3, %v4955_v55  ;;  %v5047_v59 = vmax.f32 %v5015_v44, 0.0  ;;  %v4994_v18 = vld [vmem:[%s5917_s20 + $0x99] sm:$0xff]  ;;  %v5003_v56 = vld [vmem:[%s5917_s20 + $0xe1] sm:$0xff]  ;;  %v5004_v5 = vld [vmem:[%s5917_s20 + $0xe9] sm:$0xff] }
 0x78c   : > { %5074 = vst [vmem:[%s10017_s11 + $0x8] sm:$0xff] %v5042_v35  ;;  %v5020_v50 = vadd.f32 %v4988_v45, %v4956_v13  ;;  %v5048_v33 = vmax.f32 %v5016_v17, 0.0  ;;  %v5021_v63 = vadd.f32 %v4989_v2, %v4957_v31  ;;  %v5049_v29 = vmax.f32 %v5017_v7, 0.0  ;;  %v5006_v17 = vld [vmem:[%s5917_s20 + $0xf9] sm:$0xff]  ;;  %v5007_v45 = vld [vmem:[%s5917_s20 + $0x101] sm:$0xff] }
 0x78d   : > { %5075 = vst [vmem:[%s10017_s11 + $0x10] sm:$0xff] %v5043_v51  ;;  %v5022_v32 = vadd.f32 %v4990_v48, %v10001_v25  ;;  %v5050_v26 = vmax.f32 %v5018_v16, 0.0  ;;  %v5023_v55 = vadd.f32 %v4991_v19, %v10003_v22  ;;  %v5051_v13 = vmax.f32 %v5019_v47, 0.0  ;;  %v5005_v51 = vld [vmem:[%s5917_s20 + $0xf1] sm:$0xff]  ;;  %s5117_s20 = scalar_lea.hbm %s10173_s4, %s5336_s12 }
 0x78e   : > { %5076 = vst [vmem:[%s10017_s11 + $0x18] sm:$0xff] %v5044_v53  ;;  %v5024_v31 = vadd.f32 %v4992_v27, %v10005_v15  ;;  %v5052_v1 = vmax.f32 %v5020_v50, 0.0  ;;  %v5025_v25 = vadd.f32 %v4993_v37, %v10007_v10  ;;  %v5053_v36 = vmax.f32 %v5021_v63, 0.0  ;;  %s5120_s22 = sshll.u32 %s5117_s20, 4  ;;  %s5121_s22 = int_to_ptr.hbm [resolvable:$true] %s5120_s22 }
 0x78f   : > { %5077 = vst [vmem:[%s10017_s11 + $0x20] sm:$0xff] %v5045_v43  ;;  %v5026_v22 = vadd.f32 %v4994_v18, %v10009_v42  ;;  %v5054_v34 = vmax.f32 %v5022_v32, 0.0  ;;  %v5027_v15 = vadd.f32 %v4995_v30, %v10011_v14  ;;  %v5055_v61 = vmax.f32 %v5023_v55, 0.0  ;;  %s5645_s27 = sshra.s32 %s5121_s22, 4  ;;  %s5646_s27 = int_to_ptr.hbm [resolvable:$true] %s5645_s27 }
 0x790   : > { %5078 = vst [vmem:[%s10017_s11 + $0x28] sm:$0xff] %v5046_v40  ;;  %v5028_v10 = vadd.f32 %v4996_v58, %v10013_v62  ;;  %v5056_v49 = vmax.f32 %v5024_v31, 0.0  ;;  %v5029_v42 = vadd.f32 %v4997_v23, %v10015_v54  ;;  %v5057_v60 = vmax.f32 %v5025_v25, 0.0  ;;  %s5647_s28 = scalar_lea.hbm %s5646_s27, 256  ;;  %p5652_p3 = scmp.lt.s32.totalorder %s5646_s27, %s10173_s4 }
 0x791   : > { %5079 = vst [vmem:[%s10017_s11 + $0x30] sm:$0xff] %v5047_v59  ;;  %v5030_v14 = vadd.f32 %v4998_v9, %v10020_v57  ;;  %v5058_v28 = vmax.f32 %v5026_v22, 0.0  ;;  %v5031_v62 = vadd.f32 %v4999_v12, %v10022_v46  ;;  %v5059_v0 = vmax.f32 %v5027_v15, 0.0  ;;  %p5648_p0 = scmp.ne.s32.totalorder %s5646_s27, %s5647_s28  ;;  %p5653_p4 = scmp.lt.s32.totalorder %s5651_s5, %s5647_s28 }
 0x792   : > { %5080 = vst [vmem:[%s10017_s11 + $0x38] sm:$0xff] %v5048_v33  ;;  %v5032_v54 = vadd.f32 %v5000_v20, %v10024_v11  ;;  %v5060_v44 = vmax.f32 %v5028_v10, 0.0  ;;  %v5033_v57 = vadd.f32 %v5001_v52, %v10026_v41  ;;  %v5061_v35 = vmax.f32 %v5029_v42, 0.0 }
 0x793   : > { %5081 = vst [vmem:[%s10017_s11 + $0x40] sm:$0xff] %v5049_v29  ;;  %v5034_v46 = vadd.f32 %v5002_v39, %v10028_v4  ;;  %v5062_v3 = vmax.f32 %v5030_v14, 0.0  ;;  %v5035_v53 = vadd.f32 %v5003_v56, %v10033_v6  ;;  %v5063_v11 = vmax.f32 %v5031_v62, 0.0  ;;  %p5649_p1 = pnand %p5648_p0, %p5772_p5  ;;  %p5654_p7 = por %p5653_p4, %p5652_p3 }
 0x794   : > { %5082 = vst [vmem:[%s10017_s11 + $0x48] sm:$0xff] %v5050_v26  ;;  %v5036_v41 = vadd.f32 %v5004_v5, %v10038_v38  ;;  %v5064_v7 = vmax.f32 %v5032_v54, 0.0  ;;  %v5037_v4 = vadd.f32 %v5005_v51, %v10043_v8  ;;  %v5065_v43 = vmax.f32 %v5033_v57, 0.0 }
 0x795   : > { %5083 = vst [vmem:[%s10017_s11 + $0x50] sm:$0xff] %v5051_v13  ;;  %v5038_v2 = vadd.f32 %v5006_v17, %v10048_v21  ;;  %v5066_v6 = vmax.f32 %v5034_v46, 0.0  ;;  %v5039_v38 = vadd.f32 %v5007_v45, %v10053_v24  ;;  %v5067_v16 = vmax.f32 %v5035_v53, 0.0  ;;  %p5650_p2 = pneg %p5649_p1 }
 0x796   : > { %5084 = vst [vmem:[%s10017_s11 + $0x58] sm:$0xff] %v5052_v1  ;;  %v5068_v8 = vmax.f32 %v5036_v41, 0.0  ;;  %v5069_v40 = vmax.f32 %v5037_v4, 0.0 }
 0x797   : > { %5085 = vst [vmem:[%s10017_s11 + $0x60] sm:$0xff] %v5053_v36  ;;  %v5070_v21 = vmax.f32 %v5038_v2, 0.0  ;;  %v5071_v48 = vmax.f32 %v5039_v38, 0.0  ;;  %p5655_p8 = pnand %p5654_p7, %p5650_p2 }
 0x798   : > { %5086 = vst [vmem:[%s10017_s11 + $0x68] sm:$0xff] %v5054_v34 }
 0x799   : > { %5087 = vst [vmem:[%s10017_s11 + $0x70] sm:$0xff] %v5055_v61 }
 0x79a   : > { %5088 = vst [vmem:[%s10017_s11 + $0x78] sm:$0xff] %v5056_v49 }
 0x79b   : > { %5089 = vst [vmem:[%s10017_s11 + $0x80] sm:$0xff] %v5057_v60 }
 0x79c   : > { %5090 = vst [vmem:[%s10017_s11 + $0x88] sm:$0xff] %v5058_v28 }
 0x79d   : > { %5091 = vst [vmem:[%s10017_s11 + $0x90] sm:$0xff] %v5059_v0 }
 0x79e   : > { %5092 = vst [vmem:[%s10017_s11 + $0x98] sm:$0xff] %v5060_v44 }
 0x79f   : > { %5093 = vst [vmem:[%s10017_s11 + $0xa0] sm:$0xff] %v5061_v35 }
 0x7a0   : > { %5094 = vst [vmem:[%s10017_s11 + $0xa8] sm:$0xff] %v5062_v3 }
 0x7a1   : > { %5095 = vst [vmem:[%s10017_s11 + $0xb0] sm:$0xff] %v5063_v11 }
 0x7a2   : > { %5096 = vst [vmem:[%s10017_s11 + $0xb8] sm:$0xff] %v5064_v7 }
 0x7a3   : > { %5097 = vst [vmem:[%s10017_s11 + $0xc0] sm:$0xff] %v5065_v43 }
 0x7a4   : > { %5098 = vst [vmem:[%s10017_s11 + $0xc8] sm:$0xff] %v5066_v6 }
 0x7a5   : > { %5099 = vst [vmem:[%s10017_s11 + $0xd0] sm:$0xff] %v5067_v16 }
 0x7a6   : > { %5100 = vst [vmem:[%s10017_s11 + $0xd8] sm:$0xff] %v5068_v8 }
 0x7a7   : > { %5101 = vst [vmem:[%s10017_s11 + $0xe0] sm:$0xff] %v5069_v40 }
 0x7a8   : > { %5102 = vst [vmem:[%s10017_s11 + $0xe8] sm:$0xff] %v5070_v21 }
 0x7a9   : > { %5103 = vst [vmem:[%s10017_s11 + $0xf0] sm:$0xff] %v5071_v48 }
 0x7aa   : > { %5658 = shalt.err (!%p5655_p8)
}
 0x7ab   : > { %s5707_s8 = smov 128   ;;  %s5708_s9 = smov 8  }
 0x7ac   : > { %5374 = dma.vmem_to_hbm [thread:$0]  (%p5772_p5), %s5119_s14, 4096, %s5121_s22, %s5106_s23, %s5707_s8, %s5707_s8, %s5708_s9  }
 0x7ad PF: > { %p5386_p9 = scmp.ge.s32.totalorder %s5697_s18, 2  ;;  %s5135_s10 = sand.u32 1, %s5685_s15  }
 0x7ae   : > { %s5136_s11 = scalar_lea.sflag [#allocation5], %s5135_s10 }
 0x7af   : > { %p5381_p10 = pnand %p5386_p9, %p5776_p6 }
 0x7b1   : > { %p5382_p11 = pneg %p5381_p10 }
 0x7b3   : > { %5680 = dma.done.wait (%p5382_p11), %s5136_s11, 4096  }
 0x7b4   : > { %5682 = vsyncadd (%p5382_p11), %s5136_s11, 4294963200  ;;  %p15_p12 = scmp.ge.s32.totalorder %s5759_s21, 4   ;;  %s11021_s15 = smov %s5689_s16 }
 0x7b5   : > { %s11022_s16 = smov %s5693_s17  ;;  %s11023_s17 = smov %s5770_s24 }
 0x7b6   : > { %s11024_s18 = smov %s5759_s21  ;;  %17 = sbr.rel (!%p15_p12) target bundleno = 4 (0x4), region = 92 }
 0x7bb   :  { %5142 = vsyncpa [#allocation4], 1 }
 0x7bc   :  { %5144 = vsyncpa [#allocation4 + $0x1], 1 }
 0x7bd   :  { %5145 = vsyncpa [#allocation5], 1 }
 0x7be   :  { %5147 = vsyncpa [#allocation5 + $0x1], 1 }

</bundles_post_ra>
